<compile_context>
chip_gen: v6e
topology: v6e:2x2x1
jax: 0.10.0
libtpu: 0.0.40
codegen_flags: <defaults>
</compile_context>

<pallas_src>
import functools

import jax
import jax.numpy as jnp
from jax.experimental import pallas as pl
from jax.experimental.pallas import tpu as pltpu

# Static problem geometry: 28x28x1 -> conv3x3 -> 26x26x32 -> conv3x3 ->
# 24x24x64 -> maxpool2 -> 12x12x64 -> fc 9216->128 -> fc 128->10.
_IMG = 28
_C1, _C2 = 32, 64
_NCLS = 10
_FEAT = 64 * 12 * 12                 # 9216
# Flat "28-stride" spatial layout lengths (flat index p = h*28 + w).
_LX = _IMG * _IMG                    # 784 input pixels per image
_LH1 = 25 * _IMG + 25 + 1            # 726 conv1 positions needed (reads x up to 783)
_LH2 = 23 * _IMG + 23 + 1            # 668 conv2 positions needed (reads h1 up to 725)
_LPM = 56 * 11 + 2 * 11 + 1          # 639 pool anchors needed   (reads h2 up to 667)
_NPOOL = 12 * 12                     # 144 pooled spatial positions
_K2 = 9 * _C1                        # 288 stacked conv2 contraction depth


def _round_up(n, m):
    return ((n + m - 1) // m) * m


# ---------------------------------------------------------------------------
# Kernel A: conv1 + ReLU + conv2 + ReLU + 2x2 max-pool, NB images per grid step
# ---------------------------------------------------------------------------
def _features_kernel(x_ref, w1_ref, b1_ref, w2_ref, b2_ref, psel_ref, out_ref,
                     h1_scr, stk_scr):
    nb = x_ref.shape[0]
    for n in range(nb):                       # unrolled; per-image state flows via refs
        # ---- conv1 (1 -> 32): hoisted single sublane broadcast + 9 shifted FMAs (VPU)
        xb = jnp.broadcast_to(x_ref[n], (_C1, _LX))          # (32, 784), one broadcast
        acc1 = jnp.broadcast_to(b1_ref[...], (_C1, _LH1))
        for k in range(9):
            off = (k // 3) * _IMG + (k % 3)
            acc1 = acc1 + w1_ref[:, k:k + 1] * xb[:, off:off + _LH1]
        h1_scr[...] = jnp.maximum(acc1, 0.0)

        # ---- stack the 9 lane-shifted h1 slices into one K=288 bf16 operand
        for k in range(9):
            off = (k // 3) * _IMG + (k % 3)
            stk_scr[_C1 * k:_C1 * (k + 1), :] = (
                h1_scr[:, off:off + _LH2].astype(jnp.bfloat16))

        # ---- conv2 (32 -> 64): single (64,288)@(288,668) bf16 MXU matmul, f32 acc
        h2 = jnp.dot(w2_ref[...], stk_scr[...],
                     preferred_element_type=jnp.float32)
        h2 = jnp.maximum(h2 + b2_ref[...], 0.0)

        # ---- fused 2x2 / stride-2 max-pool: shifted maxes + one-hot selection matmul
        m = jnp.maximum(
            jnp.maximum(h2[:, 0:_LPM], h2[:, 1:1 + _LPM]),
            jnp.maximum(h2[:, _IMG:_IMG + _LPM], h2[:, _IMG + 1:_IMG + 1 + _LPM]))
        out_ref[n] = jnp.dot(m.astype(jnp.bfloat16), psel_ref[...],
                             preferred_element_type=jnp.float32
                             ).astype(out_ref.dtype)


def conv_pool_features(x_flat, w1, b1, w2s, b2, psel, nb):
    """(Bp, 1, 784) -> pooled features (Bp, 64, 144) bf16, torch NCHW-flatten order."""
    Bp = x_flat.shape[0]
    return pl.pallas_call(
        _features_kernel,
        grid=(Bp // nb,),
        out_shape=jax.ShapeDtypeStruct((Bp, _C2, _NPOOL), jnp.bfloat16),
        in_specs=[
            pl.BlockSpec((nb, 1, _LX), lambda b: (b, 0, 0)),
            pl.BlockSpec((_C1, 9), lambda b: (0, 0)),
            pl.BlockSpec((_C1, 1), lambda b: (0, 0)),
            pl.BlockSpec((_C2, _K2), lambda b: (0, 0)),
            pl.BlockSpec((_C2, 1), lambda b: (0, 0)),
            pl.BlockSpec((_LPM, _NPOOL), lambda b: (0, 0)),
        ],
        out_specs=pl.BlockSpec((nb, _C2, _NPOOL), lambda b: (b, 0, 0)),
        scratch_shapes=[
            pltpu.VMEM((_C1, _LH1), jnp.float32),    # conv1 activations (reused per image)
            pltpu.VMEM((_K2, _LH2), jnp.bfloat16),   # stacked conv2 operand (reused)
        ],
        compiler_params=pltpu.CompilerParams(dimension_semantics=("parallel",)),
    )(x_flat, w1, b1, w2s, b2, psel)


# ---------------------------------------------------------------------------
# Kernel B: fc1 + ReLU + fc2 + log_softmax (bf16 activations/weights, f32 acc)
# ---------------------------------------------------------------------------
def _head_kernel(a_ref, w1_ref, b1_ref, w2_ref, b2_ref, o_ref):
    h = jnp.dot(a_ref[...], w1_ref[...],
                preferred_element_type=jnp.float32) + b1_ref[...]
    h = jnp.maximum(h, 0.0)
    logits = jnp.dot(h, w2_ref[...],
                     preferred_element_type=jnp.float32) + b2_ref[...]
    mx = jnp.max(logits, axis=-1, keepdims=True)
    s = logits - mx
    lse = jnp.log(jnp.sum(jnp.exp(s), axis=-1, keepdims=True))
    o_ref[...] = (s - lse).astype(o_ref.dtype)


def mlp_head(act, fc1_w, fc1_b, fc2_w, fc2_b, tb):
    Bh = act.shape[0]
    return pl.pallas_call(
        _head_kernel,
        grid=(Bh // tb,),
        out_shape=jax.ShapeDtypeStruct((Bh, _NCLS), jnp.float32),
        in_specs=[
            pl.BlockSpec((tb, _FEAT), lambda i: (i, 0)),
            pl.BlockSpec((_FEAT, 128), lambda i: (0, 0)),
            pl.BlockSpec((1, 128), lambda i: (0, 0)),
            pl.BlockSpec((128, _NCLS), lambda i: (0, 0)),
            pl.BlockSpec((1, _NCLS), lambda i: (0, 0)),
        ],
        out_specs=pl.BlockSpec((tb, _NCLS), lambda i: (i, 0)),
        compiler_params=pltpu.CompilerParams(dimension_semantics=("parallel",)),
    )(act, fc1_w, fc1_b, fc2_w, fc2_b)


# ---------------------------------------------------------------------------
# Parameter prep (done once, outside the hot forward path)
# ---------------------------------------------------------------------------
def prepare_params(params):
    # One-hot pooling selection: column q picks flat anchor 56*(q//12)+2*(q%12).
    q = jnp.arange(_NPOOL)
    anchors = 56 * (q // 12) + 2 * (q % 12)
    psel = (jnp.arange(_LPM)[:, None] == anchors[None, :]).astype(jnp.bfloat16)
    # Stacked conv2 weight: column (3*i+j)*32 + c  <->  stack row 32*k + c.
    w2s = jnp.transpose(params["conv2_w"], (0, 2, 3, 1)).reshape(_C2, _K2)
    return dict(
        w1=params["conv1_w"].reshape(_C1, 9),                       # [o, 3*i+j]
        b1=params["conv1_b"].reshape(_C1, 1),
        w2s=w2s.astype(jnp.bfloat16),                               # (64, 288) bf16
        b2=params["conv2_b"].reshape(_C2, 1),
        psel=psel,                                                  # (639, 144) bf16 one-hot
        fc1_w=jnp.transpose(params["fc1_w"]).astype(jnp.bfloat16),  # (9216, 128) bf16
        fc1_b=params["fc1_b"].reshape(1, 128),
        fc2_w=jnp.transpose(params["fc2_w"]),                       # (128, 10) f32
        fc2_b=params["fc2_b"].reshape(1, _NCLS),
    )


# ---------------------------------------------------------------------------
# Forward pass
# ---------------------------------------------------------------------------
def extract_features(prep, x_nchw):
    """(B,1,28,28) -> (B, 9216) bf16 pooled features in torch.flatten(NCHW) order."""
    B = x_nchw.shape[0]
    nb = max(1, min(8, B // 2))               # keep grid >= 2 when possible (v7x: 2 TCs)
    Bp = _round_up(B, nb)
    x_flat = x_nchw.reshape(B, 1, _LX)
    if Bp != B:
        x_flat = jnp.pad(x_flat, ((0, Bp - B), (0, 0), (0, 0)))
    pooled = conv_pool_features(x_flat, prep["w1"], prep["b1"], prep["w2s"],
                                prep["b2"], prep["psel"], nb)   # (Bp, 64, 144) bf16
    return pooled.reshape(Bp, _FEAT)[:B]


def net_forward(prep, x_nchw):
    # dropout1 / dropout2: identity in eval mode.
    B = x_nchw.shape[0]
    feats = extract_features(prep, x_nchw)                      # (B, 9216) bf16
    # fc-head row tile: multiple of 8, capped at 128; batch padded (no tb=B fallback).
    tb = min(128, max(8, _round_up(max(B // 2, 1), 8)))
    Bh = _round_up(B, tb)
    if Bh != B:
        feats = jnp.pad(feats, ((0, Bh - B), (0, 0)))
    out = mlp_head(feats, prep["fc1_w"], prep["fc1_b"],
                   prep["fc2_w"], prep["fc2_b"], tb)
    return out[:B]


# ---------------------------------------------------------------------------
# Pure-JAX reference (for correctness checking) and init
# ---------------------------------------------------------------------------
def reference_forward(params, x):
    conv = functools.partial(jax.lax.conv_general_dilated,
                             window_strides=(1, 1), padding="VALID",
                             dimension_numbers=("NCHW", "OIHW", "NCHW"),
                             precision=jax.lax.Precision.HIGHEST)
    y = conv(x, params["conv1_w"]) + params["conv1_b"].reshape(1, -1, 1, 1)
    y = jax.nn.relu(y)
    y = conv(y, params["conv2_w"]) + params["conv2_b"].reshape(1, -1, 1, 1)
    y = jax.nn.relu(y)
    y = jax.lax.reduce_window(y, -jnp.inf, jax.lax.max,
                              (1, 1, 2, 2), (1, 1, 2, 2), "VALID")
    feats = y.reshape(y.shape[0], -1)
    h = jax.nn.relu(feats @ params["fc1_w"].T + params["fc1_b"])
    logits = h @ params["fc2_w"].T + params["fc2_b"]
    return feats, jax.nn.log_softmax(logits, axis=1)


def init_params(key):
    ks = jax.random.split(key, 8)

    def u(k, shape, fan_in):
        bound = 1.0 / jnp.sqrt(float(fan_in))
        return jax.random.uniform(k, shape, jnp.float32, -bound, bound)

    return dict(
        conv1_w=u(ks[0], (32, 1, 3, 3), 1 * 9),
        conv1_b=u(ks[1], (32,), 1 * 9),
        conv2_w=u(ks[2], (64, 32, 3, 3), 32 * 9),
        conv2_b=u(ks[3], (64,), 32 * 9),
        fc1_w=u(ks[4], (128, 9216), 9216),
        fc1_b=u(ks[5], (128,), 9216),
        fc2_w=u(ks[6], (10, 128), 128),
        fc2_b=u(ks[7], (10,), 128),
    )


if __name__ == "__main__":
    key = jax.random.PRNGKey(0)
    pkey, xkey = jax.random.split(key)
    params = init_params(pkey)
    prep = prepare_params(params)              # one-time weight repack / transpose / cast
    x = jax.random.normal(xkey, (2, 1, 28, 28), jnp.float32)

    fwd = jax.jit(net_forward)
    out = jax.block_until_ready(fwd(prep, x))

    assert out.shape == (2, 10), out.shape
    assert bool(jnp.all(jnp.isfinite(out)))
    # log_softmax sanity: probabilities sum to 1 per row.
    assert jnp.allclose(jnp.sum(jnp.exp(out), axis=1), 1.0, atol=1e-3)

    # Correctness vs. a pure-JAX/XLA reference of the same forward pass.
    # (Pooled features / fc1 intentionally use bf16 operands with f32 accumulation.)
    ref_feats, ref_out = jax.jit(reference_forward)(params, x)
    feats = jax.block_until_ready(
        jax.jit(extract_features)(prep, x)).astype(jnp.float32)
    assert jnp.allclose(feats, ref_feats, atol=5e-2, rtol=5e-2), \
        float(jnp.max(jnp.abs(feats - ref_feats)))
    assert jnp.allclose(out, ref_out, atol=1e-1), \
        float(jnp.max(jnp.abs(out - ref_out)))

    print("KERNEL_OK")
</pallas_src>

<mosaic_0001>
module attributes {stable_mosaic.version = 11 : i64} {
  func.func @_features_kernel(%arg0: i32, %arg1: memref<1x1x784xf32, #tpu.memory_space<vmem>>, %arg2: memref<32x9xf32, #tpu.memory_space<vmem>>, %arg3: memref<32x1xf32, #tpu.memory_space<vmem>>, %arg4: memref<64x288xbf16, #tpu.memory_space<vmem>>, %arg5: memref<64x1xf32, #tpu.memory_space<vmem>>, %arg6: memref<639x144xbf16, #tpu.memory_space<vmem>>, %arg7: memref<1x64x144xbf16, #tpu.memory_space<vmem>>, %arg8: memref<32x726xf32, #tpu.memory_space<vmem>>, %arg9: memref<288x668xbf16, #tpu.memory_space<vmem>>) attributes {dimension_semantics = [#tpu.dimension_semantics<parallel>], iteration_bounds = array<i64: 2>, scalar_prefetch = 0 : i64, scratch_operands = 2 : i64, tpu.core_type = #tpu.core_type<tc>, window_params = [{transform_indices = @transform_0, window_bounds = array<i64: 1, 1, 784>}, {pipeline_mode = #tpu.pipeline_mode<synchronous>, transform_indices = @transform_1, window_bounds = array<i64: 32, 9>}, {pipeline_mode = #tpu.pipeline_mode<synchronous>, transform_indices = @transform_2, window_bounds = array<i64: 32, 1>}, {pipeline_mode = #tpu.pipeline_mode<synchronous>, transform_indices = @transform_3, window_bounds = array<i64: 64, 288>}, {pipeline_mode = #tpu.pipeline_mode<synchronous>, transform_indices = @transform_4, window_bounds = array<i64: 64, 1>}, {pipeline_mode = #tpu.pipeline_mode<synchronous>, transform_indices = @transform_5, window_bounds = array<i64: 639, 144>}, {transform_indices = @transform_6, window_bounds = array<i64: 1, 64, 144>}]} {
    %c0 = arith.constant 0 : index
    %c0_0 = arith.constant 0 : index
    %c0_1 = arith.constant 0 : index
    %0 = vector.load %arg1[%c0, %c0_0, %c0_1] : memref<1x1x784xf32, #tpu.memory_space<vmem>>, vector<1x1x784xf32>
    %1 = vector.shape_cast %0 : vector<1x1x784xf32> to vector<1x784xf32>
    %2 = vector.shape_cast %1 : vector<1x784xf32> to vector<1x784xf32>
    %3 = vector.broadcast %2 : vector<1x784xf32> to vector<32x784xf32>
    %c0_2 = arith.constant 0 : index
    %c0_3 = arith.constant 0 : index
    %4 = vector.load %arg3[%c0_2, %c0_3] : memref<32x1xf32, #tpu.memory_space<vmem>>, vector<32x1xf32>
    %5 = vector.shape_cast %4 : vector<32x1xf32> to vector<32x1xf32>
    %6 = vector.broadcast %5 : vector<32x1xf32> to vector<32x726xf32>
    %c0_4 = arith.constant 0 : index
    %c0_5 = arith.constant 0 : index
    %7 = vector.load %arg2[%c0_4, %c0_5] : memref<32x9xf32, #tpu.memory_space<vmem>>, vector<32x1xf32>
    %8 = vector.extract_strided_slice %3 {offsets = [0, 0], sizes = [32, 726], strides = [1, 1]} : vector<32x784xf32> to vector<32x726xf32>
    %9 = vector.broadcast %7 : vector<32x1xf32> to vector<32x726xf32>
    %10 = arith.mulf %9, %8 : vector<32x726xf32>
    %11 = arith.addf %6, %10 : vector<32x726xf32>
    %c0_6 = arith.constant 0 : index
    %c1 = arith.constant 1 : index
    %12 = vector.load %arg2[%c0_6, %c1] : memref<32x9xf32, #tpu.memory_space<vmem>>, vector<32x1xf32>
    %13 = vector.extract_strided_slice %3 {offsets = [0, 1], sizes = [32, 726], strides = [1, 1]} : vector<32x784xf32> to vector<32x726xf32>
    %14 = vector.broadcast %12 : vector<32x1xf32> to vector<32x726xf32>
    %15 = arith.mulf %14, %13 : vector<32x726xf32>
    %16 = arith.addf %11, %15 : vector<32x726xf32>
    %c0_7 = arith.constant 0 : index
    %c2 = arith.constant 2 : index
    %17 = vector.load %arg2[%c0_7, %c2] : memref<32x9xf32, #tpu.memory_space<vmem>>, vector<32x1xf32>
    %18 = vector.extract_strided_slice %3 {offsets = [0, 2], sizes = [32, 726], strides = [1, 1]} : vector<32x784xf32> to vector<32x726xf32>
    %19 = vector.broadcast %17 : vector<32x1xf32> to vector<32x726xf32>
    %20 = arith.mulf %19, %18 : vector<32x726xf32>
    %21 = arith.addf %16, %20 : vector<32x726xf32>
    %c0_8 = arith.constant 0 : index
    %c3 = arith.constant 3 : index
    %22 = vector.load %arg2[%c0_8, %c3] : memref<32x9xf32, #tpu.memory_space<vmem>>, vector<32x1xf32>
    %23 = vector.extract_strided_slice %3 {offsets = [0, 28], sizes = [32, 726], strides = [1, 1]} : vector<32x784xf32> to vector<32x726xf32>
    %24 = vector.broadcast %22 : vector<32x1xf32> to vector<32x726xf32>
    %25 = arith.mulf %24, %23 : vector<32x726xf32>
    %26 = arith.addf %21, %25 : vector<32x726xf32>
    %c0_9 = arith.constant 0 : index
    %c4 = arith.constant 4 : index
    %27 = vector.load %arg2[%c0_9, %c4] : memref<32x9xf32, #tpu.memory_space<vmem>>, vector<32x1xf32>
    %28 = vector.extract_strided_slice %3 {offsets = [0, 29], sizes = [32, 726], strides = [1, 1]} : vector<32x784xf32> to vector<32x726xf32>
    %29 = vector.broadcast %27 : vector<32x1xf32> to vector<32x726xf32>
    %30 = arith.mulf %29, %28 : vector<32x726xf32>
    %31 = arith.addf %26, %30 : vector<32x726xf32>
    %c0_10 = arith.constant 0 : index
    %c5 = arith.constant 5 : index
    %32 = vector.load %arg2[%c0_10, %c5] : memref<32x9xf32, #tpu.memory_space<vmem>>, vector<32x1xf32>
    %33 = vector.extract_strided_slice %3 {offsets = [0, 30], sizes = [32, 726], strides = [1, 1]} : vector<32x784xf32> to vector<32x726xf32>
    %34 = vector.broadcast %32 : vector<32x1xf32> to vector<32x726xf32>
    %35 = arith.mulf %34, %33 : vector<32x726xf32>
    %36 = arith.addf %31, %35 : vector<32x726xf32>
    %c0_11 = arith.constant 0 : index
    %c6 = arith.constant 6 : index
    %37 = vector.load %arg2[%c0_11, %c6] : memref<32x9xf32, #tpu.memory_space<vmem>>, vector<32x1xf32>
    %38 = vector.extract_strided_slice %3 {offsets = [0, 56], sizes = [32, 726], strides = [1, 1]} : vector<32x784xf32> to vector<32x726xf32>
    %39 = vector.broadcast %37 : vector<32x1xf32> to vector<32x726xf32>
    %40 = arith.mulf %39, %38 : vector<32x726xf32>
    %41 = arith.addf %36, %40 : vector<32x726xf32>
    %c0_12 = arith.constant 0 : index
    %c7 = arith.constant 7 : index
    %42 = vector.load %arg2[%c0_12, %c7] : memref<32x9xf32, #tpu.memory_space<vmem>>, vector<32x1xf32>
    %43 = vector.extract_strided_slice %3 {offsets = [0, 57], sizes = [32, 726], strides = [1, 1]} : vector<32x784xf32> to vector<32x726xf32>
    %44 = vector.broadcast %42 : vector<32x1xf32> to vector<32x726xf32>
    %45 = arith.mulf %44, %43 : vector<32x726xf32>
    %46 = arith.addf %41, %45 : vector<32x726xf32>
    %c0_13 = arith.constant 0 : index
    %c8 = arith.constant 8 : index
    %47 = vector.load %arg2[%c0_13, %c8] : memref<32x9xf32, #tpu.memory_space<vmem>>, vector<32x1xf32>
    %48 = vector.extract_strided_slice %3 {offsets = [0, 58], sizes = [32, 726], strides = [1, 1]} : vector<32x784xf32> to vector<32x726xf32>
    %49 = vector.broadcast %47 : vector<32x1xf32> to vector<32x726xf32>
    %50 = arith.mulf %49, %48 : vector<32x726xf32>
    %51 = arith.addf %46, %50 : vector<32x726xf32>
    %cst = arith.constant 0.000000e+00 : f32
    %52 = vector.broadcast %cst : f32 to vector<32x726xf32>
    %53 = arith.maximumf %51, %52 : vector<32x726xf32>
    %c0_14 = arith.constant 0 : index
    %c0_15 = arith.constant 0 : index
    %54 = vector.load %arg8[%c0_14, %c0_15] : memref<32x726xf32, #tpu.memory_space<vmem>>, vector<32x726xf32>
    tpu.vector_store %arg8[%c0_14, %c0_15], %53 {strides = array<i32>} : memref<32x726xf32, #tpu.memory_space<vmem>>, vector<32x726xf32>,
    %c0_16 = arith.constant 0 : index
    %c0_17 = arith.constant 0 : index
    %55 = vector.load %arg8[%c0_16, %c0_17] : memref<32x726xf32, #tpu.memory_space<vmem>>, vector<32x668xf32>
    %56 = arith.truncf %55 : vector<32x668xf32> to vector<32x668xbf16>
    %c0_18 = arith.constant 0 : index
    %c0_19 = arith.constant 0 : index
    %57 = vector.load %arg9[%c0_18, %c0_19] : memref<288x668xbf16, #tpu.memory_space<vmem>>, vector<32x668xbf16>
    tpu.vector_store %arg9[%c0_18, %c0_19], %56 {strides = array<i32>} : memref<288x668xbf16, #tpu.memory_space<vmem>>, vector<32x668xbf16>,
    %c0_20 = arith.constant 0 : index
    %c1_21 = arith.constant 1 : index
    %58 = vector.load %arg8[%c0_20, %c1_21] : memref<32x726xf32, #tpu.memory_space<vmem>>, vector<32x668xf32>
    %59 = arith.truncf %58 : vector<32x668xf32> to vector<32x668xbf16>
    %c32 = arith.constant 32 : index
    %c0_22 = arith.constant 0 : index
    %60 = vector.load %arg9[%c32, %c0_22] : memref<288x668xbf16, #tpu.memory_space<vmem>>, vector<32x668xbf16>
    tpu.vector_store %arg9[%c32, %c0_22], %59 {strides = array<i32>} : memref<288x668xbf16, #tpu.memory_space<vmem>>, vector<32x668xbf16>,
    %c0_23 = arith.constant 0 : index
    %c2_24 = arith.constant 2 : index
    %61 = vector.load %arg8[%c0_23, %c2_24] : memref<32x726xf32, #tpu.memory_space<vmem>>, vector<32x668xf32>
    %62 = arith.truncf %61 : vector<32x668xf32> to vector<32x668xbf16>
    %c64 = arith.constant 64 : index
    %c0_25 = arith.constant 0 : index
    %63 = vector.load %arg9[%c64, %c0_25] : memref<288x668xbf16, #tpu.memory_space<vmem>>, vector<32x668xbf16>
    tpu.vector_store %arg9[%c64, %c0_25], %62 {strides = array<i32>} : memref<288x668xbf16, #tpu.memory_space<vmem>>, vector<32x668xbf16>,
    %c0_26 = arith.constant 0 : index
    %c28 = arith.constant 28 : index
    %64 = vector.load %arg8[%c0_26, %c28] : memref<32x726xf32, #tpu.memory_space<vmem>>, vector<32x668xf32>
    %65 = arith.truncf %64 : vector<32x668xf32> to vector<32x668xbf16>
    %c96 = arith.constant 96 : index
    %c0_27 = arith.constant 0 : index
    %66 = vector.load %arg9[%c96, %c0_27] : memref<288x668xbf16, #tpu.memory_space<vmem>>, vector<32x668xbf16>
    tpu.vector_store %arg9[%c96, %c0_27], %65 {strides = array<i32>} : memref<288x668xbf16, #tpu.memory_space<vmem>>, vector<32x668xbf16>,
    %c0_28 = arith.constant 0 : index
    %c29 = arith.constant 29 : index
    %67 = vector.load %arg8[%c0_28, %c29] : memref<32x726xf32, #tpu.memory_space<vmem>>, vector<32x668xf32>
    %68 = arith.truncf %67 : vector<32x668xf32> to vector<32x668xbf16>
    %c128 = arith.constant 128 : index
    %c0_29 = arith.constant 0 : index
    %69 = vector.load %arg9[%c128, %c0_29] : memref<288x668xbf16, #tpu.memory_space<vmem>>, vector<32x668xbf16>
    tpu.vector_store %arg9[%c128, %c0_29], %68 {strides = array<i32>} : memref<288x668xbf16, #tpu.memory_space<vmem>>, vector<32x668xbf16>,
    %c0_30 = arith.constant 0 : index
    %c30 = arith.constant 30 : index
    %70 = vector.load %arg8[%c0_30, %c30] : memref<32x726xf32, #tpu.memory_space<vmem>>, vector<32x668xf32>
    %71 = arith.truncf %70 : vector<32x668xf32> to vector<32x668xbf16>
    %c160 = arith.constant 160 : index
    %c0_31 = arith.constant 0 : index
    %72 = vector.load %arg9[%c160, %c0_31] : memref<288x668xbf16, #tpu.memory_space<vmem>>, vector<32x668xbf16>
    tpu.vector_store %arg9[%c160, %c0_31], %71 {strides = array<i32>} : memref<288x668xbf16, #tpu.memory_space<vmem>>, vector<32x668xbf16>,
    %c0_32 = arith.constant 0 : index
    %c56 = arith.constant 56 : index
    %73 = vector.load %arg8[%c0_32, %c56] : memref<32x726xf32, #tpu.memory_space<vmem>>, vector<32x668xf32>
    %74 = arith.truncf %73 : vector<32x668xf32> to vector<32x668xbf16>
    %c192 = arith.constant 192 : index
    %c0_33 = arith.constant 0 : index
    %75 = vector.load %arg9[%c192, %c0_33] : memref<288x668xbf16, #tpu.memory_space<vmem>>, vector<32x668xbf16>
    tpu.vector_store %arg9[%c192, %c0_33], %74 {strides = array<i32>} : memref<288x668xbf16, #tpu.memory_space<vmem>>, vector<32x668xbf16>,
    %c0_34 = arith.constant 0 : index
    %c57 = arith.constant 57 : index
    %76 = vector.load %arg8[%c0_34, %c57] : memref<32x726xf32, #tpu.memory_space<vmem>>, vector<32x668xf32>
    %77 = arith.truncf %76 : vector<32x668xf32> to vector<32x668xbf16>
    %c224 = arith.constant 224 : index
    %c0_35 = arith.constant 0 : index
    %78 = vector.load %arg9[%c224, %c0_35] : memref<288x668xbf16, #tpu.memory_space<vmem>>, vector<32x668xbf16>
    tpu.vector_store %arg9[%c224, %c0_35], %77 {strides = array<i32>} : memref<288x668xbf16, #tpu.memory_space<vmem>>, vector<32x668xbf16>,
    %c0_36 = arith.constant 0 : index
    %c58 = arith.constant 58 : index
    %79 = vector.load %arg8[%c0_36, %c58] : memref<32x726xf32, #tpu.memory_space<vmem>>, vector<32x668xf32>
    %80 = arith.truncf %79 : vector<32x668xf32> to vector<32x668xbf16>
    %c256 = arith.constant 256 : index
    %c0_37 = arith.constant 0 : index
    %81 = vector.load %arg9[%c256, %c0_37] : memref<288x668xbf16, #tpu.memory_space<vmem>>, vector<32x668xbf16>
    tpu.vector_store %arg9[%c256, %c0_37], %80 {strides = array<i32>} : memref<288x668xbf16, #tpu.memory_space<vmem>>, vector<32x668xbf16>,
    %c0_38 = arith.constant 0 : index
    %c0_39 = arith.constant 0 : index
    %82 = vector.load %arg4[%c0_38, %c0_39] : memref<64x288xbf16, #tpu.memory_space<vmem>>, vector<64x288xbf16>
    %c0_40 = arith.constant 0 : index
    %c0_41 = arith.constant 0 : index
    %83 = vector.load %arg9[%c0_40, %c0_41] : memref<288x668xbf16, #tpu.memory_space<vmem>>, vector<288x668xbf16>
    %cst_42 = arith.constant dense<0.000000e+00> : vector<64x668xf32>
    %84 = tpu.matmul %82, %83, %cst_42 {dimension_numbers = #tpu.dot_dimension_numbers<[1], [0], [0], [1], [0, 0, 1, 1], [], []>} : vector<64x288xbf16>, vector<288x668xbf16>, vector<64x668xf32> -> vector<64x668xf32>
    %c0_43 = arith.constant 0 : index
    %c0_44 = arith.constant 0 : index
    %85 = vector.load %arg5[%c0_43, %c0_44] : memref<64x1xf32, #tpu.memory_space<vmem>>, vector<64x1xf32>
    %86 = vector.broadcast %85 : vector<64x1xf32> to vector<64x668xf32>
    %87 = arith.addf %84, %86 : vector<64x668xf32>
    %cst_45 = arith.constant 0.000000e+00 : f32
    %88 = vector.broadcast %cst_45 : f32 to vector<64x668xf32>
    %89 = arith.maximumf %87, %88 : vector<64x668xf32>
    %90 = vector.extract_strided_slice %89 {offsets = [0, 0], sizes = [64, 639], strides = [1, 1]} : vector<64x668xf32> to vector<64x639xf32>
    %91 = vector.extract_strided_slice %89 {offsets = [0, 1], sizes = [64, 639], strides = [1, 1]} : vector<64x668xf32> to vector<64x639xf32>
    %92 = arith.maximumf %90, %91 : vector<64x639xf32>
    %93 = vector.extract_strided_slice %89 {offsets = [0, 28], sizes = [64, 639], strides = [1, 1]} : vector<64x668xf32> to vector<64x639xf32>
    %94 = vector.extract_strided_slice %89 {offsets = [0, 29], sizes = [64, 639], strides = [1, 1]} : vector<64x668xf32> to vector<64x639xf32>
    %95 = arith.maximumf %93, %94 : vector<64x639xf32>
    %96 = arith.maximumf %92, %95 : vector<64x639xf32>
    %97 = arith.truncf %96 : vector<64x639xf32> to vector<64x639xbf16>
    %c0_46 = arith.constant 0 : index
    %c0_47 = arith.constant 0 : index
    %98 = vector.load %arg6[%c0_46, %c0_47] : memref<639x144xbf16, #tpu.memory_space<vmem>>, vector<639x144xbf16>
    %cst_48 = arith.constant dense<0.000000e+00> : vector<64x144xf32>
    %99 = tpu.matmul %97, %98, %cst_48 {dimension_numbers = #tpu.dot_dimension_numbers<[1], [0], [0], [1], [0, 0, 1, 1], [], []>} : vector<64x639xbf16>, vector<639x144xbf16>, vector<64x144xf32> -> vector<64x144xf32>
    %100 = arith.truncf %99 : vector<64x144xf32> to vector<64x144xbf16>
    %c0_49 = arith.constant 0 : index
    %c0_50 = arith.constant 0 : index
    %c0_51 = arith.constant 0 : index
    %101 = vector.load %arg7[%c0_49, %c0_50, %c0_51] : memref<1x64x144xbf16, #tpu.memory_space<vmem>>, vector<1x64x144xbf16>
    %102 = vector.shape_cast %101 : vector<1x64x144xbf16> to vector<64x144xbf16>
    %103 = vector.shape_cast %100 : vector<64x144xbf16> to vector<1x64x144xbf16>
    tpu.vector_store %arg7[%c0_49, %c0_50, %c0_51], %103 {strides = array<i32>} : memref<1x64x144xbf16, #tpu.memory_space<vmem>>, vector<1x64x144xbf16>,
    return
  }
  func.func @transform_0(%arg0: i32) -> (i32, i32, i32) {
    %c0_i32 = arith.constant 0 : i32
    %c0_i32_0 = arith.constant 0 : i32
    %c0_i32_1 = arith.constant 0 : i32
    return %arg0, %c0_i32, %c0_i32_0 : i32, i32, i32
  }
  func.func @transform_1(%arg0: i32) -> (i32, i32) {
    %c0_i32 = arith.constant 0 : i32
    %c0_i32_0 = arith.constant 0 : i32
    %c0_i32_1 = arith.constant 0 : i32
    return %c0_i32, %c0_i32_0 : i32, i32
  }
  func.func @transform_2(%arg0: i32) -> (i32, i32) {
    %c0_i32 = arith.constant 0 : i32
    %c0_i32_0 = arith.constant 0 : i32
    %c0_i32_1 = arith.constant 0 : i32
    return %c0_i32, %c0_i32_0 : i32, i32
  }
  func.func @transform_3(%arg0: i32) -> (i32, i32) {
    %c0_i32 = arith.constant 0 : i32
    %c0_i32_0 = arith.constant 0 : i32
    %c0_i32_1 = arith.constant 0 : i32
    return %c0_i32, %c0_i32_0 : i32, i32
  }
  func.func @transform_4(%arg0: i32) -> (i32, i32) {
    %c0_i32 = arith.constant 0 : i32
    %c0_i32_0 = arith.constant 0 : i32
    %c0_i32_1 = arith.constant 0 : i32
    return %c0_i32, %c0_i32_0 : i32, i32
  }
  func.func @transform_5(%arg0: i32) -> (i32, i32) {
    %c0_i32 = arith.constant 0 : i32
    %c0_i32_0 = arith.constant 0 : i32
    %c0_i32_1 = arith.constant 0 : i32
    return %c0_i32, %c0_i32_0 : i32, i32
  }
  func.func @transform_6(%arg0: i32) -> (i32, i32, i32) {
    %c0_i32 = arith.constant 0 : i32
    %c0_i32_0 = arith.constant 0 : i32
    %c0_i32_1 = arith.constant 0 : i32
    return %arg0, %c0_i32, %c0_i32_0 : i32, i32, i32
  }
}

module attributes {stable_mosaic.version = 11 : i64} {
  func.func @_head_kernel(%arg0: i32, %arg1: memref<8x9216xbf16, #tpu.memory_space<vmem>>, %arg2: memref<9216x128xbf16, #tpu.memory_space<vmem>>, %arg3: memref<1x128xf32, #tpu.memory_space<vmem>>, %arg4: memref<128x10xf32, #tpu.memory_space<vmem>>, %arg5: memref<1x10xf32, #tpu.memory_space<vmem>>, %arg6: memref<8x10xf32, #tpu.memory_space<vmem>>) attributes {dimension_semantics = [#tpu.dimension_semantics<parallel>], iteration_bounds = array<i64: 1>, scalar_prefetch = 0 : i64, scratch_operands = 0 : i64, tpu.core_type = #tpu.core_type<tc>, window_params = [{transform_indices = @transform_0, window_bounds = array<i64: 8, 9216>}, {pipeline_mode = #tpu.pipeline_mode<synchronous>, transform_indices = @transform_1, window_bounds = array<i64: 9216, 128>}, {pipeline_mode = #tpu.pipeline_mode<synchronous>, transform_indices = @transform_2, window_bounds = array<i64: 1, 128>}, {pipeline_mode = #tpu.pipeline_mode<synchronous>, transform_indices = @transform_3, window_bounds = array<i64: 128, 10>}, {pipeline_mode = #tpu.pipeline_mode<synchronous>, transform_indices = @transform_4, window_bounds = array<i64: 1, 10>}, {transform_indices = @transform_5, window_bounds = array<i64: 8, 10>}]} {
    %c0 = arith.constant 0 : index
    %c0_0 = arith.constant 0 : index
    %0 = vector.load %arg1[%c0, %c0_0] : memref<8x9216xbf16, #tpu.memory_space<vmem>>, vector<8x9216xbf16>
    %c0_1 = arith.constant 0 : index
    %c0_2 = arith.constant 0 : index
    %1 = vector.load %arg2[%c0_1, %c0_2] : memref<9216x128xbf16, #tpu.memory_space<vmem>>, vector<9216x128xbf16>
    %cst = arith.constant dense<0.000000e+00> : vector<8x128xf32>
    %2 = tpu.matmul %0, %1, %cst {dimension_numbers = #tpu.dot_dimension_numbers<[1], [0], [0], [1], [0, 0, 1, 1], [], []>} : vector<8x9216xbf16>, vector<9216x128xbf16>, vector<8x128xf32> -> vector<8x128xf32>
    %c0_3 = arith.constant 0 : index
    %c0_4 = arith.constant 0 : index
    %3 = vector.load %arg3[%c0_3, %c0_4] : memref<1x128xf32, #tpu.memory_space<vmem>>, vector<1x128xf32>
    %4 = vector.broadcast %3 : vector<1x128xf32> to vector<8x128xf32>
    %5 = arith.addf %2, %4 : vector<8x128xf32>
    %cst_5 = arith.constant 0.000000e+00 : f32
    %6 = vector.broadcast %cst_5 : f32 to vector<8x128xf32>
    %7 = arith.maximumf %5, %6 : vector<8x128xf32>
    %c0_6 = arith.constant 0 : index
    %c0_7 = arith.constant 0 : index
    %8 = vector.load %arg4[%c0_6, %c0_7] : memref<128x10xf32, #tpu.memory_space<vmem>>, vector<128x10xf32>
    %cst_8 = arith.constant dense<0.000000e+00> : vector<8x10xf32>
    %9 = tpu.matmul %7, %8, %cst_8 {dimension_numbers = #tpu.dot_dimension_numbers<[1], [0], [0], [1], [0, 0, 1, 1], [], []>} : vector<8x128xf32>, vector<128x10xf32>, vector<8x10xf32> -> vector<8x10xf32>
    %c0_9 = arith.constant 0 : index
    %c0_10 = arith.constant 0 : index
    %10 = vector.load %arg5[%c0_9, %c0_10] : memref<1x10xf32, #tpu.memory_space<vmem>>, vector<1x10xf32>
    %11 = vector.broadcast %10 : vector<1x10xf32> to vector<8x10xf32>
    %12 = arith.addf %9, %11 : vector<8x10xf32>
    %cst_11 = arith.constant dense<0xFF800000> : vector<8xf32>
    %13 = vector.multi_reduction <maximumf>, %12, %cst_11 [1] : vector<8x10xf32> to vector<8xf32>
    %14 = vector.shape_cast %13 : vector<8xf32> to vector<8x1xf32>
    %15 = vector.broadcast %14 : vector<8x1xf32> to vector<8x10xf32>
    %16 = arith.subf %12, %15 : vector<8x10xf32>
    %17 = math.exp %16 : vector<8x10xf32>
    %cst_12 = arith.constant dense<0.000000e+00> : vector<8xf32>
    %18 = vector.multi_reduction <add>, %17, %cst_12 [1] : vector<8x10xf32> to vector<8xf32>
    %19 = vector.shape_cast %18 : vector<8xf32> to vector<8x1xf32>
    %20 = math.log %19 : vector<8x1xf32>
    %21 = vector.broadcast %20 : vector<8x1xf32> to vector<8x10xf32>
    %22 = arith.subf %16, %21 : vector<8x10xf32>
    %c0_13 = arith.constant 0 : index
    %c0_14 = arith.constant 0 : index
    %23 = vector.load %arg6[%c0_13, %c0_14] : memref<8x10xf32, #tpu.memory_space<vmem>>, vector<8x10xf32>
    tpu.vector_store %arg6[%c0_13, %c0_14], %22 {strides = array<i32>} : memref<8x10xf32, #tpu.memory_space<vmem>>, vector<8x10xf32>,
    return
  }
  func.func @transform_0(%arg0: i32) -> (i32, i32) {
    %c0_i32 = arith.constant 0 : i32
    %c0_i32_0 = arith.constant 0 : i32
    return %arg0, %c0_i32 : i32, i32
  }
  func.func @transform_1(%arg0: i32) -> (i32, i32) {
    %c0_i32 = arith.constant 0 : i32
    %c0_i32_0 = arith.constant 0 : i32
    %c0_i32_1 = arith.constant 0 : i32
    return %c0_i32, %c0_i32_0 : i32, i32
  }
  func.func @transform_2(%arg0: i32) -> (i32, i32) {
    %c0_i32 = arith.constant 0 : i32
    %c0_i32_0 = arith.constant 0 : i32
    %c0_i32_1 = arith.constant 0 : i32
    return %c0_i32, %c0_i32_0 : i32, i32
  }
  func.func @transform_3(%arg0: i32) -> (i32, i32) {
    %c0_i32 = arith.constant 0 : i32
    %c0_i32_0 = arith.constant 0 : i32
    %c0_i32_1 = arith.constant 0 : i32
    return %c0_i32, %c0_i32_0 : i32, i32
  }
  func.func @transform_4(%arg0: i32) -> (i32, i32) {
    %c0_i32 = arith.constant 0 : i32
    %c0_i32_0 = arith.constant 0 : i32
    %c0_i32_1 = arith.constant 0 : i32
    return %c0_i32, %c0_i32_0 : i32, i32
  }
  func.func @transform_5(%arg0: i32) -> (i32, i32) {
    %c0_i32 = arith.constant 0 : i32
    %c0_i32_0 = arith.constant 0 : i32
    return %arg0, %c0_i32 : i32, i32
  }
}

</mosaic_0001>

<bundles_post_ra>
// kernel: net_forward.2
= control target key start
LH: loop header
LB: loop body
LE: loop exit
PB: predicated region body
PF: predicated region fallthrough
CT: control target
= control target key end

     0   :  { %11 = vsyncpa [#allocation5], 0  ;;  %s7159_s21 = smov 0   ;;  %s11118_s0 = inlined_call_operand.vmem [shape: f32[2,1,784], index: 0, kind: input, shape index: {}]   ;;  %s11119_s1 = inlined_call_operand.vmem [shape: f32[32,9], index: 1, kind: input, shape index: {}]   ;;  %s11120_s2 = inlined_call_operand.vmem [shape: f32[32,1], index: 2, kind: input, shape index: {}]   ;;  %s11121_s3 = inlined_call_operand.hbm [shape: bf16[64,288], index: 3, kind: input, shape index: {}]   ;;  %s11122_s4 = inlined_call_operand.vmem [shape: f32[64,1], index: 4, kind: input, shape index: {}]   ;;  %s11123_s5 = inlined_call_operand.vmem [shape: bf16[639,144], index: 5, kind: input, shape index: {}]   ;;  %s11124_s6 = inlined_call_operand.vmem [shape: bf16[2,64,144], index: 6, kind: output, shape index: {}]  }
   0x1 LB: > { %s7165_s22 = sadd.s32 4294967295, %s7101_s21   ;;  %p6084_p0 = scmp.ge.s32.totalorder %s7101_s21, 1  ;;  %s7101_s21 = sphi %s7159_s21, %s17_s21  }
   0x2   : > { %p179_p1 = scmp.lt.s32.totalorder %s7101_s21, 3  ;;  %s7103_s23 = smov [#allocation4]  }
   0x3   : > { %s197_s24 = sshll.u32 %s7103_s23, 4  ;;  %p6567_p3 = scmp.eq.s32.totalorder %s7165_s22, 0  ;;  %s198_s24 = int_to_ptr.vmem [resolvable:$true] %s197_s24 }
   0x4   : > { %p7169_p2 = pnand %p6084_p0, %p179_p1  ;;  %s7076_s26 = scalar_lea.vmem %s198_s24, 1536 }
   0x5   : > { %p7077_p7 = scmp.ne.s32.totalorder %s198_s24, %s7076_s26  ;;  %p7084_p10 = scmp.lt.s32.totalorder %s198_s24, %s198_s24 }
   0x6   : > { %p6563_p4 = pneg %p7169_p2  ;;  %p7085_p11 = scmp.lt.s32.totalorder %s7076_s26, %s7076_s26 }
   0x8   : > { %p6564_p5 = pnand %p6567_p3, %p6563_p4  ;;  %p7086_p12 = por %p7085_p11, %p7084_p10 }
   0xa   : > { %p7067_p6 = pneg %p6564_p5 }
   0xc   : > { %p7079_p8 = pnand %p7077_p7, %p7067_p6 }
   0xe   : > { %p7080_p9 = pneg %p7079_p8 }
  0x10   : > { %p7087_p13 = pnand %p7086_p12, %p7080_p9 }
  0x12   : > { %7090 = shalt.err (!%p7087_p13)
}
  0x13   : > { %s7104_s27 = smov 192   ;;  %s7105_s28 = smov 12  }
  0x14   : > { %6566 = dma.hbm_to_vmem [thread:$0]  (!%p6564_p5), %s11121_s3, 1536, %s198_s24, [#allocation5], %s7104_s27, %s7104_s27, %s7105_s28  }
  0x15   : > { %226 = sbr.rel (%p7169_p2) target bundleno = 1728 (0x6c0), region = 44 }
  0x1a   : > { %7096 = dma.done.wait (%p6567_p3), [#allocation5], 1536  }
  0x1b   : > { %7098 = vsyncadd (%p6567_p3), [#allocation5], 4294965760  ;;  %v7106_v0 = vmov 1   ;;  %v11125_v1 = vmov 0   ;;  %v7192_v2 = vld [vmem:[%s11119_s1] sm:$0xff]  ;;  %v268_v3 = vld [vmem:[%s11120_s2 + $0x10] sm:$0xff]  ;;  %v295_v17 = vlaneseq }
  0x1c   : > { %6599 = vset.pattern.permute.xlu0 %v7106_v0  ;;  %6598 = vset.pattern.permute.xlu1 %v11125_v1  ;;  %v7201_v4 = vld [vmem:[%s11119_s1 + $0x18] sm:$0xff]  ;;  %v7209_v6 = vld [vmem:[%s11119_s1 + $0x8] sm:$0xff]  ;;  %v292_v7 = vld [vmem:[%s11119_s1 + $0x10] sm:$0xff]  ;;  %v7108_v8 = vmov 2   ;;  %v7109_v9 = vmov 3   ;;  %v7110_v10 = vmov 4  }
  0x1d   : > { %4277 = vmatprep.mubr.bf16.mxu1 %v11125_v1  ;;  %394 = vperm.xlu0 %6599, %v7192_v2   ;;  %v269_v5 = vld [vmem:[%s11120_s2 + $0x18] sm:$0xff]  ;;  %v7111_v11 = vmov 6   ;;  %v7112_v12 = vmov 7   ;;  %v7113_v13 = vmov 8   ;;  %v266_v14 = vld [vmem:[%s11120_s2] sm:$0xff]  ;;  %v7114_v15 = vmov 5  }
  0x1e   : > { %282 = vperm.xlu1 %6598, %v268_v3   ;;  %v267_v16 = vld [vmem:[%s11120_s2 + $0x8] sm:$0xff]  ;;  %p255_p0 = scmp.lt.s32.totalorder %s7165_s22, 1  ;;  %v7253_v18 = vshrl.u32 %v295_v17, 7  ;;  %s7115_s29 = smov 127   ;;  %vm505_vm0 = vcmask 1039360   ;;  %vm686_vm1 = vcmask 1031168  }
  0x1f   : > { %s7116_s30 = smov 126   ;;  %s7117_s7 = smov 100   ;;  %vm867_vm2 = vcmask 818176   ;;  %vm1048_vm3 = vcmask 809984   ;;  %vm1229_vm4 = vcmask 801792   ;;  %vm1431_vm5 = vcmask 588800  }
  0x20   : > { %s11723_s22 = smov (!%p255_p0, %s7165_s22), 1  ;;  %v301_v19 = vsub.s32 1, %v7253_v18  ;;  %v297_v20 = vsub.s32 0, %v7253_v18  ;;  %v309_v22 = vsub.s32 3, %v7253_v18  ;;  %v305_v23 = vsub.s32 2, %v7253_v18  ;;  %s7118_s8 = smov 99  }
  0x21   : > { %406 = vperm.xlu0 %6599, %v7201_v4   ;;  %s6558_s25 = smul.u32 7, %s11723_s22  ;;  %v317_v32 = vsub.s32 5, %v7253_v18  ;;  %v313_v33 = vsub.s32 4, %v7253_v18  ;;  %s7119_s9 = smov 98   ;;  %vm1632_vm6 = vcmask 580608   ;;  %vm1833_vm7 = vcmask 572416  }
  0x22   : > { %287 = vperm.xlu1 %6598, %v269_v5   ;;  %s7120_s10 = smov 72   ;;  %s7121_s11 = smov 71   ;;  %vm1935_vm8 = vcmask 703488   ;;  %vm2053_vm9 = vcmask 1043456   ;;  %vm2054_vm10 = vcmask 228356   ;;  %vm4159_vm12 = vcmask 261120  }
  0x23   : > { %s258_s28 = scalar_lea.vmem %s11118_s0, %s6558_s25  ;;  %s7122_s12 = smov 70   ;;  %vm9030_vm11 = vmor %vm2054_vm10, %vm2053_vm9  ;;  %vm5728_vm13 = vcmask 1046528   ;;  %vm5729_vm14 = vcmask 1047552   ;;  %vm6005_vm15 = vcmask 130052  }
  0x24   : > { %v7260_v21 = vld [vmem:[%s258_s28] sm:$0x7f]  ;;  %s6425_s19 = sshll.u32 %s11723_s22, 6 }
  0x25   : > { %6601 = vset.pattern.permute.xlu0 %v7108_v8  ;;  %v7265_v24 = vrot.slane %v7260_v21, %v301_v19  ;;  %v7268_v25 = vrot.slane %v7260_v21, %v297_v20  ;;  %v7271_v26 = vrot.slane %v7260_v21, %v309_v22  ;;  %v7274_v27 = vrot.slane %v7260_v21, %v305_v23  ;;  %s11082_s24 = scalar_lea.vmem %s11124_s6, %s6425_s19 }
  0x26   : > { %332 = vperm.xlu1 %6598, %v7209_v6   ;;  %583 = vperm.xlu0 %6601, %v292_v7   ;;  %v7289_v37 = vrot.slane %v7260_v21, %v317_v32  ;;  %v7292_v38 = vrot.slane %v7260_v21, %v313_v33 }
  0x27   : > { %11325 = vst [vmem:[#allocation7_spill] sm:$0xff] %v7274_v27 }
  0x28   : > { %11328 = vst [vmem:[#allocation10_spill] sm:$0xff] %v7292_v38 }
  0x2a   : > { %342 = vperm.xlu1 %6598, %v7201_v4   ;;  %6604 = vset.pattern.permute.xlu0 %v7109_v9 }
  0x2b   : > { %768 = vperm.xlu0 %6604, %v7201_v4  }
  0x2e   : > { %6600 = vset.pattern.permute.xlu1 %v7106_v0 }
  0x2f   : > { %398 = vperm.xlu1 %6600, %v7209_v6   ;;  %760 = vperm.xlu0 %6604, %v7209_v6  }
  0x33   : > { %402 = vperm.xlu1 %6600, %v292_v7   ;;  %6608 = vset.pattern.permute.xlu0 %v7110_v10 }
  0x34   : > { %945 = vperm.xlu0 %6608, %v292_v7  }
  0x37   : > { %6602 = vset.pattern.permute.xlu1 %v7108_v8 }
  0x38   : > { %587 = vperm.xlu1 %6602, %v7201_v4   ;;  %937 = vperm.xlu0 %6608, %v7192_v2  }
  0x3c   : > { %6603 = vset.pattern.permute.xlu1 %v7109_v9  ;;  %6612 = vset.pattern.permute.xlu0 %v7111_v11 }
  0x3d   : > { %764 = vperm.xlu1 %6603, %v292_v7   ;;  %1316 = vperm.xlu0 %6612, %v7201_v4  }
  0x41   : > { %6605 = vset.pattern.permute.xlu1 %v7108_v8  ;;  %1308 = vperm.xlu0 %6612, %v7209_v6  }
  0x42   : > { %575 = vperm.xlu1 %6605, %v7192_v2  }
  0x45   : > { %6616 = vset.pattern.permute.xlu0 %v7112_v12 }
  0x46   : > { %579 = vperm.xlu1 %6605, %v7209_v6   ;;  %1513 = vperm.xlu0 %6616, %v292_v7  }
  0x4a   : > { %6606 = vset.pattern.permute.xlu1 %v7110_v10  ;;  %1505 = vperm.xlu0 %6616, %v7192_v2  }
  0x4b   : > { %949 = vperm.xlu1 %6606, %v7201_v4  }
  0x4e   : > { %6620 = vset.pattern.permute.xlu0 %v7113_v13 }
  0x4f   : > { %6607 = vset.pattern.permute.xlu1 %v7109_v9  ;;  %1710 = vperm.xlu0 %6620, %v7209_v6  }
  0x50   : > { %756 = vperm.xlu1 %6607, %v7192_v2  }
  0x53   : > { %6621 = vset.pattern.permute.xlu0 %v11125_v1 }
  0x54   : > { %6609 = vset.pattern.permute.xlu1 %v7114_v15  ;;  %272 = vperm.xlu0 %6621, %v266_v14  }
  0x55   : > { %1126 = vperm.xlu1 %6609, %v292_v7  }
  0x58   : > { %277 = vperm.xlu0 %6621, %v267_v16  }
  0x59   : > { %1130 = vperm.xlu1 %6609, %v7201_v4  }
  0x5c   : > { %327 = vperm.xlu0 %6621, %v7192_v2  }
  0x5d   : > { %6610 = vset.pattern.permute.xlu1 %v7110_v10 }
  0x5e   : > { %941 = vperm.xlu1 %6610, %v7209_v6  }
  0x60   : > { %337 = vperm.xlu0 %6621, %v292_v7  }
  0x62   : > { %6611 = vset.pattern.permute.xlu1 %v7111_v11 }
  0x63   : > { %1312 = vperm.xlu1 %6611, %v292_v7  }
  0x67   : > { %6613 = vset.pattern.permute.xlu1 %v7114_v15 }
  0x68   : > { %1118 = vperm.xlu1 %6613, %v7192_v2  }
  0x6c   : > { %1122 = vperm.xlu1 %6613, %v7209_v6  }
  0x70   : > { %6614 = vset.pattern.permute.xlu1 %v7112_v12 }
  0x71   : > { %1517 = vperm.xlu1 %6614, %v7201_v4  }
  0x75   : > { %6615 = vset.pattern.permute.xlu1 %v7111_v11 }
  0x76   : > { %1304 = vperm.xlu1 %6615, %v7192_v2  }
  0x7a   : > { %6617 = vset.pattern.permute.xlu1 %v7113_v13 }
  0x7b   : > { %1714 = vperm.xlu1 %6617, %v292_v7  }
  0x7f   : > { %1718 = vperm.xlu1 %6617, %v7201_v4  }
  0x83   : > { %6618 = vset.pattern.permute.xlu1 %v7112_v12 }
  0x84   : > { %1509 = vperm.xlu1 %6618, %v7209_v6  }
  0x88   : > { %6619 = vset.pattern.permute.xlu1 %v7113_v13 }
  0x89   : > { %1706 = vperm.xlu1 %6619, %v7192_v2  }
  0x8d   : > { %6622 = vset.pattern.permute.xlu1 %v11125_v1 }
  0x98   : > { %v395_v28 = vpop.permute.xlu0 %394 }
  0x99   : > { %v7276_v29 = vpop.permute.xlu1 %282  ;;  %v410_v30 = vmul.f32 %v395_v28, %v7265_v24  ;;  %v409_v31 = vmul.f32 %v395_v28, %v7268_v25  ;;  %v412_v34 = vmul.f32 %v395_v28, %v7271_v26  ;;  %v411_v35 = vmul.f32 %v395_v28, %v7274_v27 }
  0x9a   : > { %11326 = vst [vmem:[#allocation8_spill] sm:$0xff] %v7276_v29  ;;  %v414_v40 = vmul.f32 %v395_v28, %v7289_v37  ;;  %v413_v41 = vmul.f32 %v395_v28, %v7292_v38 }
  0x9b   : > { %459 = vrot.lane.b32.xlu0 %v410_v30, %s7115_s29  ;;  %457 = vrot.lane.b32.xlu1 %v409_v31, %s7115_s29 }
  0x9c   : > { %v7323_v51 = vpop.permute.xlu0 %406 }
  0x9d   : > { %v7286_v36 = vpop.permute.xlu1 %287  ;;  %v428_v52 = vmul.f32 %v7323_v51, %v7265_v24  ;;  %v430_v55 = vmul.f32 %v7323_v51, %v7271_v26  ;;  %v427_v56 = vmul.f32 %v7323_v51, %v7268_v25  ;;  %v429_v60 = vmul.f32 %v7323_v51, %v7274_v27 }
  0x9e   : > { %11327 = vst [vmem:[#allocation9_spill] sm:$0xff] %v7286_v36  ;;  %v431_v63 = vmul.f32 %v7323_v51, %v7292_v38 }
  0x9f   : > { %463 = vrot.lane.b32.xlu0 %v412_v34, %s7115_s29  ;;  %461 = vrot.lane.b32.xlu1 %v411_v35, %s7115_s29 }
  0xa1   : > { %v7296_v39 = vpop.permute.xlu1 %332  ;;  %v7339_v57 = vpop.permute.xlu0 %583 }
  0xa2   : > { %11329 = vst [vmem:[#allocation11_spill] sm:$0xff] %v7296_v39  ;;  %v602_v58 = vmul.f32 %v7339_v57, %v7268_v25  ;;  %v604_v61 = vmul.f32 %v7339_v57, %v7274_v27  ;;  %v606_v3 = vmul.f32 %v7339_v57, %v7292_v38  ;;  %v603_v4 = vmul.f32 %v7339_v57, %v7265_v24 }
  0xa3   : > { %467 = vrot.lane.b32.xlu0 %v414_v40, %s7115_s29  ;;  %465 = vrot.lane.b32.xlu1 %v413_v41, %s7115_s29  ;;  %v605_v6 = vmul.f32 %v7339_v57, %v7271_v26 }
  0xa5   : > { %v7302_v42 = vpop.permute.xlu1 %342 }
  0xa6   : > { %11330 = vst [vmem:[#allocation12_spill] sm:$0xff] %v7302_v42  ;;  %v7361_v2 = vpop.permute.xlu0 %768 }
  0xa7   : > { %v790_v41 = vmul.f32 %v7361_v2, %v7265_v24 }
  0xaa   : > { %v7304_v43 = vpop.permute.xlu1 %398  ;;  %v7375_v8 = vpop.permute.xlu0 %760 }
  0xab   : > { %v415_v44 = vmul.f32 %v7304_v43, %v7268_v25  ;;  %v416_v13 = vmul.f32 %v7304_v43, %v7265_v24  ;;  %v418_v16 = vmul.f32 %v7304_v43, %v7271_v26  ;;  %v417_v23 = vmul.f32 %v7304_v43, %v7274_v27 }
  0xac   : > { %v419_v32 = vmul.f32 %v7304_v43, %v7292_v38 }
  0xad   : > { %469 = vrot.lane.b32.xlu1 %v415_v44, %s7115_s29 }
  0xae   : > { %v7309_v45 = vpop.permute.xlu1 %402 }
  0xaf   : > { %v423_v46 = vmul.f32 %v7309_v45, %v7274_v27  ;;  %v421_v47 = vmul.f32 %v7309_v45, %v7268_v25  ;;  %v425_v48 = vmul.f32 %v7309_v45, %v7292_v38  ;;  %v422_v49 = vmul.f32 %v7309_v45, %v7265_v24  ;;  %v7387_v12 = vpop.permute.xlu0 %945 }
  0xb0   : > { %v424_v53 = vmul.f32 %v7309_v45, %v7271_v26 }
  0xb1   : > { %485 = vrot.lane.b32.xlu0 %v423_v46, %s7115_s29  ;;  %481 = vrot.lane.b32.xlu1 %v421_v47, %s7115_s29 }
  0xb3   : > { %v7321_v50 = vpop.permute.xlu1 %587  ;;  %v7401_v19 = vpop.permute.xlu0 %937 }
  0xb4   : > { %v609_v5 = vmul.f32 %v7321_v50, %v7265_v24  ;;  %v611_v9 = vmul.f32 %v7321_v50, %v7271_v26  ;;  %v608_v10 = vmul.f32 %v7321_v50, %v7268_v25  ;;  %v610_v14 = vmul.f32 %v7321_v50, %v7274_v27 }
  0xb5   : > { %489 = vrot.lane.b32.xlu0 %v425_v48, %s7115_s29  ;;  %483 = vrot.lane.b32.xlu1 %v422_v49, %s7115_s29  ;;  %v612_v17 = vmul.f32 %v7321_v50, %v7292_v38  ;;  %v792_v48 = vmul.f32 %v7361_v2, %v7271_v26  ;;  %v789_v49 = vmul.f32 %v7361_v2, %v7268_v25 }
  0xb8   : > { %v7331_v54 = vpop.permute.xlu1 %764  ;;  %v7415_v30 = vpop.permute.xlu0 %1316 }
  0xb9   : > { %495 = vrot.lane.b32.xlu0 %v428_v52, %s7115_s29  ;;  %487 = vrot.lane.b32.xlu1 %v424_v53, %s7115_s29  ;;  %v783_v22 = vmul.f32 %v7331_v54, %v7268_v25  ;;  %v785_v31 = vmul.f32 %v7331_v54, %v7274_v27  ;;  %v787_v33 = vmul.f32 %v7331_v54, %v7292_v38 }
  0xba   : > { %v784_v34 = vmul.f32 %v7331_v54, %v7265_v24  ;;  %v786_v44 = vmul.f32 %v7331_v54, %v7271_v26 }
  0xbc   : > { %v7429_v40 = vpop.permute.xlu0 %1308 }
  0xbd   : > { %499 = vrot.lane.b32.xlu0 %v430_v55, %s7115_s29  ;;  %493 = vrot.lane.b32.xlu1 %v427_v56, %s7115_s29  ;;  %v7345_v59 = vpop.permute.xlu1 %575  ;;  %v791_v55 = vmul.f32 %v7361_v2, %v7274_v27 }
  0xbe   : > { %v590_v53 = vmul.f32 %v7345_v59, %v7268_v25 }
  0xc1   : > { %662 = vrot.lane.b32.xlu0 %v602_v58, %s7116_s30  ;;  %497 = vrot.lane.b32.xlu1 %v429_v60, %s7115_s29  ;;  %v7353_v62 = vpop.permute.xlu1 %579  ;;  %v7441_v47 = vpop.permute.xlu0 %1513  ;;  %v592_v60 = vmul.f32 %v7345_v59, %v7274_v27 }
  0xc5   : > { %666 = vrot.lane.b32.xlu0 %v604_v61, %s7116_s30  ;;  %501 = vrot.lane.b32.xlu1 %v431_v63, %s7115_s29  ;;  %v7455_v56 = vpop.permute.xlu0 %1505  ;;  %v793_v61 = vmul.f32 %v7361_v2, %v7292_v38 }
  0xc6   : > { %v7359_v0 = vpop.permute.xlu1 %949 }
  0xc9   : > { %670 = vrot.lane.b32.xlu0 %v606_v3, %s7116_s30  ;;  %664 = vrot.lane.b32.xlu1 %v603_v4, %s7116_s30  ;;  %v594_v3 = vmul.f32 %v7345_v59, %v7292_v38  ;;  %v591_v4 = vmul.f32 %v7345_v59, %v7265_v24 }
  0xca   : > { %v7467_v63 = vpop.permute.xlu0 %1710 }
  0xcb   : > { %v7373_v7 = vpop.permute.xlu1 %756 }
  0xcd   : > { %676 = vrot.lane.b32.xlu0 %v609_v5, %s7116_s30  ;;  %668 = vrot.lane.b32.xlu1 %v605_v6, %s7116_s30  ;;  %v597_v6 = vmul.f32 %v7353_v62, %v7265_v24 }
  0xd0   : > { %v7383_v11 = vpop.permute.xlu1 %1126 }
  0xd1   : > { %680 = vrot.lane.b32.xlu0 %v611_v9, %s7116_s30  ;;  %674 = vrot.lane.b32.xlu1 %v608_v10, %s7116_s30  ;;  %v593_v9 = vmul.f32 %v7345_v59, %v7271_v26  ;;  %v7481_v10 = vpop.permute.xlu0 %272 }
  0xd2   : > { %11331 = vst [vmem:[#allocation13_spill] sm:$0xff] %v7481_v10 }
  0xd4   : > { %v7395_v15 = vpop.permute.xlu1 %1130 }
  0xd5   : > { %471 = vrot.lane.b32.xlu0 %v416_v13, %s7115_s29  ;;  %678 = vrot.lane.b32.xlu1 %v610_v14, %s7116_s30  ;;  %v599_v14 = vmul.f32 %v7353_v62, %v7271_v26 }
  0xd9   : > { %475 = vrot.lane.b32.xlu0 %v418_v16, %s7115_s29  ;;  %682 = vrot.lane.b32.xlu1 %v612_v17, %s7116_s30  ;;  %v7405_v20 = vpop.permute.xlu1 %941  ;;  %v596_v16 = vmul.f32 %v7353_v62, %v7268_v25  ;;  %v7493_v17 = vpop.permute.xlu0 %277 }
  0xda   : > { %11332 = vst [vmem:[#allocation14_spill] sm:$0xff] %v7493_v17 }
  0xdd   : > { %843 = vrot.lane.b32.xlu0 %v783_v22, %s7117_s7  ;;  %473 = vrot.lane.b32.xlu1 %v417_v23, %s7115_s29  ;;  %v964_v22 = vmul.f32 %v7387_v12, %v7268_v25  ;;  %v598_v23 = vmul.f32 %v7353_v62, %v7274_v27 }
  0xde   : > { %v7413_v28 = vpop.permute.xlu1 %1312 }
  0xe1   : > { %847 = vrot.lane.b32.xlu0 %v785_v31, %s7117_s7  ;;  %477 = vrot.lane.b32.xlu1 %v419_v32, %s7115_s29  ;;  %v966_v32 = vmul.f32 %v7387_v12, %v7274_v27 }
  0xe3   : > { %v7427_v35 = vpop.permute.xlu1 %1118 }
  0xe5   : > { %851 = vrot.lane.b32.xlu0 %v787_v33, %s7117_s7  ;;  %845 = vrot.lane.b32.xlu1 %v784_v34, %s7117_s7  ;;  %v600_v33 = vmul.f32 %v7353_v62, %v7292_v38  ;;  %v7507_v34 = vpop.permute.xlu0 %327 }
  0xe6   : > { %11333 = vst [vmem:[#allocation15_spill] sm:$0xff] %v7507_v34 }
  0xe7   : > { %v7437_v46 = vpop.permute.xlu1 %1122 }
  0xe9   : > { %857 = vrot.lane.b32.xlu0 %v790_v41, %s7117_s7  ;;  %849 = vrot.lane.b32.xlu1 %v786_v44, %s7117_s7  ;;  %v968_v44 = vmul.f32 %v7387_v12, %v7292_v38 }
  0xec   : > { %v7447_v52 = vpop.permute.xlu1 %1517 }
  0xed   : > { %861 = vrot.lane.b32.xlu0 %v792_v48, %s7117_s7  ;;  %855 = vrot.lane.b32.xlu1 %v789_v49, %s7117_s7  ;;  %v965_v48 = vmul.f32 %v7387_v12, %v7265_v24  ;;  %v7519_v49 = vpop.permute.xlu0 %337 }
  0xee   : > { %11334 = vst [vmem:[#allocation16_spill] sm:$0xff] %v7519_v49 }
  0xf1   : > { %638 = vrot.lane.b32.xlu0 %v590_v53, %s7116_s30  ;;  %859 = vrot.lane.b32.xlu1 %v791_v55, %s7117_s7  ;;  %v7459_v58 = vpop.permute.xlu1 %1304  ;;  %v971_v55 = vmul.f32 %v7359_v0, %v7265_v24 }
  0xf5   : > { %642 = vrot.lane.b32.xlu0 %v592_v60, %s7116_s30  ;;  %863 = vrot.lane.b32.xlu1 %v793_v61, %s7117_s7  ;;  %v967_v60 = vmul.f32 %v7387_v12, %v7271_v26 }
  0xf6   : > { %v7473_v5 = vpop.permute.xlu1 %1714 }
  0xf9   : > { %646 = vrot.lane.b32.xlu0 %v594_v3, %s7116_s30  ;;  %640 = vrot.lane.b32.xlu1 %v591_v4, %s7116_s30  ;;  %v973_v3 = vmul.f32 %v7359_v0, %v7271_v26  ;;  %v970_v4 = vmul.f32 %v7359_v0, %v7268_v25 }
  0xfa   : > { %v7485_v13 = vpop.permute.xlu1 %1718 }
  0xfd   : > { %652 = vrot.lane.b32.xlu0 %v597_v6, %s7116_s30  ;;  %644 = vrot.lane.b32.xlu1 %v593_v9, %s7116_s30  ;;  %v426_v9 = vmul.f32 %v7309_v45, %v7289_v37 }
  0xff   : > { %v7499_v31 = vpop.permute.xlu1 %1509 }
 0x101   : > { %656 = vrot.lane.b32.xlu0 %v599_v14, %s7116_s30  ;;  %650 = vrot.lane.b32.xlu1 %v596_v16, %s7116_s30  ;;  %v972_v14 = vmul.f32 %v7359_v0, %v7274_v27 }
 0x104   : > { %v7511_v41 = vpop.permute.xlu1 %1706 }
 0x105   : > { %1024 = vrot.lane.b32.xlu0 %v964_v22, %s7118_s8  ;;  %654 = vrot.lane.b32.xlu1 %v598_v23, %s7116_s30  ;;  %v771_v23 = vmul.f32 %v7373_v7, %v7268_v25 }
 0x109   : > { %1028 = vrot.lane.b32.xlu0 %v966_v32, %s7118_s8  ;;  %658 = vrot.lane.b32.xlu1 %v600_v33, %s7116_s30  ;;  %v974_v32 = vmul.f32 %v7359_v0, %v7292_v38 }
 0x10d   : > { %1032 = vrot.lane.b32.xlu0 %v968_v44, %s7118_s8  ;;  %1026 = vrot.lane.b32.xlu1 %v965_v48, %s7118_s8  ;;  %v7521_v53 = vpop.permute.xlu1 %457  ;;  %v7529_v61 = vpop.permute.xlu0 %459  ;;  %v773_v44 = vmul.f32 %v7373_v7, %v7274_v27  ;;  %v432_v48 = vmul.f32 %v7323_v51, %v7289_v37 }
 0x10e   : > { %11335 = vst [vmem:[#allocation17_spill] sm:$0xff] %v7521_v53  ;;  %11336 = vst [vmem:[#allocation18_spill] sm:$0xff] %v7529_v61 }
 0x111   : > { %1038 = vrot.lane.b32.xlu0 %v971_v55, %s7118_s8  ;;  %1030 = vrot.lane.b32.xlu1 %v967_v60, %s7118_s8  ;;  %v7535_v6 = vpop.permute.xlu1 %461  ;;  %v7543_v16 = vpop.permute.xlu0 %463 }
 0x112   : > { %11337 = vst [vmem:[#allocation19_spill] sm:$0xff] %v7535_v6  ;;  %11338 = vst [vmem:[#allocation20_spill] sm:$0xff] %v7543_v16 }
 0x115   : > { %1042 = vrot.lane.b32.xlu0 %v973_v3, %s7118_s8  ;;  %1036 = vrot.lane.b32.xlu1 %v970_v4, %s7118_s8  ;;  %v7547_v22 = vpop.permute.xlu1 %465  ;;  %v7555_v45 = vpop.permute.xlu0 %467  ;;  %v775_v3 = vmul.f32 %v7373_v7, %v7292_v38  ;;  %v772_v4 = vmul.f32 %v7373_v7, %v7265_v24 }
 0x116   : > { %11339 = vst [vmem:[#allocation21_spill] sm:$0xff] %v7547_v22  ;;  %11340 = vst [vmem:[#allocation22_spill] sm:$0xff] %v7555_v45 }
 0x119   : > { %491 = vrot.lane.b32.xlu0 %v426_v9, %s7115_s29  ;;  %1040 = vrot.lane.b32.xlu1 %v972_v14, %s7118_s8  ;;  %v778_v14 = vmul.f32 %v7375_v8, %v7265_v24 }
 0x11d   : > { %819 = vrot.lane.b32.xlu0 %v771_v23, %s7117_s7  ;;  %1044 = vrot.lane.b32.xlu1 %v974_v32, %s7118_s8  ;;  %v774_v23 = vmul.f32 %v7373_v7, %v7271_v26 }
 0x11f   : > { %v7557_v33 = vpop.permute.xlu1 %469 }
 0x120   : > { %11341 = vst [vmem:[#allocation23_spill] sm:$0xff] %v7557_v33  ;;  %v781_v33 = vmul.f32 %v7375_v8, %v7292_v38 }
 0x121   : > { %823 = vrot.lane.b32.xlu0 %v773_v44, %s7117_s7  ;;  %503 = vrot.lane.b32.xlu1 %v432_v48, %s7115_s29  ;;  %v780_v48 = vmul.f32 %v7375_v8, %v7271_v26 }
 0x123   : > { %v7565_v55 = vpop.permute.xlu0 %485  ;;  %v7567_v60 = vpop.permute.xlu1 %481 }
 0x125   : > { %827 = vrot.lane.b32.xlu0 %v775_v3, %s7117_s7  ;;  %821 = vrot.lane.b32.xlu1 %v772_v4, %s7117_s7  ;;  %v777_v3 = vmul.f32 %v7375_v8, %v7268_v25 }
 0x127   : > { %v7575_v9 = vpop.permute.xlu0 %489  ;;  %v7577_v51 = vpop.permute.xlu1 %483 }
 0x128   : > { %11342 = vst [vmem:[#allocation24_spill] sm:$0xff] %v7575_v9 }
 0x129   : > { %833 = vrot.lane.b32.xlu0 %v778_v14, %s7117_s7  ;;  %825 = vrot.lane.b32.xlu1 %v774_v23, %s7117_s7  ;;  %v1145_v14 = vmul.f32 %v7383_v11, %v7268_v25  ;;  %v779_v23 = vmul.f32 %v7375_v8, %v7274_v27 }
 0x12b   : > { %v7585_v32 = vpop.permute.xlu0 %495  ;;  %v7587_v44 = vpop.permute.xlu1 %487 }
 0x12d   : > { %837 = vrot.lane.b32.xlu0 %v780_v48, %s7117_s7  ;;  %831 = vrot.lane.b32.xlu1 %v777_v3, %s7117_s7  ;;  %v1147_v3 = vmul.f32 %v7383_v11, %v7274_v27 }
 0x12f   : > { %v7595_v4 = vpop.permute.xlu0 %499  ;;  %v7597_v1 = vpop.permute.xlu1 %493 }
 0x131   : > { %1205 = vrot.lane.b32.xlu0 %v1145_v14, %s7119_s9  ;;  %835 = vrot.lane.b32.xlu1 %v779_v23, %s7117_s7  ;;  %v1149_v14 = vmul.f32 %v7383_v11, %v7292_v38  ;;  %v1146_v23 = vmul.f32 %v7383_v11, %v7265_v24 }
 0x133   : > { %v7605_v45 = vpop.permute.xlu0 %662  ;;  %v7607_v48 = vpop.permute.xlu1 %497 }
 0x135   : > { %1209 = vrot.lane.b32.xlu0 %v1147_v3, %s7119_s9  ;;  %839 = vrot.lane.b32.xlu1 %v781_v33, %s7117_s7  ;;  %v1152_v33 = vmul.f32 %v7395_v15, %v7265_v24  ;;  %v1148_v3 = vmul.f32 %v7383_v11, %v7271_v26 }
 0x137   : > { %v7615_v22 = vpop.permute.xlu0 %666  ;;  %v7617_v16 = vpop.permute.xlu1 %501 }
 0x139   : > { %1213 = vrot.lane.b32.xlu0 %v1149_v14, %s7119_s9  ;;  %1207 = vrot.lane.b32.xlu1 %v1146_v23, %s7119_s9  ;;  %v1154_v14 = vmul.f32 %v7395_v15, %v7271_v26  ;;  %v1151_v23 = vmul.f32 %v7395_v15, %v7268_v25 }
 0x13b   : > { %v7625_v17 = vpop.permute.xlu0 %670  ;;  %v7627_v6 = vpop.permute.xlu1 %664 }
 0x13d   : > { %1219 = vrot.lane.b32.xlu0 %v1152_v33, %s7119_s9  ;;  %1211 = vrot.lane.b32.xlu1 %v1148_v3, %s7119_s9  ;;  %v607_v33 = vmul.f32 %v7339_v57, %v7289_v37  ;;  %v1153_v3 = vmul.f32 %v7395_v15, %v7274_v27 }
 0x13f   : > { %v7635_v10 = vpop.permute.xlu0 %676  ;;  %v7637_v53 = vpop.permute.xlu1 %668 }
 0x140   : > { %11343 = vst [vmem:[#allocation25_spill] sm:$0xff] %v7635_v10 }
 0x141   : > { %1223 = vrot.lane.b32.xlu0 %v1154_v14, %s7119_s9  ;;  %1217 = vrot.lane.b32.xlu1 %v1151_v23, %s7119_s9  ;;  %v952_v14 = vmul.f32 %v7401_v19, %v7268_v25  ;;  %v1155_v23 = vmul.f32 %v7395_v15, %v7292_v38 }
 0x143   : > { %v7645_v61 = vpop.permute.xlu0 %680  ;;  %v7647_v39 = vpop.permute.xlu1 %674 }
 0x144   : > { %11344 = vst [vmem:[#allocation26_spill] sm:$0xff] %v7645_v61 }
 0x145   : > { %672 = vrot.lane.b32.xlu0 %v607_v33, %s7116_s30  ;;  %1221 = vrot.lane.b32.xlu1 %v1153_v3, %s7119_s9  ;;  %v954_v33 = vmul.f32 %v7401_v19, %v7274_v27  ;;  %v613_v3 = vmul.f32 %v7321_v50, %v7289_v37 }
 0x147   : > { %v7655_v34 = vpop.permute.xlu0 %471  ;;  %v7657_v10 = vpop.permute.xlu1 %678 }
 0x148   : > { %11345 = vst [vmem:[#allocation27_spill] sm:$0xff] %v7655_v34  ;;  %11346 = vst [vmem:[#allocation28_spill] sm:$0xff] %v7657_v10 }
 0x149   : > { %1000 = vrot.lane.b32.xlu0 %v952_v14, %s7118_s8  ;;  %1225 = vrot.lane.b32.xlu1 %v1155_v23, %s7119_s9  ;;  %v956_v14 = vmul.f32 %v7401_v19, %v7292_v38  ;;  %v953_v23 = vmul.f32 %v7401_v19, %v7265_v24 }
 0x14b   : > { %v7665_v57 = vpop.permute.xlu0 %475  ;;  %v7667_v61 = vpop.permute.xlu1 %682 }
 0x14c   : > { %11347 = vst [vmem:[#allocation29_spill] sm:$0xff] %v7665_v57 }
 0x14d   : > { %1004 = vrot.lane.b32.xlu0 %v954_v33, %s7118_s8  ;;  %684 = vrot.lane.b32.xlu1 %v613_v3, %s7116_s30  ;;  %v959_v33 = vmul.f32 %v7405_v20, %v7265_v24  ;;  %v955_v3 = vmul.f32 %v7401_v19, %v7271_v26 }
 0x14f   : > { %v7675_v34 = vpop.permute.xlu0 %843  ;;  %v7677_v10 = vpop.permute.xlu1 %473 }
 0x150   : > { %11348 = vst [vmem:[#allocation30_spill] sm:$0xff] %v7675_v34  ;;  %11349 = vst [vmem:[#allocation31_spill] sm:$0xff] %v7677_v10 }
 0x151   : > { %1008 = vrot.lane.b32.xlu0 %v956_v14, %s7118_s8  ;;  %1002 = vrot.lane.b32.xlu1 %v953_v23, %s7118_s8  ;;  %v961_v14 = vmul.f32 %v7405_v20, %v7271_v26  ;;  %v958_v23 = vmul.f32 %v7405_v20, %v7268_v25 }
 0x153   : > { %v7685_v57 = vpop.permute.xlu0 %847  ;;  %v7687_v50 = vpop.permute.xlu1 %477 }
 0x154   : > { %11350 = vst [vmem:[#allocation32_spill] sm:$0xff] %v7685_v57  ;;  %11351 = vst [vmem:[#allocation33_spill] sm:$0xff] %v7687_v50 }
 0x155   : > { %1014 = vrot.lane.b32.xlu0 %v959_v33, %s7118_s8  ;;  %1006 = vrot.lane.b32.xlu1 %v955_v3, %s7118_s8  ;;  %v1333_v33 = vmul.f32 %v7413_v28, %v7268_v25  ;;  %v960_v3 = vmul.f32 %v7405_v20, %v7274_v27 }
 0x157   : > { %v7695_v10 = vpop.permute.xlu0 %851  ;;  %v7697_v34 = vpop.permute.xlu1 %845 }
 0x158   : > { %11352 = vst [vmem:[#allocation34_spill] sm:$0xff] %v7695_v10  ;;  %11353 = vst [vmem:[#allocation35_spill] sm:$0xff] %v7697_v34 }
 0x159   : > { %1018 = vrot.lane.b32.xlu0 %v961_v14, %s7118_s8  ;;  %1012 = vrot.lane.b32.xlu1 %v958_v23, %s7118_s8  ;;  %v1335_v23 = vmul.f32 %v7413_v28, %v7274_v27 }
 0x15b   : > { %v7705_v50 = vpop.permute.xlu0 %857  ;;  %v7707_v57 = vpop.permute.xlu1 %849 }
 0x15c   : > { %11354 = vst [vmem:[#allocation36_spill] sm:$0xff] %v7705_v50  ;;  %11355 = vst [vmem:[#allocation37_spill] sm:$0xff] %v7707_v57  ;;  %v962_v50 = vmul.f32 %v7405_v20, %v7292_v38 }
 0x15d   : > { %1403 = vrot.lane.b32.xlu0 %v1333_v33, %s7120_s10  ;;  %1016 = vrot.lane.b32.xlu1 %v960_v3, %s7118_s8  ;;  %v1337_v33 = vmul.f32 %v7413_v28, %v7292_v38  ;;  %v1334_v3 = vmul.f32 %v7413_v28, %v7265_v24 }
 0x15f   : > { %v7715_v10 = vpop.permute.xlu0 %861  ;;  %v7717_v14 = vpop.permute.xlu1 %855 }
 0x160   : > { %11356 = vst [vmem:[#allocation38_spill] sm:$0xff] %v7715_v10  ;;  %11357 = vst [vmem:[#allocation39_spill] sm:$0xff] %v7717_v14 }
 0x161   : > { %1407 = vrot.lane.b32.xlu0 %v1335_v23, %s7120_s10  ;;  %1020 = vrot.lane.b32.xlu1 %v962_v50, %s7118_s8  ;;  %v1341_v50 = vmul.f32 %v7415_v30, %v7265_v24  ;;  %v1336_v23 = vmul.f32 %v7413_v28, %v7271_v26 }
 0x163   : > { %v7725_v57 = vpop.permute.xlu0 %638  ;;  %v7727_v34 = vpop.permute.xlu1 %859 }
 0x164   : > { %11358 = vst [vmem:[#allocation40_spill] sm:$0xff] %v7725_v57  ;;  %11359 = vst [vmem:[#allocation41_spill] sm:$0xff] %v7727_v34 }
 0x165   : > { %1411 = vrot.lane.b32.xlu0 %v1337_v33, %s7120_s10  ;;  %1405 = vrot.lane.b32.xlu1 %v1334_v3, %s7120_s10  ;;  %v1343_v33 = vmul.f32 %v7415_v30, %v7271_v26  ;;  %v1340_v3 = vmul.f32 %v7415_v30, %v7268_v25 }
 0x167   : > { %v7735_v10 = vpop.permute.xlu0 %642  ;;  %v7737_v14 = vpop.permute.xlu1 %863 }
 0x168   : > { %11360 = vst [vmem:[#allocation42_spill] sm:$0xff] %v7735_v10  ;;  %11361 = vst [vmem:[#allocation43_spill] sm:$0xff] %v7737_v14 }
 0x169   : > { %1419 = vrot.lane.b32.xlu0 %v1341_v50, %s7120_s10  ;;  %1409 = vrot.lane.b32.xlu1 %v1336_v23, %s7120_s10  ;;  %v420_v50 = vmul.f32 %v7304_v43, %v7289_v37  ;;  %v1342_v23 = vmul.f32 %v7415_v30, %v7274_v27 }
 0x16b   : > { %v7745_v57 = vpop.permute.xlu0 %646  ;;  %v7747_v34 = vpop.permute.xlu1 %640 }
 0x16c   : > { %11362 = vst [vmem:[#allocation44_spill] sm:$0xff] %v7745_v57  ;;  %11363 = vst [vmem:[#allocation45_spill] sm:$0xff] %v7747_v34 }
 0x16d   : > { %1423 = vrot.lane.b32.xlu0 %v1343_v33, %s7120_s10  ;;  %1417 = vrot.lane.b32.xlu1 %v1340_v3, %s7120_s10  ;;  %v794_v33 = vmul.f32 %v7361_v2, %v7289_v37  ;;  %v1344_v3 = vmul.f32 %v7415_v30, %v7292_v38 }
 0x16f   : > { %v7755_v10 = vpop.permute.xlu0 %652  ;;  %v7757_v14 = vpop.permute.xlu1 %644 }
 0x170   : > { %11364 = vst [vmem:[#allocation46_spill] sm:$0xff] %v7755_v10  ;;  %11365 = vst [vmem:[#allocation47_spill] sm:$0xff] %v7757_v14 }
 0x171   : > { %479 = vrot.lane.b32.xlu0 %v420_v50, %s7115_s29  ;;  %1421 = vrot.lane.b32.xlu1 %v1342_v23, %s7120_s10  ;;  %v1134_v50 = vmul.f32 %v7427_v35, %v7265_v24  ;;  %v788_v23 = vmul.f32 %v7331_v54, %v7289_v37 }
 0x173   : > { %v7765_v57 = vpop.permute.xlu0 %656  ;;  %v7767_v34 = vpop.permute.xlu1 %650 }
 0x174   : > { %11366 = vst [vmem:[#allocation48_spill] sm:$0xff] %v7765_v57  ;;  %11367 = vst [vmem:[#allocation49_spill] sm:$0xff] %v7767_v34 }
 0x175   : > { %865 = vrot.lane.b32.xlu0 %v794_v33, %s7117_s7  ;;  %1425 = vrot.lane.b32.xlu1 %v1344_v3, %s7120_s10  ;;  %v1136_v33 = vmul.f32 %v7427_v35, %v7271_v26  ;;  %v1133_v3 = vmul.f32 %v7427_v35, %v7268_v25 }
 0x177   : > { %v7775_v43 = vpop.permute.xlu0 %1024  ;;  %v7777_v10 = vpop.permute.xlu1 %654 }
 0x178   : > { %11368 = vst [vmem:[#allocation50_spill] sm:$0xff] %v7777_v10 }
 0x179   : > { %1183 = vrot.lane.b32.xlu0 %v1134_v50, %s7119_s9  ;;  %853 = vrot.lane.b32.xlu1 %v788_v23, %s7117_s7  ;;  %v1139_v50 = vmul.f32 %v7437_v46, %v7268_v25  ;;  %v1135_v23 = vmul.f32 %v7427_v35, %v7274_v27 }
 0x17b   : > { %v7785_v2 = vpop.permute.xlu0 %1028  ;;  %v7787_v57 = vpop.permute.xlu1 %658 }
 0x17c   : > { %11369 = vst [vmem:[#allocation51_spill] sm:$0xff] %v7787_v57 }
 0x17d   : > { %1187 = vrot.lane.b32.xlu0 %v1136_v33, %s7119_s9  ;;  %1181 = vrot.lane.b32.xlu1 %v1133_v3, %s7119_s9  ;;  %v1141_v33 = vmul.f32 %v7437_v46, %v7274_v27  ;;  %v1137_v3 = vmul.f32 %v7427_v35, %v7292_v38 }
 0x17f   : > { %v7795_v10 = vpop.permute.xlu0 %1032  ;;  %v7797_v54 = vpop.permute.xlu1 %1026 }
 0x180   : > { %11370 = vst [vmem:[#allocation52_spill] sm:$0xff] %v7795_v10 }
 0x181   : > { %1193 = vrot.lane.b32.xlu0 %v1139_v50, %s7119_s9  ;;  %1185 = vrot.lane.b32.xlu1 %v1135_v23, %s7119_s9  ;;  %v1143_v50 = vmul.f32 %v7437_v46, %v7292_v38  ;;  %v1140_v23 = vmul.f32 %v7437_v46, %v7265_v24 }
 0x183   : > { %v7805_v57 = vpop.permute.xlu0 %1038  ;;  %v7807_v34 = vpop.permute.xlu1 %1030 }
 0x184   : > { %11371 = vst [vmem:[#allocation53_spill] sm:$0xff] %v7805_v57  ;;  %11372 = vst [vmem:[#allocation54_spill] sm:$0xff] %v7807_v34 }
 0x185   : > { %1197 = vrot.lane.b32.xlu0 %v1141_v33, %s7119_s9  ;;  %1189 = vrot.lane.b32.xlu1 %v1137_v3, %s7119_s9  ;;  %v1535_v33 = vmul.f32 %v7441_v47, %v7265_v24  ;;  %v1142_v3 = vmul.f32 %v7437_v46, %v7271_v26 }
 0x187   : > { %v7815_v14 = vpop.permute.xlu0 %1042  ;;  %v7817_v10 = vpop.permute.xlu1 %1036 }
 0x188   : > { %11373 = vst [vmem:[#allocation55_spill] sm:$0xff] %v7815_v14  ;;  %11374 = vst [vmem:[#allocation56_spill] sm:$0xff] %v7817_v10 }
 0x189   : > { %1201 = vrot.lane.b32.xlu0 %v1143_v50, %s7119_s9  ;;  %1195 = vrot.lane.b32.xlu1 %v1140_v23, %s7119_s9  ;;  %v1537_v23 = vmul.f32 %v7441_v47, %v7271_v26 }
 0x18b   : > { %v7825_v57 = vpop.permute.xlu0 %491  ;;  %v7827_v34 = vpop.permute.xlu1 %1040 }
 0x18c   : > { %11375 = vst [vmem:[#allocation57_spill] sm:$0xff] %v7825_v57  ;;  %11376 = vst [vmem:[#allocation58_spill] sm:$0xff] %v7827_v34  ;;  %v1534_v57 = vmul.f32 %v7441_v47, %v7268_v25 }
 0x18d   : > { %1606 = vrot.lane.b32.xlu0 %v1535_v33, %s7121_s11  ;;  %1199 = vrot.lane.b32.xlu1 %v1142_v3, %s7119_s9  ;;  %v1541_v33 = vmul.f32 %v7447_v52, %v7268_v25  ;;  %v1536_v3 = vmul.f32 %v7441_v47, %v7274_v27 }
 0x18f   : > { %v7835_v14 = vpop.permute.xlu0 %819  ;;  %v7837_v50 = vpop.permute.xlu1 %1044 }
 0x190   : > { %11377 = vst [vmem:[#allocation59_spill] sm:$0xff] %v7835_v14  ;;  %11378 = vst [vmem:[#allocation60_spill] sm:$0xff] %v7837_v50 }
 0x191   : > { %1610 = vrot.lane.b32.xlu0 %v1537_v23, %s7121_s11  ;;  %1604 = vrot.lane.b32.xlu1 %v1534_v57, %s7121_s11  ;;  %v1543_v57 = vmul.f32 %v7447_v52, %v7274_v27  ;;  %v1538_v23 = vmul.f32 %v7441_v47, %v7292_v38 }
 0x193   : > { %v7845_v34 = vpop.permute.xlu0 %823  ;;  %v7847_v10 = vpop.permute.xlu1 %503 }
 0x194   : > { %11379 = vst [vmem:[#allocation61_spill] sm:$0xff] %v7845_v34  ;;  %11380 = vst [vmem:[#allocation62_spill] sm:$0xff] %v7847_v10 }
 0x195   : > { %1618 = vrot.lane.b32.xlu0 %v1541_v33, %s7121_s11  ;;  %1608 = vrot.lane.b32.xlu1 %v1536_v3, %s7121_s11  ;;  %v1545_v33 = vmul.f32 %v7447_v52, %v7292_v38  ;;  %v1542_v3 = vmul.f32 %v7447_v52, %v7265_v24 }
 0x197   : > { %v7855_v14 = vpop.permute.xlu0 %827  ;;  %v7857_v50 = vpop.permute.xlu1 %821 }
 0x198   : > { %11381 = vst [vmem:[#allocation63_spill] sm:$0xff] %v7855_v14  ;;  %11382 = vst [vmem:[#allocation64_spill] sm:$0xff] %v7857_v50 }
 0x199   : > { %1622 = vrot.lane.b32.xlu0 %v1543_v57, %s7121_s11  ;;  %1612 = vrot.lane.b32.xlu1 %v1538_v23, %s7121_s11  ;;  %v601_v57 = vmul.f32 %v7353_v62, %v7289_v37  ;;  %v1544_v23 = vmul.f32 %v7447_v52, %v7271_v26 }
 0x19b   : > { %v7865_v10 = vpop.permute.xlu0 %833  ;;  %v7867_v34 = vpop.permute.xlu1 %825 }
 0x19c   : > { %11383 = vst [vmem:[#allocation65_spill] sm:$0xff] %v7865_v10  ;;  %11384 = vst [vmem:[#allocation66_spill] sm:$0xff] %v7867_v34 }
 0x19d   : > { %1626 = vrot.lane.b32.xlu0 %v1545_v33, %s7121_s11  ;;  %1620 = vrot.lane.b32.xlu1 %v1542_v3, %s7121_s11  ;;  %v975_v33 = vmul.f32 %v7359_v0, %v7289_v37  ;;  %v595_v3 = vmul.f32 %v7345_v59, %v7289_v37 }
 0x19f   : > { %v7875_v14 = vpop.permute.xlu0 %837  ;;  %v7877_v50 = vpop.permute.xlu1 %831 }
 0x1a0   : > { %11385 = vst [vmem:[#allocation67_spill] sm:$0xff] %v7875_v14  ;;  %11386 = vst [vmem:[#allocation68_spill] sm:$0xff] %v7877_v50 }
 0x1a1   : > { %660 = vrot.lane.b32.xlu0 %v601_v57, %s7116_s30  ;;  %1624 = vrot.lane.b32.xlu1 %v1544_v23, %s7121_s11  ;;  %v1320_v57 = vmul.f32 %v7459_v58, %v7265_v24  ;;  %v969_v23 = vmul.f32 %v7387_v12, %v7289_v37 }
 0x1a3   : > { %v7885_v10 = vpop.permute.xlu0 %1205  ;;  %v7887_v34 = vpop.permute.xlu1 %835 }
 0x1a4   : > { %11387 = vst [vmem:[#allocation69_spill] sm:$0xff] %v7887_v34 }
 0x1a5   : > { %1046 = vrot.lane.b32.xlu0 %v975_v33, %s7118_s8  ;;  %648 = vrot.lane.b32.xlu1 %v595_v3, %s7116_s30  ;;  %v1322_v33 = vmul.f32 %v7459_v58, %v7271_v26  ;;  %v1319_v3 = vmul.f32 %v7459_v58, %v7268_v25 }
 0x1a7   : > { %v7895_v62 = vpop.permute.xlu0 %1209  ;;  %v7897_v14 = vpop.permute.xlu1 %839 }
 0x1a8   : > { %11388 = vst [vmem:[#allocation70_spill] sm:$0xff] %v7897_v14 }
 0x1a9   : > { %1377 = vrot.lane.b32.xlu0 %v1320_v57, %s7120_s10  ;;  %1034 = vrot.lane.b32.xlu1 %v969_v23, %s7118_s8  ;;  %v1326_v57 = vmul.f32 %v7429_v40, %v7268_v25  ;;  %v1321_v23 = vmul.f32 %v7459_v58, %v7274_v27 }
 0x1ab   : > { %v7905_v0 = vpop.permute.xlu0 %1213  ;;  %v7907_v59 = vpop.permute.xlu1 %1207 }
 0x1ac   : > { %11389 = vst [vmem:[#allocation71_spill] sm:$0xff] %v7905_v0 }
 0x1ad   : > { %1381 = vrot.lane.b32.xlu0 %v1322_v33, %s7120_s10  ;;  %1375 = vrot.lane.b32.xlu1 %v1319_v3, %s7120_s10  ;;  %v1328_v33 = vmul.f32 %v7429_v40, %v7274_v27  ;;  %v1323_v3 = vmul.f32 %v7459_v58, %v7292_v38 }
 0x1af   : > { %v7915_v14 = vpop.permute.xlu0 %1219  ;;  %v7917_v12 = vpop.permute.xlu1 %1211 }
 0x1b0   : > { %11390 = vst [vmem:[#allocation72_spill] sm:$0xff] %v7915_v14 }
 0x1b1   : > { %1389 = vrot.lane.b32.xlu0 %v1326_v57, %s7120_s10  ;;  %1379 = vrot.lane.b32.xlu1 %v1321_v23, %s7120_s10  ;;  %v1330_v57 = vmul.f32 %v7429_v40, %v7292_v38  ;;  %v1327_v23 = vmul.f32 %v7429_v40, %v7265_v24 }
 0x1b3   : > { %v7925_v34 = vpop.permute.xlu0 %1223  ;;  %v7927_v50 = vpop.permute.xlu1 %1217 }
 0x1b4   : > { %11391 = vst [vmem:[#allocation73_spill] sm:$0xff] %v7925_v34  ;;  %11392 = vst [vmem:[#allocation74_spill] sm:$0xff] %v7927_v50 }
 0x1b5   : > { %1393 = vrot.lane.b32.xlu0 %v1328_v33, %s7120_s10  ;;  %1383 = vrot.lane.b32.xlu1 %v1323_v3, %s7120_s10  ;;  %v1736_v33 = vmul.f32 %v7473_v5, %v7265_v24  ;;  %v1329_v3 = vmul.f32 %v7429_v40, %v7271_v26 }
 0x1b7   : > { %v7935_v14 = vpop.permute.xlu0 %672  ;;  %v7937_v0 = vpop.permute.xlu1 %1221 }
 0x1b8   : > { %11393 = vst [vmem:[#allocation75_spill] sm:$0xff] %v7935_v14  ;;  %11394 = vst [vmem:[#allocation76_spill] sm:$0xff] %v7937_v0 }
 0x1b9   : > { %1397 = vrot.lane.b32.xlu0 %v1330_v57, %s7120_s10  ;;  %1391 = vrot.lane.b32.xlu1 %v1327_v23, %s7120_s10  ;;  %v1738_v23 = vmul.f32 %v7473_v5, %v7271_v26 }
 0x1bb   : > { %v7945_v34 = vpop.permute.xlu0 %1000  ;;  %v7947_v50 = vpop.permute.xlu1 %1225 }
 0x1bc   : > { %11395 = vst [vmem:[#allocation77_spill] sm:$0xff] %v7945_v34  ;;  %11396 = vst [vmem:[#allocation78_spill] sm:$0xff] %v7947_v50  ;;  %v1735_v34 = vmul.f32 %v7473_v5, %v7268_v25 }
 0x1bd   : > { %1807 = vrot.lane.b32.xlu0 %v1736_v33, %s7122_s12  ;;  %1395 = vrot.lane.b32.xlu1 %v1329_v3, %s7120_s10  ;;  %v1742_v33 = vmul.f32 %v7485_v13, %v7268_v25  ;;  %v1737_v3 = vmul.f32 %v7473_v5, %v7274_v27 }
 0x1bf   : > { %v7955_v14 = vpop.permute.xlu0 %1004  ;;  %v7957_v57 = vpop.permute.xlu1 %684 }
 0x1c0   : > { %11397 = vst [vmem:[#allocation79_spill] sm:$0xff] %v7955_v14  ;;  %11398 = vst [vmem:[#allocation80_spill] sm:$0xff] %v7957_v57 }
 0x1c1   : > { %1811 = vrot.lane.b32.xlu0 %v1738_v23, %s7122_s12  ;;  %1805 = vrot.lane.b32.xlu1 %v1735_v34, %s7122_s12  ;;  %v1744_v34 = vmul.f32 %v7485_v13, %v7274_v27  ;;  %v1739_v23 = vmul.f32 %v7473_v5, %v7292_v38 }
 0x1c3   : > { %v7965_v50 = vpop.permute.xlu0 %1008  ;;  %v7967_v0 = vpop.permute.xlu1 %1002 }
 0x1c4   : > { %11399 = vst [vmem:[#allocation81_spill] sm:$0xff] %v7965_v50  ;;  %11400 = vst [vmem:[#allocation82_spill] sm:$0xff] %v7967_v0 }
 0x1c5   : > { %1819 = vrot.lane.b32.xlu0 %v1742_v33, %s7122_s12  ;;  %1809 = vrot.lane.b32.xlu1 %v1737_v3, %s7122_s12  ;;  %v1746_v33 = vmul.f32 %v7485_v13, %v7292_v38  ;;  %v1743_v3 = vmul.f32 %v7485_v13, %v7265_v24 }
 0x1c7   : > { %v7975_v57 = vpop.permute.xlu0 %1014  ;;  %v7977_v14 = vpop.permute.xlu1 %1006 }
 0x1c8   : > { %11401 = vst [vmem:[#allocation83_spill] sm:$0xff] %v7975_v57  ;;  %11402 = vst [vmem:[#allocation84_spill] sm:$0xff] %v7977_v14 }
 0x1c9   : > { %1823 = vrot.lane.b32.xlu0 %v1744_v34, %s7122_s12  ;;  %1813 = vrot.lane.b32.xlu1 %v1739_v23, %s7122_s12  ;;  %v782_v34 = vmul.f32 %v7375_v8, %v7289_v37  ;;  %v1745_v23 = vmul.f32 %v7485_v13, %v7271_v26 }
 0x1cb   : > { %v7985_v50 = vpop.permute.xlu0 %1018  ;;  %v7987_v0 = vpop.permute.xlu1 %1012 }
 0x1cc   : > { %11403 = vst [vmem:[#allocation85_spill] sm:$0xff] %v7985_v50  ;;  %11404 = vst [vmem:[#allocation86_spill] sm:$0xff] %v7987_v0 }
 0x1cd   : > { %1827 = vrot.lane.b32.xlu0 %v1746_v33, %s7122_s12  ;;  %1821 = vrot.lane.b32.xlu1 %v1743_v3, %s7122_s12  ;;  %v1156_v33 = vmul.f32 %v7395_v15, %v7289_v37  ;;  %v776_v3 = vmul.f32 %v7373_v7, %v7289_v37 }
 0x1cf   : > { %v7995_v57 = vpop.permute.xlu0 %1403  ;;  %v7997_v14 = vpop.permute.xlu1 %1016 }
 0x1d0   : > { %11405 = vst [vmem:[#allocation87_spill] sm:$0xff] %v7997_v14 }
 0x1d1   : > { %841 = vrot.lane.b32.xlu0 %v782_v34, %s7117_s7  ;;  %1825 = vrot.lane.b32.xlu1 %v1745_v23, %s7122_s12  ;;  %v1521_v34 = vmul.f32 %v7455_v56, %v7265_v24  ;;  %v1150_v23 = vmul.f32 %v7383_v11, %v7289_v37 }
 0x1d3   : > { %v8005_v50 = vpop.permute.xlu0 %1407  ;;  %v8007_v0 = vpop.permute.xlu1 %1020 }
 0x1d4   : > { %11406 = vst [vmem:[#allocation88_spill] sm:$0xff] %v8007_v0 }
 0x1d5   : > { %1227 = vrot.lane.b32.xlu0 %v1156_v33, %s7119_s9  ;;  %829 = vrot.lane.b32.xlu1 %v776_v3, %s7117_s7  ;;  %v1523_v33 = vmul.f32 %v7455_v56, %v7271_v26  ;;  %v1520_v3 = vmul.f32 %v7455_v56, %v7268_v25 }
 0x1d7   : > { %v8015_v8 = vpop.permute.xlu0 %1411  ;;  %v8017_v14 = vpop.permute.xlu1 %1405 }
 0x1d8   : > { %11407 = vst [vmem:[#allocation89_spill] sm:$0xff] %v8015_v8 }
 0x1d9   : > { %1578 = vrot.lane.b32.xlu0 %v1521_v34, %s7121_s11  ;;  %1215 = vrot.lane.b32.xlu1 %v1150_v23, %s7119_s9  ;;  %v1527_v34 = vmul.f32 %v7499_v31, %v7268_v25  ;;  %v1522_v23 = vmul.f32 %v7455_v56, %v7274_v27 }
 0x1db   : > { %v8025_v15 = vpop.permute.xlu0 %1419  ;;  %v8027_v7 = vpop.permute.xlu1 %1409 }
 0x1dc   : > { %11408 = vst [vmem:[#allocation90_spill] sm:$0xff] %v8025_v15 }
 0x1dd   : > { %1582 = vrot.lane.b32.xlu0 %v1523_v33, %s7121_s11  ;;  %1576 = vrot.lane.b32.xlu1 %v1520_v3, %s7121_s11  ;;  %v1529_v33 = vmul.f32 %v7499_v31, %v7274_v27  ;;  %v1524_v3 = vmul.f32 %v7455_v56, %v7292_v38 }
 0x1df   : > { %v8035_v0 = vpop.permute.xlu0 %1423  ;;  %v8037_v11 = vpop.permute.xlu1 %1417 }
 0x1e0   : > { %11409 = vst [vmem:[#allocation91_spill] sm:$0xff] %v8035_v0  ;;  %11410 = vst [vmem:[#allocation92_spill] sm:$0xff] %v8037_v11 }
 0x1e1   : > { %1590 = vrot.lane.b32.xlu0 %v1527_v34, %s7121_s11  ;;  %1580 = vrot.lane.b32.xlu1 %v1522_v23, %s7121_s11  ;;  %v1531_v34 = vmul.f32 %v7499_v31, %v7292_v38  ;;  %v1528_v23 = vmul.f32 %v7499_v31, %v7265_v24 }
 0x1e3   : > { %v8045_v15 = vpop.permute.xlu0 %479  ;;  %v8047_v8 = vpop.permute.xlu1 %1421 }
 0x1e4   : > { %11411 = vst [vmem:[#allocation93_spill] sm:$0xff] %v8045_v15  ;;  %11412 = vst [vmem:[#allocation94_spill] sm:$0xff] %v8047_v8  ;;  %v1300_v15 = vsub.s32 6, %v7253_v18 }
 0x1e5   : > { %1594 = vrot.lane.b32.xlu0 %v1529_v33, %s7121_s11  ;;  %1584 = vrot.lane.b32.xlu1 %v1524_v3, %s7121_s11  ;;  %v963_v3 = vmul.f32 %v7405_v20, %v7289_v37  ;;  %v957_v20 = vmul.f32 %v7401_v19, %v7289_v37 }
 0x1e7   : > { %v8055_v0 = vpop.permute.xlu0 %865  ;;  %v8057_v11 = vpop.permute.xlu1 %1425 }
 0x1e8   : > { %11413 = vst [vmem:[#allocation95_spill] sm:$0xff] %v8055_v0  ;;  %11414 = vst [vmem:[#allocation96_spill] sm:$0xff] %v8057_v11  ;;  %v1530_v0 = vmul.f32 %v7499_v31, %v7271_v26  ;;  %v8075_v11 = vrot.slane %v7260_v21, %v1300_v15 }
 0x1e9   : > { %1598 = vrot.lane.b32.xlu0 %v1531_v34, %s7121_s11  ;;  %1592 = vrot.lane.b32.xlu1 %v1528_v23, %s7121_s11 }
 0x1ea   : > { %v1339_v23 = vmul.f32 %v7413_v28, %v8075_v11 }
 0x1eb   : > { %v8066_v8 = vpop.permute.xlu0 %1183  ;;  %v8068_v33 = vpop.permute.xlu1 %853 }
 0x1ec   : > { %11415 = vst [vmem:[#allocation97_spill] sm:$0xff] %v8066_v8  ;;  %11416 = vst [vmem:[#allocation98_spill] sm:$0xff] %v8068_v33  ;;  %v1547_v8 = vmul.f32 %v7447_v52, %v8075_v11 }
 0x1ed   : > { %1022 = vrot.lane.b32.xlu0 %v963_v3, %s7118_s8  ;;  %1596 = vrot.lane.b32.xlu1 %v1530_v0, %s7121_s11  ;;  %v1346_v0 = vmul.f32 %v7415_v30, %v8075_v11  ;;  %v1338_v3 = vmul.f32 %v7413_v28, %v7289_v37 }
 0x1ef   : > { %v8079_v18 = vpop.permute.xlu0 %1187  ;;  %v8081_v34 = vpop.permute.xlu1 %1181 }
 0x1f0   : > { %11417 = vst [vmem:[#allocation99_spill] sm:$0xff] %v8079_v18  ;;  %11418 = vst [vmem:[#allocation100_spill] sm:$0xff] %v8081_v34 }
 0x1f1   : > { %1415 = vrot.lane.b32.xlu0 %v1339_v23, %s7120_s10  ;;  %1010 = vrot.lane.b32.xlu1 %v957_v20, %s7118_s8  ;;  %v1722_v23 = vmul.f32 %v7511_v41, %v7265_v24  ;;  %v1345_v20 = vmul.f32 %v7415_v30, %v7289_v37 }
 0x1f3   : > { %v8089_v21 = vpop.permute.xlu0 %1193  ;;  %v8091_v15 = vpop.permute.xlu1 %1185 }
 0x1f4   : > { %11419 = vst [vmem:[#allocation101_spill] sm:$0xff] %v8089_v21  ;;  %11420 = vst [vmem:[#allocation102_spill] sm:$0xff] %v8091_v15 }
 0x1f5   : > { %1429 = vrot.lane.b32.xlu0 %v1346_v0, %s7120_s10  ;;  %1413 = vrot.lane.b32.xlu1 %v1338_v3, %s7120_s10  ;;  %v1724_v0 = vmul.f32 %v7511_v41, %v7271_v26  ;;  %v1721_v3 = vmul.f32 %v7511_v41, %v7268_v25 }
 0x1f7   : > { %v8099_v33 = vpop.permute.xlu0 %1197  ;;  %v8101_v19 = vpop.permute.xlu1 %1189 }
 0x1f8   : > { %11421 = vst [vmem:[#allocation103_spill] sm:$0xff] %v8099_v33  ;;  %11422 = vst [vmem:[#allocation104_spill] sm:$0xff] %v8101_v19 }
 0x1f9   : > { %1779 = vrot.lane.b32.xlu0 %v1722_v23, %s7122_s12  ;;  %1427 = vrot.lane.b32.xlu1 %v1345_v20, %s7120_s10  ;;  %v1728_v23 = vmul.f32 %v7467_v63, %v7268_v25  ;;  %v1723_v20 = vmul.f32 %v7511_v41, %v7274_v27 }
 0x1fb   : > { %v8109_v21 = vpop.permute.xlu0 %1201  ;;  %v8111_v28 = vpop.permute.xlu1 %1195 }
 0x1fc   : > { %11423 = vst [vmem:[#allocation105_spill] sm:$0xff] %v8109_v21  ;;  %11424 = vst [vmem:[#allocation106_spill] sm:$0xff] %v8111_v28 }
 0x1fd   : > { %1783 = vrot.lane.b32.xlu0 %v1724_v0, %s7122_s12  ;;  %1777 = vrot.lane.b32.xlu1 %v1721_v3, %s7122_s12  ;;  %v1730_v0 = vmul.f32 %v7467_v63, %v7274_v27  ;;  %v1725_v3 = vmul.f32 %v7511_v41, %v7292_v38 }
 0x1ff   : > { %v8119_v33 = vpop.permute.xlu0 %1606  ;;  %v8121_v30 = vpop.permute.xlu1 %1199 }
 0x200   : > { %11425 = vst [vmem:[#allocation107_spill] sm:$0xff] %v8121_v30 }
 0x201   : > { %1791 = vrot.lane.b32.xlu0 %v1728_v23, %s7122_s12  ;;  %1781 = vrot.lane.b32.xlu1 %v1723_v20, %s7122_s12  ;;  %v1732_v23 = vmul.f32 %v7467_v63, %v7292_v38  ;;  %v1729_v20 = vmul.f32 %v7467_v63, %v7265_v24 }
 0x203   : > { %v8129_v21 = vpop.permute.xlu0 %1610  ;;  %v8131_v28 = vpop.permute.xlu1 %1604 }
 0x205   : > { %1795 = vrot.lane.b32.xlu0 %v1730_v0, %s7122_s12  ;;  %1785 = vrot.lane.b32.xlu1 %v1725_v3, %s7122_s12  ;;  %v1144_v0 = vmul.f32 %v7437_v46, %v7289_v37  ;;  %v1731_v3 = vmul.f32 %v7467_v63, %v7271_v26  ;;  %v363_v46 = vmul.f32 %v7302_v42, %v7268_v25 }
 0x207   : > { %v8139_v30 = vpop.permute.xlu0 %1618  ;;  %v8141_v19 = vpop.permute.xlu1 %1608 }
 0x208   : > { %11426 = vst [vmem:[#allocation108_spill] sm:$0xff] %v8139_v30  ;;  %v1546_v30 = vmul.f32 %v7447_v52, %v7289_v37  ;;  %v1332_v52 = vmul.f32 %v7429_v40, %v8075_v11 }
 0x209   : > { %1799 = vrot.lane.b32.xlu0 %v1732_v23, %s7122_s12  ;;  %1793 = vrot.lane.b32.xlu1 %v1729_v20, %s7122_s12  ;;  %v1540_v23 = vmul.f32 %v7441_v47, %v8075_v11  ;;  %v1138_v20 = vmul.f32 %v7427_v35, %v7289_v37  ;;  %v364_v35 = vmul.f32 %v7302_v42, %v7265_v24 }
 0x20b   : > { %v8149_v18 = vpop.permute.xlu0 %1622  ;;  %v8151_v15 = vpop.permute.xlu1 %1612 }
 0x20c   : > { %11427 = vst [vmem:[#allocation109_spill] sm:$0xff] %v8149_v18  ;;  %11428 = vst [vmem:[#allocation110_spill] sm:$0xff] %v8151_v15 }
 0x20d   : > { %1203 = vrot.lane.b32.xlu0 %v1144_v0, %s7119_s9  ;;  %1797 = vrot.lane.b32.xlu1 %v1731_v3, %s7122_s12 }
 0x20f   : > { %v8159_v38 = vpop.permute.xlu0 %1626  ;;  %v8161_v34 = vpop.permute.xlu1 %1620 }
 0x210   : > { %11429 = vst [vmem:[#allocation111_spill] sm:$0xff] %v8159_v38  ;;  %11430 = vst [vmem:[#allocation112_spill] sm:$0xff] %v8161_v34  ;;  %v1539_v38 = vmul.f32 %v7441_v47, %v7289_v37  ;;  %v1325_v47 = vmul.f32 %v7459_v58, %v8075_v11  ;;  %v358_v34 = vmul.f32 %v7519_v49, %v7265_v24 }
 0x211   : > { %1616 = vrot.lane.b32.xlu0 %v1540_v23, %s7121_s11  ;;  %1191 = vrot.lane.b32.xlu1 %v1138_v20, %s7119_s9  ;;  %v365_v23 = vmul.f32 %v7302_v42, %v7274_v27  ;;  %v366_v20 = vmul.f32 %v7302_v42, %v7271_v26 }
 0x213   : > { %v8171_v0 = vpop.permute.xlu0 %660  ;;  %v8173_v3 = vpop.permute.xlu1 %1624  ;;  %v390_v42 = vadd.f32 %v366_v20, %v7286_v36  ;;  %v1324_v20 = vmul.f32 %v7459_v58, %v7289_v37 }
 0x214   : > { %11431 = vst [vmem:[#allocation113_spill] sm:$0xff] %v8171_v0  ;;  %11432 = vst [vmem:[#allocation114_spill] sm:$0xff] %v8173_v3  ;;  %v387_v0 = vadd.f32 %v363_v46, %v7286_v36  ;;  %v360_v46 = vmul.f32 %v7519_v49, %v7271_v26 }
 0x215   : > { %1630 = vrot.lane.b32.xlu0 %v1547_v8, %s7121_s11  ;;  %1614 = vrot.lane.b32.xlu1 %v1539_v38, %s7121_s11  ;;  %v357_v8 = vmul.f32 %v7519_v49, %v7268_v25  ;;  %v359_v38 = vmul.f32 %v7519_v49, %v7274_v27  ;;  %v1331_v27 = vmul.f32 %v7429_v40, %v7289_v37 }
 0x216   : > { %v8215_v49 = vmul.f32 %v7455_v56, %v8075_v11  ;;  %v8233_v40 = vmul.f32 %v7467_v63, %v7289_v37  ;;  %v384_v58 = vadd.f32 %v360_v46, %v7276_v29  ;;  %v1747_v46 = vmul.f32 %v7485_v13, %v7289_v37 }
 0x217   : > { %v8188_v3 = vpop.permute.xlu0 %1046  ;;  %v8190_v18 = vpop.permute.xlu1 %648 }
 0x218   : > { %11433 = vst [vmem:[#allocation115_spill] sm:$0xff] %v8188_v3  ;;  %11434 = vst [vmem:[#allocation116_spill] sm:$0xff] %v8190_v18  ;;  %v388_v18 = vadd.f32 %v364_v35, %v7286_v36  ;;  %v389_v3 = vadd.f32 %v365_v23, %v7286_v36  ;;  %v382_v36 = vadd.f32 %v358_v34, %v7276_v29 }
 0x219   : > { %1387 = vrot.lane.b32.xlu0 %v1325_v47, %s7120_s10  ;;  %1628 = vrot.lane.b32.xlu1 %v1546_v30, %s7121_s11  ;;  %v8225_v30 = vmul.f32 %v7455_v56, %v7289_v37  ;;  %v8229_v47 = vmul.f32 %v7467_v63, %v8075_v11  ;;  %v516_v56 = vsel %vm505_vm0, %v7567_v60, %v7577_v51 }
 0x21a   : > { %v1741_v63 = vmul.f32 %v7473_v5, %v8075_v11  ;;  %v1740_v34 = vmul.f32 %v7473_v5, %v7289_v37  ;;  %v1748_v60 = vmul.f32 %v7485_v13, %v8075_v11  ;;  %v521_v5 = vsel %vm505_vm0, %v7597_v1, %v7585_v32 }
 0x21b   : > { %v8217_v35 = vpop.permute.xlu0 %1377  ;;  %v8219_v23 = vpop.permute.xlu1 %1034  ;;  %v8281_v1 = vmul.f32 %v7511_v41, %v8075_v11 }
 0x21c   : > { %11435 = vst [vmem:[#allocation117_spill] sm:$0xff] %v8217_v35  ;;  %11436 = vst [vmem:[#allocation118_spill] sm:$0xff] %v8219_v23  ;;  %v381_v35 = vadd.f32 %v357_v8, %v7276_v29  ;;  %v383_v23 = vadd.f32 %v359_v38, %v7276_v29  ;;  %v517_v8 = vsel %vm505_vm0, %v7577_v51, %v7565_v55 }
 0x21d   : > { %1401 = vrot.lane.b32.xlu0 %v1332_v52, %s7120_s10  ;;  %1385 = vrot.lane.b32.xlu1 %v1324_v20, %s7120_s10  ;;  %v518_v38 = vsel %vm505_vm0, %v7565_v55, %v7587_v44  ;;  %v519_v52 = vsel %vm505_vm0, %v7587_v44, %v7575_v9  ;;  %v8270_v55 = vmul.f32 %v7499_v31, %v8075_v11 }
 0x21e   : > { %v8274_v29 = vmul.f32 %v7499_v31, %v7289_v37  ;;  %v562_v13 = vadd.f32 %v516_v56, %v381_v35  ;;  %v522_v44 = vsel %vm505_vm0, %v7585_v32, %v7607_v48  ;;  %v8285_v9 = vmul.f32 %v7511_v41, %v7289_v37  ;;  %v11439_v56 = vld [vmem:[#allocation25_spill] sm:$0xff] }
 0x21f   : > { %v8264_v20 = vpop.permute.xlu0 %1381  ;;  %v8266_v51 = vpop.permute.xlu1 %1375  ;;  %v523_v31 = vsel %vm505_vm0, %v7607_v48, %v7595_v4  ;;  %v565_v32 = vadd.f32 %v519_v52, %v384_v58  ;;  %v568_v35 = vadd.f32 %v521_v5, %v387_v0  ;;  %v524_v11 = vsel %vm505_vm0, %v7595_v4, %v7617_v16  ;;  %v11442_v5 = vld [vmem:[#allocation35_spill] sm:$0xff] }
 0x220   : > { %11437 = vst [vmem:[#allocation119_spill] sm:$0xff] %v8264_v20  ;;  %11438 = vst [vmem:[#allocation120_spill] sm:$0xff] %v8266_v51  ;;  %v563_v20 = vadd.f32 %v517_v8, %v382_v36  ;;  %v564_v51 = vadd.f32 %v518_v38, %v383_v23  ;;  %v697_v36 = vsel %vm686_vm1, %v7605_v45, %v7627_v6 }
 0x221   : > { %1817 = vrot.lane.b32.xlu0 %v1741_v63, %s7122_s12  ;;  %1399 = vrot.lane.b32.xlu1 %v1331_v27, %s7120_s10  ;;  %v569_v41 = vadd.f32 %v522_v44, %v388_v18  ;;  %v698_v48 = vsel %vm686_vm1, %v7627_v6, %v7615_v22  ;;  %v699_v23 = vsel %vm686_vm1, %v7615_v22, %v7637_v53  ;;  %v11440_v18 = vld [vmem:[#allocation28_spill] sm:$0xff]  ;;  %v11441_v63 = vld [vmem:[#allocation26_spill] sm:$0xff] }
 0x222   : > { %v700_v27 = vsel %vm686_vm1, %v7637_v53, %v7625_v17  ;;  %v570_v58 = vadd.f32 %v523_v31, %v389_v3  ;;  %v702_v45 = vsel %vm686_vm1, %v7647_v39, %v11439_v56  ;;  %v703_v6 = vsel %vm686_vm1, %v11439_v56, %v11440_v18  ;;  %v11443_v44 = vld [vmem:[#allocation30_spill] sm:$0xff] }
 0x223   : > { %v8307_v0 = vpop.permute.xlu0 %1389  ;;  %v8309_v4 = vpop.permute.xlu1 %1379  ;;  %v704_v22 = vsel %vm686_vm1, %v11440_v18, %v11441_v63  ;;  %v571_v8 = vadd.f32 %v524_v11, %v390_v42  ;;  %v743_v38 = vadd.f32 %v697_v36, %v562_v13  ;;  %v705_v53 = vsel %vm686_vm1, %v11441_v63, %v7667_v61  ;;  %v11444_v13 = vld [vmem:[#allocation32_spill] sm:$0xff] }
 0x224   : > { %v744_v39 = vadd.f32 %v698_v48, %v563_v20  ;;  %v745_v3 = vadd.f32 %v699_v23, %v564_v51  ;;  %v746_v52 = vadd.f32 %v700_v27, %v565_v32  ;;  %v878_v31 = vsel %vm867_vm2, %v11443_v44, %v11442_v5  ;;  %v11446_v51 = vld [vmem:[#allocation34_spill] sm:$0xff]  ;;  %v11449_v27 = vld [vmem:[#allocation41_spill] sm:$0xff] }
 0x225   : > { %1831 = vrot.lane.b32.xlu0 %v1748_v60, %s7122_s12  ;;  %1815 = vrot.lane.b32.xlu1 %v1740_v34, %s7122_s12  ;;  %v749_v56 = vadd.f32 %v702_v45, %v568_v35  ;;  %v750_v18 = vadd.f32 %v703_v6, %v569_v41  ;;  %v751_v42 = vadd.f32 %v704_v22, %v570_v58  ;;  %v11445_v34 = vld [vmem:[#allocation37_spill] sm:$0xff]  ;;  %v11447_v35 = vld [vmem:[#allocation36_spill] sm:$0xff]  ;;  %v11448_v41 = vld [vmem:[#allocation39_spill] sm:$0xff] }
 0x226   : > { %v879_v11 = vsel %vm867_vm2, %v11442_v5, %v11444_v13  ;;  %v752_v60 = vadd.f32 %v705_v53, %v571_v8  ;;  %v880_v20 = vsel %vm867_vm2, %v11444_v13, %v11445_v34  ;;  %v881_v32 = vsel %vm867_vm2, %v11445_v34, %v11446_v51  ;;  %v11450_v45 = vld [vmem:[#allocation38_spill] sm:$0xff]  ;;  %v11451_v8 = vld [vmem:[#allocation43_spill] sm:$0xff] }
 0x227   : > { %v8331_v36 = vpop.permute.xlu0 %1393  ;;  %v8333_v63 = vpop.permute.xlu1 %1383  ;;  %v883_v48 = vsel %vm867_vm2, %v11448_v41, %v11447_v35  ;;  %v924_v23 = vadd.f32 %v878_v31, %v743_v38  ;;  %v884_v58 = vsel %vm867_vm2, %v11447_v35, %v11449_v27  ;;  %v885_v6 = vsel %vm867_vm2, %v11449_v27, %v11450_v45  ;;  %v11452_v34 = vld [vmem:[#allocation54_spill] sm:$0xff]  ;;  %v11453_v41 = vld [vmem:[#allocation52_spill] sm:$0xff] }
 0x228   : > { %v925_v22 = vadd.f32 %v879_v11, %v744_v39  ;;  %v886_v53 = vsel %vm867_vm2, %v11450_v45, %v11451_v8  ;;  %v1059_v38 = vsel %vm1048_vm3, %v7775_v43, %v7797_v54  ;;  %v1060_v5 = vsel %vm1048_vm3, %v7797_v54, %v7785_v2  ;;  %v11458_v27 = vld [vmem:[#allocation60_spill] sm:$0xff] }
 0x229   : > { %1588 = vrot.lane.b32.xlu0 %v8215_v49, %s7121_s11  ;;  %1829 = vrot.lane.b32.xlu1 %v1747_v46, %s7122_s12  ;;  %v926_v44 = vadd.f32 %v880_v20, %v745_v3  ;;  %v927_v31 = vadd.f32 %v881_v32, %v746_v52  ;;  %v930_v13 = vadd.f32 %v883_v48, %v749_v56  ;;  %v11456_v32 = vld [vmem:[#allocation58_spill] sm:$0xff] }
 0x22a   : > { %v1061_v49 = vsel %vm1048_vm3, %v7785_v2, %v11452_v34  ;;  %v931_v11 = vadd.f32 %v884_v58, %v750_v18  ;;  %v932_v35 = vadd.f32 %v885_v6, %v751_v42  ;;  %v1062_v43 = vsel %vm1048_vm3, %v11452_v34, %v11453_v41  ;;  %v11454_v18 = vld [vmem:[#allocation53_spill] sm:$0xff]  ;;  %v11455_v42 = vld [vmem:[#allocation56_spill] sm:$0xff] }
 0x22b   : > { %v8365_v46 = vpop.permute.xlu0 %1397  ;;  %v8367_v39 = vpop.permute.xlu1 %1391  ;;  %v1240_v54 = vsel %vm1229_vm4, %v7885_v10, %v7907_v59  ;;  %v933_v3 = vadd.f32 %v886_v53, %v752_v60  ;;  %v1105_v52 = vadd.f32 %v1059_v38, %v924_v23  ;;  %v1106_v56 = vadd.f32 %v1060_v5, %v925_v22  ;;  %v11457_v23 = vld [vmem:[#allocation55_spill] sm:$0xff] }
 0x22c   : > { %v1107_v2 = vadd.f32 %v1061_v49, %v926_v44  ;;  %v1064_v20 = vsel %vm1048_vm3, %v11455_v42, %v11454_v18  ;;  %v1065_v48 = vsel %vm1048_vm3, %v11454_v18, %v11456_v32  ;;  %v1444_v10 = vsel %vm1431_vm5, %v7995_v57, %v8017_v14  ;;  %v11459_v53 = vld [vmem:[#allocation71_spill] sm:$0xff]  ;;  %v11461_v18 = vld [vmem:[#allocation74_spill] sm:$0xff]  ;;  %v11462_v42 = vld [vmem:[#allocation76_spill] sm:$0xff] }
 0x22d   : > { %1602 = vrot.lane.b32.xlu0 %v8270_v55, %s7121_s11  ;;  %1586 = vrot.lane.b32.xlu1 %v8225_v30, %s7121_s11  ;;  %v1108_v60 = vadd.f32 %v1062_v43, %v927_v31  ;;  %v1066_v55 = vsel %vm1048_vm3, %v11456_v32, %v11457_v23  ;;  %v1067_v30 = vsel %vm1048_vm3, %v11457_v23, %v11458_v27  ;;  %v11467_v23 = vld [vmem:[#allocation92_spill] sm:$0xff]  ;;  %v11516_v27 = vld [vmem:[#allocation51_spill] sm:$0xff] }
 0x22e   : > { %v1286_v58 = vadd.f32 %v1240_v54, %v1105_v52  ;;  %v1241_v22 = vsel %vm1229_vm4, %v7907_v59, %v7895_v62  ;;  %v1242_v57 = vsel %vm1229_vm4, %v7895_v62, %v7917_v12  ;;  %v1243_v38 = vsel %vm1229_vm4, %v7917_v12, %v11459_v53  ;;  %v11460_v52 = vld [vmem:[#allocation72_spill] sm:$0xff] }
 0x22f   : > { %v1808_v45 = vpop.permute.xlu0 %1807  ;;  %v8394_v6 = vpop.permute.xlu1 %1395  ;;  %v1645_v5 = vsel %vm1632_vm6, %v8131_v28, %v8119_v33  ;;  %v1111_v44 = vadd.f32 %v1064_v20, %v930_v13  ;;  %v1112_v31 = vadd.f32 %v1065_v48, %v931_v11  ;;  %v1113_v59 = vadd.f32 %v1066_v55, %v932_v35 }
 0x230   : > { %v1492_v34 = vadd.f32 %v1444_v10, %v1286_v58  ;;  %v1114_v62 = vadd.f32 %v1067_v30, %v933_v3  ;;  %v1445_v12 = vsel %vm1431_vm5, %v8017_v14, %v8005_v50  ;;  %v1446_v28 = vsel %vm1431_vm5, %v8005_v50, %v8027_v7  ;;  %v11465_v10 = vld [vmem:[#allocation89_spill] sm:$0xff] }
 0x231   : > { %1789 = vrot.lane.b32.xlu0 %v8281_v1, %s7122_s12  ;;  %1600 = vrot.lane.b32.xlu1 %v8274_v29, %s7121_s11  ;;  %v1287_v13 = vadd.f32 %v1241_v22, %v1106_v56  ;;  %v1288_v49 = vadd.f32 %v1242_v57, %v1107_v2  ;;  %v1289_v11 = vadd.f32 %v1243_v38, %v1108_v60 }
 0x232   : > { %v1693_v43 = vadd.f32 %v1645_v5, %v1492_v34  ;;  %v1245_v29 = vsel %vm1229_vm4, %v11461_v18, %v11460_v52  ;;  %v1646_v35 = vsel %vm1632_vm6, %v8119_v33, %v8141_v19  ;;  %v1647_v14 = vsel %vm1632_vm6, %v8141_v19, %v8129_v21  ;;  %v11463_v33 = vld [vmem:[#allocation73_spill] sm:$0xff]  ;;  %v11464_v19 = vld [vmem:[#allocation78_spill] sm:$0xff]  ;;  %v11470_v18 = vld [vmem:[#allocation91_spill] sm:$0xff] }
 0x233   : > { %v1812_v54 = vpop.permute.xlu0 %1811  ;;  %v1806_v1 = vpop.permute.xlu1 %1805  ;;  %v1493_v3 = vadd.f32 %v1445_v12, %v1287_v13  ;;  %v1494_v56 = vadd.f32 %v1446_v28, %v1288_v49  ;;  %v1246_v20 = vsel %vm1229_vm4, %v11460_v52, %v11462_v42  ;;  %v1247_v32 = vsel %vm1229_vm4, %v11462_v42, %v11463_v33  ;;  %v11469_v52 = vld [vmem:[#allocation94_spill] sm:$0xff] }
 0x234   : > { %v1846_v50 = vsel %vm1833_vm7, %v1806_v1, %v1808_v45  ;;  %v1248_v48 = vsel %vm1229_vm4, %v11463_v33, %v11464_v19  ;;  %v1447_v60 = vsel %vm1431_vm5, %v8027_v7, %v11465_v10  ;;  %v1292_v38 = vadd.f32 %v1245_v29, %v1111_v44  ;;  %v11515_v10 = vld [vmem:[#allocation48_spill] sm:$0xff] }
 0x235   : > { %v1894_v2 = vadd.f32 %v1846_v50, %v1693_v43  ;;  %1803 = vrot.lane.b32.xlu0 %v8229_v47, %s7122_s12  ;;  %1787 = vrot.lane.b32.xlu1 %v8285_v9, %s7122_s12  ;;  %v11466_v47 = vld [vmem:[#allocation90_spill] sm:$0xff]  ;;  %v1694_v55 = vadd.f32 %v1646_v35, %v1493_v3  ;;  %v1695_v30 = vadd.f32 %v1647_v14, %v1494_v56  ;;  %v11476_v50 = vld [vmem:[#allocation108_spill] sm:$0xff]  ;;  %v11477_v56 = vld [vmem:[#allocation109_spill] sm:$0xff] }
 0x236   : > { %v1450_v9 = vsel %vm1431_vm5, %v11467_v23, %v11466_v47  ;;  %v1648_v5 = vsel %vm1632_vm6, %v8129_v21, %v8151_v15  ;;  %v1293_v7 = vadd.f32 %v1246_v20, %v1112_v31  ;;  %v1495_v28 = vadd.f32 %v1447_v60, %v1289_v11  ;;  %v11514_v15 = vld [vmem:[#allocation50_spill] sm:$0xff] }
 0x237   : > { %v8447_v58 = vmax.f32 %v1894_v2, 0.0  ;;  %v1820_v22 = vpop.permute.xlu0 %1819  ;;  %v1810_v57 = vpop.permute.xlu1 %1809  ;;  %v1294_v43 = vadd.f32 %v1247_v32, %v1113_v59  ;;  %v1295_v1 = vadd.f32 %v1248_v48, %v1114_v62  ;;  %v1498_v44 = vadd.f32 %v1450_v9, %v1292_v38  ;;  %v11475_v62 = vld [vmem:[#allocation112_spill] sm:$0xff]  ;;  %v11481_v38 = vld [vmem:[#allocation111_spill] sm:$0xff] }
 0x238   : > { %v1847_v34 = vsel %vm1833_vm7, %v1808_v45, %v1810_v57  ;;  %v1848_v12 = vsel %vm1833_vm7, %v1810_v57, %v1812_v54  ;;  %v1451_v21 = vsel %vm1431_vm5, %v11466_v47, %v11469_v52  ;;  %v1452_v45 = vsel %vm1431_vm5, %v11469_v52, %v11470_v18 }
 0x239   : > { %11468 = vst [vmem:[#allocation25_spill] sm:$0xff] %v8447_v58  ;;  %1943 = vst [vmem:[#allocation2 + $0x60] sm:$0xff] %v8447_v58  ;;  %v1895_v13 = vadd.f32 %v1847_v34, %v1694_v55  ;;  %v1896_v49 = vadd.f32 %v1848_v12, %v1695_v30  ;;  %1801 = vrot.lane.b32.xlu1 %v8233_v40, %s7122_s12  ;;  %v1696_v31 = vadd.f32 %v1648_v5, %v1495_v28  ;;  %v11474_v40 = vld [vmem:[#allocation96_spill] sm:$0xff] }
 0x23a   : > { %v1453_v59 = vsel %vm1431_vm5, %v11470_v18, %v11474_v40  ;;  %v1651_v3 = vsel %vm1632_vm6, %v11476_v50, %v11475_v62  ;;  %v1652_v2 = vsel %vm1632_vm6, %v11475_v62, %v11477_v56  ;;  %v1499_v20 = vadd.f32 %v1451_v21, %v1293_v7  ;;  %v11509_v40 = vld [vmem:[#allocation42_spill] sm:$0xff] }
 0x23b   : > { %v8463_v11 = vmax.f32 %v1895_v13, 0.0  ;;  %v8465_v29 = vmax.f32 %v1896_v49, 0.0  ;;  %v1824_v35 = vpop.permute.xlu0 %1823  ;;  %v8467_v14 = vpop.permute.xlu1 %1813  ;;  %v1500_v48 = vadd.f32 %v1452_v45, %v1294_v43  ;;  %v1501_v60 = vadd.f32 %v1453_v59, %v1295_v1 }
 0x23c   : > { %11473 = vst [vmem:[#allocation35_spill] sm:$0xff] %v8467_v14  ;;  %v1849_v42 = vsel %vm1833_vm7, %v1812_v54, %v8467_v14  ;;  %v1699_v47 = vadd.f32 %v1651_v3, %v1498_v44  ;;  %v1700_v23 = vadd.f32 %v1652_v2, %v1499_v20  ;;  %v11480_v54 = vld [vmem:[#allocation114_spill] sm:$0xff]  ;;  %v11503_v14 = vld [vmem:[#allocation31_spill] sm:$0xff] }
 0x23d   : > { %11471 = vst [vmem:[#allocation28_spill] sm:$0xff] %v8463_v11  ;;  %11472 = vst [vmem:[#allocation26_spill] sm:$0xff] %v8465_v29  ;;  %v1897_v33 = vadd.f32 %v1849_v42, %v1696_v31  ;;  %v8484_v32 = vpack.c.bf16 %v8463_v11, %v8447_v58  ;;  %v1653_v57 = vsel %vm1632_vm6, %v11477_v56, %v11480_v54 }
 0x23e   : > { %1944 = vst [vmem:[#allocation2 + $0x68] sm:$0xff] %v8463_v11  ;;  %1945 = vst [vmem:[#allocation2 + $0x70] sm:$0xff] %v8465_v29  ;;  %v1654_v5 = vsel %vm1632_vm6, %v11480_v54, %v11481_v38  ;;  %v1701_v49 = vadd.f32 %v1653_v57, %v1500_v48  ;;  %v11491_v57 = vld [vmem:[#allocation15_spill] sm:$0xff]  ;;  %v11504_v38 = vld [vmem:[#allocation29_spill] sm:$0xff] }
 0x23f   : > { %v8486_v9 = vmax.f32 %v1897_v33, 0.0  ;;  %v8488_v55 = vpop.permute.xlu0 %1827  ;;  %v1822_v30 = vpop.permute.xlu1 %1821  ;;  %3318 = vrot.lane.b32.xlu1 %v8484_v32, %s7122_s12  ;;  %v1702_v43 = vadd.f32 %v1654_v5, %v1501_v60  ;;  %v345_v5 = vmul.f32 %v11491_v57, %v7268_v25  ;;  %v11496_v60 = vld [vmem:[#allocation13_spill] sm:$0xff] }
 0x240   : > { %11479 = vst [vmem:[#allocation32_spill] sm:$0xff] %v8488_v55  ;;  %v1852_v34 = vsel %vm1833_vm7, %v1820_v22, %v1822_v30  ;;  %v1853_v12 = vsel %vm1833_vm7, %v1822_v30, %v1824_v35 }
 0x241   : > { %11478 = vst [vmem:[#allocation30_spill] sm:$0xff] %v8486_v9  ;;  %1946 = vst [vmem:[#allocation2 + $0x78] sm:$0xff] %v8486_v9  ;;  %v1900_v7 = vadd.f32 %v1852_v34, %v1699_v47  ;;  %v1901_v28 = vadd.f32 %v1853_v12, %v1700_v23  ;;  %v8503_v13 = vpack.c.bf16 %v8486_v9, %v8465_v29  ;;  %v11500_v9 = vld [vmem:[#allocation21_spill] sm:$0xff] }
 0x242   : > { %v369_v58 = vadd.f32 %v345_v5, %v11496_v60 }
 0x243   : > { %v8505_v1 = vmax.f32 %v1900_v7, 0.0  ;;  %v8507_v44 = vmax.f32 %v1901_v28, 0.0  ;;  %v8509_v52 = vpop.permute.xlu0 %841  ;;  %v1826_v21 = vpop.permute.xlu1 %1825  ;;  %3320 = vrot.lane.b32.xlu0 %v8503_v13, %s7122_s12  ;;  %v346_v7 = vmul.f32 %v11491_v57, %v7265_v24  ;;  %v11492_v28 = vld [vmem:[#allocation7_spill] sm:$0xff] }
 0x244   : > { %11484 = vst [vmem:[#allocation36_spill] sm:$0xff] %v8509_v52  ;;  %v1854_v22 = vsel %vm1833_vm7, %v1824_v35, %v1826_v21  ;;  %v1855_v18 = vsel %vm1833_vm7, %v1826_v21, %v8488_v55  ;;  %v11493_v21 = vld [vmem:[#allocation11_spill] sm:$0xff] }
 0x245   : > { %11482 = vst [vmem:[#allocation37_spill] sm:$0xff] %v8505_v1  ;;  %11483 = vst [vmem:[#allocation34_spill] sm:$0xff] %v8507_v44  ;;  %v1902_v45 = vadd.f32 %v1854_v22, %v1701_v49  ;;  %v1903_v31 = vadd.f32 %v1855_v18, %v1702_v43  ;;  %v8520_v59 = vpack.c.bf16 %v8507_v44, %v8505_v1  ;;  %v11501_v55 = vld [vmem:[#allocation27_spill] sm:$0xff] }
 0x246   : > { %1949 = vst [vmem:[#allocation2 + $0x90] sm:$0xff] %v8505_v1  ;;  %1950 = vst [vmem:[#allocation2 + $0x98] sm:$0xff] %v8507_v44  ;;  %v347_v49 = vmul.f32 %v11491_v57, %v11492_v28  ;;  %v348_v43 = vmul.f32 %v11491_v57, %v7271_v26  ;;  %v351_v22 = vmul.f32 %v11493_v21, %v7268_v25  ;;  %v11497_v1 = vld [vmem:[#allocation19_spill] sm:$0xff]  ;;  %v11498_v25 = vld [vmem:[#allocation14_spill] sm:$0xff] }
 0x247   : > { %11485 = vst [vmem:[#allocation39_spill] sm:$0xff] %v8520_v59  ;;  %v8522_v62 = vmax.f32 %v1902_v45, 0.0  ;;  %v8524_v50 = vmax.f32 %v1903_v31, 0.0  ;;  %v8526_v3 = vpop.permute.xlu0 %1227  ;;  %v8528_v35 = vpop.permute.xlu1 %829  ;;  %3324 = vrot.lane.b32.xlu1 %v8520_v59, %s7122_s12  ;;  %v352_v18 = vmul.f32 %v11493_v21, %v7265_v24  ;;  %v11494_v45 = vld [vmem:[#allocation18_spill] sm:$0xff]  ;;  %v11495_v31 = vld [vmem:[#allocation17_spill] sm:$0xff]  ;;  %v353_v2 = vmul.f32 %v11493_v21, %v11492_v28  ;;  %v11499_v28 = vld [vmem:[#allocation20_spill] sm:$0xff] }
 0x248   : > { %11488 = vst [vmem:[#allocation43_spill] sm:$0xff] %v8526_v3  ;;  %11489 = vst [vmem:[#allocation54_spill] sm:$0xff] %v8528_v35  ;;  %v506_v42 = vsel %vm505_vm0, %v11495_v31, %v11494_v45  ;;  %v354_v48 = vmul.f32 %v11493_v21, %v7271_v26  ;;  %v507_v11 = vsel %vm505_vm0, %v11494_v45, %v11497_v1 }
 0x249   : > { %11486 = vst [vmem:[#allocation41_spill] sm:$0xff] %v8522_v62  ;;  %11487 = vst [vmem:[#allocation38_spill] sm:$0xff] %v8524_v50  ;;  %v8536_v56 = vpack.c.bf16 %v8524_v50, %v8522_v62  ;;  %v375_v44 = vadd.f32 %v351_v22, %v11498_v25  ;;  %v376_v24 = vadd.f32 %v352_v18, %v11498_v25 }
 0x24a   : > { %1951 = vst [vmem:[#allocation2 + $0xa0] sm:$0xff] %v8522_v62  ;;  %1952 = vst [vmem:[#allocation2 + $0xa8] sm:$0xff] %v8524_v50  ;;  %v370_v31 = vadd.f32 %v346_v7, %v11496_v60  ;;  %v508_v26 = vsel %vm505_vm0, %v11497_v1, %v11499_v28  ;;  %v509_v5 = vsel %vm505_vm0, %v11499_v28, %v11500_v9  ;;  %v11502_v7 = vld [vmem:[#allocation23_spill] sm:$0xff] }
 0x24b   : > { %v8542_v20 = vpop.permute.xlu0 %1578  ;;  %v8544_v33 = vpop.permute.xlu1 %1215  ;;  %3326 = vrot.lane.b32.xlu0 %v8536_v56, %s7122_s12  ;;  %v377_v45 = vadd.f32 %v353_v2, %v11498_v25  ;;  %v550_v50 = vadd.f32 %v506_v42, %v369_v58  ;;  %v371_v22 = vadd.f32 %v347_v49, %v11496_v60  ;;  %v372_v18 = vadd.f32 %v348_v43, %v11496_v60  ;;  %v11505_v49 = vld [vmem:[#allocation33_spill] sm:$0xff]  ;;  %v11510_v9 = vld [vmem:[#allocation47_spill] sm:$0xff] }
 0x24c   : > { %11490 = vst [vmem:[#allocation52_spill] sm:$0xff] %v8544_v33  ;;  %v378_v59 = vadd.f32 %v354_v48, %v11498_v25  ;;  %v551_v52 = vadd.f32 %v507_v11, %v370_v31  ;;  %v511_v35 = vsel %vm505_vm0, %v11502_v7, %v11501_v55  ;;  %v512_v1 = vsel %vm505_vm0, %v11501_v55, %v11503_v14  ;;  %v11506_v48 = vld [vmem:[#allocation45_spill] sm:$0xff]  ;;  %v11507_v11 = vld [vmem:[#allocation40_spill] sm:$0xff]  ;;  %v11542_v33 = vld [vmem:[#allocation87_spill] sm:$0xff] }
 0x24d   : > { %v513_v2 = vsel %vm505_vm0, %v11503_v14, %v11504_v38  ;;  %v552_v58 = vadd.f32 %v508_v26, %v371_v22  ;;  %v553_v42 = vadd.f32 %v509_v5, %v372_v18  ;;  %v514_v43 = vsel %vm505_vm0, %v11504_v38, %v11505_v49  ;;  %v11511_v26 = vld [vmem:[#allocation44_spill] sm:$0xff]  ;;  %v11512_v5 = vld [vmem:[#allocation46_spill] sm:$0xff]  ;;  %v11513_v22 = vld [vmem:[#allocation49_spill] sm:$0xff] }
 0x24e   : > { %v687_v31 = vsel %vm686_vm1, %v11507_v11, %v11506_v48  ;;  %v688_v55 = vsel %vm686_vm1, %v11506_v48, %v11509_v40  ;;  %v689_v14 = vsel %vm686_vm1, %v11509_v40, %v11510_v9  ;;  %v690_v38 = vsel %vm686_vm1, %v11510_v9, %v11511_v26 }
 0x24f   : > { %v8552_v47 = vpop.permute.xlu0 %1582  ;;  %v8554_v23 = vpop.permute.xlu1 %1576  ;;  %v692_v18 = vsel %vm686_vm1, %v11513_v22, %v11512_v5  ;;  %v556_v11 = vadd.f32 %v511_v35, %v375_v44  ;;  %v558_v49 = vadd.f32 %v513_v2, %v377_v45  ;;  %v693_v19 = vsel %vm686_vm1, %v11512_v5, %v11514_v15  ;;  %v11521_v2 = vld [vmem:[#allocation61_spill] sm:$0xff]  ;;  %v11527_v5 = vld [vmem:[#allocation67_spill] sm:$0xff] }
 0x250   : > { %v559_v48 = vadd.f32 %v514_v43, %v378_v59  ;;  %v731_v3 = vadd.f32 %v687_v31, %v550_v50  ;;  %v694_v40 = vsel %vm686_vm1, %v11514_v15, %v11515_v10  ;;  %v695_v9 = vsel %vm686_vm1, %v11515_v10, %v11516_v27  ;;  %v11520_v59 = vld [vmem:[#allocation59_spill] sm:$0xff]  ;;  %v11522_v43 = vld [vmem:[#allocation66_spill] sm:$0xff]  ;;  %v11534_v27 = vld [vmem:[#allocation84_spill] sm:$0xff] }
 0x251   : > { %v732_v26 = vadd.f32 %v688_v55, %v551_v52  ;;  %v733_v53 = vadd.f32 %v689_v14, %v552_v58  ;;  %v734_v22 = vadd.f32 %v690_v38, %v553_v42  ;;  %v737_v44 = vadd.f32 %v692_v18, %v556_v11  ;;  %v11523_v42 = vld [vmem:[#allocation63_spill] sm:$0xff]  ;;  %v11524_v55 = vld [vmem:[#allocation65_spill] sm:$0xff]  ;;  %v11528_v11 = vld [vmem:[#allocation70_spill] sm:$0xff] }
 0x252   : > { %v870_v10 = vsel %vm867_vm2, %v11521_v2, %v11522_v43  ;;  %v739_v52 = vadd.f32 %v694_v40, %v558_v49  ;;  %v740_v58 = vadd.f32 %v695_v9, %v559_v48  ;;  %v871_v31 = vsel %vm867_vm2, %v11522_v43, %v11523_v42  ;;  %v11526_v14 = vld [vmem:[#allocation69_spill] sm:$0xff]  ;;  %v11529_v48 = vld [vmem:[#allocation82_spill] sm:$0xff]  ;;  %v11531_v43 = vld [vmem:[#allocation79_spill] sm:$0xff] }
 0x253   : > { %v8556_v30 = vpop.permute.xlu0 %1590  ;;  %v8558_v54 = vpop.permute.xlu1 %1580  ;;  %v874_v38 = vsel %vm867_vm2, %v11524_v55, %v11526_v14  ;;  %v875_v18 = vsel %vm867_vm2, %v11526_v14, %v11527_v5  ;;  %v876_v49 = vsel %vm867_vm2, %v11527_v5, %v11528_v11  ;;  %v11530_v40 = vld [vmem:[#allocation77_spill] sm:$0xff]  ;;  %v915_v14 = vadd.f32 %v871_v31, %v734_v22  ;;  %v11539_v22 = vld [vmem:[#allocation86_spill] sm:$0xff] }
 0x254   : > { %v1049_v9 = vsel %vm1048_vm3, %v11530_v40, %v11529_v48  ;;  %v1051_v5 = vsel %vm1048_vm3, %v11531_v43, %v11534_v27  ;;  %v11535_v11 = vld [vmem:[#allocation97_spill] sm:$0xff] }
 0x255   : > { %v11540_v31 = vld [vmem:[#allocation117_spill] sm:$0xff] }
 0x257   : > { %v8562_v34 = vpop.permute.xlu0 %1594  ;;  %v8564_v12 = vpop.permute.xlu1 %1584 }
 0x25b   : > { %v8589_v29 = vpop.permute.xlu0 %1598  ;;  %v8591_v62 = vpop.permute.xlu1 %1592 }
 0x25f   : > { %v8619_v28 = vpop.permute.xlu0 %1022  ;;  %v8621_v7 = vpop.permute.xlu1 %1596 }
 0x260   : > { %11508 = vst [vmem:[#allocation53_spill] sm:$0xff] %v8619_v28  ;;  %v557_v28 = vadd.f32 %v512_v1, %v376_v24  ;;  %v11519_v1 = vld [vmem:[#allocation64_spill] sm:$0xff] }
 0x261   : > { %v868_v50 = vsel %vm867_vm2, %v11520_v59, %v11519_v1  ;;  %v869_v15 = vsel %vm867_vm2, %v11519_v1, %v11521_v2  ;;  %v914_v2 = vadd.f32 %v870_v10, %v733_v53  ;;  %v920_v53 = vadd.f32 %v875_v18, %v739_v52  ;;  %v11544_v18 = vld [vmem:[#allocation88_spill] sm:$0xff] }
 0x262   : > { %v738_v45 = vadd.f32 %v693_v19, %v557_v28  ;;  %v11525_v19 = vld [vmem:[#allocation68_spill] sm:$0xff]  ;;  %v912_v1 = vadd.f32 %v868_v50, %v731_v3  ;;  %v913_v59 = vadd.f32 %v869_v15, %v732_v26  ;;  %v921_v50 = vadd.f32 %v876_v49, %v740_v58 }
 0x263   : > { %v8644_v35 = vpop.permute.xlu0 %1415  ;;  %v8646_v24 = vpop.permute.xlu1 %1010  ;;  %v873_v28 = vsel %vm867_vm2, %v11525_v19, %v11524_v55  ;;  %v1050_v19 = vsel %vm1048_vm3, %v11529_v48, %v11531_v43  ;;  %v11537_v48 = vld [vmem:[#allocation81_spill] sm:$0xff] }
 0x264   : > { %11517 = vst [vmem:[#allocation56_spill] sm:$0xff] %v8644_v35  ;;  %11518 = vst [vmem:[#allocation58_spill] sm:$0xff] %v8646_v24  ;;  %v918_v42 = vadd.f32 %v873_v28, %v737_v44  ;;  %v11536_v35 = vld [vmem:[#allocation100_spill] sm:$0xff]  ;;  %v919_v26 = vadd.f32 %v874_v38, %v738_v45  ;;  %v1093_v15 = vadd.f32 %v1049_v9, %v912_v1  ;;  %v11543_v45 = vld [vmem:[#allocation85_spill] sm:$0xff] }
 0x265   : > { %v1230_v3 = vsel %vm1229_vm4, %v11536_v35, %v11535_v11  ;;  %v1094_v10 = vadd.f32 %v1050_v19, %v913_v59  ;;  %v1052_v40 = vsel %vm1048_vm3, %v11534_v27, %v11537_v48  ;;  %v11541_v28 = vld [vmem:[#allocation120_spill] sm:$0xff]  ;;  %v1056_v52 = vsel %vm1048_vm3, %v11542_v33, %v11543_v45  ;;  %v11545_v9 = vld [vmem:[#allocation102_spill] sm:$0xff]  ;;  %v11546_v59 = vld [vmem:[#allocation99_spill] sm:$0xff] }
 0x266   : > { %v1432_v43 = vsel %vm1431_vm5, %v11541_v28, %v11540_v31  ;;  %v1274_v58 = vadd.f32 %v1230_v3, %v1093_v15  ;;  %v1057_v49 = vsel %vm1048_vm3, %v11543_v45, %v11544_v18  ;;  %v1231_v1 = vsel %vm1229_vm4, %v11535_v11, %v11545_v9  ;;  %v11548_v45 = vld [vmem:[#allocation119_spill] sm:$0xff] }
 0x267   : > { %v8678_v55 = vpop.permute.xlu0 %1429  ;;  %v8680_v24 = vpop.permute.xlu1 %1413  ;;  %v1096_v19 = vadd.f32 %v1052_v40, %v915_v14  ;;  %v1101_v28 = vadd.f32 %v1056_v52, %v920_v53  ;;  %v1433_v11 = vsel %vm1431_vm5, %v11540_v31, %v8309_v4  ;;  %v1102_v18 = vadd.f32 %v1057_v49, %v921_v50  ;;  %v11551_v52 = vld [vmem:[#allocation103_spill] sm:$0xff] }
 0x268   : > { %11532 = vst [vmem:[#allocation55_spill] sm:$0xff] %v8678_v55  ;;  %11533 = vst [vmem:[#allocation72_spill] sm:$0xff] %v8680_v24  ;;  %v11538_v55 = vld [vmem:[#allocation83_spill] sm:$0xff]  ;;  %v1095_v24 = vadd.f32 %v1051_v5, %v914_v2  ;;  %v1232_v2 = vsel %vm1229_vm4, %v11545_v9, %v11546_v59  ;;  %v11547_v5 = vld [vmem:[#allocation104_spill] sm:$0xff]  ;;  %v1480_v15 = vadd.f32 %v1432_v43, %v1274_v58 }
 0x269   : > { %v1054_v44 = vsel %vm1048_vm3, %v11539_v22, %v11538_v55  ;;  %v1055_v35 = vsel %vm1048_vm3, %v11538_v55, %v11542_v33  ;;  %v1633_v33 = vsel %vm1632_vm6, %v8554_v23, %v8542_v20  ;;  %v1233_v3 = vsel %vm1229_vm4, %v11546_v59, %v11547_v5  ;;  %v11549_v43 = vld [vmem:[#allocation106_spill] sm:$0xff]  ;;  %v11552_v49 = vld [vmem:[#allocation107_spill] sm:$0xff] }
 0x26a   : > { %v1099_v55 = vadd.f32 %v1054_v44, %v918_v42  ;;  %v1100_v22 = vadd.f32 %v1055_v35, %v919_v26  ;;  %v1434_v9 = vsel %vm1431_vm5, %v8309_v4, %v11548_v45  ;;  %v1275_v48 = vadd.f32 %v1231_v1, %v1094_v10  ;;  %v11550_v35 = vld [vmem:[#allocation101_spill] sm:$0xff] }
 0x26b   : > { %v1780_v38 = vpop.permute.xlu0 %1779  ;;  %v8703_v27 = vpop.permute.xlu1 %1427  ;;  %v1276_v23 = vadd.f32 %v1232_v2, %v1095_v24  ;;  %v1681_v14 = vadd.f32 %v1633_v33, %v1480_v15  ;;  %v1277_v44 = vadd.f32 %v1233_v3, %v1096_v19  ;;  %v1634_v26 = vsel %vm1632_vm6, %v8542_v20, %v8558_v54  ;;  %v11553_v1 = vld [vmem:[#allocation105_spill] sm:$0xff] }
 0x26c   : > { %v1635_v53 = vsel %vm1632_vm6, %v8558_v54, %v8552_v47  ;;  %v1235_v4 = vsel %vm1229_vm4, %v11550_v35, %v11549_v43  ;;  %v1481_v50 = vadd.f32 %v1433_v11, %v1275_v48  ;;  %v1236_v58 = vsel %vm1229_vm4, %v11549_v43, %v11551_v52 }
 0x26d   : > { %v1482_v24 = vadd.f32 %v1434_v9, %v1276_v23  ;;  %v1237_v20 = vsel %vm1229_vm4, %v11551_v52, %v11552_v49  ;;  %v1238_v54 = vsel %vm1229_vm4, %v11552_v49, %v11553_v1  ;;  %v1435_v59 = vsel %vm1431_vm5, %v11548_v45, %v8333_v63 }
 0x26e   : > { %v1438_v48 = vsel %vm1431_vm5, %v8307_v0, %v8367_v39  ;;  %v1682_v2 = vadd.f32 %v1634_v26, %v1481_v50  ;;  %v1280_v11 = vadd.f32 %v1235_v4, %v1099_v55  ;;  %v1636_v9 = vsel %vm1632_vm6, %v8552_v47, %v8564_v12 }
 0x26f   : > { %v1784_v42 = vpop.permute.xlu0 %1783  ;;  %v1778_v40 = vpop.permute.xlu1 %1777  ;;  %v1683_v33 = vadd.f32 %v1635_v53, %v1482_v24  ;;  %v1281_v45 = vadd.f32 %v1236_v58, %v1100_v22  ;;  %v1282_v53 = vadd.f32 %v1237_v20, %v1101_v28  ;;  %v1439_v55 = vsel %vm1431_vm5, %v8367_v39, %v8331_v36 }
 0x270   : > { %v1834_v31 = vsel %vm1833_vm7, %v1778_v40, %v1780_v38  ;;  %v1483_v40 = vadd.f32 %v1435_v59, %v1277_v44  ;;  %v1486_v43 = vadd.f32 %v1438_v48, %v1280_v11  ;;  %v1440_v47 = vsel %vm1431_vm5, %v8331_v36, %v8394_v6 }
 0x271   : > { %v1882_v10 = vadd.f32 %v1834_v31, %v1681_v14  ;;  %v1283_v31 = vadd.f32 %v1238_v54, %v1102_v18  ;;  %v1441_v18 = vsel %vm1431_vm5, %v8394_v6, %v8365_v46  ;;  %v1639_v39 = vsel %vm1632_vm6, %v8556_v30, %v8591_v62 }
 0x272   : > { %v1640_v36 = vsel %vm1632_vm6, %v8591_v62, %v8562_v34  ;;  %v1487_v50 = vadd.f32 %v1439_v55, %v1281_v45  ;;  %v1687_v30 = vadd.f32 %v1639_v39, %v1486_v43  ;;  %v1642_v54 = vsel %vm1632_vm6, %v8621_v7, %v8589_v29 }
 0x273   : > { %v8751_v19 = vmax.f32 %v1882_v10, 0.0  ;;  %v1792_v3 = vpop.permute.xlu0 %1791  ;;  %v1782_v15 = vpop.permute.xlu1 %1781  ;;  %v1488_v10 = vadd.f32 %v1440_v47, %v1282_v53  ;;  %v1489_v52 = vadd.f32 %v1441_v18, %v1283_v31  ;;  %v11555_v18 = vld [vmem:[#allocation16_spill] sm:$0xff] }
 0x274   : > { %v1835_v23 = vsel %vm1833_vm7, %v1780_v38, %v1782_v15  ;;  %v1836_v14 = vsel %vm1833_vm7, %v1782_v15, %v1784_v42  ;;  %v1684_v38 = vadd.f32 %v1636_v9, %v1483_v40  ;;  %v1688_v58 = vadd.f32 %v1640_v36, %v1487_v50  ;;  %v11564_v47 = vld [vmem:[#allocation80_spill] sm:$0xff] }
 0x275   : > { %1930 = vst [vmem:[#allocation2] sm:$0xff] %v8751_v19  ;;  %v1883_v0 = vadd.f32 %v1835_v23, %v1682_v2  ;;  %v1884_v26 = vadd.f32 %v1836_v14, %v1683_v33  ;;  %v1690_v9 = vadd.f32 %v1642_v54, %v1489_v52  ;;  %v362_v36 = vmul.f32 %v11555_v18, %v7289_v37  ;;  %v11582_v52 = vld [vmem:[#allocation55_spill] sm:$0xff] }
 0x277   : > { %v8765_v35 = vmax.f32 %v1883_v0, 0.0  ;;  %v8767_v22 = vmax.f32 %v1884_v26, 0.0  ;;  %v1796_v44 = vpop.permute.xlu0 %1795  ;;  %v8769_v4 = vpop.permute.xlu1 %1785 }
 0x278   : > { %v1837_v28 = vsel %vm1833_vm7, %v1784_v42, %v8769_v4  ;;  %v1641_v42 = vsel %vm1632_vm6, %v8562_v34, %v8621_v7 }
 0x279   : > { %1931 = vst [vmem:[#allocation2 + $0x8] sm:$0xff] %v8765_v35  ;;  %1932 = vst [vmem:[#allocation2 + $0x10] sm:$0xff] %v8767_v22  ;;  %v1885_v24 = vadd.f32 %v1837_v28, %v1684_v38  ;;  %v8786_v6 = vpack.c.bf16 %v8765_v35, %v8751_v19  ;;  %v1689_v11 = vadd.f32 %v1641_v42, %v1488_v10  ;;  %v11558_v42 = vld [vmem:[#allocation8_spill] sm:$0xff] }
 0x27a   : > { %v11573_v10 = vld [vmem:[#allocation56_spill] sm:$0xff] }
 0x27b   : > { %v8788_v49 = vmax.f32 %v1885_v24, 0.0  ;;  %v8790_v62 = vpop.permute.xlu0 %1799  ;;  %v1794_v20 = vpop.permute.xlu1 %1793  ;;  %3306 = vrot.lane.b32.xlu1 %v8786_v6, %s7122_s12 }
 0x27c   : > { %v1840_v59 = vsel %vm1833_vm7, %v1792_v3, %v1794_v20  ;;  %v1841_v48 = vsel %vm1833_vm7, %v1794_v20, %v1796_v44 }
 0x27d   : > { %1933 = vst [vmem:[#allocation2 + $0x18] sm:$0xff] %v8788_v49  ;;  %v1888_v2 = vadd.f32 %v1840_v59, %v1687_v30  ;;  %v1889_v33 = vadd.f32 %v1841_v48, %v1688_v58  ;;  %v8805_v15 = vpack.c.bf16 %v8788_v49, %v8767_v22  ;;  %v11556_v30 = vld [vmem:[#allocation57_spill] sm:$0xff]  ;;  %v11557_v58 = vld [vmem:[#allocation24_spill] sm:$0xff]  ;;  %v386_v59 = vadd.f32 %v362_v36, %v11558_v42 }
 0x27e   : > { %v520_v20 = vsel %vm505_vm0, %v11557_v58, %v11556_v30  ;;  %v11559_v48 = vld [vmem:[#allocation12_spill] sm:$0xff] }
 0x27f   : > { %v8807_v23 = vmax.f32 %v1888_v2, 0.0  ;;  %v8809_v34 = vmax.f32 %v1889_v33, 0.0  ;;  %v8811_v14 = vpop.permute.xlu0 %1203  ;;  %v1798_v7 = vpop.permute.xlu1 %1797  ;;  %3308 = vrot.lane.b32.xlu0 %v8805_v15, %s7122_s12  ;;  %v368_v33 = vmul.f32 %v11559_v48, %v7289_v37 }
 0x280   : > { %v1842_v3 = vsel %vm1833_vm7, %v1796_v44, %v1798_v7  ;;  %v1843_v45 = vsel %vm1833_vm7, %v1798_v7, %v8790_v62  ;;  %v11554_v44 = vld [vmem:[#allocation10_spill] sm:$0xff] }
 0x281   : > { %1937 = vst [vmem:[#allocation2 + $0x30] sm:$0xff] %v8807_v23  ;;  %1938 = vst [vmem:[#allocation2 + $0x38] sm:$0xff] %v8809_v34  ;;  %v1890_v40 = vadd.f32 %v1842_v3, %v1689_v11  ;;  %v1891_v0 = vadd.f32 %v1843_v45, %v1690_v9  ;;  %v8822_v26 = vpack.c.bf16 %v8809_v34, %v8807_v23  ;;  %v11560_v11 = vld [vmem:[#allocation75_spill] sm:$0xff] }
 0x282   : > { %v361_v39 = vmul.f32 %v11555_v18, %v11554_v44  ;;  %v367_v2 = vmul.f32 %v11559_v48, %v11554_v44  ;;  %v701_v9 = vsel %vm686_vm1, %v7625_v17, %v11560_v11  ;;  %v567_v3 = vadd.f32 %v11556_v30, %v386_v59  ;;  %v11562_v30 = vld [vmem:[#allocation98_spill] sm:$0xff] }
 0x283   : > { %v8824_v53 = vmax.f32 %v1890_v40, 0.0  ;;  %v8826_v31 = vmax.f32 %v1891_v0, 0.0  ;;  %v8828_v55 = vpop.permute.xlu0 %1616  ;;  %v8830_v43 = vpop.permute.xlu1 %1191  ;;  %3312 = vrot.lane.b32.xlu1 %v8822_v26, %s7122_s12  ;;  %v355_v45 = vmul.f32 %v11493_v21, %v11554_v44  ;;  %v350_v18 = vmul.f32 %v11491_v57, %v7289_v37 }
 0x284   : > { %v385_v54 = vadd.f32 %v361_v39, %v11558_v42  ;;  %v11561_v39 = vld [vmem:[#allocation62_spill] sm:$0xff]  ;;  %v356_v17 = vmul.f32 %v11493_v21, %v7289_v37  ;;  %v882_v58 = vsel %vm867_vm2, %v11446_v51, %v11562_v30  ;;  %v748_v48 = vadd.f32 %v11560_v11, %v567_v3  ;;  %v11566_v3 = vld [vmem:[#allocation95_spill] sm:$0xff] }
 0x285   : > { %1939 = vst [vmem:[#allocation2 + $0x40] sm:$0xff] %v8824_v53  ;;  %1940 = vst [vmem:[#allocation2 + $0x48] sm:$0xff] %v8826_v31  ;;  %v8846_v28 = vpack.c.bf16 %v8826_v31, %v8824_v53  ;;  %v525_v36 = vsel %vm505_vm0, %v7617_v16, %v11561_v39  ;;  %v349_v38 = vmul.f32 %v11491_v57, %v11554_v44  ;;  %v11565_v21 = vld [vmem:[#allocation118_spill] sm:$0xff] }
 0x286   : > { %v566_v7 = vadd.f32 %v520_v20, %v385_v54  ;;  %v11563_v20 = vld [vmem:[#allocation9_spill] sm:$0xff]  ;;  %v706_v16 = vsel %vm686_vm1, %v7667_v61, %v11564_v47  ;;  %v8896_v37 = vadd.f32 %v355_v45, %v11498_v25  ;;  %v1063_v51 = vsel %vm1048_vm3, %v11453_v41, %v11565_v21  ;;  %v11567_v45 = vld [vmem:[#allocation52_spill] sm:$0xff] }
 0x287   : > { %v8848_v50 = vpop.permute.xlu0 %1630  ;;  %v1615_v24 = vpop.permute.xlu1 %1614  ;;  %3314 = vrot.lane.b32.xlu0 %v8846_v28, %s7122_s12  ;;  %2495 = vrot.lane.b32.xlu1 %v8503_v13, %s7117_s7  ;;  %v391_v42 = vadd.f32 %v367_v2, %v11563_v20  ;;  %v392_v54 = vadd.f32 %v368_v33, %v11563_v20  ;;  %v929_v11 = vadd.f32 %v11562_v30, %v748_v48  ;;  %v11572_v48 = vld [vmem:[#allocation89_spill] sm:$0xff] }
 0x288   : > { %v747_v59 = vadd.f32 %v701_v9, %v566_v7  ;;  %v374_v61 = vadd.f32 %v350_v18, %v11496_v60  ;;  %v8911_v44 = vadd.f32 %v356_v17, %v11498_v25  ;;  %v887_v41 = vsel %vm867_vm2, %v11451_v8, %v11566_v3  ;;  %v11569_v18 = vld [vmem:[#allocation115_spill] sm:$0xff]  ;;  %v11571_v17 = vld [vmem:[#allocation72_spill] sm:$0xff] }
 0x289   : > { %v572_v2 = vadd.f32 %v525_v36, %v391_v42  ;;  %v573_v33 = vadd.f32 %v11561_v39, %v392_v54  ;;  %v11568_v39 = vld [vmem:[#allocation71_spill] sm:$0xff]  ;;  %v1110_v42 = vadd.f32 %v11565_v21, %v929_v11  ;;  %v373_v54 = vadd.f32 %v349_v38, %v11496_v60  ;;  %v11574_v38 = vld [vmem:[#allocation22_spill] sm:$0xff] }
 0x28a   : > { %v928_v9 = vadd.f32 %v882_v58, %v747_v59  ;;  %v1244_v36 = vsel %vm1229_vm4, %v11568_v39, %v11567_v45  ;;  %v11570_v59 = vld [vmem:[#allocation60_spill] sm:$0xff]  ;;  %v1448_v8 = vsel %vm1431_vm5, %v11572_v48, %v11571_v17  ;;  %v1449_v39 = vsel %vm1431_vm5, %v11571_v17, %v11573_v10  ;;  %v11576_v11 = vld [vmem:[#allocation78_spill] sm:$0xff] }
 0x28b   : > { %v8873_v40 = vpop.permute.xlu0 %1387  ;;  %v1629_v0 = vpop.permute.xlu1 %1628  ;;  %2501 = vrot.lane.b32.xlu1 %v8536_v56, %s7117_s7  ;;  %v753_v30 = vadd.f32 %v706_v16, %v572_v2  ;;  %v754_v58 = vadd.f32 %v11564_v47, %v573_v33  ;;  %v1068_v25 = vsel %vm1048_vm3, %v11570_v59, %v11569_v18  ;;  %v1291_v21 = vadd.f32 %v11567_v45, %v1110_v42  ;;  %v11577_v48 = vld [vmem:[#allocation110_spill] sm:$0xff]  ;;  %v11580_v42 = vld [vmem:[#allocation33_spill] sm:$0xff] }
 0x28c   : > { %v1109_v20 = vadd.f32 %v1063_v51, %v928_v9  ;;  %v555_v33 = vadd.f32 %v11574_v38, %v374_v61  ;;  %v11575_v9 = vld [vmem:[#allocation43_spill] sm:$0xff]  ;;  %v1649_v10 = vsel %vm1632_vm6, %v11577_v48, %v1615_v24  ;;  %v11579_v61 = vld [vmem:[#allocation93_spill] sm:$0xff] }
 0x28d   : > { %v934_v16 = vadd.f32 %v887_v41, %v753_v30  ;;  %v935_v47 = vadd.f32 %v11566_v3, %v754_v58  ;;  %v1249_v59 = vsel %vm1229_vm4, %v11576_v11, %v11575_v9  ;;  %v1650_v3 = vsel %vm1632_vm6, %v1615_v24, %v8828_v55  ;;  %v11578_v58 = vld [vmem:[#allocation21_spill] sm:$0xff]  ;;  %v11581_v11 = vld [vmem:[#allocation96_spill] sm:$0xff] }
 0x28e   : > { %v1290_v51 = vadd.f32 %v1244_v36, %v1109_v20  ;;  %v1497_v30 = vadd.f32 %v1449_v39, %v1291_v21  ;;  %v510_v20 = vsel %vm505_vm0, %v11578_v58, %v11574_v38  ;;  %v515_v17 = vsel %vm505_vm0, %v11580_v42, %v11579_v61  ;;  %v11584_v38 = vld [vmem:[#allocation35_spill] sm:$0xff]  ;;  %v11588_v42 = vld [vmem:[#allocation44_spill] sm:$0xff] }
 0x28f   : > { %v8903_v7 = vpop.permute.xlu0 %1401  ;;  %v8905_v57 = vpop.permute.xlu1 %1385  ;;  %2493 = vrot.lane.b32.xlu1 %v8484_v32, %s7117_s7  ;;  %v1115_v41 = vadd.f32 %v1068_v25, %v934_v16  ;;  %v1116_v45 = vadd.f32 %v11569_v18, %v935_v47  ;;  %v1454_v48 = vsel %vm1431_vm5, %v11581_v11, %v8703_v27  ;;  %v1455_v55 = vsel %vm1431_vm5, %v8703_v27, %v11582_v52  ;;  %v11583_v47 = vld [vmem:[#allocation111_spill] sm:$0xff] }
 0x290   : > { %v1496_v36 = vadd.f32 %v1448_v8, %v1290_v51  ;;  %v1698_v8 = vadd.f32 %v1650_v3, %v1497_v30  ;;  %v1655_v51 = vsel %vm1632_vm6, %v11583_v47, %v1629_v0  ;;  %v1656_v21 = vsel %vm1632_vm6, %v1629_v0, %v8848_v50  ;;  %v11587_v30 = vld [vmem:[#allocation116_spill] sm:$0xff] }
 0x291   : > { %v1296_v24 = vadd.f32 %v1249_v59, %v1115_v41  ;;  %v1297_v18 = vadd.f32 %v11575_v9, %v1116_v45  ;;  %v554_v3 = vadd.f32 %v510_v20, %v373_v54  ;;  %v11585_v41 = vld [vmem:[#allocation113_spill] sm:$0xff]  ;;  %v11586_v45 = vld [vmem:[#allocation51_spill] sm:$0xff]  ;;  %v691_v11 = vsel %vm686_vm1, %v11588_v42, %v11587_v30  ;;  %v11589_v20 = vld [vmem:[#allocation54_spill] sm:$0xff] }
 0x292   : > { %v1697_v25 = vadd.f32 %v1649_v10, %v1496_v36  ;;  %v696_v36 = vsel %vm686_vm1, %v11586_v45, %v11585_v41  ;;  %v560_v54 = vadd.f32 %v515_v17, %v8896_v37  ;;  %v561_v37 = vadd.f32 %v11579_v61, %v8911_v44  ;;  %v11596_v61 = vld [vmem:[#allocation53_spill] sm:$0xff] }
 0x293   : > { %v1818_v2 = vpop.permute.xlu0 %1817  ;;  %v8933_v60 = vpop.permute.xlu1 %1399  ;;  %2483 = vrot.lane.b32.xlu1 %v8805_v15, %s7117_s7  ;;  %v1502_v52 = vadd.f32 %v1454_v48, %v1296_v24  ;;  %v1503_v9 = vadd.f32 %v1455_v55, %v1297_v18  ;;  %v11590_v24 = vld [vmem:[#allocation63_spill] sm:$0xff] }
 0x294   : > { %v872_v18 = vsel %vm867_vm2, %v11590_v24, %v11589_v20  ;;  %v741_v17 = vadd.f32 %v696_v36, %v560_v54  ;;  %v742_v44 = vadd.f32 %v11585_v41, %v561_v37  ;;  %v11597_v36 = vld [vmem:[#allocation88_spill] sm:$0xff]  ;;  %v1239_v41 = vsel %vm1229_vm4, %v11553_v1, %v8811_v14 }
 0x295   : > { %v1703_v50 = vadd.f32 %v1655_v51, %v1502_v52  ;;  %v1704_v0 = vadd.f32 %v1656_v21, %v1503_v9  ;;  %v735_v51 = vadd.f32 %v691_v11, %v554_v3  ;;  %v736_v21 = vadd.f32 %v11587_v30, %v555_v33  ;;  %v11593_v52 = vld [vmem:[#allocation70_spill] sm:$0xff] }
 0x296   : > { %v1436_v24 = vsel %vm1431_vm5, %v8333_v63, %v8905_v57  ;;  %v1442_v1 = vsel %vm1431_vm5, %v8365_v46, %v8933_v60 }
 0x297   : > { %v1832_v39 = vpop.permute.xlu0 %1831  ;;  %v1816_v16 = vpop.permute.xlu1 %1815  ;;  %2489 = vrot.lane.b32.xlu1 %v8846_v28, %s7117_s7  ;;  %v916_v3 = vadd.f32 %v872_v18, %v735_v51  ;;  %v917_v33 = vadd.f32 %v11589_v20, %v736_v21 }
 0x298   : > { %v1850_v58 = vsel %vm1833_vm7, %v11584_v38, %v1816_v16  ;;  %v1851_v27 = vsel %vm1833_vm7, %v1816_v16, %v1818_v2 }
 0x299   : > { %v8968_v59 = vadd.f32 %v1850_v58, %v1697_v25  ;;  %v1899_v10 = vadd.f32 %v1851_v27, %v1698_v8  ;;  %v11591_v25 = vld [vmem:[#allocation32_spill] sm:$0xff] }
 0x29a   : > { %v11592_v27 = vld [vmem:[#allocation36_spill] sm:$0xff] }
 0x29b   : > { %v1922_v47 = vmax.f32 %v8968_v59, 0.0  ;;  %v1923_v2 = vmax.f32 %v1899_v10, 0.0  ;;  %v1589_v48 = vpop.permute.xlu0 %1588  ;;  %v1830_v55 = vpop.permute.xlu1 %1829  ;;  %2481 = vrot.lane.b32.xlu1 %v8786_v6, %s7117_s7  ;;  %v877_v9 = vsel %vm867_vm2, %v11593_v52, %v11592_v27  ;;  %v11594_v59 = vld [vmem:[#allocation58_spill] sm:$0xff]  ;;  %v11595_v10 = vld [vmem:[#allocation81_spill] sm:$0xff]  ;;  %v923_v20 = vadd.f32 %v11592_v27, %v742_v44 }
 0x29c   : > { %v1856_v8 = vsel %vm1833_vm7, %v11591_v25, %v1830_v55  ;;  %v1857_v16 = vsel %vm1833_vm7, %v1830_v55, %v1832_v39  ;;  %v1053_v39 = vsel %vm1048_vm3, %v11595_v10, %v11594_v59  ;;  %v1098_v54 = vadd.f32 %v11594_v59, %v917_v33 }
 0x29d   : > { %1947 = vst [vmem:[#allocation2 + $0x80] sm:$0xff] %v1922_v47  ;;  %1948 = vst.msk [vmem:[#allocation2 + $0x88] sm:$0xff] %vm1935_vm8, %v1923_v2  ;;  %v1904_v38 = vadd.f32 %v1856_v8, %v1703_v50  ;;  %v1905_v58 = vadd.f32 %v1857_v16, %v1704_v0  ;;  %v1058_v50 = vsel %vm1048_vm3, %v11597_v36, %v11596_v61 }
 0x29e   : > { %v1234_v0 = vsel %vm1229_vm4, %v11547_v5, %v8830_v43  ;;  %v922_v2 = vadd.f32 %v877_v9, %v741_v17  ;;  %v1097_v55 = vadd.f32 %v1053_v39, %v916_v3  ;;  %v1437_v5 = vsel %vm1431_vm5, %v8905_v57, %v8873_v40 }
 0x29f   : > { %v1928_v45 = vmax.f32 %v1904_v38, 0.0  ;;  %v1929_v30 = vmax.f32 %v1905_v58, 0.0  ;;  %v1603_v42 = vpop.permute.xlu0 %1602  ;;  %v1587_v11 = vpop.permute.xlu1 %1586  ;;  %2330 = vrot.lane.b32.xlu1 %v8503_v13, %s7116_s30  ;;  %v1279_v8 = vadd.f32 %v8830_v43, %v1098_v54  ;;  %v1104_v51 = vadd.f32 %v11596_v61, %v923_v20 }
 0x2a0   : > { %v1103_v18 = vadd.f32 %v1058_v50, %v922_v2  ;;  %v1278_v25 = vadd.f32 %v1234_v0, %v1097_v55  ;;  %v1637_v63 = vsel %vm1632_vm6, %v8564_v12, %v1587_v11  ;;  %v1638_v40 = vsel %vm1632_vm6, %v1587_v11, %v1589_v48  ;;  %v11600_v55 = vld [vmem:[#allocation39_spill] sm:$0xff] }
 0x2a1   : > { %1953 = vst [vmem:[#allocation2 + $0xb0] sm:$0xff] %v1928_v45  ;;  %1954 = vst.msk [vmem:[#allocation2 + $0xb8] sm:$0xff] %vm1935_vm8, %v1929_v30  ;;  %v1485_v58 = vadd.f32 %v1437_v5, %v1279_v8  ;;  %v1285_v46 = vadd.f32 %v8811_v14, %v1104_v51  ;;  %v1443_v12 = vsel %vm1431_vm5, %v8933_v60, %v8903_v7 }
 0x2a2   : > { %v1284_v57 = vadd.f32 %v1239_v41, %v1103_v18  ;;  %v1484_v38 = vadd.f32 %v1436_v24, %v1278_v25 }
 0x2a3   : > { %v1601_v16 = vpop.permute.xlu1 %1600  ;;  %2336 = vrot.lane.b32.xlu1 %v8536_v56, %s7116_s30  ;;  %v1790_v17 = vpop.permute.xlu0 %1789  ;;  %v1686_v52 = vadd.f32 %v1638_v40, %v1485_v58  ;;  %v1491_v10 = vadd.f32 %v1443_v12, %v1285_v46 }
 0x2a4   : > { %v1972_v21 = vld [vmem:[#allocation2 + $0x88] sm:$0xff]  ;;  %v1490_v27 = vadd.f32 %v1442_v1, %v1284_v57  ;;  %v1685_v48 = vadd.f32 %v1637_v63, %v1484_v38  ;;  %v1643_v14 = vsel %vm1632_vm6, %v8589_v29, %v1601_v16  ;;  %v1644_v7 = vsel %vm1632_vm6, %v1601_v16, %v1603_v42 }
 0x2a5   : > { %v9034_v37 = vpack.c.bf16 %v1972_v21, %v1922_v47  ;;  %v1692_v11 = vadd.f32 %v1644_v7, %v1491_v10  ;;  %v2742_v7 = vld [vmem:[#allocation2 + $0x78] sm:$0xff] }
 0x2a6   : > { %v1691_v30 = vadd.f32 %v1643_v14, %v1490_v27 }
 0x2a7   : > { %2497 = vrot.lane.b32.xlu0 %v9034_v37, %s7117_s7  ;;  %v1788_v9 = vpop.permute.xlu1 %1787  ;;  %2328 = vrot.lane.b32.xlu1 %v8484_v32, %s7116_s30  ;;  %2062 = vst.msk [vmem:[#allocation3 + $0x40] sm:$0xff] %vm9030_vm11, %v9034_v37  ;;  %v1804_v44 = vpop.permute.xlu0 %1803 }
 0x2a8   : > { %v1978_v47 = vld [vmem:[#allocation2 + $0xb8] sm:$0xff]  ;;  %v1838_v60 = vsel %vm1833_vm7, %v8769_v4, %v1788_v9  ;;  %v1839_v59 = vsel %vm1833_vm7, %v1788_v9, %v1790_v17 }
 0x2a9   : > { %v9053_v39 = vpack.c.bf16 %v1978_v47, %v1928_v45  ;;  %v1886_v3 = vadd.f32 %v1838_v60, %v1685_v48  ;;  %v1887_v33 = vadd.f32 %v1839_v59, %v1686_v52  ;;  %v2741_v59 = vld [vmem:[#allocation2 + $0x70] sm:$0xff] }
 0x2ab   : > { %v1910_v61 = vmax.f32 %v1886_v3, 0.0  ;;  %v1911_v36 = vmax.f32 %v1887_v33, 0.0  ;;  %2503 = vrot.lane.b32.xlu0 %v9053_v39, %s7117_s7  ;;  %v1802_v29 = vpop.permute.xlu1 %1801  ;;  %2318 = vrot.lane.b32.xlu1 %v8805_v15, %s7116_s30  ;;  %2065 = vst.msk [vmem:[#allocation3 + $0x58] sm:$0xff] %vm9030_vm11, %v9053_v39  ;;  %v6493_v33 = vpack.c.bf16 %v2742_v7, %v2741_v59 }
 0x2ac   : > { %v1844_v4 = vsel %vm1833_vm7, %v8790_v62, %v1802_v29  ;;  %v1845_v45 = vsel %vm1833_vm7, %v1802_v29, %v1804_v44  ;;  %v6863_v44 = vld [vmem:[#allocation4 + $0x8] ss:$12 sps:$4 sm:$0xff]  }
 0x2ad   : > { %1934 = vst [vmem:[#allocation2 + $0x20] sm:$0xff] %v1910_v61  ;;  %1936 = vst.msk [vmem:[#allocation2 + $0x28] sm:$0xff] %vm1935_vm8, %v1911_v36  ;;  %v1892_v42 = vadd.f32 %v1844_v4, %v1691_v30  ;;  %v1893_v50 = vadd.f32 %v1845_v45, %v1692_v11  ;;  %v2740_v4 = vld [vmem:[#allocation2 + $0x68] sm:$0xff] }
 0x2af   : > { %v1916_v0 = vmax.f32 %v1892_v42, 0.0  ;;  %v1917_v2 = vmax.f32 %v1893_v50, 0.0  ;;  %2499 = vrot.lane.b32.xlu0 %v11600_v55, %s7117_s7  ;;  %2324 = vrot.lane.b32.xlu1 %v8846_v28, %s7116_s30  ;;  %v2739_v42 = vld [vmem:[#allocation2 + $0x60] sm:$0xff] }
 0x2b1   : > { %1941 = vst [vmem:[#allocation2 + $0x50] sm:$0xff] %v1916_v0  ;;  %1942 = vst.msk [vmem:[#allocation2 + $0x58] sm:$0xff] %vm1935_vm8, %v1917_v2  ;;  %v3319_v54 = vpop.permute.xlu1 %3318  ;;  %v6492_v2 = vpack.c.bf16 %v2740_v4, %v2739_v42 }
 0x2b2   : > { %v3336_v24 = vrot.slane %v3319_v54, 4 }
 0x2b3   : > { %2316 = vrot.lane.b32.xlu1 %v8786_v6, %s7116_s30 }
 0x2b4   : > { %v1960_v62 = vld [vmem:[#allocation2 + $0x28] sm:$0xff] }
 0x2b5   : > { %v9073_v20 = vpack.c.bf16 %v1960_v62, %v1910_v61  ;;  %v9075_v41 = vpop.permute.xlu0 %3320 }
 0x2b6   : > { %v3337_v5 = vrot.slane %v9075_v41, 4 }
 0x2b7   : > { %2485 = vrot.lane.b32.xlu0 %v9073_v20, %s7117_s7  ;;  %2164 = vrot.lane.b32.xlu1 %v8503_v13, %s7115_s29  ;;  %2056 = vst.msk [vmem:[#allocation3 + $0x10] sm:$0xff] %vm9030_vm11, %v9073_v20 }
 0x2b8   : > { %v1966_v18 = vld [vmem:[#allocation2 + $0x58] sm:$0xff]  ;;  %v3353_v25 = vsel %vm2053_vm9, %v3336_v24, %v3337_v5  ;;  %v2910_v24 = vld [vmem:[#allocation2 + $0x90] sm:$0xff] }
 0x2b9   : > { %v9088_v8 = vpack.c.bf16 %v1966_v18, %v1916_v0  ;;  %v3354_v16 = vsel %vm1833_vm7, %v3319_v54, %v3353_v25  ;;  %v3325_v51 = vpop.permute.xlu1 %3324  ;;  %v2911_v18 = vld [vmem:[#allocation2 + $0x98] sm:$0xff] }
 0x2ba   : > { %v3339_v21 = vrot.slane %v3325_v51, 4 }
 0x2bb   : > { %2491 = vrot.lane.b32.xlu0 %v9088_v8, %s7117_s7  ;;  %2170 = vrot.lane.b32.xlu1 %v8536_v56, %s7115_s29  ;;  %2059 = vst.msk [vmem:[#allocation3 + $0x28] sm:$0xff] %vm9030_vm11, %v9088_v8 }
 0x2bd   : > { %v9098_v1 = vpop.permute.xlu0 %3326 }
 0x2be   : > { %v3340_v63 = vrot.slane %v9098_v1, 4 }
 0x2bf   : > { %2487 = vrot.lane.b32.xlu0 %v8822_v26, %s7117_s7  ;;  %2162 = vrot.lane.b32.xlu1 %v8484_v32, %s7115_s29 }
 0x2c0   : > { %v3358_v40 = vsel %vm2053_vm9, %v3339_v21, %v3340_v63 }
 0x2c1   : > { %v3359_v57 = vsel %vm1833_vm7, %v3325_v51, %v3358_v40  ;;  %v9220_v51 = vpack.c.bf16 %v2911_v18, %v2910_v24  ;;  %v2570_v24 = vld [vmem:[#allocation2 + $0x40] sm:$0xff] }
 0x2c2   : > { %v6314_v38 = vcombine.high %v3354_v16, %v3359_v57  ;;  %v6313_v58 = vcombine.low %v3354_v16, %v3359_v57  ;;  %v2583_v57 = vld [vmem:[#allocation2 + $0xa8] sm:$0xff] }
 0x2c3   : > { %2332 = vrot.lane.b32.xlu0 %v9034_v37, %s7116_s30  ;;  %2152 = vrot.lane.b32.xlu1 %v8805_v15, %s7115_s29 }
 0x2c4   : > { %4257 = vmatprep.subr.bf16.mxu1 %v6314_v38 }
 0x2c5   : > { %4258 = vmatpush1.bf16.msra.mxu1 %v6313_v58 }
 0x2c7   : > { %2338 = vrot.lane.b32.xlu0 %v9053_v39, %s7116_s30  ;;  %2158 = vrot.lane.b32.xlu1 %v8846_v28, %s7115_s29 }
 0x2cb   : > { %2334 = vrot.lane.b32.xlu0 %v11600_v55, %s7116_s30  ;;  %2150 = vrot.lane.b32.xlu1 %v8786_v6, %s7115_s29 }
 0x2cf   : > { %2320 = vrot.lane.b32.xlu0 %v9073_v20, %s7116_s30  ;;  %3155 = vrot.lane.b32.xlu1 %v8503_v13, %s7121_s11 }
 0x2d3   : > { %2326 = vrot.lane.b32.xlu0 %v9088_v8, %s7116_s30  ;;  %3161 = vrot.lane.b32.xlu1 %v8536_v56, %s7121_s11 }
 0x2d7   : > { %2322 = vrot.lane.b32.xlu0 %v8822_v26, %s7116_s30  ;;  %3153 = vrot.lane.b32.xlu1 %v8484_v32, %s7121_s11 }
 0x2db   : > { %2166 = vrot.lane.b32.xlu0 %v9034_v37, %s7115_s29  ;;  %3143 = vrot.lane.b32.xlu1 %v8805_v15, %s7121_s11 }
 0x2df   : > { %2172 = vrot.lane.b32.xlu0 %v9053_v39, %s7115_s29  ;;  %3149 = vrot.lane.b32.xlu1 %v8846_v28, %s7121_s11 }
 0x2e3   : > { %2168 = vrot.lane.b32.xlu0 %v11600_v55, %s7115_s29  ;;  %3141 = vrot.lane.b32.xlu1 %v8786_v6, %s7121_s11 }
 0x2e7   : > { %2154 = vrot.lane.b32.xlu0 %v9073_v20, %s7115_s29  ;;  %2990 = vrot.lane.b32.xlu1 %v8503_v13, %s7120_s10 }
 0x2eb   : > { %2160 = vrot.lane.b32.xlu0 %v9088_v8, %s7115_s29  ;;  %2996 = vrot.lane.b32.xlu1 %v8536_v56, %s7120_s10 }
 0x2ed   : > { %v3307_v17 = vpop.permute.xlu1 %3306 }
 0x2ee   : > { %v3330_v12 = vrot.slane %v3307_v17, 4 }
 0x2ef   : > { %2156 = vrot.lane.b32.xlu0 %v8822_v26, %s7115_s29  ;;  %2988 = vrot.lane.b32.xlu1 %v8484_v32, %s7120_s10 }
 0x2f1   : > { %v9157_v46 = vpop.permute.xlu0 %3308 }
 0x2f2   : > { %v3331_v27 = vrot.slane %v9157_v46, 4 }
 0x2f3   : > { %3157 = vrot.lane.b32.xlu0 %v9034_v37, %s7121_s11  ;;  %2978 = vrot.lane.b32.xlu1 %v8805_v15, %s7120_s10 }
 0x2f4   : > { %v3342_v13 = vsel %vm2053_vm9, %v3330_v12, %v3331_v27 }
 0x2f5   : > { %v3344_v48 = vsel %vm1833_vm7, %v3307_v17, %v3342_v13  ;;  %v3313_v52 = vpop.permute.xlu1 %3312 }
 0x2f6   : > { %v3333_v47 = vrot.slane %v3313_v52, 4 }
 0x2f7   : > { %3163 = vrot.lane.b32.xlu0 %v9053_v39, %s7121_s11  ;;  %2984 = vrot.lane.b32.xlu1 %v8846_v28, %s7120_s10 }
 0x2f9   : > { %v9172_v32 = vpop.permute.xlu0 %3314  ;;  %v9174_v9 = vpop.permute.xlu1 %2495 }
 0x2fa   : > { %v3334_v14 = vrot.slane %v9172_v32, 4  ;;  %v2512_v36 = vrot.slane %v9174_v9, 4 }
 0x2fb   : > { %3159 = vrot.lane.b32.xlu0 %v11600_v55, %s7121_s11  ;;  %2976 = vrot.lane.b32.xlu1 %v8786_v6, %s7120_s10  ;;  %v11601_v55 = vmov 0  }
 0x2fc   : > { %v3348_v60 = vsel %vm2053_vm9, %v3333_v47, %v3334_v14 }
 0x2fd   : > { %v3349_v10 = vsel %vm1833_vm7, %v3313_v52, %v3348_v60  ;;  %v9185_v3 = vpop.permute.xlu1 %2501 }
 0x2fe   : > { %v6308_v30 = vcombine.high %v3344_v48, %v3349_v10  ;;  %v6307_v11 = vcombine.low %v3344_v48, %v3349_v10 }
 0x2ff   : > { %3145 = vrot.lane.b32.xlu0 %v9073_v20, %s7121_s11  ;;  %2825 = vrot.lane.b32.xlu1 %v6493_v33, %s7119_s9 }
 0x300   : > { %4259 = vmatprep.subr.bf16.mxu1 %v6308_v30 }
 0x301   : > { %v2494_v61 = vpop.permute.xlu1 %2493  ;;  %4260 = vmatpush1.bf16.msra.mxu1 %v6307_v11  ;;  %v2565_v11 = vld [vmem:[#allocation2 + $0x18] sm:$0xff] }
 0x302   : > { %v2511_v29 = vrot.slane %v2494_v61, 4 }
 0x303   : > { %3151 = vrot.lane.b32.xlu0 %v9088_v8, %s7121_s11  ;;  %2831 = vrot.lane.b32.xlu1 %v8536_v56, %s7119_s9 }
 0x304   : > { %v2528_v45 = vsel %vm2053_vm9, %v2511_v29, %v2512_v36  ;;  %6319 = vmatmul.mubr.msk.bf16.vlgmr.msra.gmra.mxu1 %vm4159_vm12, %v6863_v44 }
 0x305   : > { %v9198_v50 = vsel %vm867_vm2, %v2494_v61, %v2528_v45  ;;  %v9200_v0 = vpop.permute.xlu1 %2483  ;;  %4287 = vmatprep.mubr.bf16.mxu1 %v11601_v55  ;;  %v2564_v61 = vld [vmem:[#allocation2 + $0x10] sm:$0xff] }
 0x306   : > { %v2506_v62 = vrot.slane %v9200_v0, 4  ;;  %v6475_v45 = vpack.c.bf16 %v2565_v11, %v2564_v61 }
 0x307   : > { %3147 = vrot.lane.b32.xlu0 %v8822_v26, %s7121_s11  ;;  %2823 = vrot.lane.b32.xlu1 %v6492_v2, %s7119_s9 }
 0x309   : > { %v9206_v54 = vpop.permute.xlu1 %2489 }
 0x30b   : > { %2992 = vrot.lane.b32.xlu0 %v9034_v37, %s7120_s10  ;;  %2813 = vrot.lane.b32.xlu1 %v8805_v15, %s7119_s9 }
 0x30d   : > { %v2482_v56 = vpop.permute.xlu1 %2481 }
 0x30e   : > { %v2505_v25 = vrot.slane %v2482_v56, 4 }
 0x30f   : > { %2998 = vrot.lane.b32.xlu0 %v9053_v39, %s7120_s10  ;;  %2819 = vrot.lane.b32.xlu1 %v8846_v28, %s7119_s9  ;;  %v2582_v28 = vld [vmem:[#allocation2 + $0xa0] sm:$0xff] }
 0x310   : > { %v2517_v16 = vsel %vm2053_vm9, %v2505_v25, %v2506_v62  ;;  %v6484_v17 = vpack.c.bf16 %v2583_v57, %v2582_v28 }
 0x311   : > { %v9223_v15 = vsel %vm867_vm2, %v2482_v56, %v2517_v16  ;;  %v9225_v21 = vpop.permute.xlu1 %2330 }
 0x312   : > { %v2347_v13 = vrot.slane %v9225_v21, 4 }
 0x313   : > { %2994 = vrot.lane.b32.xlu0 %v9220_v51, %s7120_s10  ;;  %2811 = vrot.lane.b32.xlu1 %v8786_v6, %s7119_s9 }
 0x315   : > { %v9231_v40 = vpop.permute.xlu1 %2336 }
 0x317   : > { %2980 = vrot.lane.b32.xlu0 %v9073_v20, %s7120_s10  ;;  %2660 = vrot.lane.b32.xlu1 %v6493_v33, %s7118_s8  ;;  %v2515_v33 = vrot.slane %v9185_v3, 4 }
 0x319   : > { %v2498_v38 = vpop.permute.xlu0 %2497  ;;  %v2329_v58 = vpop.permute.xlu1 %2328 }
 0x31a   : > { %v2513_v12 = vrot.slane %v2498_v38, 4  ;;  %v2346_v48 = vrot.slane %v2329_v58, 4 }
 0x31b   : > { %2986 = vrot.lane.b32.xlu0 %v9088_v8, %s7120_s10  ;;  %2666 = vrot.lane.b32.xlu1 %v6484_v17, %s7118_s8  ;;  %v2563_v17 = vld [vmem:[#allocation2 + $0x8] sm:$0xff] }
 0x31c   : > { %v2530_v6 = vsel %vm2053_vm9, %v2512_v36, %v2513_v12  ;;  %v2532_v52 = vsel %vm867_vm2, %v2498_v38, %v2513_v12  ;;  %v2363_v47 = vsel %vm2053_vm9, %v2346_v48, %v2347_v13  ;;  %v2562_v48 = vld [vmem:[#allocation2] sm:$0xff] }
 0x31d   : > { %v2531_v7 = vsel %vm867_vm2, %v9174_v9, %v2530_v6  ;;  %2558 = vst.msk [vmem:[#allocation3 + $0x160] sm:$0xff] %vm9030_vm11, %v2532_v52  ;;  %v2504_v60 = vpop.permute.xlu0 %2503  ;;  %v9250_v59 = vsel %vm686_vm1, %v2329_v58, %v2363_v47  ;;  %v9252_v10 = vpop.permute.xlu1 %2318 }
 0x31e   : > { %v2516_v30 = vrot.slane %v2504_v60, 4  ;;  %v2341_v28 = vrot.slane %v9252_v10, 4 }
 0x31f   : > { %2982 = vrot.lane.b32.xlu0 %v8822_v26, %s7120_s10  ;;  %2658 = vrot.lane.b32.xlu1 %v6492_v2, %s7118_s8  ;;  %v2571_v2 = vld [vmem:[#allocation2 + $0x48] sm:$0xff] }
 0x320   : > { %v2535_v9 = vsel %vm2053_vm9, %v2515_v33, %v2516_v30  ;;  %v2537_v44 = vsel %vm867_vm2, %v2504_v60, %v2516_v30  ;;  %v6478_v16 = vpack.c.bf16 %v2571_v2, %v2570_v24 }
 0x321   : > { %v2536_v36 = vsel %vm867_vm2, %v9185_v3, %v2535_v9  ;;  %2561 = vst.msk [vmem:[#allocation3 + $0x178] sm:$0xff] %vm9030_vm11, %v2537_v44  ;;  %v2500_v29 = vpop.permute.xlu0 %2499  ;;  %v9264_v4 = vpop.permute.xlu1 %2324  ;;  %v2509_v9 = vrot.slane %v9206_v54, 4 }
 0x322   : > { %v2514_v42 = vrot.slane %v2500_v29, 4  ;;  %v6255_v56 = vcombine.low %v2531_v7, %v2536_v36  ;;  %v6256_v26 = vcombine.high %v2531_v7, %v2536_v36 }
 0x323   : > { %2827 = vrot.lane.b32.xlu0 %v9034_v37, %s7119_s9  ;;  %2648 = vrot.lane.b32.xlu1 %v6475_v45, %s7118_s8 }
 0x324   : > { %v2533_v18 = vsel %vm2053_vm9, %v2514_v42, %v2515_v33  ;;  %4318 = vmatprep.subr.bf16.mxu1 %v6256_v26  ;;  %v2733_v26 = vld [vmem:[#allocation2 + $0x30] sm:$0xff] }
 0x325   : > { %v2534_v3 = vsel %vm867_vm2, %v2500_v29, %v2533_v18  ;;  %4319 = vmatpush1.bf16.msra.mxu1 %v6255_v56  ;;  %v2317_v25 = vpop.permute.xlu1 %2316 }
 0x326   : > { %v2340_v57 = vrot.slane %v2317_v25, 4  ;;  %v6254_v38 = vcombine.high %v9198_v50, %v2534_v3  ;;  %v6253_v58 = vcombine.low %v9198_v50, %v2534_v3  ;;  %v6474_v50 = vpack.c.bf16 %v2563_v17, %v2562_v48  ;;  %v2579_v17 = vld [vmem:[#allocation2 + $0x88] sm:$0xff] }
 0x327   : > { %2833 = vrot.lane.b32.xlu0 %v9053_v39, %s7119_s9  ;;  %2654 = vrot.lane.b32.xlu1 %v6478_v16, %s7118_s8 }
 0x328   : > { %v2352_v12 = vsel %vm2053_vm9, %v2340_v57, %v2341_v28  ;;  %4172 = vmatprep.subr.bf16.mxu0 %v6254_v38 }
 0x329   : > { %v2486_v6 = vpop.permute.xlu0 %2485  ;;  %v9281_v52 = vsel %vm686_vm1, %v2317_v25, %v2352_v12  ;;  %4173 = vmatpush1.bf16.msra.mxu0 %v6253_v58  ;;  %v9283_v47 = vpop.permute.xlu1 %2164 }
 0x32a   : > { %v2507_v7 = vrot.slane %v2486_v6, 4  ;;  %v2181_v45 = vrot.slane %v9283_v47, 4 }
 0x32b   : > { %2829 = vrot.lane.b32.xlu0 %v9220_v51, %s7119_s9  ;;  %2646 = vrot.lane.b32.xlu1 %v6474_v50, %s7118_s8 }
 0x32c   : > { %v2520_v39 = vsel %vm2053_vm9, %v2506_v62, %v2507_v7  ;;  %v2522_v60 = vsel %vm867_vm2, %v2486_v6, %v2507_v7  ;;  %v6864_v62 = vld [vmem:[#allocation4 + $0x20] ss:$12 sps:$4 sm:$0xff]   ;;  %v6865_v6 = vld [vmem:[#allocation4 + $0x38] ss:$12 sps:$4 sm:$0xff]  }
 0x32d   : > { %v2521_v33 = vsel %vm867_vm2, %v9200_v0, %v2520_v39  ;;  %2552 = vst.msk [vmem:[#allocation3 + $0x130] sm:$0xff] %vm9030_vm11, %v2522_v60  ;;  %v2492_v30 = vpop.permute.xlu0 %2491  ;;  %v9296_v11 = vpop.permute.xlu1 %2170  ;;  %6320 = vmatmul.mubr.msk.bf16.gmra.mxu1 %vm4159_vm12, %v6864_v62 }
 0x32e   : > { %v2510_v44 = vrot.slane %v2492_v30, 4  ;;  %4297 = vmatprep.mubr.bf16.mxu1 %v11601_v55 }
 0x32f   : > { %2815 = vrot.lane.b32.xlu0 %v9073_v20, %s7119_s9  ;;  %3322 = vrot.lane.b32.xlu1 %v9034_v37, %s7122_s12  ;;  %v2734_v37 = vld [vmem:[#allocation2 + $0x38] sm:$0xff] }
 0x330   : > { %v2525_v61 = vsel %vm2053_vm9, %v2509_v9, %v2510_v44  ;;  %v2527_v0 = vsel %vm867_vm2, %v2492_v30, %v2510_v44  ;;  %v9321_v57 = vpack.c.bf16 %v2734_v37, %v2733_v26  ;;  %v2350_v30 = vrot.slane %v9231_v40, 4  ;;  %v2585_v44 = vld [vmem:[#allocation2 + $0xb8] sm:$0xff] }
 0x331   : > { %v2526_v36 = vsel %vm867_vm2, %v9206_v54, %v2525_v61  ;;  %2555 = vst.msk [vmem:[#allocation3 + $0x148] sm:$0xff] %vm9030_vm11, %v2527_v0  ;;  %v2488_v29 = vpop.permute.xlu0 %2487  ;;  %v2163_v42 = vpop.permute.xlu1 %2162 }
 0x332   : > { %v2508_v56 = vrot.slane %v2488_v29, 4  ;;  %v2180_v24 = vrot.slane %v2163_v42, 4  ;;  %v6249_v2 = vcombine.low %v2521_v33, %v2526_v36  ;;  %v6250_v18 = vcombine.high %v2521_v33, %v2526_v36 }
 0x333   : > { %2821 = vrot.lane.b32.xlu0 %v9088_v8, %s7119_s9  ;;  %3310 = vrot.lane.b32.xlu1 %v9073_v20, %s7122_s12  ;;  %v2578_v20 = vld [vmem:[#allocation2 + $0x80] sm:$0xff] }
 0x334   : > { %v2523_v54 = vsel %vm2053_vm9, %v2508_v56, %v2509_v9  ;;  %v2198_v3 = vsel %vm2053_vm9, %v2180_v24, %v2181_v45  ;;  %4320 = vmatprep.subr.bf16.mxu1 %v6250_v18  ;;  %v6482_v33 = vpack.c.bf16 %v2579_v17, %v2578_v20  ;;  %v2566_v20 = vld [vmem:[#allocation2 + $0x20] sm:$0xff]  ;;  %v2567_v17 = vld [vmem:[#allocation2 + $0x28] sm:$0xff] }
 0x335   : > { %v2524_v25 = vsel %vm867_vm2, %v2488_v29, %v2523_v54  ;;  %v2333_v16 = vpop.permute.xlu0 %2332  ;;  %v9324_v38 = vsel %vm505_vm0, %v2163_v42, %v2198_v3  ;;  %4321 = vmatpush1.bf16.msra.mxu1 %v6249_v2  ;;  %v9326_v8 = vpop.permute.xlu1 %2152  ;;  %v6866_v2 = vld [vmem:[#allocation4 + $0x50] ss:$12 sps:$4 sm:$0xff]  }
 0x336   : > { %v2348_v58 = vrot.slane %v2333_v16, 4  ;;  %v6248_v12 = vcombine.high %v9223_v15, %v2524_v25  ;;  %v6247_v48 = vcombine.low %v9223_v15, %v2524_v25  ;;  %6321 = vmatmul.mubr.msk.bf16.gmra.mxu1 %vm4159_vm12, %v6865_v6  ;;  %v2175_v36 = vrot.slane %v9326_v8, 4 }
 0x337   : > { %2817 = vrot.lane.b32.xlu0 %v9321_v57, %s7119_s9  ;;  %4307 = vmatprep.mubr.bf16.mxu1 %v11601_v55 }
 0x338   : > { %v2365_v50 = vsel %vm2053_vm9, %v2347_v13, %v2348_v58  ;;  %v2367_v7 = vsel %vm686_vm1, %v2333_v16, %v2348_v58  ;;  %4174 = vmatprep.subr.bf16.mxu0 %v6248_v12  ;;  %v2584_v13 = vld [vmem:[#allocation2 + $0xb0] sm:$0xff] }
 0x339   : > { %v2366_v39 = vsel %vm686_vm1, %v9225_v21, %v2365_v50  ;;  %2393 = vst.msk [vmem:[#allocation3 + $0x100] sm:$0xff] %vm9030_vm11, %v2367_v7  ;;  %v2339_v60 = vpop.permute.xlu0 %2338  ;;  %4175 = vmatpush1.bf16.msra.mxu0 %v6247_v48  ;;  %v9340_v15 = vpop.permute.xlu1 %2158  ;;  %v9353_v29 = vpack.c.bf16 %v2585_v44, %v2584_v13 }
 0x33a   : > { %v2351_v9 = vrot.slane %v2339_v60, 4 }
 0x33b   : > { %2662 = vrot.lane.b32.xlu0 %v6482_v33, %s7118_s8 }
 0x33c   : > { %v2370_v21 = vsel %vm2053_vm9, %v2350_v30, %v2351_v9  ;;  %v2372_v62 = vsel %vm686_vm1, %v2339_v60, %v2351_v9  ;;  %v2573_v9 = vld [vmem:[#allocation2 + $0x58] sm:$0xff] }
 0x33d   : > { %v2371_v61 = vsel %vm686_vm1, %v9231_v40, %v2370_v21  ;;  %2396 = vst.msk [vmem:[#allocation3 + $0x118] sm:$0xff] %vm9030_vm11, %v2372_v62  ;;  %v2335_v0 = vpop.permute.xlu0 %2334  ;;  %v2151_v42 = vpop.permute.xlu1 %2150 }
 0x33e   : > { %v2349_v56 = vrot.slane %v2335_v0, 4  ;;  %v2174_v26 = vrot.slane %v2151_v42, 4  ;;  %v6243_v37 = vcombine.low %v2366_v39, %v2371_v61  ;;  %v6244_v24 = vcombine.high %v2366_v39, %v2371_v61  ;;  %6322 = vmatmul.mubr.msk.bf16.gmra.mxu1 %vm4159_vm12, %v6866_v2 }
 0x33f   : > { %2668 = vrot.lane.b32.xlu0 %v9353_v29, %s7118_s8 }
 0x340   : > { %v2368_v18 = vsel %vm2053_vm9, %v2349_v56, %v2350_v30  ;;  %v2187_v40 = vsel %vm2053_vm9, %v2174_v26, %v2175_v36  ;;  %4322 = vmatprep.subr.bf16.mxu1 %v6244_v24  ;;  %v2572_v30 = vld [vmem:[#allocation2 + $0x50] sm:$0xff] }
 0x341   : > { %v2369_v54 = vsel %vm686_vm1, %v2335_v0, %v2368_v18  ;;  %v2321_v3 = vpop.permute.xlu0 %2320  ;;  %v9363_v25 = vsel %vm505_vm0, %v2151_v42, %v2187_v40  ;;  %4323 = vmatpush1.bf16.msra.mxu1 %v6243_v37  ;;  %v9365_v16 = vpop.permute.xlu1 %3155  ;;  %v6479_v62 = vpack.c.bf16 %v2573_v9, %v2572_v30  ;;  %v9391_v0 = vld [vmem:[#allocation4 + $0x4] ss:$12 sps:$4 sm:$0xff]  }
 0x342   : > { %v2342_v58 = vrot.slane %v2321_v3, 4  ;;  %v6242_v12 = vcombine.high %v9250_v59, %v2369_v54  ;;  %v6241_v48 = vcombine.low %v9250_v59, %v2369_v54  ;;  %v6476_v59 = vpack.c.bf16 %v2567_v17, %v2566_v20  ;;  %4350 = vmatprep.mubr.bf16.mxu1 %v9391_v0  ;;  %4204 = vmatprep.mubr.bf16.mxu0 %v9391_v0 }
 0x343   : > { %2664 = vrot.lane.b32.xlu0 %v9220_v51, %s7118_s8  ;;  %v2344_v51 = vrot.slane %v9264_v4, 4  ;;  %v3172_v21 = vrot.slane %v9365_v16, 4 }
 0x344   : > { %v2355_v6 = vsel %vm2053_vm9, %v2341_v28, %v2342_v58  ;;  %v2357_v50 = vsel %vm686_vm1, %v2321_v3, %v2342_v58  ;;  %4176 = vmatprep.subr.bf16.mxu0 %v6242_v12 }
 0x345   : > { %v2356_v7 = vsel %vm686_vm1, %v9252_v10, %v2355_v6  ;;  %2387 = vst.msk [vmem:[#allocation3 + $0xd0] sm:$0xff] %vm9030_vm11, %v2357_v50  ;;  %v2327_v39 = vpop.permute.xlu0 %2326  ;;  %4177 = vmatpush1.bf16.msra.mxu0 %v6241_v48  ;;  %v9380_v60 = vpop.permute.xlu1 %3161 }
 0x346   : > { %v2345_v33 = vrot.slane %v2327_v39, 4 }
 0x347   : > { %2650 = vrot.lane.b32.xlu0 %v6476_v59, %s7118_s8 }
 0x348   : > { %v2360_v28 = vsel %vm2053_vm9, %v2344_v51, %v2345_v33  ;;  %v2362_v13 = vsel %vm686_vm1, %v2327_v39, %v2345_v33 }
 0x349   : > { %v2361_v10 = vsel %vm686_vm1, %v9264_v4, %v2360_v28  ;;  %2390 = vst.msk [vmem:[#allocation3 + $0xe8] sm:$0xff] %vm9030_vm11, %v2362_v13  ;;  %v2323_v44 = vpop.permute.xlu0 %2322  ;;  %v3154_v61 = vpop.permute.xlu1 %3153  ;;  %v3512_v13 = vld [vmem:[%s11122_s4 + $0x8] sm:$0xff] }
 0x34a   : > { %v2343_v42 = vrot.slane %v2323_v44, 4  ;;  %v3171_v56 = vrot.slane %v3154_v61, 4  ;;  %v6237_v26 = vcombine.low %v2356_v7, %v2361_v10  ;;  %v6238_v37 = vcombine.high %v2356_v7, %v2361_v10 }
 0x34b   : > { %2656 = vrot.lane.b32.xlu0 %v6479_v62, %s7118_s8 }
 0x34c   : > { %v2358_v4 = vsel %vm2053_vm9, %v2343_v42, %v2344_v51  ;;  %v3188_v24 = vsel %vm2053_vm9, %v3171_v56, %v3172_v21  ;;  %4324 = vmatprep.subr.bf16.mxu1 %v6238_v37 }
 0x34d   : > { %v2359_v2 = vsel %vm686_vm1, %v2323_v44, %v2358_v4  ;;  %v2167_v18 = vpop.permute.xlu0 %2166  ;;  %v9402_v40 = vsel %vm1632_vm6, %v3154_v61, %v3188_v24  ;;  %4325 = vmatpush1.bf16.msra.mxu1 %v6237_v26  ;;  %v9404_v54 = vpop.permute.xlu1 %3143  ;;  %v3515_v24 = vld [vmem:[%s11122_s4 + $0x20] sm:$0xff] }
 0x34e   : > { %v2182_v3 = vrot.slane %v2167_v18, 4  ;;  %v6236_v58 = vcombine.high %v9281_v52, %v2359_v2  ;;  %v6235_v20 = vcombine.low %v9281_v52, %v2359_v2  ;;  %v2184_v52 = vrot.slane %v9296_v11, 4 }
 0x34f   : > { %2652 = vrot.lane.b32.xlu0 %v9321_v57, %s7118_s8  ;;  %v3166_v59 = vrot.slane %v9404_v54, 4 }
 0x350   : > { %v2200_v17 = vsel %vm2053_vm9, %v2181_v45, %v2182_v3  ;;  %v2202_v12 = vsel %vm505_vm0, %v2167_v18, %v2182_v3  ;;  %4178 = vmatprep.subr.bf16.mxu0 %v6236_v58  ;;  %v2178_v3 = vrot.slane %v9340_v15, 4  ;;  %v6882_v43 = vld [vmem:[#allocation3 + $0xd0] ss:$24 sps:$4 sm:$0xff]  }
 0x351   : > { %v2201_v48 = vsel %vm505_vm0, %v9283_v47, %v2200_v17  ;;  %2228 = vst.msk [vmem:[#allocation3 + $0xa0] sm:$0xff] %vm9030_vm11, %v2202_v12  ;;  %v2173_v6 = vpop.permute.xlu0 %2172  ;;  %4179 = vmatpush1.bf16.msra.mxu0 %v6235_v20  ;;  %v9418_v50 = vpop.permute.xlu1 %3149  ;;  %v3517_v17 = vld [vmem:[%s11122_s4 + $0x30] sm:$0xff] }
 0x352   : > { %v2185_v57 = vrot.slane %v2173_v6, 4 }
 0x353   : > { %3328 = vrot.lane.b32.xlu0 %v9353_v29, %s7122_s12 }
 0x354   : > { %v2205_v45 = vsel %vm2053_vm9, %v2184_v52, %v2185_v57  ;;  %v2207_v7 = vsel %vm505_vm0, %v2173_v6, %v2185_v57 }
 0x355   : > { %v2206_v47 = vsel %vm505_vm0, %v9296_v11, %v2205_v45  ;;  %2231 = vst.msk [vmem:[#allocation3 + $0xb8] sm:$0xff] %vm9030_vm11, %v2207_v7  ;;  %v2169_v39 = vpop.permute.xlu0 %2168  ;;  %v3142_v51 = vpop.permute.xlu1 %3141 }
 0x356   : > { %v2183_v33 = vrot.slane %v2169_v39, 4  ;;  %v3165_v30 = vrot.slane %v3142_v51, 4  ;;  %v6231_v9 = vcombine.low %v2201_v48, %v2206_v47  ;;  %v6232_v28 = vcombine.high %v2201_v48, %v2206_v47 }
 0x357   : > { %3316 = vrot.lane.b32.xlu0 %v6479_v62, %s7122_s12 }
 0x358   : > { %v2203_v29 = vsel %vm2053_vm9, %v2183_v33, %v2184_v52  ;;  %v3177_v11 = vsel %vm2053_vm9, %v3165_v30, %v3166_v59  ;;  %4326 = vmatprep.subr.bf16.mxu1 %v6232_v28  ;;  %v11602_v28 = vld [vmem:[#allocation38_spill] sm:$0xff] }
 0x359   : > { %v2204_v10 = vsel %vm505_vm0, %v2169_v39, %v2203_v29  ;;  %v2155_v44 = vpop.permute.xlu0 %2154  ;;  %v9440_v61 = vsel %vm1632_vm6, %v3142_v51, %v3177_v11  ;;  %4327 = vmatpush1.bf16.msra.mxu1 %v6231_v9  ;;  %v9442_v42 = vpop.permute.xlu1 %2990  ;;  %v11603_v29 = vld [vmem:[#allocation30_spill] sm:$0xff] }
 0x35a   : > { %v2176_v62 = vrot.slane %v2155_v44, 4  ;;  %v6230_v56 = vcombine.high %v9324_v38, %v2204_v10  ;;  %v6229_v26 = vcombine.low %v9324_v38, %v2204_v10  ;;  %v3007_v48 = vrot.slane %v9442_v42, 4 }
 0x35b   : > { %3526 = vperm.xlu0 %6621, %v3512_v13   ;;  %v11604_v13 = vpack.c.bf16 %v11602_v28, %v11603_v29 }
 0x35c   : > { %v2190_v37 = vsel %vm2053_vm9, %v2175_v36, %v2176_v62  ;;  %v2192_v4 = vsel %vm505_vm0, %v2155_v44, %v2176_v62  ;;  %4180 = vmatprep.subr.bf16.mxu0 %v6230_v56 }
 0x35d   : > { %v2191_v2 = vsel %vm505_vm0, %v9326_v8, %v2190_v37  ;;  %2222 = vst.msk [vmem:[#allocation3 + $0x70] sm:$0xff] %vm9030_vm11, %v2192_v4  ;;  %v2161_v18 = vpop.permute.xlu0 %2160  ;;  %4181 = vmatpush1.bf16.msra.mxu0 %v6229_v26  ;;  %v9457_v38 = vpop.permute.xlu1 %2996  ;;  %v11605_v37 = vld [vmem:[#allocation41_spill] sm:$0xff]  ;;  %v11606_v4 = vld [vmem:[#allocation26_spill] sm:$0xff] }
 0x35e   : > { %v2179_v36 = vrot.slane %v2161_v18, 4 }
 0x35f   : > { %3541 = vperm.xlu0 %6621, %v3515_v24   ;;  %v11607_v24 = vpack.c.bf16 %v11605_v37, %v11606_v4 }
 0x360   : > { %v2195_v58 = vsel %vm2053_vm9, %v2178_v3, %v2179_v36  ;;  %v2197_v20 = vsel %vm505_vm0, %v2161_v18, %v2179_v36  ;;  %v11608_v18 = vld [vmem:[#allocation34_spill] sm:$0xff] }
 0x361   : > { %v2196_v8 = vsel %vm505_vm0, %v9340_v15, %v2195_v58  ;;  %2225 = vst.msk [vmem:[#allocation3 + $0x88] sm:$0xff] %vm9030_vm11, %v2197_v20  ;;  %v2157_v12 = vpop.permute.xlu0 %2156  ;;  %v2989_v6 = vpop.permute.xlu1 %2988 }
 0x362   : > { %v2177_v52 = vrot.slane %v2157_v12, 4  ;;  %v3006_v57 = vrot.slane %v2989_v6, 4  ;;  %v6225_v45 = vcombine.low %v2191_v2, %v2196_v8  ;;  %v6226_v7 = vcombine.high %v2191_v2, %v2196_v8 }
 0x363   : > { %3551 = vperm.xlu0 %6621, %v3517_v17   ;;  %v3175_v2 = vrot.slane %v9380_v60, 4 }
 0x364   : > { %v2193_v47 = vsel %vm2053_vm9, %v2177_v52, %v2178_v3  ;;  %v3023_v39 = vsel %vm2053_vm9, %v3006_v57, %v3007_v48  ;;  %4328 = vmatprep.subr.bf16.mxu1 %v6226_v7  ;;  %v11609_v3 = vld [vmem:[#allocation28_spill] sm:$0xff]  ;;  %v11613_v52 = vld [vmem:[#allocation25_spill] sm:$0xff] }
 0x365   : > { %v2194_v15 = vsel %vm505_vm0, %v2157_v12, %v2193_v47  ;;  %v3158_v51 = vpop.permute.xlu0 %3157  ;;  %v9476_v33 = vsel %vm1431_vm5, %v2989_v6, %v3023_v39  ;;  %4329 = vmatpush1.bf16.msra.mxu1 %v6225_v45  ;;  %v9478_v30 = vpop.permute.xlu1 %2978  ;;  %v11610_v36 = vpack.c.bf16 %v11608_v18, %v11609_v3  ;;  %v11612_v6 = vld [vmem:[#allocation37_spill] sm:$0xff] }
 0x366   : > { %v3173_v9 = vrot.slane %v3158_v51, 4  ;;  %4330 = vmatprep.subr.bf16.mxu1 %v11604_v13  ;;  %v6224_v11 = vcombine.high %v9363_v25, %v2194_v15  ;;  %v6223_v10 = vcombine.low %v9363_v25, %v2194_v15  ;;  %v3001_v12 = vrot.slane %v9478_v30, 4 }
 0x367   : > { %v11614_v57 = vpack.c.bf16 %v11612_v6, %v11613_v52 }
 0x368   : > { %v3190_v44 = vsel %vm2053_vm9, %v3172_v21, %v3173_v9  ;;  %v3192_v62 = vsel %vm1632_vm6, %v3158_v51, %v3173_v9  ;;  %4182 = vmatprep.subr.bf16.mxu0 %v6224_v11 }
 0x369   : > { %v3191_v56 = vsel %vm1632_vm6, %v9365_v16, %v3190_v44  ;;  %3218 = vst.msk [vmem:[#allocation3 + $0x2e0] sm:$0xff] %vm9030_vm11, %v3192_v62  ;;  %v3164_v26 = vpop.permute.xlu0 %3163  ;;  %4183 = vmatpush1.bf16.msra.mxu0 %v6223_v10  ;;  %4331 = vmatpush1.bf16.msra.mxu1 %v11607_v24  ;;  %v9496_v25 = vpop.permute.xlu1 %2984  ;;  %v11611_v16 = vpack.c.bf16 %v8826_v31, %v8788_v49  ;;  %v3169_v62 = vrot.slane %v9418_v50, 4 }
 0x36a   : > { %v3176_v21 = vrot.slane %v3164_v26, 4  ;;  %4184 = vmatprep.subr.bf16.mxu0 %v11610_v36  ;;  %v11615_v49 = vpack.c.bf16 %v8824_v53, %v8767_v22 }
 0x36b   : > { %4332 = vmatprep.subr.bf16.mxu1 %v11611_v16 }
 0x36c   : > { %v3195_v58 = vsel %vm2053_vm9, %v3175_v2, %v3176_v21  ;;  %v3197_v20 = vsel %vm1632_vm6, %v3164_v26, %v3176_v21 }
 0x36d   : > { %v3196_v17 = vsel %vm1632_vm6, %v9380_v60, %v3195_v58  ;;  %3221 = vst.msk [vmem:[#allocation3 + $0x2f8] sm:$0xff] %vm9030_vm11, %v3197_v20  ;;  %v3160_v8 = vpop.permute.xlu0 %3159  ;;  %4185 = vmatpush1.bf16.msra.mxu0 %v11614_v57  ;;  %4333 = vmatpush1.bf16.msra.mxu1 %v11615_v49  ;;  %v2977_v31 = vpop.permute.xlu1 %2976  ;;  %v11616_v60 = vpack.c.bf16 %v8809_v34, %v8765_v35 }
 0x36e   : > { %v3174_v45 = vrot.slane %v3160_v8, 4  ;;  %v3000_v7 = vrot.slane %v2977_v31, 4  ;;  %v6303_v47 = vcombine.low %v3191_v56, %v3196_v17  ;;  %v6304_v39 = vcombine.high %v3191_v56, %v3196_v17 }
 0x36f   : > { %4186 = vmatprep.subr.bf16.mxu0 %v11616_v60  ;;  %v11617_v35 = vpack.c.bf16 %v8807_v23, %v8751_v19 }
 0x370   : > { %v3193_v15 = vsel %vm2053_vm9, %v3174_v45, %v3175_v2  ;;  %v3012_v51 = vsel %vm2053_vm9, %v3000_v7, %v3001_v12  ;;  %4334 = vmatprep.subr.bf16.mxu1 %v6304_v39  ;;  %v3010_v7 = vrot.slane %v9457_v38, 4 }
 0x371   : > { %v3194_v9 = vsel %vm1632_vm6, %v3160_v8, %v3193_v15  ;;  %v3146_v22 = vpop.permute.xlu0 %3145  ;;  %v9527_v53 = vsel %vm1431_vm5, %v2977_v31, %v3012_v51  ;;  %4335 = vmatpush2.bf16.msra.mxu1 %v6303_v47  ;;  %v9529_v28 = vpop.permute.xlu1 %2825  ;;  %4187 = vmatpush1.bf16.msra.mxu0 %v11617_v35 }
 0x372   : > { %v3167_v34 = vrot.slane %v3146_v22, 4  ;;  %v6302_v29 = vcombine.high %v9402_v40, %v3194_v9  ;;  %v6301_v13 = vcombine.low %v9402_v40, %v3194_v9  ;;  %v2842_v37 = vrot.slane %v9529_v28, 4 }
 0x374   : > { %v3180_v11 = vsel %vm2053_vm9, %v3166_v59, %v3167_v34  ;;  %v3182_v10 = vsel %vm1632_vm6, %v3146_v22, %v3167_v34  ;;  %4188 = vmatprep.subr.bf16.mxu0 %v6302_v29 }
 0x375   : > { %v3181_v44 = vsel %vm1632_vm6, %v9404_v54, %v3180_v11  ;;  %3212 = vst.msk [vmem:[#allocation3 + $0x2b0] sm:$0xff] %vm9030_vm11, %v3182_v10  ;;  %v3152_v19 = vpop.permute.xlu0 %3151  ;;  %v9544_v23 = vpop.permute.xlu1 %2831  ;;  %4189 = vmatpush2.bf16.msra.mxu0 %v6301_v13 }
 0x376   : > { %v3170_v40 = vrot.slane %v3152_v19, 4 }
 0x378   : > { %v3185_v56 = vsel %vm2053_vm9, %v3169_v62, %v3170_v40  ;;  %v3187_v59 = vsel %vm1632_vm6, %v3152_v19, %v3170_v40 }
 0x379   : > { %v3186_v26 = vsel %vm1632_vm6, %v9418_v50, %v3185_v56  ;;  %3215 = vst.msk [vmem:[#allocation3 + $0x2c8] sm:$0xff] %vm9030_vm11, %v3187_v59  ;;  %v3148_v54 = vpop.permute.xlu0 %3147  ;;  %v2824_v4 = vpop.permute.xlu1 %2823 }
 0x37a   : > { %v3168_v24 = vrot.slane %v3148_v54, 4  ;;  %v2841_v2 = vrot.slane %v2824_v4, 4  ;;  %v6297_v21 = vcombine.low %v3181_v44, %v3186_v26  ;;  %v6298_v18 = vcombine.high %v3181_v44, %v3186_v26 }
 0x37c   : > { %v3183_v3 = vsel %vm2053_vm9, %v3168_v24, %v3169_v62  ;;  %v2858_v36 = vsel %vm2053_vm9, %v2841_v2, %v2842_v37  ;;  %4336 = vmatprep.subr.bf16.mxu1 %v6298_v18  ;;  %v3511_v2 = vld [vmem:[%s11122_s4] sm:$0xff] }
 0x37d   : > { %v3184_v50 = vsel %vm1632_vm6, %v3148_v54, %v3183_v3  ;;  %v2993_v16 = vpop.permute.xlu0 %2992  ;;  %v9560_v58 = vsel %vm1229_vm4, %v2824_v4, %v2858_v36  ;;  %4337 = vmatpush2.bf16.msra.mxu1 %v6297_v21  ;;  %v9562_v20 = vpop.permute.xlu1 %2813  ;;  %v3004_v4 = vrot.slane %v9496_v25, 4  ;;  %3521 = vperm.xlu1 %6622, %v3511_v2  }
 0x37e   : > { %v3008_v17 = vrot.slane %v2993_v16, 4  ;;  %v6296_v8 = vcombine.high %v9440_v61, %v3184_v50  ;;  %v6295_v6 = vcombine.low %v9440_v61, %v3184_v50  ;;  %v2836_v39 = vrot.slane %v9562_v20, 4 }
 0x380   : > { %v3025_v52 = vsel %vm2053_vm9, %v3007_v48, %v3008_v17  ;;  %v3027_v57 = vsel %vm1431_vm5, %v2993_v16, %v3008_v17  ;;  %4190 = vmatprep.subr.bf16.mxu0 %v6296_v8 }
 0x381   : > { %v3026_v49 = vsel %vm1431_vm5, %v9442_v42, %v3025_v52  ;;  %3053 = vst.msk [vmem:[#allocation3 + $0x280] sm:$0xff] %vm9030_vm11, %v3027_v57  ;;  %v2999_v31 = vpop.permute.xlu0 %2998  ;;  %v9574_v45 = vpop.permute.xlu1 %2819  ;;  %4191 = vmatpush2.bf16.msra.mxu0 %v6295_v6 }
 0x382   : > { %v3011_v61 = vrot.slane %v2999_v31, 4 }
 0x384   : > { %v3030_v60 = vsel %vm2053_vm9, %v3010_v7, %v3011_v61  ;;  %v3032_v48 = vsel %vm1431_vm5, %v2999_v31, %v3011_v61 }
 0x385   : > { %v3031_v47 = vsel %vm1431_vm5, %v9457_v38, %v3030_v60  ;;  %3056 = vst.msk [vmem:[#allocation3 + $0x298] sm:$0xff] %vm9030_vm11, %v3032_v48  ;;  %v2995_v42 = vpop.permute.xlu0 %2994  ;;  %v2812_v15 = vpop.permute.xlu1 %2811 }
 0x386   : > { %v3009_v51 = vrot.slane %v2995_v42, 4  ;;  %v2835_v9 = vrot.slane %v2812_v15, 4  ;;  %v6291_v22 = vcombine.low %v3026_v49, %v3031_v47  ;;  %v6292_v35 = vcombine.high %v3026_v49, %v3031_v47 }
 0x388   : > { %v3028_v34 = vsel %vm2053_vm9, %v3009_v51, %v3010_v7  ;;  %v2847_v29 = vsel %vm2053_vm9, %v2835_v9, %v2836_v39  ;;  %4338 = vmatprep.subr.bf16.mxu1 %v6292_v35  ;;  %v2845_v51 = vrot.slane %v9544_v23, 4 }
 0x389   : > { %v3029_v38 = vsel %vm1431_vm5, %v2995_v42, %v3028_v34  ;;  %v2981_v13 = vpop.permute.xlu0 %2980  ;;  %v9590_v11 = vsel %vm1229_vm4, %v2812_v15, %v2847_v29  ;;  %4339 = vmatpush2.bf16.msra.mxu1 %v6291_v22  ;;  %v9592_v10 = vpop.permute.xlu1 %2660 }
 0x38a   : > { %v3002_v44 = vrot.slane %v2981_v13, 4  ;;  %v6290_v19 = vcombine.high %v9476_v33, %v3029_v38  ;;  %v6289_v62 = vcombine.low %v9476_v33, %v3029_v38  ;;  %v2677_v18 = vrot.slane %v9592_v10, 4 }
 0x38c   : > { %v3015_v40 = vsel %vm2053_vm9, %v3001_v12, %v3002_v44  ;;  %v3017_v56 = vsel %vm1431_vm5, %v2981_v13, %v3002_v44  ;;  %4192 = vmatprep.subr.bf16.mxu0 %v6290_v19 }
 0x38d   : > { %v3016_v59 = vsel %vm1431_vm5, %v9478_v30, %v3015_v40  ;;  %3047 = vst.msk [vmem:[#allocation3 + $0x250] sm:$0xff] %vm9030_vm11, %v3017_v56  ;;  %v2987_v26 = vpop.permute.xlu0 %2986  ;;  %v9604_v54 = vpop.permute.xlu1 %2666  ;;  %4193 = vmatpush2.bf16.msra.mxu0 %v6289_v62 }
 0x38e   : > { %v3005_v33 = vrot.slane %v2987_v26, 4 }
 0x390   : > { %v3020_v24 = vsel %vm2053_vm9, %v3004_v4, %v3005_v33  ;;  %v3022_v12 = vsel %vm1431_vm5, %v2987_v26, %v3005_v33 }
 0x391   : > { %v3021_v30 = vsel %vm1431_vm5, %v9496_v25, %v3020_v24  ;;  %3050 = vst.msk [vmem:[#allocation3 + $0x268] sm:$0xff] %vm9030_vm11, %v3022_v12  ;;  %v2983_v21 = vpop.permute.xlu0 %2982  ;;  %v2659_v3 = vpop.permute.xlu1 %2658 }
 0x392   : > { %v3003_v36 = vrot.slane %v2983_v21, 4  ;;  %v2676_v50 = vrot.slane %v2659_v3, 4  ;;  %v6285_v16 = vcombine.low %v3016_v59, %v3021_v30  ;;  %v6286_v17 = vcombine.high %v3016_v59, %v3021_v30 }
 0x394   : > { %v3018_v8 = vsel %vm2053_vm9, %v3003_v36, %v3004_v4  ;;  %v2693_v6 = vsel %vm2053_vm9, %v2676_v50, %v2677_v18  ;;  %4340 = vmatprep.subr.bf16.mxu1 %v6286_v17  ;;  %v2839_v17 = vrot.slane %v9574_v45, 4 }
 0x395   : > { %v3019_v25 = vsel %vm1431_vm5, %v2983_v21, %v3018_v8  ;;  %v2828_v52 = vpop.permute.xlu0 %2827  ;;  %v9623_v57 = vsel %vm1048_vm3, %v2659_v3, %v2693_v6  ;;  %4341 = vmatpush2.bf16.msra.mxu1 %v6285_v16  ;;  %v9625_v49 = vpop.permute.xlu1 %2648  ;;  %v3518_v6 = vld [vmem:[%s11122_s4 + $0x38] sm:$0xff] }
 0x396   : > { %v2843_v31 = vrot.slane %v2828_v52, 4  ;;  %v6284_v7 = vcombine.high %v9527_v53, %v3019_v25  ;;  %v6283_v61 = vcombine.low %v9527_v53, %v3019_v25  ;;  %v3513_v53 = vld [vmem:[%s11122_s4 + $0x10] sm:$0xff]  ;;  %v2671_v29 = vrot.slane %v9625_v49, 4 }
 0x397   : > { %3531 = vperm.xlu1 %6622, %v3513_v53  }
 0x398   : > { %v2860_v60 = vsel %vm2053_vm9, %v2842_v37, %v2843_v31  ;;  %v2862_v48 = vsel %vm1229_vm4, %v2828_v52, %v2843_v31  ;;  %4194 = vmatprep.subr.bf16.mxu0 %v6284_v7 }
 0x399   : > { %v2861_v47 = vsel %vm1229_vm4, %v9529_v28, %v2860_v60  ;;  %2888 = vst.msk [vmem:[#allocation3 + $0x220] sm:$0xff] %vm9030_vm11, %v2862_v48  ;;  %v2834_v42 = vpop.permute.xlu0 %2833  ;;  %v9637_v15 = vpop.permute.xlu1 %2654  ;;  %4195 = vmatpush2.bf16.msra.mxu0 %v6283_v61  ;;  %v3514_v28 = vld [vmem:[%s11122_s4 + $0x18] sm:$0xff] }
 0x39a   : > { %v2846_v37 = vrot.slane %v2834_v42, 4 }
 0x39b   : > { %3536 = vperm.xlu1 %6622, %v3514_v28  }
 0x39c   : > { %v2865_v9 = vsel %vm2053_vm9, %v2845_v51, %v2846_v37  ;;  %v2867_v22 = vsel %vm1229_vm4, %v2834_v42, %v2846_v37 }
 0x39d   : > { %v2866_v35 = vsel %vm1229_vm4, %v9544_v23, %v2865_v9  ;;  %2891 = vst.msk [vmem:[#allocation3 + $0x238] sm:$0xff] %vm9030_vm11, %v2867_v22  ;;  %v2830_v34 = vpop.permute.xlu0 %2829  ;;  %v2647_v38 = vpop.permute.xlu1 %2646 }
 0x39e   : > { %v2844_v13 = vrot.slane %v2830_v34, 4  ;;  %v2670_v44 = vrot.slane %v2647_v38, 4  ;;  %v6279_v19 = vcombine.low %v2861_v47, %v2866_v35  ;;  %v6280_v62 = vcombine.high %v2861_v47, %v2866_v35 }
 0x3a0   : > { %v2863_v40 = vsel %vm2053_vm9, %v2844_v13, %v2845_v51  ;;  %v2682_v56 = vsel %vm2053_vm9, %v2670_v44, %v2671_v29  ;;  %4342 = vmatprep.subr.bf16.mxu1 %v6280_v62 }
 0x3a1   : > { %v2864_v23 = vsel %vm1229_vm4, %v2830_v34, %v2863_v40  ;;  %v2816_v59 = vpop.permute.xlu0 %2815  ;;  %v9659_v26 = vsel %vm1048_vm3, %v2647_v38, %v2682_v56  ;;  %4343 = vmatpush2.bf16.msra.mxu1 %v6279_v19  ;;  %v3323_v4 = vpop.permute.xlu1 %3322  ;;  %v2680_v34 = vrot.slane %v9604_v54, 4 }
 0x3a2   : > { %v2837_v33 = vrot.slane %v2816_v59, 4  ;;  %v3338_v24 = vrot.slane %v3323_v4, 4  ;;  %v6278_v12 = vcombine.high %v9560_v58, %v2864_v23  ;;  %v6277_v2 = vcombine.low %v9560_v58, %v2864_v23 }
 0x3a4   : > { %v2850_v30 = vsel %vm2053_vm9, %v2836_v39, %v2837_v33  ;;  %v2852_v21 = vsel %vm1229_vm4, %v2816_v59, %v2837_v33  ;;  %v3355_v3 = vsel %vm2053_vm9, %v3337_v5, %v3338_v24  ;;  %v3357_v36 = vsel %vm1833_vm7, %v3323_v4, %v3338_v24  ;;  %4196 = vmatprep.subr.bf16.mxu0 %v6278_v12  ;;  %v3516_v5 = vld [vmem:[%s11122_s4 + $0x28] sm:$0xff] }
 0x3a5   : > { %v2851_v50 = vsel %vm1229_vm4, %v9562_v20, %v2850_v30  ;;  %2882 = vst.msk [vmem:[#allocation3 + $0x1f0] sm:$0xff] %vm9030_vm11, %v2852_v21  ;;  %v2822_v58 = vpop.permute.xlu0 %2821  ;;  %v9677_v16 = vsel %vm1833_vm7, %v9075_v41, %v3355_v3  ;;  %3383 = vst.msk [vmem:[#allocation3 + $0x340] sm:$0xff] %vm9030_vm11, %v3357_v36  ;;  %v3311_v39 = vpop.permute.xlu1 %3310  ;;  %4197 = vmatpush2.bf16.msra.mxu0 %v6277_v2  ;;  %3546 = vperm.xlu1 %6622, %v3516_v5   ;;  %v2674_v30 = vrot.slane %v9637_v15, 4  ;;  %v6869_v5 = vld [vmem:[#allocation3 + $0x164] ss:$24 sps:$4 sm:$0xff]  }
 0x3a6   : > { %v2840_v20 = vrot.slane %v2822_v58, 4  ;;  %v3332_v8 = vrot.slane %v3311_v39, 4 }
 0x3a8   : > { %v2855_v41 = vsel %vm2053_vm9, %v2839_v17, %v2840_v20  ;;  %v2857_v25 = vsel %vm1229_vm4, %v2822_v58, %v2840_v20  ;;  %v3345_v52 = vsel %vm2053_vm9, %v3331_v27, %v3332_v8  ;;  %v3347_v31 = vsel %vm1833_vm7, %v3311_v39, %v3332_v8 }
 0x3a9   : > { %v2856_v7 = vsel %vm1229_vm4, %v9574_v45, %v2855_v41  ;;  %2885 = vst.msk [vmem:[#allocation3 + $0x208] sm:$0xff] %vm9030_vm11, %v2857_v25  ;;  %v2818_v61 = vpop.permute.xlu0 %2817  ;;  %v9700_v60 = vsel %vm1833_vm7, %v9157_v46, %v3345_v52  ;;  %3377 = vst.msk [vmem:[#allocation3 + $0x310] sm:$0xff] %vm9030_vm11, %v3347_v31  ;;  %3556 = vperm.xlu1 %6622, %v3518_v6   ;;  %v9748_v25 = vld [vmem:[#allocation4 + $0x1c] ss:$12 sps:$4 sm:$0xff]   ;;  %v6867_v52 = vld [vmem:[#allocation3 + $0x160] ss:$24 sps:$4 sm:$0xff]  }
 0x3aa   : > { %v2838_v48 = vrot.slane %v2818_v61, 4  ;;  %v6273_v47 = vcombine.low %v2851_v50, %v2856_v7  ;;  %v6274_v42 = vcombine.high %v2851_v50, %v2856_v7 }
 0x3ac   : > { %v2853_v27 = vsel %vm2053_vm9, %v2838_v48, %v2839_v17  ;;  %4344 = vmatprep.subr.bf16.mxu1 %v6274_v42  ;;  %v9743_v17 = vld [vmem:[#allocation4] ss:$12 sps:$4 sm:$0xff]  }
 0x3ad   : > { %v2854_v45 = vsel %vm1229_vm4, %v2818_v61, %v2853_v27  ;;  %v2663_v53 = vpop.permute.xlu0 %2662  ;;  %4345 = vmatpush2.bf16.msra.mxu1 %v6273_v47  ;;  %v6875_v61 = vld [vmem:[#allocation3 + $0x134] ss:$24 sps:$4 sm:$0xff]   ;;  %v6873_v27 = vld [vmem:[#allocation3 + $0x130] ss:$24 sps:$4 sm:$0xff]  }
 0x3ae   : > { %v2678_v51 = vrot.slane %v2663_v53, 4  ;;  %v6272_v37 = vcombine.high %v9590_v11, %v2854_v45  ;;  %v6271_v46 = vcombine.low %v9590_v11, %v2854_v45 }
 0x3b0   : > { %v2695_v9 = vsel %vm2053_vm9, %v2677_v18, %v2678_v51  ;;  %v2697_v22 = vsel %vm1048_vm3, %v2663_v53, %v2678_v51  ;;  %4198 = vmatprep.subr.bf16.mxu0 %v6272_v37  ;;  %v6878_v53 = vld [vmem:[#allocation3 + $0x104] ss:$24 sps:$4 sm:$0xff]  }
 0x3b1   : > { %v2696_v28 = vsel %vm1048_vm3, %v9592_v10, %v2695_v9  ;;  %2723 = vst.msk [vmem:[#allocation3 + $0x1c0] sm:$0xff] %vm9030_vm11, %v2697_v22  ;;  %v2669_v35 = vpop.permute.xlu0 %2668  ;;  %4199 = vmatpush2.bf16.msra.mxu0 %v6271_v46  ;;  %v9767_v51 = vld [vmem:[#allocation4 + $0x18] ss:$12 sps:$4 sm:$0xff]   ;;  %v9776_v9 = vld [vmem:[#allocation4 + $0x34] ss:$12 sps:$4 sm:$0xff]  }
 0x3b2   : > { %v2681_v38 = vrot.slane %v2669_v35, 4  ;;  %v6876_v46 = vld [vmem:[#allocation3 + $0x100] ss:$24 sps:$4 sm:$0xff]   ;;  %v6884_v22 = vld [vmem:[#allocation3 + $0xd4] ss:$24 sps:$4 sm:$0xff]  }
 0x3b4   : > { %v2700_v11 = vsel %vm2053_vm9, %v2680_v34, %v2681_v38  ;;  %v2702_v13 = vsel %vm1048_vm3, %v2669_v35, %v2681_v38  ;;  %v9784_v35 = vld [vmem:[#allocation4 + $0x4c] ss:$12 sps:$4 sm:$0xff]  }
 0x3b5   : > { %v2701_v18 = vsel %vm1048_vm3, %v9604_v54, %v2700_v11  ;;  %2726 = vst.msk [vmem:[#allocation3 + $0x1d8] sm:$0xff] %vm9030_vm11, %v2702_v13  ;;  %v2665_v44 = vpop.permute.xlu0 %2664  ;;  %v6896_v38 = vld [vmem:[#allocation3 + $0x74] ss:$24 sps:$4 sm:$0xff]   ;;  %v6894_v11 = vld [vmem:[#allocation3 + $0x70] ss:$24 sps:$4 sm:$0xff]  }
 0x3b6   : > { %v2679_v10 = vrot.slane %v2665_v44, 4  ;;  %v6267_v19 = vcombine.low %v2696_v28, %v2701_v18  ;;  %v6268_v62 = vcombine.high %v2696_v28, %v2701_v18  ;;  %v9781_v28 = vld [vmem:[#allocation4 + $0x30] ss:$12 sps:$4 sm:$0xff]   ;;  %v9789_v18 = vld [vmem:[#allocation4 + $0x48] ss:$12 sps:$4 sm:$0xff]  }
 0x3b7   : > { %v6899_v13 = vld [vmem:[#allocation3 + $0x44] ss:$24 sps:$4 sm:$0xff]  }
 0x3b8   : > { %v2698_v40 = vsel %vm2053_vm9, %v2679_v10, %v2680_v34  ;;  %4346 = vmatprep.subr.bf16.mxu1 %v6268_v62  ;;  %v6888_v34 = vld [vmem:[#allocation3 + $0xa0] ss:$24 sps:$4 sm:$0xff]   ;;  %v6905_v10 = vld [vmem:[#allocation3 + $0x14] ss:$24 sps:$4 sm:$0xff]   ;;  %v6908_v62 = vld [vmem:[#allocation3 + $0x2e4] ss:$24 sps:$4 sm:$0xff]  }
 0x3b9   : > { %v2699_v56 = vsel %vm1048_vm3, %v2665_v44, %v2698_v40  ;;  %v2651_v23 = vpop.permute.xlu0 %2650  ;;  %4347 = vmatpush2.bf16.msra.mxu1 %v6267_v19  ;;  %v6897_v44 = vld [vmem:[#allocation3 + $0x40] ss:$24 sps:$4 sm:$0xff]   ;;  %v6903_v19 = vld [vmem:[#allocation3 + $0x10] ss:$24 sps:$4 sm:$0xff]  }
 0x3ba   : > { %v2672_v59 = vrot.slane %v2651_v23, 4  ;;  %v6266_v4 = vcombine.high %v9623_v57, %v2699_v56  ;;  %v6265_v33 = vcombine.low %v9623_v57, %v2699_v56  ;;  %v6906_v40 = vld [vmem:[#allocation3 + $0x2e0] ss:$24 sps:$4 sm:$0xff]   ;;  %v6911_v56 = vld [vmem:[#allocation3 + $0x2b4] ss:$24 sps:$4 sm:$0xff]  }
 0x3bc   : > { %v2685_v54 = vsel %vm2053_vm9, %v2671_v29, %v2672_v59  ;;  %v2687_v24 = vsel %vm1048_vm3, %v2651_v23, %v2672_v59  ;;  %4200 = vmatprep.subr.bf16.mxu0 %v6266_v4  ;;  %v6909_v59 = vld [vmem:[#allocation3 + $0x2b0] ss:$24 sps:$4 sm:$0xff]  }
 0x3bd   : > { %v2686_v12 = vsel %vm1048_vm3, %v9625_v49, %v2685_v54  ;;  %2717 = vst.msk [vmem:[#allocation3 + $0x190] sm:$0xff] %vm9030_vm11, %v2687_v24  ;;  %v2657_v2 = vpop.permute.xlu0 %2656  ;;  %4201 = vmatpush2.bf16.msra.mxu0 %v6265_v33  ;;  %v7053_v4 = vld [vmem:[#allocation4 + $0x8] ss:$12 sps:$4 sm:$0xff]   ;;  %v6915_v24 = vld [vmem:[#allocation3 + $0x280] ss:$24 sps:$4 sm:$0xff]  }
 0x3be   : > { %v2675_v21 = vrot.slane %v2657_v2, 4 }
 0x3c0   : > { %v2690_v57 = vsel %vm2053_vm9, %v2674_v30, %v2675_v21  ;;  %v2692_v3 = vsel %vm1048_vm3, %v2657_v2, %v2675_v21  ;;  %v6918_v2 = vld [vmem:[#allocation3 + $0x250] ss:$24 sps:$4 sm:$0xff]   ;;  %v6923_v21 = vld [vmem:[#allocation3 + $0x224] ss:$24 sps:$4 sm:$0xff]  }
 0x3c1   : > { %v2691_v29 = vsel %vm1048_vm3, %v9637_v15, %v2690_v57  ;;  %2720 = vst.msk [vmem:[#allocation3 + $0x1a8] sm:$0xff] %vm9030_vm11, %v2692_v3  ;;  %v2653_v36 = vpop.permute.xlu0 %2652  ;;  %v6921_v57 = vld [vmem:[#allocation3 + $0x220] ss:$24 sps:$4 sm:$0xff]   ;;  %v6926_v3 = vld [vmem:[#allocation3 + $0x1f4] ss:$24 sps:$4 sm:$0xff]  }
 0x3c2   : > { %v2673_v49 = vrot.slane %v2653_v36, 4  ;;  %v6261_v50 = vcombine.low %v2686_v12, %v2691_v29  ;;  %v6262_v58 = vcombine.high %v2686_v12, %v2691_v29  ;;  %v6920_v12 = vld [vmem:[#allocation3 + $0x254] ss:$24 sps:$4 sm:$0xff]   ;;  %v6924_v29 = vld [vmem:[#allocation3 + $0x1f0] ss:$24 sps:$4 sm:$0xff]  }
 0x3c4   : > { %v2688_v39 = vsel %vm2053_vm9, %v2673_v49, %v2674_v30  ;;  %4348 = vmatprep.subr.bf16.mxu1 %v6262_v58  ;;  %v7054_v30 = vld [vmem:[#allocation4 + $0x20] ss:$12 sps:$4 sm:$0xff]   ;;  %v6929_v49 = vld [vmem:[#allocation3 + $0x1c4] ss:$24 sps:$4 sm:$0xff]  }
 0x3c5   : > { %v2689_v20 = vsel %vm1048_vm3, %v2653_v36, %v2688_v39  ;;  %v3329_v8 = vpop.permute.xlu0 %3328  ;;  %4349 = vmatpush2.bf16.msra.mxu1 %v6261_v50  ;;  %v7055_v36 = vld [vmem:[#allocation4 + $0x38] ss:$12 sps:$4 sm:$0xff]  }
 0x3c6   : > { %v3341_v6 = vrot.slane %v3329_v8, 4  ;;  %4464 = vmatprep.subr.bf16.mxu1 %v6869_v5  ;;  %v6260_v15 = vcombine.high %v9659_v26, %v2689_v20  ;;  %v6259_v41 = vcombine.low %v9659_v26, %v2689_v20  ;;  %v6927_v50 = vld [vmem:[#allocation3 + $0x1c0] ss:$24 sps:$4 sm:$0xff]   ;;  %v7056_v5 = vld [vmem:[#allocation4 + $0x50] ss:$12 sps:$4 sm:$0xff]  }
 0x3c8   : > { %v3360_v31 = vsel %vm2053_vm9, %v3340_v63, %v3341_v6  ;;  %v3362_v7 = vsel %vm1833_vm7, %v3329_v8, %v3341_v6  ;;  %4202 = vmatprep.subr.bf16.mxu0 %v6260_v15  ;;  %4351 = vmatmul.mubr.bf16.vlgmr.msra.gmra.mxu1 %v9743_v17  ;;  %v6932_v58 = vld [vmem:[#allocation3 + $0x194] ss:$24 sps:$4 sm:$0xff]   ;;  %v6930_v39 = vld [vmem:[#allocation3 + $0x190] ss:$24 sps:$4 sm:$0xff]  }
 0x3c9   : > { %v3361_v48 = vsel %vm1833_vm7, %v9098_v1, %v3360_v31  ;;  %3386 = vst.msk [vmem:[#allocation3 + $0x358] sm:$0xff] %vm9030_vm11, %v3362_v7  ;;  %v3317_v26 = vpop.permute.xlu0 %3316  ;;  %4203 = vmatpush2.bf16.msra.mxu0 %v6259_v41  ;;  %4465 = vmatpush1.bf16.msra.mxu1 %v6867_v52 }
 0x3ca   : > { %v3335_v47 = vrot.slane %v3317_v26, 4  ;;  %4466 = vmatprep.subr.bf16.mxu1 %v6875_v61  ;;  %v6315_v42 = vcombine.low %v9677_v16, %v3361_v48  ;;  %v6316_v63 = vcombine.high %v9677_v16, %v3361_v48  ;;  %4360 = vmatprep.mubr.bf16.mxu1 %v9748_v25 }
 0x3cc   : > { %v3350_v45 = vsel %vm2053_vm9, %v3334_v14, %v3335_v47  ;;  %v3352_v1 = vsel %vm1833_vm7, %v3317_v26, %v3335_v47  ;;  %4205 = vmatmul.mubr.bf16.vlgmr.msra.gmra.mxu0 %v9743_v17  ;;  %4403 = vmatprep.subr.bf16.mxu0 %v6316_v63 }
 0x3cd   : > { %v3351_v37 = vsel %vm1833_vm7, %v9172_v32, %v3350_v45  ;;  %3380 = vst.msk [vmem:[#allocation3 + $0x328] sm:$0xff] %vm9030_vm11, %v3352_v1  ;;  %4404 = vmatpush1.bf16.msra.mxu0 %v6315_v42  ;;  %4467 = vmatpush1.bf16.msra.mxu1 %v6873_v27 }
 0x3ce   : > { %4468 = vmatprep.subr.bf16.mxu1 %v6878_v53  ;;  %v6309_v16 = vcombine.low %v9700_v60, %v3351_v37  ;;  %v6310_v14 = vcombine.high %v9700_v60, %v3351_v37  ;;  %4214 = vmatprep.mubr.bf16.mxu0 %v9748_v25  ;;  %v6890_v60 = vld [vmem:[#allocation3 + $0xa4] ss:$24 sps:$4 sm:$0xff]  }
 0x3d0   : > { %4361 = vmatmul.mubr.bf16.gmra.mxu1 %v9767_v51  ;;  %4405 = vmatprep.subr.bf16.mxu0 %v6310_v14  ;;  %v6887_v32 = vld [vmem:[#allocation3 + $0x344] ss:$24 sps:$4 sm:$0xff]   ;;  %v6885_v23 = vld [vmem:[#allocation3 + $0x340] ss:$24 sps:$4 sm:$0xff]  }
 0x3d1   : > { %4406 = vmatpush1.bf16.msra.mxu0 %v6309_v16  ;;  %4469 = vmatpush1.bf16.msra.mxu1 %v6876_v46 }
 0x3d2   : > { %4470 = vmatprep.subr.bf16.mxu1 %v6884_v22  ;;  %4549 = vmatprep.subr.bf16.mxu0 %v6887_v32 }
 0x3d3   : > { %4370 = vmatprep.mubr.bf16.mxu1 %v9776_v9 }
 0x3d4   : > { %4215 = vmatmul.mubr.bf16.gmra.mxu0 %v9767_v51  ;;  %v6914_v33 = vld [vmem:[#allocation3 + $0x314] ss:$24 sps:$4 sm:$0xff]   ;;  %v6912_v54 = vld [vmem:[#allocation3 + $0x310] ss:$24 sps:$4 sm:$0xff]  }
 0x3d5   : > { %4471 = vmatpush1.bf16.msra.mxu1 %v6882_v43  ;;  %4224 = vmatprep.mubr.bf16.mxu0 %v9776_v9 }
 0x3d6   : > { %4472 = vmatprep.subr.bf16.mxu1 %v6890_v60 }
 0x3d8   : > { %4371 = vmatmul.mubr.bf16.gmra.mxu1 %v9781_v28 }
 0x3d9   : > { %4473 = vmatpush1.bf16.msra.mxu1 %v6888_v34  ;;  %4380 = vmatprep.mubr.bf16.mxu1 %v9784_v35 }
 0x3da   : > { %4474 = vmatprep.subr.bf16.mxu1 %v6896_v38 }
 0x3dc   : > { %4225 = vmatmul.mubr.bf16.gmra.mxu0 %v9781_v28 }
 0x3dd   : > { %4475 = vmatpush1.bf16.msra.mxu1 %v6894_v11  ;;  %4234 = vmatprep.mubr.bf16.mxu0 %v9784_v35 }
 0x3de   : > { %4476 = vmatprep.subr.bf16.mxu1 %v6899_v13 }
 0x3e0   : > { %4381 = vmatmul.mubr.bf16.gmra.mxu1 %v9789_v18 }
 0x3e1   : > { %4477 = vmatpush1.bf16.msra.mxu1 %v6897_v44  ;;  %4496 = vmatprep.mubr.bf16.mxu1 %v9391_v0  ;;  %v6917_v0 = vld [vmem:[#allocation3 + $0x284] ss:$24 sps:$4 sm:$0xff]  }
 0x3e2   : > { %4478 = vmatprep.subr.bf16.mxu1 %v6905_v10  ;;  %v9856_v10 = vpop.permute.xlu0 %3526 }
 0x3e4   : > { %4235 = vmatmul.mubr.bf16.gmra.mxu0 %v9789_v18 }
 0x3e5   : > { %4479 = vmatpush1.bf16.msra.mxu1 %v6903_v19  ;;  %4423 = vmatprep.mubr.bf16.mxu0 %v11601_v55 }
 0x3e6   : > { %4480 = vmatprep.subr.bf16.mxu1 %v6908_v62 }
 0x3e9   : > { %4481 = vmatpush2.bf16.msra.mxu1 %v6906_v40 }
 0x3ea   : > { %4482 = vmatprep.subr.bf16.mxu1 %v6911_v56 }
 0x3ec   : > { %6323 = vmatmul.mubr.msk.bf16.vlgmr.msra.gmra.mxu0 %vm4159_vm12, %v7053_v4 }
 0x3ed   : > { %4550 = vmatpush1.bf16.msra.mxu0 %v6885_v23  ;;  %4483 = vmatpush2.bf16.msra.mxu1 %v6909_v59 }
 0x3ee   : > { %4551 = vmatprep.subr.bf16.mxu0 %v6914_v33  ;;  %4484 = vmatprep.subr.bf16.mxu1 %v6917_v0 }
 0x3ef   : > { %4433 = vmatprep.mubr.bf16.mxu0 %v11601_v55 }
 0x3f1   : > { %4552 = vmatpush1.bf16.msra.mxu0 %v6912_v54  ;;  %4485 = vmatpush2.bf16.msra.mxu1 %v6915_v24 }
 0x3f2   : > { %4486 = vmatprep.subr.bf16.mxu1 %v6920_v12 }
 0x3f4   : > { %6324 = vmatmul.mubr.msk.bf16.gmra.mxu0 %vm4159_vm12, %v7054_v30 }
 0x3f5   : > { %4487 = vmatpush2.bf16.msra.mxu1 %v6918_v2  ;;  %4443 = vmatprep.mubr.bf16.mxu0 %v11601_v55 }
 0x3f6   : > { %4488 = vmatprep.subr.bf16.mxu1 %v6923_v21 }
 0x3f9   : > { %4489 = vmatpush2.bf16.msra.mxu1 %v6921_v57 }
 0x3fa   : > { %4490 = vmatprep.subr.bf16.mxu1 %v6926_v3 }
 0x3fc   : > { %6325 = vmatmul.mubr.msk.bf16.gmra.mxu0 %vm4159_vm12, %v7055_v36 }
 0x3fd   : > { %4491 = vmatpush2.bf16.msra.mxu1 %v6924_v29  ;;  %4453 = vmatprep.mubr.bf16.mxu0 %v11601_v55 }
 0x3fe   : > { %4492 = vmatprep.subr.bf16.mxu1 %v6929_v49 }
 0x401   : > { %4493 = vmatpush2.bf16.msra.mxu1 %v6927_v50 }
 0x402   : > { %4494 = vmatprep.subr.bf16.mxu1 %v6932_v58 }
 0x404   : > { %6326 = vmatmul.mubr.msk.bf16.gmra.mxu0 %vm4159_vm12, %v7056_v5 }
 0x405   : > { %4495 = vmatpush2.bf16.msra.mxu1 %v6930_v39  ;;  %4569 = vmatprep.mubr.bf16.mxu0 %v11601_v55 }
 0x408   : > { %4497 = vmatmul.mubr.bf16.vlgmr.msra.gmra.mxu1 %v9743_v17  ;;  %v4279_v17 = vpop.f32.mrf.mxu1 }
 0x409   : > { %4506 = vmatprep.mubr.bf16.mxu1 %v9748_v25 }
 0x40a   : > { %v4281_v20 = vpop.f32.mrf.mxu1 }
 0x40c   : > { %6327 = vmatmul.mubr.msk.bf16.vlgmr.msra.gmra.mxu0 %vm4159_vm12, %v7053_v4  ;;  %v4283_v8 = vpop.f32.mrf.mxu1 }
 0x40d   : > { %4579 = vmatprep.mubr.bf16.mxu0 %v11601_v55 }
 0x40e   : > { %v4285_v6 = vpop.f32.mrf.mxu1 }
 0x410   : > { %4507 = vmatmul.mubr.bf16.gmra.mxu1 %v9767_v51  ;;  %v9818_v15 = vpop.f32.mrf.mxu1 }
 0x411   : > { %4516 = vmatprep.mubr.bf16.mxu1 %v9776_v9 }
 0x412   : > { %v9820_v41 = vpop.f32.mrf.mxu1 }
 0x414   : > { %6328 = vmatmul.mubr.msk.bf16.gmra.mxu0 %vm4159_vm12, %v7054_v30  ;;  %v9822_v25 = vpop.f32.mrf.mxu1 }
 0x415   : > { %4589 = vmatprep.mubr.bf16.mxu0 %v11601_v55 }
 0x416   : > { %v9824_v52 = vpop.f32.mrf.mxu1 }
 0x418   : > { %4517 = vmatmul.mubr.bf16.gmra.mxu1 %v9781_v28  ;;  %v9826_v31 = vpop.f32.mrf.mxu1 }
 0x419   : > { %4526 = vmatprep.mubr.bf16.mxu1 %v9784_v35 }
 0x41a   : > { %v9828_v7 = vpop.f32.mrf.mxu1 }
 0x41c   : > { %6329 = vmatmul.mubr.msk.bf16.gmra.mxu0 %vm4159_vm12, %v7055_v36  ;;  %v9830_v61 = vpop.f32.mrf.mxu1 }
 0x41d   : > { %4599 = vmatprep.mubr.bf16.mxu0 %v11601_v55 }
 0x41e   : > { %v9832_v48 = vpop.f32.mrf.mxu1 }
 0x420   : > { %4527 = vmatmul.mubr.bf16.gmra.mxu1 %v9789_v18  ;;  %v9834_v26 = vpop.f32.mrf.mxu1  ;;  %v9852_v18 = vpop.permute.xlu1 %3521 }
 0x422   : > { %v9836_v47 = vpop.f32.mrf.mxu1 }
 0x424   : > { %6330 = vmatmul.mubr.msk.bf16.gmra.mxu0 %vm4159_vm12, %v7056_v5  ;;  %v9838_v42 = vpop.f32.mrf.mxu1  ;;  %v9862_v23 = vpop.permute.xlu1 %3531 }
 0x426   : > { %v9840_v63 = vpop.f32.mrf.mxu1 }
 0x428   : > { %v9882_v50 = vpop.permute.xlu1 %3536 }
 0x488   : > { %v4352_v27 = vpop.f32.mrf.mxu1 }
 0x489   : > { %v4353_v54 = vadd.f32 %v4352_v27, %v9852_v18 }
 0x48a   : > { %v4354_v53 = vpop.f32.mrf.mxu1 }
 0x48b   : > { %v4355_v21 = vadd.f32 %v4354_v53, %v9852_v18 }
 0x48c   : > { %v4206_v45 = vpop.f32.mrf.mxu0  ;;  %v4356_v16 = vpop.f32.mrf.mxu1 }
 0x48d   : > { %v4207_v59 = vadd.f32 %v4206_v45, %v9852_v18  ;;  %v4357_v57 = vadd.f32 %v4356_v16, %v9856_v10 }
 0x48e   : > { %v4208_v1 = vpop.f32.mrf.mxu0  ;;  %v4358_v9 = vpop.f32.mrf.mxu1 }
 0x48f   : > { %v4209_v19 = vadd.f32 %v4208_v1, %v9852_v18  ;;  %v9877_v3 = vadd.f32 %v4279_v17, %v4207_v59  ;;  %v4359_v5 = vadd.f32 %v4358_v9, %v9856_v10 }
 0x490   : > { %v4210_v51 = vpop.f32.mrf.mxu0  ;;  %v4362_v43 = vpop.f32.mrf.mxu1 }
 0x491   : > { %v9867_v33 = vadd.f32 %v4281_v20, %v4209_v19  ;;  %v4211_v0 = vadd.f32 %v4210_v51, %v9856_v10  ;;  %v4363_v45 = vadd.f32 %v4362_v43, %v9862_v23  ;;  %v11271_v43 = vmax.f32 %v9877_v3, 0.0 }
 0x492   : > { %v4212_v37 = vpop.f32.mrf.mxu0  ;;  %v4364_v35 = vpop.f32.mrf.mxu1 }
 0x493   : > { %v4213_v62 = vadd.f32 %v4212_v37, %v9856_v10  ;;  %v11253_v36 = vmax.f32 %v9867_v33, 0.0  ;;  %v9880_v49 = vadd.f32 %v4283_v8, %v4211_v0  ;;  %v4365_v0 = vadd.f32 %v4364_v35, %v9862_v23  ;;  %v9932_v35 = vpop.permute.xlu1 %3546 }
 0x494   : > { %v4216_v14 = vpop.f32.mrf.mxu0  ;;  %v4366_v11 = vpop.f32.mrf.mxu1 }
 0x495   : > { %v9871_v24 = vadd.f32 %v4285_v6, %v4213_v62  ;;  %v4217_v19 = vadd.f32 %v4216_v14, %v9862_v23 }
 0x496   : > { %v4218_v46 = vpop.f32.mrf.mxu0  ;;  %v4368_v40 = vpop.f32.mrf.mxu1 }
 0x497   : > { %v11282_v20 = vmax.f32 %v9871_v24, 0.0  ;;  %v4219_v6 = vadd.f32 %v4218_v46, %v9862_v23  ;;  %v11272_v46 = vmax.f32 %v9880_v49, 0.0 }
 0x498   : > { %v4220_v22 = vpop.f32.mrf.mxu0  ;;  %v4372_v12 = vpop.f32.mrf.mxu1 }
 0x499   : > { %v4221_v37 = vadd.f32 %v4220_v22, %v9882_v50  ;;  %v9911_v62 = vadd.f32 %v9820_v41, %v4219_v6 }
 0x49a   : > { %v4222_v32 = vpop.f32.mrf.mxu0  ;;  %v4374_v27 = vpop.f32.mrf.mxu1 }
 0x49b   : > { %v4223_v1 = vadd.f32 %v4222_v32, %v9882_v50  ;;  %v9923_v14 = vadd.f32 %v9822_v25, %v4221_v37 }
 0x49c   : > { %v9842_v60 = vpop.f32.mrf.mxu0  ;;  %v4376_v22 = vpop.f32.mrf.mxu1 }
 0x49e   : > { %v9844_v28 = vpop.f32.mrf.mxu0 }
 0x4a0   : > { %v9846_v34 = vpop.f32.mrf.mxu0 }
 0x4a2   : > { %v9848_v38 = vpop.f32.mrf.mxu0 }
 0x4a4   : > { %v9850_v13 = vpop.f32.mrf.mxu0 }
 0x4a6   : > { %v9854_v44 = vpop.f32.mrf.mxu0 }
 0x4a8   : > { %v9860_v56 = vpop.f32.mrf.mxu0 }
 0x4aa   : > { %v9865_v4 = vpop.f32.mrf.mxu0 }
 0x4ac   : > { %v4425_v2 = vpop.f32.mrf.mxu0 }
 0x4ad   : > { %v9873_v30 = vadd.f32 %v4425_v2, %v4353_v54  ;;  %v9915_v54 = vadd.f32 %v9824_v52, %v4223_v1  ;;  %v6638_v52 = vpack.i.bf16 %v11272_v46, %v11271_v43 }
 0x4ae   : > { %v4427_v29 = vpop.f32.mrf.mxu0 }
 0x4af   : > { %v11266_v58 = vmax.f32 %v9873_v30, 0.0  ;;  %v9885_v39 = vadd.f32 %v4427_v29, %v4355_v21  ;;  %v4367_v29 = vadd.f32 %v4366_v11, %v9882_v50  ;;  %v9942_v11 = vadd.f32 %v9818_v15, %v4217_v19 }
 0x4b0   : > { %v4429_v17 = vpop.f32.mrf.mxu0  ;;  %v11258_v15 = vmax.f32 %v9923_v14, 0.0 }
 0x4b1   : > { %v6623_v8 = vpack.i.bf16 %v11266_v58, %v11253_v36  ;;  %v11250_v53 = vmax.f32 %v9885_v39, 0.0  ;;  %v9897_v51 = vadd.f32 %v4429_v17, %v4357_v57 }
 0x4b2   : > { %v4431_v16 = vpop.f32.mrf.mxu0 }
 0x4b3   : > { %v6628_v9 = vpack.i.bf16 %v11282_v20, %v11250_v53  ;;  %v9905_v32 = vadd.f32 %v4431_v16, %v4359_v5  ;;  %6624 = vrot.lane.b32.xlu0 %v6623_v8, %s7115_s29  ;;  %v11277_v2 = vmax.f32 %v9897_v51, 0.0  ;;  %v9926_v5 = vpop.permute.xlu0 %3541  ;;  %v4378_v8 = vpop.f32.mrf.mxu1  ;;  %v4369_v16 = vadd.f32 %v4368_v40, %v9882_v50 }
 0x4b4   : > { %v4435_v59 = vpop.f32.mrf.mxu0  ;;  %v4229_v1 = vadd.f32 %v9844_v28, %v9926_v5  ;;  %v4373_v19 = vadd.f32 %v4372_v12, %v9926_v5 }
 0x4b5   : > { %v11249_v21 = vmax.f32 %v9905_v32, 0.0  ;;  %v9919_v57 = vadd.f32 %v4435_v59, %v4363_v45  ;;  %6629 = vrot.lane.b32.xlu1 %v6628_v9, %s7115_s29  ;;  %v11252_v45 = vmax.f32 %v9911_v62, 0.0  ;;  %v11255_v9 = vmax.f32 %v9915_v54, 0.0  ;;  %v4382_v12 = vpop.f32.mrf.mxu1 }
 0x4b6   : > { %v4437_v41 = vpop.f32.mrf.mxu0  ;;  %v4233_v59 = vadd.f32 %v9848_v38, %v9932_v35 }
 0x4b7   : > { %v6633_v6 = vpack.i.bf16 %v11249_v21, %v11277_v2  ;;  %v11251_v25 = vmax.f32 %v9919_v57, 0.0  ;;  %v9939_v17 = vadd.f32 %v4437_v41, %v4365_v0 }
 0x4b8   : > { %v4439_v37 = vpop.f32.mrf.mxu0  ;;  %v9974_v53 = vadd.f32 %v9832_v48, %v4233_v59  ;;  %v4231_v48 = vadd.f32 %v9846_v34, %v9932_v35  ;;  %v4379_v34 = vadd.f32 %v4378_v8, %v9932_v35 }
 0x4b9   : > { %v11254_v0 = vmax.f32 %v9939_v17, 0.0  ;;  %v9952_v41 = vadd.f32 %v4439_v37, %v4367_v29  ;;  %6634 = vrot.lane.b32.xlu0 %v6633_v6, %s7115_s29  ;;  %6639 = vrot.lane.b32.xlu1 %v6638_v52, %s7115_s29  ;;  %v6643_v40 = vpack.i.bf16 %v11251_v25, %v11252_v45  ;;  %v11263_v6 = vmax.f32 %v9942_v11, 0.0 }
 0x4ba   : > { %v4441_v28 = vpop.f32.mrf.mxu0  ;;  %v4375_v52 = vadd.f32 %v4374_v27, %v9926_v5  ;;  %v9971_v37 = vadd.f32 %v9828_v7, %v4229_v1  ;;  %v4377_v1 = vadd.f32 %v4376_v22, %v9932_v35  ;;  %v4384_v22 = vpop.f32.mrf.mxu1 }
 0x4bb   : > { %v6648_v38 = vpack.i.bf16 %v11255_v9, %v11254_v0  ;;  %v9966_v29 = vadd.f32 %v4441_v28, %v4369_v16  ;;  %v11257_v25 = vmax.f32 %v9952_v41, 0.0  ;;  %v6658_v7 = vpack.i.bf16 %v11258_v15, %v11263_v6  ;;  %v9989_v16 = vpop.permute.xlu1 %3556 }
 0x4bc   : > { %v4445_v21 = vpop.f32.mrf.mxu0  ;;  %v11262_v0 = vmax.f32 %v9974_v53, 0.0  ;;  %v4243_v9 = vadd.f32 %v9865_v4, %v9989_v16  ;;  %v10013_v15 = vadd.f32 %v9830_v61, %v4231_v48 }
 0x4bd   : > { %v11256_v45 = vmax.f32 %v9966_v29, 0.0  ;;  %v9978_v36 = vadd.f32 %v4445_v21, %v4373_v19  ;;  %6644 = vrot.lane.b32.xlu0 %v6643_v40, %s7115_s29  ;;  %6649 = vrot.lane.b32.xlu1 %v6648_v38, %s7115_s29  ;;  %v4227_v19 = vadd.f32 %v9842_v60, %v9926_v5  ;;  %v11259_v40 = vmax.f32 %v9971_v37, 0.0  ;;  %v4386_v60 = vpop.f32.mrf.mxu1 }
 0x4be   : > { %v4447_v27 = vpop.f32.mrf.mxu0 }
 0x4bf   : > { %v6653_v21 = vpack.i.bf16 %v11256_v45, %v11257_v25  ;;  %v11260_v59 = vmax.f32 %v9978_v36, 0.0  ;;  %v9996_v28 = vadd.f32 %v4447_v27, %v4375_v52  ;;  %v10010_v27 = vpop.permute.xlu0 %3551 }
 0x4c0   : > { %v4449_v38 = vpop.f32.mrf.mxu0  ;;  %v4385_v61 = vadd.f32 %v4384_v22, %v10010_v27 }
 0x4c1   : > { %v11261_v45 = vmax.f32 %v9996_v28, 0.0  ;;  %v10006_v25 = vadd.f32 %v4449_v38, %v4377_v1  ;;  %6654 = vrot.lane.b32.xlu0 %v6653_v21, %s7115_s29  ;;  %6659 = vrot.lane.b32.xlu1 %v6658_v7, %s7115_s29  ;;  %v6663_v4 = vpack.i.bf16 %v11260_v59, %v11259_v40  ;;  %v10026_v7 = vadd.f32 %v9826_v31, %v4227_v19  ;;  %v4388_v31 = vpop.f32.mrf.mxu1 }
 0x4c2   : > { %v4451_v52 = vpop.f32.mrf.mxu0  ;;  %v4383_v21 = vadd.f32 %v4382_v12, %v10010_v27  ;;  %v4239_v38 = vadd.f32 %v9854_v44, %v10010_v27  ;;  %v10033_v40 = vadd.f32 %v9840_v63, %v4243_v9  ;;  %v11268_v12 = vmax.f32 %v10013_v15, 0.0 }
 0x4c3   : > { %v6668_v8 = vpack.i.bf16 %v11262_v0, %v11261_v45  ;;  %v10023_v1 = vadd.f32 %v4451_v52, %v4379_v34  ;;  %v11265_v59 = vmax.f32 %v10006_v25, 0.0  ;;  %v11267_v9 = vmax.f32 %v10026_v7, 0.0 }
 0x4c4   : > { %v4455_v48 = vpop.f32.mrf.mxu0  ;;  %v4389_v0 = vadd.f32 %v4388_v31, %v9989_v16 }
 0x4c5   : > { %v11264_v45 = vmax.f32 %v10023_v1, 0.0  ;;  %6669 = vrot.lane.b32.xlu0 %v6668_v8, %s7115_s29  ;;  %6664 = vrot.lane.b32.xlu1 %v6663_v4, %s7115_s29  ;;  %v10044_v22 = vadd.f32 %v4455_v48, %v4383_v21  ;;  %v10050_v8 = vadd.f32 %v9836_v47, %v4239_v38  ;;  %v11270_v4 = vmax.f32 %v10033_v40, 0.0 }
 0x4c6   : > { %v4457_v19 = vpop.f32.mrf.mxu0  ;;  %v4241_v21 = vadd.f32 %v9860_v56, %v9989_v16  ;;  %v6678_v47 = vpack.i.bf16 %v11268_v12, %v11267_v9 }
 0x4c7   : > { %v6673_v44 = vpack.i.bf16 %v11264_v45, %v11265_v59  ;;  %v10046_v63 = vadd.f32 %v4457_v19, %v4385_v61  ;;  %v4387_v61 = vadd.f32 %v4386_v60, %v9989_v16  ;;  %v11276_v38 = vmax.f32 %v10044_v22, 0.0 }
 0x4c8   : > { %v4459_v34 = vpop.f32.mrf.mxu0  ;;  %v4498_v52 = vpop.f32.mrf.mxu1  ;;  %v4237_v59 = vadd.f32 %v9850_v13, %v10010_v27  ;;  %v11273_v58 = vmax.f32 %v10050_v8, 0.0  ;;  %v10079_v12 = vadd.f32 %v9838_v42, %v4241_v21 }
 0x4c9   : > { %v11269_v6 = vmax.f32 %v10046_v63, 0.0  ;;  %6674 = vrot.lane.b32.xlu1 %v6673_v44, %s7115_s29  ;;  %v10070_v45 = vadd.f32 %v4459_v34, %v4387_v61  ;;  %v4499_v9 = vadd.f32 %v4498_v52, %v9852_v18 }
 0x4ca   : > { %v4461_v48 = vpop.f32.mrf.mxu0  ;;  %v4500_v19 = vpop.f32.mrf.mxu1  ;;  %v6683_v13 = vpack.i.bf16 %v11276_v38, %v11273_v58  ;;  %v11279_v46 = vmax.f32 %v10079_v12, 0.0 }
 0x4cb   : > { %v6688_v31 = vpack.i.bf16 %v11270_v4, %v11269_v6  ;;  %v10068_v44 = vadd.f32 %v4461_v48, %v4389_v0  ;;  %v11275_v52 = vmax.f32 %v10070_v45, 0.0  ;;  %v4501_v42 = vadd.f32 %v4500_v19, %v9852_v18 }
 0x4cc   : > { %v4502_v56 = vpop.f32.mrf.mxu1  ;;  %v4571_v60 = vpop.f32.mrf.mxu0 }
 0x4cd   : > { %6689 = vrot.lane.b32.xlu0 %v6688_v31, %s7115_s29  ;;  %6679 = vrot.lane.b32.xlu1 %v6678_v47, %s7115_s29  ;;  %v11274_v0 = vmax.f32 %v10068_v44, 0.0  ;;  %v4503_v48 = vadd.f32 %v4502_v56, %v9856_v10  ;;  %v4572_v6 = vadd.f32 %v4571_v60, %v4499_v9  ;;  %v10089_v47 = vadd.f32 %v9834_v26, %v4237_v59 }
 0x4ce   : > { %v4504_v34 = vpop.f32.mrf.mxu1  ;;  %v4573_v61 = vpop.f32.mrf.mxu0 }
 0x4cf   : > { %v4505_v21 = vadd.f32 %v4504_v34, %v9856_v10  ;;  %v6693_v9 = vpack.i.bf16 %v11274_v0, %v11275_v52  ;;  %v10099_v58 = vmax.f32 %v4572_v6, 0.0  ;;  %v10101_v26 = vadd.f32 %v4573_v61, %v4501_v42 }
 0x4d0   : > { %v4508_v31 = vpop.f32.mrf.mxu1  ;;  %v4575_v4 = vpop.f32.mrf.mxu0  ;;  %v11278_v19 = vmax.f32 %v10089_v47, 0.0 }
 0x4d1   : > { %v4576_v43 = vadd.f32 %v4575_v4, %v4503_v48  ;;  %6684 = vrot.lane.b32.xlu1 %v6683_v13, %s7115_s29  ;;  %11618 = vst [vmem:[#allocation74_spill] sm:$0xff] %v10099_v58  ;;  %v4509_v34 = vadd.f32 %v4508_v31, %v9862_v23  ;;  %v11280_v42 = vmax.f32 %v10101_v26, 0.0 }
 0x4d2   : > { %v4510_v56 = vpop.f32.mrf.mxu1  ;;  %v4577_v60 = vpop.f32.mrf.mxu0 }
 0x4d3   : > { %v10103_v59 = vmax.f32 %v4576_v43, 0.0  ;;  %v10105_v18 = vadd.f32 %v4577_v60, %v4505_v21  ;;  %v6718_v43 = vpack.i.bf16 %v11279_v46, %v11278_v19  ;;  %v4511_v52 = vadd.f32 %v4510_v56, %v9862_v23 }
 0x4d4   : > { %v4512_v10 = vpop.f32.mrf.mxu1  ;;  %v4581_v4 = vpop.f32.mrf.mxu0 }
 0x4d5   : > { %v6698_v13 = vpack.i.bf16 %v10103_v59, %v10099_v58  ;;  %v11281_v48 = vmax.f32 %v10105_v18, 0.0  ;;  %6694 = vrot.lane.b32.xlu1 %v6693_v9, %s7115_s29  ;;  %v4513_v21 = vadd.f32 %v4512_v10, %v9882_v50  ;;  %v4582_v60 = vadd.f32 %v4581_v4, %v4509_v34 }
 0x4d6   : > { %v4514_v6 = vpop.f32.mrf.mxu1  ;;  %v4583_v61 = vpop.f32.mrf.mxu0 }
 0x4d7   : > { %6699 = vrot.lane.b32.xlu0 %v6698_v13, %s7115_s29  ;;  %v6703_v9 = vpack.i.bf16 %v11281_v48, %v11280_v42  ;;  %v4515_v38 = vadd.f32 %v4514_v6, %v9882_v50  ;;  %v10127_v10 = vmax.f32 %v4582_v60, 0.0  ;;  %v10129_v4 = vadd.f32 %v4583_v61, %v4511_v52 }
 0x4d8   : > { %v4518_v31 = vpop.f32.mrf.mxu1  ;;  %v4585_v0 = vpop.f32.mrf.mxu0 }
 0x4d9   : > { %v4586_v2 = vadd.f32 %v4585_v0, %v4513_v21  ;;  %6719 = vrot.lane.b32.xlu1 %v6718_v43, %s7115_s29  ;;  %11619 = vst [vmem:[#allocation76_spill] sm:$0xff] %v10129_v4  ;;  %v4519_v42 = vadd.f32 %v4518_v31, %v9926_v5  ;;  %v11284_v52 = vmax.f32 %v10129_v4, 0.0 }
 0x4da   : > { %v4520_v19 = vpop.f32.mrf.mxu1  ;;  %v4587_v46 = vpop.f32.mrf.mxu0 }
 0x4db   : > { %v10131_v34 = vmax.f32 %v4586_v2, 0.0  ;;  %v10133_v13 = vadd.f32 %v4587_v46, %v4515_v38  ;;  %6704 = vrot.lane.b32.xlu0 %v6703_v9, %s7115_s29  ;;  %v4521_v2 = vadd.f32 %v4520_v19, %v9926_v5 }
 0x4dc   : > { %v4522_v23 = vpop.f32.mrf.mxu1  ;;  %v4591_v56 = vpop.f32.mrf.mxu0 }
 0x4dd   : > { %11620 = vst [vmem:[#allocation73_spill] sm:$0xff] %v10133_v13  ;;  %v6708_v50 = vpack.i.bf16 %v10131_v34, %v10127_v10  ;;  %v11285_v0 = vmax.f32 %v10133_v13, 0.0  ;;  %v4523_v46 = vadd.f32 %v4522_v23, %v9932_v35  ;;  %v4592_v38 = vadd.f32 %v4591_v56, %v4519_v42 }
 0x4de   : > { %v4524_v6 = vpop.f32.mrf.mxu1  ;;  %v4593_v43 = vpop.f32.mrf.mxu0  ;;  %v11630_v13 = vmax.f32 %v9880_v49, 0.0 }
 0x4df   : > { %6709 = vrot.lane.b32.xlu0 %v6708_v50, %s7115_s29  ;;  %v6713_v60 = vpack.i.bf16 %v11285_v0, %v11284_v52  ;;  %v4525_v31 = vadd.f32 %v4524_v6, %v9932_v35  ;;  %v10149_v9 = vadd.f32 %v4593_v43, %v4521_v2  ;;  %v10151_v5 = vmax.f32 %v4592_v38, 0.0 }
 0x4e0   : > { %v4528_v61 = vpop.f32.mrf.mxu1  ;;  %v4595_v21 = vpop.f32.mrf.mxu0 }
 0x4e1   : > { %11621 = vst [vmem:[#allocation90_spill] sm:$0xff] %v10149_v9  ;;  %v4596_v48 = vadd.f32 %v4595_v21, %v4523_v46  ;;  %v11289_v50 = vmax.f32 %v10149_v9, 0.0  ;;  %v4529_v52 = vadd.f32 %v4528_v61, %v10010_v27 }
 0x4e2   : > { %v4530_v20 = vpop.f32.mrf.mxu1  ;;  %v4597_v55 = vpop.f32.mrf.mxu0 }
 0x4e3   : > { %v10153_v19 = vmax.f32 %v4596_v48, 0.0  ;;  %v10155_v42 = vadd.f32 %v4597_v55, %v4525_v31  ;;  %6714 = vrot.lane.b32.xlu0 %v6713_v60, %s7115_s29  ;;  %v4531_v48 = vadd.f32 %v4530_v20, %v10010_v27 }
 0x4e4   : > { %v4532_v23 = vpop.f32.mrf.mxu1  ;;  %v4601_v56 = vpop.f32.mrf.mxu0 }
 0x4e5   : > { %11622 = vst [vmem:[#allocation92_spill] sm:$0xff] %v10155_v42  ;;  %v6723_v35 = vpack.i.bf16 %v10153_v19, %v10151_v5  ;;  %v11290_v6 = vmax.f32 %v10155_v42, 0.0  ;;  %v4533_v46 = vadd.f32 %v4532_v23, %v9989_v16  ;;  %v4602_v38 = vadd.f32 %v4601_v56, %v4529_v52 }
 0x4e6   : > { %v4534_v43 = vpop.f32.mrf.mxu1  ;;  %v4603_v2 = vpop.f32.mrf.mxu0  ;;  %v11628_v42 = vmax.f32 %v9897_v51, 0.0  ;;  %v7004_v51 = vld [vmem:[%s11123_s5 + $0x84] ss:$8 sps:$4 sm:$0xff]  }
 0x4e7   : > { %v6728_v55 = vpack.i.bf16 %v11290_v6, %v11289_v50  ;;  %6724 = vrot.lane.b32.xlu0 %v6723_v35, %s7115_s29  ;;  %v4535_v21 = vadd.f32 %v4534_v43, %v9989_v16  ;;  %v10171_v60 = vadd.f32 %v4603_v2, %v4531_v48  ;;  %v10174_v20 = vmax.f32 %v4602_v38, 0.0  ;;  %v6935_v35 = vld [vmem:[%s11123_s5 + $0x74] ss:$8 sps:$4 sm:$0xff]   ;;  %v6936_v43 = vld [vmem:[%s11123_s5 + $0x60] ss:$8 sps:$4 sm:$0xff]  }
 0x4e8   : > { %v4605_v61 = vpop.f32.mrf.mxu0  ;;  %5738 = vmatprep.subr.bf16.mxu0 %v6935_v35  ;;  %v6938_v2 = vld [vmem:[%s11123_s5 + $0x64] ss:$8 sps:$4 sm:$0xff]   ;;  %v6941_v48 = vld [vmem:[%s11123_s5 + $0x54] ss:$8 sps:$4 sm:$0xff]   ;;  %v6945_v35 = vld [vmem:[%s11123_s5 + $0x30] ss:$8 sps:$4 sm:$0xff]  }
 0x4e9   : > { %11623 = vst [vmem:[#allocation94_spill] sm:$0xff] %v10171_v60  ;;  %v4606_v31 = vadd.f32 %v4605_v61, %v4533_v46  ;;  %6729 = vrot.lane.b32.xlu1 %v6728_v55, %s7115_s29  ;;  %11624 = vst [vmem:[#allocation91_spill] sm:$0xff] %v10174_v20  ;;  %v11287_v23 = vmax.f32 %v10171_v60, 0.0  ;;  %v6939_v55 = vld [vmem:[%s11123_s5 + $0x50] ss:$8 sps:$4 sm:$0xff]  }
 0x4ea   : > { %v4607_v0 = vpop.f32.mrf.mxu0  ;;  %v6957_v46 = vld [vmem:[%s11123_s5 + $0x170] ss:$8 sps:$4 sm:$0xff]   ;;  %v6944_v38 = vld [vmem:[%s11123_s5 + $0x44] ss:$8 sps:$4 sm:$0xff]   ;;  %v6959_v61 = vld [vmem:[%s11123_s5 + $0x174] ss:$8 sps:$4 sm:$0xff]  }
 0x4eb   : > { %v10176_v27 = vmax.f32 %v4606_v31, 0.0  ;;  %v10178_v9 = vadd.f32 %v4607_v0, %v4535_v21  ;;  %v6933_v0 = vld [vmem:[%s11123_s5 + $0x70] ss:$8 sps:$4 sm:$0xff]   ;;  %v6965_v21 = vld [vmem:[%s11123_s5 + $0x164] ss:$8 sps:$4 sm:$0xff]   ;;  %5811 = vmatprep.subr.bf16.mxu1 %v6959_v61 }
 0x4ec   : > { %5739 = vmatpush1.bf16.msra.mxu0 %v6933_v0  ;;  %v6942_v31 = vld [vmem:[%s11123_s5 + $0x40] ss:$8 sps:$4 sm:$0xff]   ;;  %5812 = vmatpush1.bf16.msra.mxu1 %v6957_v46  ;;  %v6971_v0 = vld [vmem:[%s11123_s5 + $0x154] ss:$8 sps:$4 sm:$0xff]   ;;  %v7001_v60 = vld [vmem:[%s11123_s5 + $0x104] ss:$8 sps:$4 sm:$0xff]  }
 0x4ed   : > { %11625 = vst [vmem:[#allocation112_spill] sm:$0xff] %v10176_v27  ;;  %11626 = vst [vmem:[#allocation108_spill] sm:$0xff] %v10178_v9  ;;  %v6733_v52 = vpack.i.bf16 %v10176_v27, %v10174_v20  ;;  %v11288_v56 = vmax.f32 %v10178_v9, 0.0  ;;  %5740 = vmatprep.subr.bf16.mxu0 %v6938_v2  ;;  %5813 = vmatprep.subr.bf16.mxu1 %v6965_v21  ;;  %v6950_v2 = vld [vmem:[%s11123_s5 + $0x24] ss:$8 sps:$4 sm:$0xff]  }
 0x4ee   : > { %v6975_v46 = vld [vmem:[%s11123_s5 + $0x140] ss:$8 sps:$4 sm:$0xff]   ;;  %v6983_v61 = vld [vmem:[%s11123_s5 + $0x134] ss:$8 sps:$4 sm:$0xff]   ;;  %v6951_v21 = vld [vmem:[%s11123_s5 + $0x10] ss:$8 sps:$4 sm:$0xff]  }
 0x4ef   : > { %v6738_v16 = vpack.i.bf16 %v11288_v56, %v11287_v23  ;;  %6734 = vrot.lane.b32.xlu0 %v6733_v52, %s7115_s29  ;;  %v6963_v52 = vld [vmem:[%s11123_s5 + $0x160] ss:$8 sps:$4 sm:$0xff]  }
 0x4f0   : > { %5741 = vmatpush1.bf16.msra.mxu0 %v6936_v43  ;;  %5814 = vmatpush1.bf16.msra.mxu1 %v6963_v52  ;;  %v6969_v43 = vld [vmem:[%s11123_s5 + $0x150] ss:$8 sps:$4 sm:$0xff]   ;;  %v6956_v52 = vld [vmem:[%s11123_s5 + $0x4] ss:$8 sps:$4 sm:$0xff]  }
 0x4f1   : > { %6739 = vrot.lane.b32.xlu1 %v6738_v16, %s7115_s29  ;;  %5742 = vmatprep.subr.bf16.mxu0 %v6941_v48  ;;  %v6947_v16 = vld [vmem:[%s11123_s5 + $0x34] ss:$8 sps:$4 sm:$0xff]   ;;  %v6977_v48 = vld [vmem:[%s11123_s5 + $0x144] ss:$8 sps:$4 sm:$0xff]  }
 0x4f2   : > { %5815 = vmatprep.subr.bf16.mxu1 %v6971_v0  ;;  %v6954_v0 = vld [vmem:[%s11123_s5] ss:$8 sps:$4 sm:$0xff]  }
 0x4f4   : > { %5743 = vmatpush1.bf16.msra.mxu0 %v6939_v55  ;;  %v6948_v55 = vld [vmem:[%s11123_s5 + $0x20] ss:$8 sps:$4 sm:$0xff]   ;;  %5816 = vmatpush1.bf16.msra.mxu1 %v6969_v43  ;;  %v6962_v43 = vld [vmem:[%s11123_s5 + $0xf4] ss:$8 sps:$4 sm:$0xff]  }
 0x4f5   : > { %5744 = vmatprep.subr.bf16.mxu0 %v6944_v38  ;;  %v6953_v38 = vld [vmem:[%s11123_s5 + $0x14] ss:$8 sps:$4 sm:$0xff]   ;;  %5817 = vmatprep.subr.bf16.mxu1 %v6977_v48  ;;  %v6968_v48 = vld [vmem:[%s11123_s5 + $0xe4] ss:$8 sps:$4 sm:$0xff]  }
 0x4f8   : > { %5745 = vmatpush1.bf16.msra.mxu0 %v6942_v31  ;;  %5818 = vmatpush1.bf16.msra.mxu1 %v6975_v46  ;;  %v6981_v31 = vld [vmem:[%s11123_s5 + $0x130] ss:$8 sps:$4 sm:$0xff]   ;;  %v6974_v46 = vld [vmem:[%s11123_s5 + $0xd4] ss:$8 sps:$4 sm:$0xff]  }
 0x4f9   : > { %5746 = vmatprep.subr.bf16.mxu0 %v6947_v16  ;;  %5819 = vmatprep.subr.bf16.mxu1 %v6983_v61  ;;  %v6989_v16 = vld [vmem:[%s11123_s5 + $0x124] ss:$8 sps:$4 sm:$0xff]  }
 0x4fa   : > { %v6980_v61 = vld [vmem:[%s11123_s5 + $0xc4] ss:$8 sps:$4 sm:$0xff]  }
 0x4fc   : > { %5747 = vmatpush1.bf16.msra.mxu0 %v6945_v35  ;;  %5820 = vmatpush1.bf16.msra.mxu1 %v6981_v31  ;;  %v6987_v35 = vld [vmem:[%s11123_s5 + $0x120] ss:$8 sps:$4 sm:$0xff]   ;;  %v6986_v31 = vld [vmem:[%s11123_s5 + $0xb4] ss:$8 sps:$4 sm:$0xff]  }
 0x4fd   : > { %5748 = vmatprep.subr.bf16.mxu0 %v6950_v2  ;;  %5821 = vmatprep.subr.bf16.mxu1 %v6989_v16  ;;  %v6960_v2 = vld [vmem:[%s11123_s5 + $0xf0] ss:$8 sps:$4 sm:$0xff]  }
 0x500   : > { %5749 = vmatpush1.bf16.msra.mxu0 %v6948_v55  ;;  %5822 = vmatpush1.bf16.msra.mxu1 %v6987_v35  ;;  %v6966_v55 = vld [vmem:[%s11123_s5 + $0xe0] ss:$8 sps:$4 sm:$0xff]   ;;  %v6992_v35 = vld [vmem:[%s11123_s5 + $0xa4] ss:$8 sps:$4 sm:$0xff]  }
 0x501   : > { %5750 = vmatprep.subr.bf16.mxu0 %v6953_v38  ;;  %v6972_v38 = vld [vmem:[%s11123_s5 + $0xd0] ss:$8 sps:$4 sm:$0xff]  }
 0x504   : > { %5751 = vmatpush1.bf16.msra.mxu0 %v6951_v21  ;;  %v6978_v21 = vld [vmem:[%s11123_s5 + $0xc0] ss:$8 sps:$4 sm:$0xff]  }
 0x505   : > { %5752 = vmatprep.subr.bf16.mxu0 %v6956_v52  ;;  %v6984_v52 = vld [vmem:[%s11123_s5 + $0xb0] ss:$8 sps:$4 sm:$0xff]  }
 0x508   : > { %5753 = vmatpush1.bf16.msra.mxu0 %v6954_v0 }
 0x509   : > { %5754 = vmatprep.subr.bf16.mxu0 %v6962_v43 }
 0x50c   : > { %5755 = vmatpush2.bf16.msra.mxu0 %v6960_v2  ;;  %v6990_v2 = vld [vmem:[%s11123_s5 + $0xa0] ss:$8 sps:$4 sm:$0xff]  }
 0x50d   : > { %5756 = vmatprep.subr.bf16.mxu0 %v6968_v48  ;;  %v6993_v48 = vld [vmem:[%s11123_s5 + $0x110] ss:$8 sps:$4 sm:$0xff]  }
 0x510   : > { %5757 = vmatpush2.bf16.msra.mxu0 %v6966_v55  ;;  %v6995_v55 = vld [vmem:[%s11123_s5 + $0x114] ss:$8 sps:$4 sm:$0xff]  }
 0x511   : > { %5758 = vmatprep.subr.bf16.mxu0 %v6974_v46  ;;  %5823 = vmatprep.subr.bf16.mxu1 %v6995_v55 }
 0x512   : > { %5824 = vmatpush1.bf16.msra.mxu1 %v6993_v48 }
 0x513   : > { %5825 = vmatprep.subr.bf16.mxu1 %v7001_v60  ;;  %v7005_v60 = vld [vmem:[%s11123_s5 + $0x1f0] ss:$8 sps:$4 sm:$0xff]  }
 0x514   : > { %5759 = vmatpush2.bf16.msra.mxu0 %v6972_v38 }
 0x515   : > { %5760 = vmatprep.subr.bf16.mxu0 %v6980_v61 }
 0x518   : > { %5761 = vmatpush2.bf16.msra.mxu0 %v6978_v21 }
 0x519   : > { %5762 = vmatprep.subr.bf16.mxu0 %v6986_v31 }
 0x51c   : > { %5763 = vmatpush2.bf16.msra.mxu0 %v6984_v52 }
 0x51d   : > { %5764 = vmatprep.subr.bf16.mxu0 %v6992_v35  ;;  %v6998_v35 = vld [vmem:[%s11123_s5 + $0x94] ss:$8 sps:$4 sm:$0xff]  }
 0x520   : > { %5765 = vmatpush2.bf16.msra.mxu0 %v6990_v2  ;;  %v6996_v2 = vld [vmem:[%s11123_s5 + $0x90] ss:$8 sps:$4 sm:$0xff]  }
 0x521   : > { %5766 = vmatprep.subr.bf16.mxu0 %v6998_v35 }
 0x524   : > { %5767 = vmatpush2.bf16.msra.mxu0 %v6996_v2 }
 0x525   : > { %v6625_v16 = vpop.permute.xlu0 %6624  ;;  %5768 = vmatprep.subr.bf16.mxu0 %v7004_v51 }
 0x526   : > { %v6627_v46 = vunpack.i.h.bf16 %v6625_v16  ;;  %v6626_v38 = vunpack.i.l.bf16 %v6625_v16 }
 0x527   : > { %v10304_v0 = vpop.permute.xlu1 %6629 }
 0x528   : > { %v11292_v43 = vunpack.i.l.bf16 %v10304_v0  ;;  %v6632_v61 = vunpack.i.h.bf16 %v10304_v0  ;;  %v4779_v49 = vsel %vm505_vm0, %v6626_v38, %v6627_v46 }
 0x52a   : > { %v4780_v16 = vsel %vm505_vm0, %v6627_v46, %v11292_v43  ;;  %v11627_v43 = vmax.f32 %v9871_v24, 0.0  ;;  %v6999_v24 = vld [vmem:[%s11123_s5 + $0x100] ss:$8 sps:$4 sm:$0xff]  }
 0x52b   : > { %v10320_v21 = vpop.permute.xlu0 %6634  ;;  %v6640_v31 = vpop.permute.xlu1 %6639  ;;  %5826 = vmatpush1.bf16.msra.mxu1 %v6999_v24 }
 0x52c   : > { %v11297_v52 = vunpack.i.h.bf16 %v10320_v21  ;;  %v6636_v23 = vunpack.i.l.bf16 %v10320_v21  ;;  %v6642_v56 = vunpack.i.h.bf16 %v6640_v31  ;;  %v6641_v50 = vunpack.i.l.bf16 %v6640_v31 }
 0x52e   : > { %v4783_v55 = vsel %vm505_vm0, %v6632_v61, %v6636_v23  ;;  %v4784_v6 = vsel %vm505_vm0, %v6636_v23, %v11297_v52  ;;  %v4782_v48 = vsel %vm505_vm0, %v6642_v56, %v6632_v61  ;;  %v4778_v31 = vsel %vm505_vm0, %v6641_v50, %v6626_v38 }
 0x52f   : > { %v10344_v9 = vmax.f32 %v11627_v43, %v4783_v55  ;;  %v10348_v4 = vmax.f32 %v11628_v42, %v4784_v6  ;;  %v10352_v23 = vmax.f32 %v11630_v13, %v4782_v48  ;;  %v11631_v56 = vmax.f32 %v9877_v3, 0.0  ;;  %v6645_v61 = vpop.permute.xlu0 %6644  ;;  %v10358_v35 = vpop.permute.xlu1 %6649  ;;  %v7002_v3 = vld [vmem:[%s11123_s5 + $0x80] ss:$8 sps:$4 sm:$0xff]   ;;  %v7007_v13 = vld [vmem:[%s11123_s5 + $0x1f4] ss:$8 sps:$4 sm:$0xff]  }
 0x530   : > { %v11632_v42 = vmax.f32 %v9873_v30, 0.0  ;;  %v6647_v46 = vunpack.i.h.bf16 %v6645_v61  ;;  %v6646_v38 = vunpack.i.l.bf16 %v6645_v61  ;;  %v11298_v55 = vunpack.i.l.bf16 %v10358_v35  ;;  %5827 = vmatprep.subr.bf16.mxu1 %v7007_v13  ;;  %5769 = vmatpush2.bf16.msra.mxu0 %v7002_v3  ;;  %v7010_v61 = vld [vmem:[%s11123_s5 + $0x1e4] ss:$8 sps:$4 sm:$0xff]  }
 0x531   : > { %11629 = vst [vmem:[#allocation109_spill] sm:$0xff] %v10348_v4  ;;  %v10356_v50 = vmax.f32 %v11631_v56, %v4778_v31  ;;  %v6753_v43 = vpack.i.bf16 %v10348_v4, %v10344_v9  ;;  %v11634_v30 = vmax.f32 %v9867_v33, 0.0  ;;  %v6652_v56 = vunpack.i.h.bf16 %v10358_v35  ;;  %5828 = vmatpush2.bf16.msra.mxu1 %v7005_v60 }
 0x532   : > { %v10375_v6 = vmax.f32 %v11632_v42, %v4780_v16  ;;  %v4787_v13 = vsel %vm505_vm0, %v6646_v38, %v6647_v46  ;;  %v4788_v42 = vsel %vm505_vm0, %v6647_v46, %v11298_v55  ;;  %5829 = vmatprep.subr.bf16.mxu1 %v7010_v61  ;;  %v11636_v60 = vmax.f32 %v9923_v14, 0.0  ;;  %v7013_v46 = vld [vmem:[%s11123_s5 + $0x1d4] ss:$8 sps:$4 sm:$0xff]  }
 0x533   : > { %v6743_v2 = vpack.i.bf16 %v10352_v23, %v10356_v50  ;;  %v10387_v16 = vmax.f32 %v11634_v30, %v4779_v49  ;;  %v10389_v48 = vpop.permute.xlu0 %6654  ;;  %6754 = vrot.lane.b32.xlu1 %v6753_v43, %s7117_s7  ;;  %v6660_v31 = vpop.permute.xlu1 %6659  ;;  %v7008_v49 = vld [vmem:[%s11123_s5 + $0x1e0] ss:$8 sps:$4 sm:$0xff]   ;;  %v11642_v55 = vmax.f32 %v10006_v25, 0.0 }
 0x534   : > { %11633 = vst [vmem:[#allocation114_spill] sm:$0xff] %v10375_v6  ;;  %v6662_v24 = vunpack.i.h.bf16 %v6660_v31  ;;  %v6661_v51 = vunpack.i.l.bf16 %v6660_v31 }
 0x535   : > { %6744 = vrot.lane.b32.xlu0 %v6743_v2, %s7117_s7  ;;  %v6748_v33 = vpack.i.bf16 %v10375_v6, %v10387_v16  ;;  %v11635_v2 = vmax.f32 %v9942_v11, 0.0  ;;  %5830 = vmatpush2.bf16.msra.mxu1 %v7008_v49 }
 0x536   : > { %v4786_v3 = vsel %vm505_vm0, %v6661_v51, %v6646_v38  ;;  %v4790_v43 = vsel %vm505_vm0, %v6662_v24, %v6652_v56  ;;  %v11638_v38 = vmax.f32 %v9911_v62, 0.0  ;;  %v11639_v24 = vmax.f32 %v9919_v57, 0.0  ;;  %5831 = vmatprep.subr.bf16.mxu1 %v7013_v46 }
 0x537   : > { %v10410_v30 = vmax.f32 %v11635_v2, %v4786_v3  ;;  %v10414_v31 = vmax.f32 %v11636_v60, %v4790_v43  ;;  %v6665_v52 = vpop.permute.xlu1 %6664  ;;  %v10428_v61 = vpop.permute.xlu0 %6669  ;;  %v6656_v43 = vunpack.i.l.bf16 %v10389_v48  ;;  %v7014_v60 = vld [vmem:[%s11123_s5 + $0x1c0] ss:$8 sps:$4 sm:$0xff]  }
 0x538   : > { %v10422_v51 = vmax.f32 %v11638_v38, %v4787_v13  ;;  %v10426_v11 = vmax.f32 %v11639_v24, %v4788_v42  ;;  %v6672_v62 = vunpack.i.h.bf16 %v10428_v61  ;;  %v7016_v42 = vld [vmem:[%s11123_s5 + $0x1c4] ss:$8 sps:$4 sm:$0xff]   ;;  %v11641_v24 = vmax.f32 %v9974_v53, 0.0 }
 0x539   : > { %11637 = vst [vmem:[#allocation15_spill] sm:$0xff] %v10414_v31  ;;  %6749 = vrot.lane.b32.xlu0 %v6748_v33, %s7117_s7  ;;  %v6758_v14 = vpack.i.bf16 %v10414_v31, %v10410_v30  ;;  %v7011_v33 = vld [vmem:[%s11123_s5 + $0x1d0] ss:$8 sps:$4 sm:$0xff]   ;;  %v7019_v31 = vld [vmem:[%s11123_s5 + $0x1b4] ss:$8 sps:$4 sm:$0xff]   ;;  %v11644_v53 = vunpack.i.h.bf16 %v10389_v48 }
 0x53a   : > { %11640 = vst [vmem:[#allocation7_spill] sm:$0xff] %v10426_v11  ;;  %v6768_v2 = vpack.i.bf16 %v10426_v11, %v10422_v51  ;;  %5832 = vmatpush2.bf16.msra.mxu1 %v7011_v33  ;;  %v6666_v11 = vunpack.i.l.bf16 %v6665_v52 }
 0x53b   : > { %v10435_v3 = vpop.permute.xlu1 %6674  ;;  %6759 = vrot.lane.b32.xlu1 %v6758_v14, %s7117_s7  ;;  %5833 = vmatprep.subr.bf16.mxu1 %v7016_v42  ;;  %v4792_v42 = vsel %vm505_vm0, %v6656_v43, %v11644_v53 }
 0x53c   : > { %v11303_v57 = vunpack.i.h.bf16 %v10435_v3  ;;  %v6676_v13 = vunpack.i.l.bf16 %v10435_v3 }
 0x53e   : > { %v4799_v46 = vsel %vm505_vm0, %v6672_v62, %v6676_v13  ;;  %v4800_v38 = vsel %vm505_vm0, %v6676_v13, %v11303_v57  ;;  %v4791_v13 = vsel %vm505_vm0, %v6652_v56, %v6656_v43  ;;  %5834 = vmatpush2.bf16.msra.mxu1 %v7014_v60  ;;  %v11645_v56 = vmax.f32 %v10013_v15, 0.0 }
 0x53f   : > { %v10457_v14 = vmax.f32 %v11641_v24, %v4799_v46  ;;  %v10461_v49 = vmax.f32 %v11642_v55, %v4800_v38  ;;  %v6680_v33 = vpop.permute.xlu1 %6679  ;;  %6769 = vrot.lane.b32.xlu1 %v6768_v2, %s7117_s7  ;;  %v7017_v55 = vld [vmem:[%s11123_s5 + $0x1b0] ss:$8 sps:$4 sm:$0xff]   ;;  %v11305_v2 = vunpack.i.l.bf16 %v10428_v61  ;;  %v6667_v46 = vunpack.i.h.bf16 %v6665_v52  ;;  %5835 = vmatprep.subr.bf16.mxu1 %v7019_v31 }
 0x540   : > { %v6682_v6 = vunpack.i.h.bf16 %v6680_v33  ;;  %v6681_v4 = vunpack.i.l.bf16 %v6680_v33  ;;  %v11646_v43 = vmax.f32 %v10026_v7, 0.0  ;;  %v11647_v60 = vmax.f32 %v9915_v54, 0.0  ;;  %v7020_v54 = vld [vmem:[%s11123_s5 + $0x1a0] ss:$8 sps:$4 sm:$0xff]  }
 0x541   : > { %11643 = vst [vmem:[#allocation11_spill] sm:$0xff] %v10461_v49  ;;  %v6783_v25 = vpack.i.bf16 %v10461_v49, %v10457_v14  ;;  %v11648_v52 = vmax.f32 %v9952_v41, 0.0  ;;  %v7123_v41 = vmov 65535  }
 0x542   : > { %v4798_v38 = vsel %vm505_vm0, %v6682_v6, %v6672_v62  ;;  %v4794_v24 = vsel %vm505_vm0, %v6681_v4, %v6666_v11  ;;  %v10490_v57 = vmax.f32 %v11647_v60, %v4791_v13  ;;  %v7022_v4 = vld [vmem:[%s11123_s5 + $0x1a4] ss:$8 sps:$4 sm:$0xff]   ;;  %v10499_v6 = vpop.permute.xlu0 %6689  ;;  %5836 = vmatpush2.bf16.msra.mxu1 %v7017_v55  ;;  %v7025_v62 = vld [vmem:[%s11123_s5 + $0x274] ss:$8 sps:$4 sm:$0xff]   ;;  %v5730_v13 = vsel %vm5728_vm13, 4294967295, %v7123_v41 }
 0x543   : > { %v10481_v33 = vmax.f32 %v11645_v56, %v4798_v38  ;;  %v10485_v53 = vmax.f32 %v11646_v43, %v4794_v24  ;;  %6784 = vrot.lane.b32.xlu1 %v6783_v25, %s7117_s7  ;;  %v10497_v15 = vmax.f32 %v11648_v52, %v4792_v42  ;;  %v10501_v7 = vpop.permute.xlu1 %6684  ;;  %v4796_v42 = vsel %vm505_vm0, %v6667_v46, %v11305_v2 }
 0x544   : > { %v4795_v25 = vsel %vm505_vm0, %v6666_v11, %v6667_v46  ;;  %5837 = vmatprep.subr.bf16.mxu1 %v7022_v4  ;;  %v10515_v38 = vsel %vm5729_vm14, %v5730_v13, 0  ;;  %v11649_v24 = vmax.f32 %v9978_v36, 0.0  ;;  %v11650_v43 = vmax.f32 %v9971_v37, 0.0  ;;  %v7028_v36 = vld [vmem:[%s11123_s5 + $0x194] ss:$8 sps:$4 sm:$0xff]  }
 0x545   : > { %v6763_v31 = vpack.i.bf16 %v10481_v33, %v10485_v53  ;;  %v5736_v55 = vand.u32 %v7025_v62, %v10515_v38  ;;  %v6773_v41 = vpack.i.bf16 %v10497_v15, %v10490_v57  ;;  %v6687_v11 = vunpack.i.h.bf16 %v10501_v7  ;;  %v7026_v37 = vld [vmem:[%s11123_s5 + $0x190] ss:$8 sps:$4 sm:$0xff]  }
 0x546   : > { %v10521_v56 = vmax.f32 %v11649_v24, %v4796_v42  ;;  %v10525_v60 = vmax.f32 %v11650_v43, %v4795_v25  ;;  %5838 = vmatpush2.bf16.msra.mxu1 %v7020_v54  ;;  %v11304_v54 = vunpack.i.l.bf16 %v10499_v6  ;;  %v6686_v62 = vunpack.i.l.bf16 %v10501_v7 }
 0x547   : > { %6764 = vrot.lane.b32.xlu0 %v6763_v31, %s7117_s7  ;;  %5884 = vmatprep.subr.bf16.mxu0 %v5736_v55  ;;  %v10535_v4 = vpop.permute.xlu1 %6694  ;;  %v11652_v24 = vunpack.i.l.bf16 %v10304_v0  ;;  %v7032_v0 = vld [vmem:[%s11123_s5 + $0x180] ss:$8 sps:$4 sm:$0xff]  }
 0x548   : > { %5839 = vmatprep.subr.bf16.mxu1 %v7028_v36  ;;  %v6778_v42 = vpack.i.bf16 %v10521_v56, %v10525_v60  ;;  %v4804_v25 = vsel %vm505_vm0, %v6687_v11, %v11304_v54  ;;  %v11653_v36 = vunpack.i.h.bf16 %v10320_v21  ;;  %v11654_v54 = vmax.f32 %v10044_v22, 0.0 }
 0x549   : > { %v6700_v52 = vpop.permute.xlu0 %6699  ;;  %v11659_v22 = vmax.f32 %v9905_v32, 0.0 }
 0x54a   : > { %v10530_v46 = vunpack.i.l.bf16 %v6700_v52  ;;  %v10537_v31 = vunpack.i.h.bf16 %v6700_v52  ;;  %5840 = vmatpush2.bf16.msra.mxu1 %v7026_v37  ;;  %v10572_v2 = vmax.f32 %v11654_v54, %v4804_v25  ;;  %v11656_v52 = vmax.f32 %v9885_v39, 0.0 }
 0x54b   : > { %6774 = vrot.lane.b32.xlu0 %v6773_v41, %s7117_s7  ;;  %v7034_v41 = vld [vmem:[%s11123_s5 + $0x184] ss:$8 sps:$4 sm:$0xff]   ;;  %v6720_v21 = vpop.permute.xlu1 %6719 }
 0x54c   : > { %11651 = vst [vmem:[#allocation18_spill] sm:$0xff] %v10530_v46  ;;  %v4781_v43 = vsel %vm505_vm0, %v11652_v24, %v10530_v46  ;;  %v4785_v37 = vsel %vm505_vm0, %v11653_v36, %v10537_v31  ;;  %v4803_v24 = vsel %vm505_vm0, %v6686_v62, %v6687_v11  ;;  %5841 = vmatprep.subr.bf16.mxu1 %v7034_v41  ;;  %11655 = vst [vmem:[#allocation17_spill] sm:$0xff] %v10572_v2 }
 0x54d   : > { %v10545_v13 = vpop.permute.xlu0 %6704  ;;  %v10576_v7 = vmax.f32 %v11656_v52, %v4781_v43  ;;  %v10588_v54 = vmax.f32 %v11659_v22, %v4785_v37  ;;  %v11660_v52 = vmax.f32 %v10050_v8, 0.0  ;;  %v6722_v32 = vunpack.i.h.bf16 %v6720_v21 }
 0x54e   : > { %v11657_v36 = vunpack.i.l.bf16 %v10545_v13  ;;  %v11658_v49 = vunpack.i.h.bf16 %v10545_v13  ;;  %5842 = vmatpush2.bf16.msra.mxu1 %v7032_v0  ;;  %v6721_v37 = vunpack.i.l.bf16 %v6720_v21  ;;  %v11662_v8 = vunpack.i.l.bf16 %v10358_v35 }
 0x54f   : > { %6779 = vrot.lane.b32.xlu0 %v6778_v42, %s7117_s7  ;;  %6542 = vmatprep.subr.bf16.mxu1 %v5736_v55 }
 0x550   : > { %v4914_v42 = vsel %vm505_vm0, %v10530_v46, %v11657_v36  ;;  %v4915_v11 = vsel %vm505_vm0, %v10537_v31, %v11658_v49  ;;  %v10596_v36 = vmax.f32 %v11660_v52, %v4803_v24  ;;  %v11309_v46 = vunpack.i.h.bf16 %v10535_v4 }
 0x551   : > { %v6710_v41 = vpop.permute.xlu0 %6709  ;;  %v4938_v39 = vmax.f32 %v10099_v58, %v4914_v42  ;;  %v4940_v25 = vmax.f32 %v10103_v59, %v4915_v11  ;;  %v6696_v49 = vunpack.i.l.bf16 %v10535_v4  ;;  %v6692_v11 = vunpack.i.h.bf16 %v10499_v6 }
 0x552   : > { %v10592_v43 = vunpack.i.h.bf16 %v6710_v41  ;;  %v10600_v0 = vunpack.i.l.bf16 %v6710_v41  ;;  %v11663_v24 = vunpack.i.h.bf16 %v10389_v48  ;;  %v6798_v52 = vpack.i.bf16 %v10572_v2, %v10596_v36 }
 0x553   : > { %v6793_v22 = vpack.i.bf16 %v4940_v25, %v10588_v54  ;;  %v6788_v42 = vpack.i.bf16 %v4938_v39, %v10576_v7  ;;  %v4807_v39 = vsel %vm505_vm0, %v6692_v11, %v6696_v49  ;;  %v4808_v35 = vsel %vm505_vm0, %v6696_v49, %v11309_v46 }
 0x554   : > { %11661 = vst [vmem:[#allocation13_spill] sm:$0xff] %v10600_v0  ;;  %v4789_v55 = vsel %vm505_vm0, %v11662_v8, %v10600_v0  ;;  %v4793_v41 = vsel %vm505_vm0, %v11663_v24, %v10592_v43  ;;  %v4806_v48 = vsel %vm505_vm0, %v6722_v32, %v6692_v11  ;;  %v4802_v8 = vsel %vm505_vm0, %v6721_v37, %v6686_v62 }
 0x555   : > { %v10605_v58 = vpop.permute.xlu0 %6714  ;;  %6794 = vrot.lane.b32.xlu1 %v6793_v22, %s7117_s7  ;;  %6789 = vrot.lane.b32.xlu0 %v6788_v42, %s7117_s7  ;;  %v11664_v24 = vmax.f32 %v9939_v17, 0.0  ;;  %v11665_v46 = vmax.f32 %v9966_v29, 0.0  ;;  %v11666_v11 = vmax.f32 %v10033_v40, 0.0  ;;  %v11667_v17 = vmax.f32 %v10070_v45, 0.0 }
 0x556   : > { %v6717_v21 = vunpack.i.h.bf16 %v10605_v58  ;;  %v11311_v25 = vunpack.i.l.bf16 %v10605_v58  ;;  %v11670_v45 = vunpack.i.l.bf16 %v10428_v61 }
 0x557   : > { %v10637_v49 = vmax.f32 %v11664_v24, %v4789_v55  ;;  %v10641_v2 = vmax.f32 %v11665_v46, %v4793_v41  ;;  %v10654_v55 = vmax.f32 %v11667_v17, %v4808_v35 }
 0x558   : > { %v4916_v22 = vsel %vm505_vm0, %v10600_v0, %v11311_v25  ;;  %v4917_v42 = vsel %vm505_vm0, %v10592_v43, %v6717_v21  ;;  %v10647_v25 = vmax.f32 %v11666_v11, %v4807_v39  ;;  %v11669_v39 = vmax.f32 %v10089_v47, 0.0 }
 0x559   : > { %v4942_v62 = vmax.f32 %v10127_v10, %v4916_v22  ;;  %v4944_v32 = vmax.f32 %v10131_v34, %v4917_v42  ;;  %v6725_v37 = vpop.permute.xlu0 %6724  ;;  %6799 = vrot.lane.b32.xlu1 %v6798_v52, %s7117_s7  ;;  %v11668_v42 = vmax.f32 %v10079_v12, 0.0  ;;  %v11671_v12 = vunpack.i.h.bf16 %v10435_v3 }
 0x55a   : > { %v10649_v0 = vunpack.i.l.bf16 %v6725_v37  ;;  %v10656_v29 = vunpack.i.h.bf16 %v6725_v37  ;;  %v10666_v24 = vmax.f32 %v11669_v39, %v4802_v8  ;;  %v11672_v3 = vmax.f32 %v9996_v28, 0.0 }
 0x55b   : > { %v6730_v46 = vpop.permute.xlu1 %6729  ;;  %v6803_v41 = vpack.i.bf16 %v4942_v62, %v10637_v49  ;;  %v6808_v22 = vpack.i.bf16 %v4944_v32, %v10641_v2  ;;  %v10662_v40 = vmax.f32 %v11668_v42, %v4806_v48  ;;  %v6813_v62 = vpack.i.bf16 %v10654_v55, %v10647_v25 }
 0x55c   : > { %v6732_v52 = vunpack.i.h.bf16 %v6730_v46  ;;  %v6731_v11 = vunpack.i.l.bf16 %v6730_v46  ;;  %v4797_v35 = vsel %vm505_vm0, %v11670_v45, %v10649_v0  ;;  %v4801_v48 = vsel %vm505_vm0, %v11671_v12, %v10656_v29 }
 0x55d   : > { %6809 = vrot.lane.b32.xlu0 %v6808_v22, %s7117_s7  ;;  %6804 = vrot.lane.b32.xlu1 %v6803_v41, %s7117_s7  ;;  %v6818_v37 = vpack.i.bf16 %v10662_v40, %v10666_v24  ;;  %v10690_v17 = vmax.f32 %v11672_v3, %v4797_v35  ;;  %v11673_v41 = vmax.f32 %v10023_v1, 0.0  ;;  %v11676_v45 = vunpack.i.h.bf16 %v10545_v13 }
 0x55e   : > { %v4919_v47 = vsel %vm505_vm0, %v10656_v29, %v6732_v52  ;;  %v4918_v8 = vsel %vm505_vm0, %v10649_v0, %v6731_v11  ;;  %v11677_v12 = vmax.f32 %v10105_v18, 0.0  ;;  %v11678_v35 = vunpack.i.l.bf16 %v10545_v13 }
 0x55f   : > { %v4948_v61 = vmax.f32 %v10153_v19, %v4919_v47  ;;  %v4946_v32 = vmax.f32 %v10151_v5, %v4918_v8  ;;  %v10695_v22 = vmax.f32 %v11673_v41, %v4801_v48  ;;  %v11679_v47 = vmax.f32 %v10101_v26, 0.0 }
 0x560   : > { %v4941_v28 = vmax.f32 %v11677_v12, %v11676_v45  ;;  %v11680_v3 = vunpack.i.l.bf16 %v10499_v6  ;;  %v11681_v18 = vunpack.i.h.bf16 %v10535_v4  ;;  %v11683_v4 = vmax.f32 %v10068_v44, 0.0  ;;  %v11691_v44 = vld [vmem:[#allocation90_spill] sm:$0xff] }
 0x561   : > { %v6735_v46 = vpop.permute.xlu0 %6734  ;;  %6814 = vrot.lane.b32.xlu0 %v6813_v62, %s7117_s7  ;;  %6819 = vrot.lane.b32.xlu1 %v6818_v37, %s7117_s7  ;;  %v4939_v8 = vmax.f32 %v11679_v47, %v11678_v35  ;;  %v6823_v1 = vpack.i.bf16 %v4946_v32, %v10690_v17  ;;  %v6828_v48 = vpack.i.bf16 %v4948_v61, %v10695_v22  ;;  %v11682_v32 = vmax.f32 %v10046_v63, 0.0  ;;  %v11687_v63 = vld [vmem:[#allocation76_spill] sm:$0xff] }
 0x562   : > { %v10697_v42 = vunpack.i.h.bf16 %v6735_v46  ;;  %v10699_v39 = vunpack.i.l.bf16 %v6735_v46 }
 0x563   : > { %v6740_v62 = vpop.permute.xlu1 %6739  ;;  %v6833_v13 = vpack.i.bf16 %v4941_v28, %v4939_v8  ;;  %v11684_v28 = vld [vmem:[#allocation73_spill] sm:$0xff] }
 0x564   : > { %11674 = vst [vmem:[#allocation19_spill] sm:$0xff] %v10697_v42  ;;  %11675 = vst [vmem:[#allocation14_spill] sm:$0xff] %v10699_v39  ;;  %v4805_v37 = vsel %vm505_vm0, %v11680_v3, %v10699_v39  ;;  %v6742_v46 = vunpack.i.h.bf16 %v6740_v62  ;;  %v6741_v41 = vunpack.i.l.bf16 %v6740_v62  ;;  %v4809_v26 = vsel %vm505_vm0, %v11681_v18, %v10697_v42  ;;  %v11689_v18 = vld [vmem:[#allocation92_spill] sm:$0xff] }
 0x565   : > { %6824 = vrot.lane.b32.xlu0 %v6823_v1, %s7117_s7  ;;  %6829 = vrot.lane.b32.xlu1 %v6828_v48, %s7117_s7  ;;  %v10728_v45 = vmax.f32 %v11682_v32, %v4805_v37  ;;  %v10734_v47 = vmax.f32 %v11683_v4, %v4809_v26  ;;  %v11685_v8 = vmax.f32 %v11684_v28, 0.0  ;;  %v11686_v1 = vunpack.i.l.bf16 %v10605_v58  ;;  %v11693_v4 = vld [vmem:[#allocation108_spill] sm:$0xff] }
 0x566   : > { %v4921_v61 = vsel %vm505_vm0, %v10697_v42, %v6742_v46  ;;  %v4920_v6 = vsel %vm505_vm0, %v10699_v39, %v6741_v41  ;;  %v11688_v48 = vmax.f32 %v11687_v63, 0.0  ;;  %v11692_v26 = vmax.f32 %v11691_v44, 0.0  ;;  %v7023_v44 = vld [vmem:[%s11123_s5 + $0x270] ss:$8 sps:$4 sm:$0xff]  }
 0x567   : > { %v4952_v12 = vmax.f32 %v10176_v27, %v4921_v61  ;;  %v4950_v35 = vmax.f32 %v10174_v20, %v4920_v6  ;;  %v4945_v62 = vmax.f32 %v11685_v8, %v6717_v21  ;;  %v11690_v61 = vmax.f32 %v11689_v18, 0.0  ;;  %v11695_v8 = vld [vmem:[#allocation94_spill] sm:$0xff] }
 0x568   : > { %v4943_v3 = vmax.f32 %v11688_v48, %v11686_v1  ;;  %v4947_v32 = vmax.f32 %v11692_v26, %v6731_v11  ;;  %v11694_v58 = vmax.f32 %v11693_v4, 0.0  ;;  %v11696_v1 = vmax.f32 %v11695_v8, 0.0 }
 0x569   : > { %6834 = vrot.lane.b32.xlu0 %v6833_v13, %s7117_s7  ;;  %v6838_v37 = vpack.i.bf16 %v4950_v35, %v10728_v45  ;;  %v4949_v6 = vmax.f32 %v11690_v61, %v6732_v52  ;;  %v6843_v13 = vpack.i.bf16 %v4952_v12, %v10734_v47 }
 0x56a   : > { %v6848_v21 = vpack.i.bf16 %v4945_v62, %v4943_v3  ;;  %v4953_v28 = vmax.f32 %v11694_v58, %v6742_v46  ;;  %v4951_v63 = vmax.f32 %v11696_v1, %v6741_v41 }
 0x56b   : > { %6839 = vrot.lane.b32.xlu1 %v6838_v37, %s7117_s7  ;;  %v6853_v35 = vpack.i.bf16 %v4949_v6, %v4947_v32 }
 0x56c   : > { %v6858_v52 = vpack.i.bf16 %v4953_v28, %v4951_v63  ;;  %v10784_v63 = vand.u32 %v7023_v44, %v10515_v38  ;;  %v10815_v38 = vld [vmem:[%s11123_s5 + $0x244] ss:$8 sps:$4 sm:$0xff]  }
 0x56d   : > { %6844 = vrot.lane.b32.xlu0 %v6843_v13, %s7117_s7 }
 0x56f   : > { %6849 = vrot.lane.b32.xlu1 %v6848_v21, %s7117_s7 }
 0x571   : > { %6854 = vrot.lane.b32.xlu0 %v6853_v35, %s7117_s7  ;;  %v10789_v35 = vld [vmem:[%s11123_s5 + $0x264] ss:$8 sps:$4 sm:$0xff]  }
 0x573   : > { %6859 = vrot.lane.b32.xlu1 %v6858_v52, %s7117_s7 }
 0x5a5   : > { %v10760_v11 = vpop.permute.xlu1 %6754 }
 0x5a6   : > { %v11315_v48 = vunpack.i.h.bf16 %v10760_v11  ;;  %v6756_v62 = vunpack.i.l.bf16 %v10760_v11 }
 0x5a7   : > { %v6745_v12 = vpop.permute.xlu0 %6744 }
 0x5a8   : > { %v6747_v3 = vunpack.i.h.bf16 %v6745_v12  ;;  %v6746_v46 = vunpack.i.l.bf16 %v6745_v12  ;;  %v5104_v41 = vsel %vm867_vm2, %v6756_v62, %v11315_v48 }
 0x5a9   : > { %v5184_v58 = vmax.f32 %v10344_v9, %v5104_v41  ;;  %v10801_v9 = vld [vmem:[%s11123_s5 + $0x254] ss:$8 sps:$4 sm:$0xff]   ;;  %v10825_v41 = vld [vmem:[%s11123_s5 + $0x240] ss:$8 sps:$4 sm:$0xff]  }
 0x5aa   : > { %v5103_v18 = vsel %vm867_vm2, %v6747_v3, %v6756_v62 }
 0x5ab   : > { %v10764_v37 = vpop.permute.xlu0 %6749  ;;  %v5183_v13 = vmax.f32 %v10352_v23, %v5103_v18  ;;  %v10795_v23 = vld [vmem:[%s11123_s5 + $0x260] ss:$8 sps:$4 sm:$0xff]   ;;  %v10831_v18 = vld [vmem:[%s11123_s5 + $0x234] ss:$8 sps:$4 sm:$0xff]  }
 0x5ac   : > { %v11314_v61 = vunpack.i.h.bf16 %v10764_v37  ;;  %v6751_v6 = vunpack.i.l.bf16 %v10764_v37 }
 0x5ad   : > { %v6760_v8 = vpop.permute.xlu1 %6759 }
 0x5ae   : > { %v5098_v26 = vsel %vm867_vm2, %v6746_v46, %v6751_v6  ;;  %v5099_v32 = vsel %vm867_vm2, %v6751_v6, %v11314_v61  ;;  %v6761_v3 = vunpack.i.l.bf16 %v6760_v8  ;;  %v6762_v6 = vunpack.i.h.bf16 %v6760_v8 }
 0x5af   : > { %v5178_v21 = vmax.f32 %v10356_v50, %v5098_v26  ;;  %v5179_v4 = vmax.f32 %v10387_v16, %v5099_v32  ;;  %v10809_v16 = vld [vmem:[%s11123_s5 + $0x250] ss:$8 sps:$4 sm:$0xff]  }
 0x5b1   : > { %v5218_v28 = vpack.c.bf16 %v5183_v13, %v5178_v21  ;;  %v5219_v1 = vpack.c.bf16 %v5184_v58, %v5179_v4  ;;  %v10803_v50 = vpop.permute.xlu1 %6769  ;;  %v11697_v13 = vld [vmem:[#allocation15_spill] sm:$0xff] }
 0x5b2   : > { %v11313_v52 = vunpack.i.h.bf16 %v10803_v50  ;;  %v6771_v12 = vunpack.i.l.bf16 %v10803_v50 }
 0x5b3   : > { %5770 = vmatprep.mubr.bf16.mxu0 %v5219_v1 }
 0x5b4   : > { %5771 = vmatmul.mubr.bf16.vlgmr.msra.gmra.mxu0 %v5218_v28  ;;  %v5108_v44 = vsel %vm867_vm2, %v6761_v3, %v6771_v12  ;;  %v5109_v26 = vsel %vm867_vm2, %v6771_v12, %v11313_v52  ;;  %v10847_v28 = vld [vmem:[%s11123_s5 + $0x230] ss:$8 sps:$4 sm:$0xff]   ;;  %v10858_v3 = vld [vmem:[%s11123_s5 + $0x224] ss:$8 sps:$4 sm:$0xff]  }
 0x5b5   : > { %5885 = vmatpush1.bf16.msra.mxu0 %v10784_v63  ;;  %v10819_v46 = vpop.permute.xlu1 %6784  ;;  %v5189_v12 = vmax.f32 %v10422_v51, %v5109_v26 }
 0x5b6   : > { %5886 = vmatprep.subr.bf16.mxu0 %v10789_v35  ;;  %v6786_v21 = vunpack.i.l.bf16 %v10819_v46 }
 0x5b9   : > { %5887 = vmatpush1.bf16.msra.mxu0 %v10795_v23  ;;  %v6765_v62 = vpop.permute.xlu0 %6764 }
 0x5ba   : > { %5888 = vmatprep.subr.bf16.mxu0 %v10801_v9  ;;  %v6767_v52 = vunpack.i.h.bf16 %v6765_v62  ;;  %v6766_v26 = vunpack.i.l.bf16 %v6765_v62 }
 0x5bd   : > { %5889 = vmatpush1.bf16.msra.mxu0 %v10809_v16  ;;  %v10837_v32 = vpop.permute.xlu0 %6774 }
 0x5be   : > { %5890 = vmatprep.subr.bf16.mxu0 %v10815_v38  ;;  %v11317_v4 = vunpack.i.h.bf16 %v10837_v32  ;;  %v6776_v58 = vunpack.i.l.bf16 %v10837_v32 }
 0x5c0   : > { %v5113_v8 = vsel %vm867_vm2, %v6762_v6, %v6776_v58  ;;  %v5114_v1 = vsel %vm867_vm2, %v6776_v58, %v11317_v4  ;;  %v5188_v6 = vmax.f32 %v10410_v30, %v5108_v44  ;;  %v11698_v58 = vunpack.i.h.bf16 %v10819_v46 }
 0x5c1   : > { %5891 = vmatpush1.bf16.msra.mxu0 %v10825_v41  ;;  %v10860_v61 = vpop.permute.xlu0 %6779  ;;  %v5194_v48 = vmax.f32 %v10490_v57, %v5114_v1  ;;  %v5193_v20 = vmax.f32 %v11697_v13, %v5113_v8  ;;  %v10874_v57 = vld [vmem:[%s11123_s5 + $0x220] ss:$8 sps:$4 sm:$0xff]  }
 0x5c2   : > { %5892 = vmatprep.subr.bf16.mxu0 %v10831_v18  ;;  %v5124_v51 = vsel %vm867_vm2, %v6786_v21, %v11698_v58  ;;  %v6782_v4 = vunpack.i.h.bf16 %v10860_v61  ;;  %v6781_v39 = vunpack.i.l.bf16 %v10860_v61  ;;  %v11699_v58 = vunpack.i.h.bf16 %v10760_v11  ;;  %v10927_v11 = vld [vmem:[%s11123_s5 + $0x200] ss:$8 sps:$4 sm:$0xff]  }
 0x5c3   : > { %v5224_v27 = vpack.c.bf16 %v5194_v48, %v5189_v12  ;;  %v5223_v42 = vpack.c.bf16 %v5193_v20, %v5188_v6  ;;  %v10884_v48 = vld [vmem:[%s11123_s5 + $0x214] ss:$8 sps:$4 sm:$0xff]   ;;  %v5123_v20 = vsel %vm867_vm2, %v6767_v52, %v6786_v21  ;;  %v5204_v13 = vmax.f32 %v10457_v14, %v5124_v51  ;;  %v10905_v14 = vld [vmem:[%s11123_s5 + $0x204] ss:$8 sps:$4 sm:$0xff]  }
 0x5c4   : > { %v5118_v30 = vsel %vm867_vm2, %v6766_v26, %v6781_v39  ;;  %v5119_v44 = vsel %vm867_vm2, %v6781_v39, %v6782_v4  ;;  %v10894_v39 = vld [vmem:[%s11123_s5 + $0x210] ss:$8 sps:$4 sm:$0xff]   ;;  %v11700_v26 = vunpack.i.h.bf16 %v10764_v37 }
 0x5c5   : > { %5893 = vmatpush1.bf16.msra.mxu0 %v10847_v28  ;;  %5780 = vmatprep.mubr.bf16.mxu0 %v5224_v27  ;;  %v5199_v62 = vmax.f32 %v10525_v60, %v5119_v44  ;;  %v5198_v8 = vmax.f32 %v10485_v53, %v5118_v30  ;;  %v5203_v27 = vmax.f32 %v10481_v33, %v5123_v20  ;;  %v11701_v20 = vld [vmem:[#allocation109_spill] sm:$0xff] }
 0x5c6   : > { %5894 = vmatprep.subr.bf16.mxu0 %v10858_v3  ;;  %5781 = vmatmul.mubr.bf16.gmra.mxu0 %v5223_v42 }
 0x5c7   : > { %v5229_v1 = vpack.c.bf16 %v5204_v13, %v5199_v62  ;;  %v10896_v12 = vpop.permute.xlu1 %6794  ;;  %v10898_v6 = vpop.permute.xlu0 %6789  ;;  %v5228_v21 = vpack.c.bf16 %v5203_v27, %v5198_v8  ;;  %v11702_v13 = vld [vmem:[#allocation114_spill] sm:$0xff] }
 0x5c8   : > { %v6797_v53 = vunpack.i.h.bf16 %v10896_v12  ;;  %v6796_v60 = vunpack.i.l.bf16 %v10896_v12  ;;  %v11321_v42 = vunpack.i.h.bf16 %v10898_v6  ;;  %v6791_v52 = vunpack.i.l.bf16 %v10898_v6 }
 0x5c9   : > { %5895 = vmatpush1.bf16.msra.mxu0 %v10874_v57  ;;  %5790 = vmatprep.mubr.bf16.mxu0 %v5229_v1  ;;  %v4869_v12 = vmax.f32 %v10131_v34, %v10592_v43 }
 0x5ca   : > { %5896 = vmatprep.subr.bf16.mxu0 %v10884_v48  ;;  %v5105_v33 = vsel %vm867_vm2, %v11699_v58, %v6796_v60  ;;  %v5106_v51 = vsel %vm867_vm2, %v6796_v60, %v6797_v53  ;;  %v5100_v30 = vsel %vm867_vm2, %v11700_v26, %v6791_v52  ;;  %v5101_v44 = vsel %vm867_vm2, %v6791_v52, %v11321_v42 }
 0x5cb   : > { %v5185_v62 = vmax.f32 %v11701_v20, %v5105_v33  ;;  %v5180_v8 = vmax.f32 %v11702_v13, %v5100_v30  ;;  %v10931_v1 = vpop.permute.xlu1 %6799  ;;  %v5181_v37 = vmax.f32 %v10576_v7, %v5101_v44  ;;  %v5186_v27 = vmax.f32 %v10588_v54, %v5106_v51 }
 0x5cc   : > { %v11323_v52 = vunpack.i.h.bf16 %v10931_v1  ;;  %v6801_v58 = vunpack.i.l.bf16 %v10931_v1  ;;  %v11703_v44 = vunpack.i.h.bf16 %v10837_v32  ;;  %v11704_v13 = vunpack.i.h.bf16 %v10803_v50 }
 0x5cd   : > { %5897 = vmatpush1.bf16.msra.mxu0 %v10894_v39  ;;  %v5220_v60 = vpack.c.bf16 %v5185_v62, %v5180_v8  ;;  %v5221_v26 = vpack.c.bf16 %v5186_v27, %v5181_v37 }
 0x5ce   : > { %5898 = vmatprep.subr.bf16.mxu0 %v10905_v14  ;;  %5791 = vmatmul.mubr.bf16.gmra.mxu0 %v5228_v21  ;;  %v5129_v21 = vsel %vm867_vm2, %v6801_v58, %v11323_v52 }
 0x5cf   : > { %v10938_v42 = vpop.permute.xlu0 %6809  ;;  %v10941_v33 = vpop.permute.xlu1 %6804  ;;  %5843 = vmatprep.mubr.bf16.mxu1 %v5221_v26 }
 0x5d0   : > { %v11322_v30 = vunpack.i.h.bf16 %v10938_v42  ;;  %v6811_v7 = vunpack.i.l.bf16 %v10938_v42  ;;  %v6807_v54 = vunpack.i.h.bf16 %v10941_v33  ;;  %v6806_v51 = vunpack.i.l.bf16 %v10941_v33  ;;  %5844 = vmatmul.mubr.bf16.vlgmr.msra.gmra.mxu1 %v5220_v60 }
 0x5d1   : > { %5899 = vmatpush1.bf16.msra.mxu0 %v10927_v11  ;;  %6550 = vmatpush1.bf16.msra.mxu1 %v10784_v63 }
 0x5d2   : > { %v5115_v20 = vsel %vm867_vm2, %v11703_v44, %v6811_v7  ;;  %v5116_v62 = vsel %vm867_vm2, %v6811_v7, %v11322_v30  ;;  %v5110_v8 = vsel %vm867_vm2, %v11704_v13, %v6806_v51  ;;  %v5111_v37 = vsel %vm867_vm2, %v6806_v51, %v6807_v54  ;;  %6543 = vmatprep.subr.bf16.mxu1 %v10789_v35  ;;  %v11705_v44 = vld [vmem:[#allocation7_spill] sm:$0xff] }
 0x5d3   : > { %v10963_v27 = vpop.permute.xlu0 %6814  ;;  %v5196_v32 = vmax.f32 %v10641_v2, %v5116_v62  ;;  %v5195_v60 = vmax.f32 %v10497_v15, %v5115_v20  ;;  %v6820_v26 = vpop.permute.xlu1 %6819  ;;  %v5191_v50 = vmax.f32 %v10637_v49, %v5111_v37  ;;  %v5190_v13 = vmax.f32 %v11705_v44, %v5110_v8 }
 0x5d4   : > { %v6817_v7 = vunpack.i.h.bf16 %v10963_v27  ;;  %v6816_v63 = vunpack.i.l.bf16 %v10963_v27  ;;  %v6822_v30 = vunpack.i.h.bf16 %v6820_v26  ;;  %v6821_v52 = vunpack.i.l.bf16 %v6820_v26 }
 0x5d5   : > { %6551 = vmatpush1.bf16.msra.mxu1 %v10795_v23  ;;  %v5226_v2 = vpack.c.bf16 %v5196_v32, %v5191_v50  ;;  %v5225_v35 = vpack.c.bf16 %v5195_v60, %v5190_v13  ;;  %v5209_v49 = vmax.f32 %v10596_v36, %v5129_v21  ;;  %v11707_v13 = vld [vmem:[#allocation18_spill] sm:$0xff]  ;;  %v4879_v27 = vmax.f32 %v10153_v19, %v10656_v29 }
 0x5d6   : > { %v5134_v51 = vsel %vm867_vm2, %v6816_v63, %v6817_v7  ;;  %v5128_v15 = vsel %vm867_vm2, %v6821_v52, %v6801_v58  ;;  %v5133_v20 = vsel %vm867_vm2, %v6822_v30, %v6816_v63  ;;  %6544 = vmatprep.subr.bf16.mxu1 %v10801_v9 }
 0x5d7   : > { %v10978_v62 = vpop.permute.xlu0 %6824  ;;  %v5214_v8 = vmax.f32 %v10647_v25, %v5134_v51  ;;  %v10983_v37 = vpop.permute.xlu1 %6829  ;;  %5853 = vmatprep.mubr.bf16.mxu1 %v5226_v2  ;;  %v5208_v32 = vmax.f32 %v10666_v24, %v5128_v15  ;;  %v5213_v52 = vmax.f32 %v10662_v40, %v5133_v20  ;;  %v11706_v24 = vunpack.i.h.bf16 %v10819_v46  ;;  %v11708_v51 = vld [vmem:[#allocation74_spill] sm:$0xff] }
 0x5d8   : > { %v6827_v26 = vunpack.i.h.bf16 %v10978_v62  ;;  %v6826_v23 = vunpack.i.l.bf16 %v10978_v62  ;;  %v6832_v58 = vunpack.i.h.bf16 %v10983_v37  ;;  %v6831_v30 = vunpack.i.l.bf16 %v10983_v37  ;;  %5854 = vmatmul.mubr.bf16.gmra.mxu1 %v5225_v35  ;;  %v11709_v35 = vld [vmem:[#allocation11_spill] sm:$0xff] }
 0x5d9   : > { %v5234_v9 = vpack.c.bf16 %v5214_v8, %v5209_v49  ;;  %6552 = vmatpush1.bf16.msra.mxu1 %v10809_v16  ;;  %v5233_v21 = vpack.c.bf16 %v5213_v52, %v5208_v32  ;;  %v4859_v46 = vmax.f32 %v10103_v59, %v10537_v31  ;;  %v4854_v2 = vmax.f32 %v11708_v51, %v11707_v13  ;;  %v11716_v13 = vld [vmem:[#allocation19_spill] sm:$0xff]  ;;  %v11717_v51 = vld [vmem:[#allocation112_spill] sm:$0xff] }
 0x5da   : > { %v5120_v36 = vsel %vm867_vm2, %v6782_v4, %v6826_v23  ;;  %v5121_v25 = vsel %vm867_vm2, %v6826_v23, %v6827_v26  ;;  %v5125_v40 = vsel %vm867_vm2, %v11706_v24, %v6831_v30  ;;  %v5126_v60 = vsel %vm867_vm2, %v6831_v30, %v6832_v58  ;;  %6545 = vmatprep.subr.bf16.mxu1 %v10815_v38  ;;  %v11712_v30 = vld [vmem:[#allocation13_spill] sm:$0xff] }
 0x5db   : > { %v6835_v63 = vpop.permute.xlu0 %6834  ;;  %5800 = vmatprep.mubr.bf16.mxu0 %v5234_v9  ;;  %v5201_v61 = vmax.f32 %v10690_v17, %v5121_v25  ;;  %v5206_v16 = vmax.f32 %v10695_v22, %v5126_v60  ;;  %v5200_v44 = vmax.f32 %v10521_v56, %v5120_v36  ;;  %v5205_v15 = vmax.f32 %v11709_v35, %v5125_v40  ;;  %v11714_v40 = vld [vmem:[#allocation17_spill] sm:$0xff]  ;;  %v11718_v35 = vld [vmem:[#allocation14_spill] sm:$0xff] }
 0x5dc   : > { %v6837_v4 = vunpack.i.h.bf16 %v6835_v63  ;;  %v6836_v50 = vunpack.i.l.bf16 %v6835_v63  ;;  %5801 = vmatmul.mubr.bf16.gmra.mxu0 %v5233_v21  ;;  %v11710_v20 = vmov 0   ;;  %v11711_v38 = vunpack.i.h.bf16 %v10898_v6 }
 0x5dd   : > { %5916 = vmatprep.mubr.bf16.mxu0 %v11710_v20  ;;  %v6840_v49 = vpop.permute.xlu1 %6839  ;;  %6553 = vmatpush1.bf16.msra.mxu1 %v10825_v41  ;;  %v5231_v56 = vpack.c.bf16 %v5206_v16, %v5201_v61  ;;  %v5230_v6 = vpack.c.bf16 %v5205_v15, %v5200_v44  ;;  %v4864_v9 = vmax.f32 %v10127_v10, %v11712_v30  ;;  %v11713_v41 = vunpack.i.h.bf16 %v10931_v1  ;;  %v11719_v15 = vld [vmem:[#allocation91_spill] sm:$0xff] }
 0x5de   : > { %v5107_v17 = vsel %vm867_vm2, %v6797_v53, %v6837_v4  ;;  %v5102_v22 = vsel %vm867_vm2, %v11711_v38, %v6836_v50  ;;  %v6842_v8 = vunpack.i.h.bf16 %v6840_v49  ;;  %v6841_v23 = vunpack.i.l.bf16 %v6840_v49  ;;  %6546 = vmatprep.subr.bf16.mxu1 %v10831_v18 }
 0x5df   : > { %v5187_v59 = vmax.f32 %v4859_v46, %v5107_v17  ;;  %v5182_v31 = vmax.f32 %v4854_v2, %v5102_v22  ;;  %v6845_v32 = vpop.permute.xlu0 %6844  ;;  %5863 = vmatprep.mubr.bf16.mxu1 %v5231_v56  ;;  %v4889_v2 = vmax.f32 %v11717_v51, %v11716_v13  ;;  %v4884_v37 = vmax.f32 %v11719_v15, %v11718_v35 }
 0x5e0   : > { %v6847_v52 = vunpack.i.h.bf16 %v6845_v32  ;;  %v6846_v53 = vunpack.i.l.bf16 %v6845_v32  ;;  %v5130_v25 = vsel %vm867_vm2, %v11713_v41, %v6841_v23  ;;  %v5131_v21 = vsel %vm867_vm2, %v6841_v23, %v6842_v8  ;;  %5864 = vmatmul.mubr.bf16.gmra.mxu1 %v5230_v6 }
 0x5e1   : > { %v5222_v36 = vpack.c.bf16 %v5187_v59, %v5182_v31  ;;  %v6850_v43 = vpop.permute.xlu1 %6849  ;;  %v5211_v24 = vmax.f32 %v10728_v45, %v5131_v21  ;;  %v5210_v60 = vmax.f32 %v11714_v40, %v5130_v25  ;;  %6554 = vmatpush1.bf16.msra.mxu1 %v10847_v28 }
 0x5e2   : > { %v5135_v18 = vsel %vm867_vm2, %v6817_v7, %v6846_v53  ;;  %v5136_v34 = vsel %vm867_vm2, %v6846_v53, %v6847_v52  ;;  %v6852_v10 = vunpack.i.h.bf16 %v6850_v43  ;;  %v6851_v63 = vunpack.i.l.bf16 %v6850_v43  ;;  %6547 = vmatprep.subr.bf16.mxu1 %v10858_v3 }
 0x5e3   : > { %v6855_v1 = vpop.permute.xlu0 %6854  ;;  %v5216_v61 = vmax.f32 %v10734_v47, %v5136_v34  ;;  %v5215_v4 = vmax.f32 %v10654_v55, %v5135_v18  ;;  %v4874_v7 = vmax.f32 %v10151_v5, %v10649_v0  ;;  %v11715_v47 = vunpack.i.h.bf16 %v10938_v42 }
 0x5e4   : > { %v6857_v50 = vunpack.i.h.bf16 %v6855_v1  ;;  %v6856_v16 = vunpack.i.l.bf16 %v6855_v1  ;;  %6411 = vmatmul.mubr.msk.bf16.vlgmr.msra.gmra.mxu0 %vm505_vm0, %v5222_v36  ;;  %v5112_v45 = vsel %vm867_vm2, %v6807_v54, %v6851_v63 }
 0x5e5   : > { %v5117_v55 = vsel %vm867_vm2, %v11715_v47, %v6852_v10  ;;  %v5236_v28 = vpack.c.bf16 %v5216_v61, %v5211_v24  ;;  %v5235_v44 = vpack.c.bf16 %v5215_v4, %v5210_v60  ;;  %5926 = vmatprep.mubr.bf16.mxu0 %v11710_v20  ;;  %v5192_v19 = vmax.f32 %v4864_v9, %v5112_v45  ;;  %v6860_v3 = vpop.permute.xlu1 %6859 }
 0x5e6   : > { %v5197_v5 = vmax.f32 %v4869_v12, %v5117_v55  ;;  %v5127_v0 = vsel %vm867_vm2, %v6832_v58, %v6857_v50  ;;  %v5122_v29 = vsel %vm867_vm2, %v6827_v26, %v6856_v16  ;;  %v6862_v42 = vunpack.i.h.bf16 %v6860_v3  ;;  %6555 = vmatpush1.bf16.msra.mxu1 %v10874_v57 }
 0x5e7   : > { %v5207_v33 = vmax.f32 %v4879_v27, %v5127_v0  ;;  %v5202_v54 = vmax.f32 %v4874_v7, %v5122_v29  ;;  %v6861_v46 = vunpack.i.l.bf16 %v6860_v3  ;;  %5873 = vmatprep.mubr.bf16.mxu1 %v5236_v28  ;;  %6548 = vmatprep.subr.bf16.mxu1 %v10884_v48 }
 0x5e8   : > { %v5227_v58 = vpack.c.bf16 %v5197_v5, %v5192_v19  ;;  %v5137_v26 = vsel %vm867_vm2, %v6847_v52, %v6862_v42  ;;  %5874 = vmatmul.mubr.bf16.gmra.mxu1 %v5235_v44 }
 0x5e9   : > { %v5132_v62 = vsel %vm867_vm2, %v6842_v8, %v6861_v46  ;;  %v5232_v17 = vpack.c.bf16 %v5207_v33, %v5202_v54  ;;  %v5217_v22 = vmax.f32 %v4889_v2, %v5137_v26  ;;  %5946 = vmatprep.mubr.bf16.mxu1 %v11710_v20 }
 0x5ea   : > { %v5212_v38 = vmax.f32 %v4884_v37, %v5132_v62  ;;  %6556 = vmatpush1.bf16.msra.mxu1 %v10894_v39 }
 0x5eb   : > { %6549 = vmatprep.subr.bf16.mxu1 %v10905_v14 }
 0x5ec   : > { %v5237_v57 = vpack.c.bf16 %v5217_v22, %v5212_v38  ;;  %6412 = vmatmul.mubr.msk.bf16.gmra.mxu0 %vm505_vm0, %v5227_v58 }
 0x5ed   : > { %5936 = vmatprep.mubr.bf16.mxu0 %v11710_v20 }
 0x5ee   : > { %6557 = vmatpush1.bf16.msra.mxu1 %v10927_v11 }
 0x5f1   : > { %6414 = vmatmul.mubr.msk.bf16.vlgmr.msra.gmra.mxu1 %vm505_vm0, %v5237_v57 }
 0x5f4   : > { %6413 = vmatmul.mubr.msk.bf16.gmra.mxu0 %vm505_vm0, %v5232_v17  ;;  %vm11085_vm0 = vmor %vm6005_vm15, %vm2053_vm9 }
 0x674   : > { %v5772_v48 = vpop.f32.mrf.mxu0 }
 0x676   : > { %v5774_v49 = vpop.f32.mrf.mxu0 }
 0x678   : > { %v5776_v56 = vpop.f32.mrf.mxu0 }
 0x67a   : > { %v5778_v59 = vpop.f32.mrf.mxu0 }
 0x686   : > { %v5782_v39 = vpop.f32.mrf.mxu0 }
 0x688   : > { %v5784_v31 = vpop.f32.mrf.mxu0 }
 0x68a   : > { %v5786_v8 = vpop.f32.mrf.mxu0 }
 0x68c   : > { %v5788_v23 = vpop.f32.mrf.mxu0 }
 0x68e   : > { %v5792_v32 = vpop.f32.mrf.mxu0 }
 0x690   : > { %v5845_v14 = vpop.f32.mrf.mxu1  ;;  %v5794_v12 = vpop.f32.mrf.mxu0 }
 0x691   : > { %v5846_v60 = vadd.f32 %v5845_v14, %v5772_v48 }
 0x692   : > { %v5847_v52 = vpop.f32.mrf.mxu1  ;;  %v11074_v20 = vpop.f32.mrf.mxu0 }
 0x693   : > { %v5848_v10 = vadd.f32 %v5847_v52, %v5774_v49 }
 0x694   : > { %v5849_v53 = vpop.f32.mrf.mxu1  ;;  %v11076_v30 = vpop.f32.mrf.mxu0 }
 0x695   : > { %v5850_v16 = vadd.f32 %v5849_v53, %v5776_v56 }
 0x696   : > { %v5851_v11 = vpop.f32.mrf.mxu1 }
 0x697   : > { %v5852_v45 = vadd.f32 %v5851_v11, %v5778_v59 }
 0x698   : > { %v5855_v6 = vpop.f32.mrf.mxu1 }
 0x699   : > { %v5856_v29 = vadd.f32 %v5855_v6, %v5782_v39 }
 0x69a   : > { %v5857_v9 = vpop.f32.mrf.mxu1 }
 0x69b   : > { %v5858_v3 = vadd.f32 %v5857_v9, %v5784_v31 }
 0x69c   : > { %v5802_v36 = vpop.f32.mrf.mxu0  ;;  %v5859_v41 = vpop.f32.mrf.mxu1 }
 0x69d   : > { %v5860_v35 = vadd.f32 %v5859_v41, %v5786_v8 }
 0x69e   : > { %v5804_v25 = vpop.f32.mrf.mxu0  ;;  %v5861_v21 = vpop.f32.mrf.mxu1 }
 0x69f   : > { %v5862_v15 = vadd.f32 %v5861_v21, %v5788_v23 }
 0x6a0   : > { %v5806_v18 = vpop.f32.mrf.mxu0  ;;  %v5865_v34 = vpop.f32.mrf.mxu1 }
 0x6a1   : > { %v5866_v57 = vadd.f32 %v5865_v34, %v5792_v32 }
 0x6a2   : > { %v5808_v43 = vpop.f32.mrf.mxu0  ;;  %v5867_v24 = vpop.f32.mrf.mxu1 }
 0x6a3   : > { %v5868_v56 = vadd.f32 %v5867_v24, %v5794_v12 }
 0x6a4   : > { %v5918_v40 = vpop.f32.mrf.mxu0  ;;  %v5869_v63 = vpop.f32.mrf.mxu1 }
 0x6a5   : > { %v5919_v61 = vadd.f32 %v5918_v40, %v5846_v60  ;;  %v5870_v32 = vadd.f32 %v5869_v63, %v11074_v20 }
 0x6a6   : > { %v5920_v1 = vpop.f32.mrf.mxu0  ;;  %v5871_v27 = vpop.f32.mrf.mxu1 }
 0x6a7   : > { %v5921_v4 = vadd.f32 %v5920_v1, %v5848_v10 }
 0x6a8   : > { %v5922_v50 = vpop.f32.mrf.mxu0  ;;  %v5875_v55 = vpop.f32.mrf.mxu1 }
 0x6a9   : > { %v6534_v47 = vpack.c.bf16 %v5921_v4, %v5919_v61  ;;  %v5923_v44 = vadd.f32 %v5922_v50, %v5850_v16  ;;  %v5876_v26 = vadd.f32 %v5875_v55, %v5802_v36  ;;  %v5872_v36 = vadd.f32 %v5871_v27, %v11076_v30 }
 0x6aa   : > { %v5924_v28 = vpop.f32.mrf.mxu0  ;;  %v5877_v5 = vpop.f32.mrf.mxu1 }
 0x6ab   : > { %6007 = vst.msk [vmem:[%s11082_s24] sm:$0xff] %vm11085_vm0, %v6534_v47  ;;  %v5925_v19 = vadd.f32 %v5924_v28, %v5852_v45  ;;  %v5878_v17 = vadd.f32 %v5877_v5, %v5804_v25 }
 0x6ac   : > { %v5928_v0 = vpop.f32.mrf.mxu0  ;;  %v5879_v54 = vpop.f32.mrf.mxu1 }
 0x6ad   : > { %v6535_v33 = vpack.c.bf16 %v5925_v19, %v5923_v44  ;;  %v5929_v46 = vadd.f32 %v5928_v0, %v5856_v29  ;;  %v5880_v8 = vadd.f32 %v5879_v54, %v5806_v18 }
 0x6ae   : > { %v5930_v42 = vpop.f32.mrf.mxu0  ;;  %v5881_v51 = vpop.f32.mrf.mxu1 }
 0x6af   : > { %6008 = vst.msk [vmem:[%s11082_s24 + $0x8] sm:$0xff] %vm11085_vm0, %v6535_v33  ;;  %v5931_v13 = vadd.f32 %v5930_v42, %v5858_v3  ;;  %v5882_v52 = vadd.f32 %v5881_v51, %v5808_v43 }
 0x6b0   : > { %v5932_v2 = vpop.f32.mrf.mxu0 }
 0x6b1   : > { %v6536_v37 = vpack.c.bf16 %v5931_v13, %v5929_v46  ;;  %v5948_v58 = vpop.f32.mrf.mxu1  ;;  %v5933_v38 = vadd.f32 %v5932_v2, %v5860_v35 }
 0x6b2   : > { %v5934_v62 = vpop.f32.mrf.mxu0  ;;  %v5949_v59 = vadd.f32 %v5948_v58, %v5876_v26 }
 0x6b3   : > { %6009 = vst.msk [vmem:[%s11082_s24 + $0x10] sm:$0xff] %vm11085_vm0, %v6536_v37  ;;  %v5935_v22 = vadd.f32 %v5934_v62, %v5862_v15  ;;  %v5950_v48 = vpop.f32.mrf.mxu1 }
 0x6b4   : > { %v5938_v49 = vpop.f32.mrf.mxu0  ;;  %v5951_v31 = vadd.f32 %v5950_v48, %v5878_v17 }
 0x6b5   : > { %v6537_v39 = vpack.c.bf16 %v5935_v22, %v5933_v38  ;;  %v5952_v23 = vpop.f32.mrf.mxu1  ;;  %v5939_v11 = vadd.f32 %v5938_v49, %v5866_v57 }
 0x6b6   : > { %v5940_v14 = vpop.f32.mrf.mxu0  ;;  %v6540_v53 = vpack.c.bf16 %v5951_v31, %v5949_v59  ;;  %v5953_v41 = vadd.f32 %v5952_v23, %v5880_v8 }
 0x6b7   : > { %6010 = vst.msk [vmem:[%s11082_s24 + $0x18] sm:$0xff] %vm11085_vm0, %v6537_v39  ;;  %v5941_v6 = vadd.f32 %v5940_v14, %v5868_v56  ;;  %v5954_v12 = vpop.f32.mrf.mxu1 }
 0x6b8   : > { %v5942_v9 = vpop.f32.mrf.mxu0  ;;  %6013 = vst.msk [vmem:[%s11082_s24 + $0x30] sm:$0xff] %vm11085_vm0, %v6540_v53  ;;  %v5955_v21 = vadd.f32 %v5954_v12, %v5882_v52 }
 0x6b9   : > { %v6538_v25 = vpack.c.bf16 %v5941_v6, %v5939_v11  ;;  %v5943_v43 = vadd.f32 %v5942_v9, %v5870_v32 }
 0x6ba   : > { %v5944_v18 = vpop.f32.mrf.mxu0  ;;  %v6541_v34 = vpack.c.bf16 %v5955_v21, %v5953_v41 }
 0x6bb   : > { %6011 = vst.msk [vmem:[%s11082_s24 + $0x20] sm:$0xff] %vm11085_vm0, %v6538_v25  ;;  %v5945_v24 = vadd.f32 %v5944_v18, %v5872_v36 }
 0x6bc   : > { %6014 = vst.msk [vmem:[%s11082_s24 + $0x38] sm:$0xff] %vm11085_vm0, %v6541_v34 }
 0x6bd   : > { %v6539_v20 = vpack.c.bf16 %v5945_v24, %v5943_v43 }
 0x6bf   : > { %6012 = vst.msk [vmem:[%s11082_s24 + $0x28] sm:$0xff] %vm11085_vm0, %v6539_v20 }
 0x6c0 PF: > { %s17_s21 = sadd.s32 1, %s7101_s21  }
 0x6c1   : > { %p14_p1 = scmp.ge.s32.totalorder %s17_s21, 4  }
 0x6c3   :  { %16 = sbr.rel (!%p14_p1) target bundleno = 1 (0x1), region = 79 }
 0x6c8   :  { %6036 = vsyncpa [#allocation5], 1 }
 0x6c9   :  { %6038 = vsyncpa [#allocation5 + $0x1], 1 }

// kernel: net_forward.3
= control target key start
LH: loop header
LB: loop body
LE: loop exit
PB: predicated region body
PF: predicated region fallthrough
CT: control target
= control target key end

     0   :  { %10 = vsyncpa [#allocation3], 0  ;;  %s8973_s0 = inlined_call_operand.vmem [shape: bf16[8,9216], index: 0, kind: input, shape index: {}]   ;;  %s8974_s1 = inlined_call_operand.hbm [shape: bf16[9216,128], index: 1, kind: input, shape index: {}]   ;;  %s8975_s2 = inlined_call_operand.hbm [shape: f32[1,128], index: 2, kind: input, shape index: {}]   ;;  %s8976_s3 = inlined_call_operand.vmem [shape: f32[128,10], index: 3, kind: input, shape index: {}]   ;;  %s8977_s4 = inlined_call_operand.hbm [shape: f32[1,10], index: 4, kind: input, shape index: {}]   ;;  %s8978_s5 = inlined_call_operand.vmem [shape: f32[8,10], index: 5, kind: output, shape index: {}]  }
   0x1   :  { %11 = vsyncpa [#allocation5], 0  ;;  %s8732_s18 = smov [#allocation4]   ;;  %s8733_s20 = smov [#allocation2]  }
   0x2   :  { %s32_s19 = sshll.u32 %s8732_s18, 4  ;;  %s19_s21 = sshll.u32 %s8733_s20, 4  ;;  %s33_s19 = int_to_ptr.vmem [resolvable:$true] %s32_s19  ;;  %s20_s21 = int_to_ptr.vmem [resolvable:$true] %s19_s21 }
   0x3   :  { %s8676_s22 = scalar_lea.vmem %s33_s19, 16  ;;  %s8680_s23 = scalar_lea.vmem %s33_s19, 32 }
   0x4   :  { %p8677_p0 = scmp.ne.s32.totalorder %s33_s19, %s8676_s22  ;;  %p8681_p1 = scmp.lt.s32.totalorder %s33_s19, %s33_s19 }
   0x5   :  { %p8682_p2 = scmp.lt.s32.totalorder %s8680_s23, %s8676_s22 }
   0x7   :  { %p8683_p3 = por %p8682_p2, %p8681_p1 }
   0x9   :  { %p8684_p4 = pnand %p8683_p3, %p8677_p0 }
   0xb   :  { %8687 = shalt.err (!%p8684_p4)
}
   0xc   :  { %35 = dma.hbm_to_vmem [thread:$0]  %s8975_s2, 16, %s33_s19, [#allocation5]  }
   0xd   :  { %s8696_s26 = scalar_lea.vmem %s20_s21, 73728  ;;  %p8701_p6 = scmp.lt.s32.totalorder %s20_s21, %s20_s21 }
   0xe   :  { %p8697_p5 = scmp.ne.s32.totalorder %s20_s21, %s8696_s26  ;;  %p8702_p7 = scmp.lt.s32.totalorder %s8696_s26, %s8696_s26 }
  0x10   :  { %p8703_p8 = por %p8702_p7, %p8701_p6 }
  0x12   :  { %p8704_p9 = pnand %p8703_p8, %p8697_p5 }
  0x14   :  { %8707 = shalt.err (!%p8704_p9)
}
  0x15   :  { %s8734_s27 = smov 64   ;;  %s8735_s28 = smov 4  }
  0x16   :  { %25 = dma.hbm_to_vmem [thread:$0]  %s8974_s1, 73728, %s20_s21, [#allocation3], %s8734_s27, %s8734_s27, %s8735_s28  }
  0x17   :  { %s8736_s6 = smov [#allocation6]  }
  0x18   :  { %s44_s7 = sshll.u32 %s8736_s6, 4  ;;  %s45_s7 = int_to_ptr.vmem [resolvable:$true] %s44_s7 }
  0x19   :  { %s8716_s8 = scalar_lea.vmem %s45_s7, 16  ;;  %s8720_s9 = scalar_lea.vmem %s45_s7, 32 }
  0x1a   :  { %p8717_p10 = scmp.ne.s32.totalorder %s45_s7, %s8716_s8  ;;  %p8721_p11 = scmp.lt.s32.totalorder %s45_s7, %s45_s7 }
  0x1b   :  { %p8722_p12 = scmp.lt.s32.totalorder %s8720_s9, %s8716_s8 }
  0x1d   :  { %p8723_p13 = por %p8722_p12, %p8721_p11 }
  0x1f   :  { %p8724_p0 = pnand %p8723_p13, %p8717_p10 }
  0x21   :  { %8727 = shalt.err (!%p8724_p0)
}
  0x22   :  { %47 = dma.hbm_to_vmem [thread:$0]  %s8977_s4, 16, %s45_s7, [#allocation5]  }
  0x23   :  { %8728 = dma.done.wait [#allocation3], 73728  }
  0x24   :  { %8729 = vsyncadd [#allocation3], 4294893568 }
  0x25   :  { %8730 = dma.done.wait [#allocation5], 32  }
  0x26   :  { %8731 = vsyncadd [#allocation5], 4294967264  ;;  %v8016_v0 = vld [vmem:[#allocation2 + $0x78] sm:$0xff]   ;;  %v8020_v4 = vld [vmem:[#allocation2 + $0x70] sm:$0xff]   ;;  %vm8738_vm0 = vmmov 0   ;;  %vm6495_vm1 = vcmask 80896  }
  0x27   :  { %v8017_v1 = vld [vmem:[#allocation2 + $0xf8] sm:$0xff]   ;;  %7165 = vmatprep.subr.bf16.mxu0 %v8016_v0  ;;  %v8021_v5 = vld [vmem:[#allocation2 + $0xf0] sm:$0xff]   ;;  %v8024_v8 = vld [vmem:[#allocation2 + $0x68] sm:$0xff]  }
  0x28   :  { %v8018_v2 = vld [vmem:[#allocation2 + $0x38] sm:$0xff]   ;;  %7187 = vmatprep.subr.bf16.mxu1 %v8017_v1  ;;  %v8022_v6 = vld [vmem:[#allocation2 + $0x30] sm:$0xff]   ;;  %v8025_v9 = vld [vmem:[#allocation2 + $0xe8] sm:$0xff]  }
  0x29   :  { %v8019_v3 = vld [vmem:[#allocation2 + $0xb8] sm:$0xff]   ;;  %7166 = vmatpush3.bf16.msra.mxu0 %v8018_v2  ;;  %v8023_v7 = vld [vmem:[#allocation2 + $0xb0] sm:$0xff]   ;;  %v8026_v10 = vld [vmem:[#allocation2 + $0x28] sm:$0xff]  }
  0x2a   :  { %7188 = vmatpush3.bf16.msra.mxu1 %v8019_v3  ;;  %7167 = vmatprep.subr.bf16.mxu0 %v8020_v4  ;;  %v8027_v11 = vld [vmem:[#allocation2 + $0xa8] sm:$0xff]   ;;  %v8028_v12 = vld [vmem:[#allocation2 + $0x60] sm:$0xff]   ;;  %v8032_v16 = vld [vmem:[#allocation2 + $0x58] sm:$0xff]  }
  0x2b   :  { %7189 = vmatprep.subr.bf16.mxu1 %v8021_v5  ;;  %v8029_v13 = vld [vmem:[#allocation2 + $0xe0] sm:$0xff]   ;;  %v8033_v17 = vld [vmem:[#allocation2 + $0xd8] sm:$0xff]   ;;  %v8036_v20 = vld [vmem:[#allocation2 + $0x50] sm:$0xff]  }
  0x2c   :  { %v8030_v14 = vld [vmem:[#allocation2 + $0x20] sm:$0xff]   ;;  %v8034_v18 = vld [vmem:[#allocation2 + $0x18] sm:$0xff]   ;;  %v8037_v21 = vld [vmem:[#allocation2 + $0xd0] sm:$0xff]  }
  0x2d   :  { %7168 = vmatpush3.bf16.msra.mxu0 %v8022_v6  ;;  %v8031_v15 = vld [vmem:[#allocation2 + $0xa0] sm:$0xff]   ;;  %v8035_v19 = vld [vmem:[#allocation2 + $0x98] sm:$0xff]   ;;  %v8038_v22 = vld [vmem:[#allocation2 + $0x10] sm:$0xff]  }
  0x2e   :  { %7190 = vmatpush3.bf16.msra.mxu1 %v8023_v7  ;;  %7169 = vmatprep.subr.bf16.mxu0 %v8024_v8  ;;  %v8039_v23 = vld [vmem:[#allocation2 + $0x90] sm:$0xff]   ;;  %v8040_v24 = vld [vmem:[#allocation2 + $0x48] sm:$0xff]   ;;  %v8044_v28 = vld [vmem:[#allocation2 + $0x40] sm:$0xff]  }
  0x2f   :  { %7191 = vmatprep.subr.bf16.mxu1 %v8025_v9  ;;  %v8041_v25 = vld [vmem:[#allocation2 + $0xc8] sm:$0xff]   ;;  %v8045_v29 = vld [vmem:[#allocation2 + $0xc0] sm:$0xff]   ;;  %v8052_v38 = vld [vmem:[#allocation2 + $0x178] sm:$0xff]  }
  0x30   :  { %v8042_v26 = vld [vmem:[#allocation2 + $0x8] sm:$0xff]   ;;  %v8046_v30 = vld [vmem:[#allocation2] sm:$0xff]   ;;  %v8053_v39 = vld [vmem:[#allocation2 + $0x1f8] sm:$0xff]  }
  0x31   :  { %7170 = vmatpush3.bf16.msra.mxu0 %v8026_v10  ;;  %v8043_v27 = vld [vmem:[#allocation2 + $0x88] sm:$0xff]   ;;  %v8047_v31 = vld [vmem:[#allocation2 + $0x80] sm:$0xff]   ;;  %v8054_v40 = vld [vmem:[#allocation2 + $0x138] sm:$0xff]  }
  0x32   :  { %7192 = vmatpush3.bf16.msra.mxu1 %v8027_v11  ;;  %7171 = vmatprep.subr.bf16.mxu0 %v8028_v12  ;;  %v58_v32 = vld [vmem:[%s8973_s0] sm:$0xff]  ;;  %v59_v33 = vld [vmem:[%s8973_s0 + $0x8] sm:$0xff]  ;;  %v8055_v41 = vld [vmem:[#allocation2 + $0x1b8] sm:$0xff]  }
  0x33   :  { %7193 = vmatprep.subr.bf16.mxu1 %v8029_v13  ;;  %v6516_v34 = vcombine.low %v58_v32, %v58_v32  ;;  %v6517_v35 = vcombine.high %v58_v32, %v58_v32  ;;  %v6518_v36 = vcombine.low %v59_v33, %v59_v33  ;;  %v6519_v37 = vcombine.high %v59_v33, %v59_v33  ;;  %v8056_v42 = vld [vmem:[#allocation2 + $0x170] sm:$0xff]   ;;  %v8060_v46 = vld [vmem:[#allocation2 + $0x168] sm:$0xff]   ;;  %v8064_v50 = vld [vmem:[#allocation2 + $0x160] sm:$0xff]  }
  0x34   :  { %v8057_v43 = vld [vmem:[#allocation2 + $0x1f0] sm:$0xff]   ;;  %v8061_v47 = vld [vmem:[#allocation2 + $0x1e8] sm:$0xff]   ;;  %v8065_v51 = vld [vmem:[#allocation2 + $0x1e0] sm:$0xff]  }
  0x35   :  { %7172 = vmatpush3.bf16.msra.mxu0 %v8030_v14  ;;  %4993 = vmatprep.mubr.bf16.mxu0 %v6517_v35  ;;  %v8058_v44 = vld [vmem:[#allocation2 + $0x130] sm:$0xff]   ;;  %v8062_v48 = vld [vmem:[#allocation2 + $0x128] sm:$0xff]   ;;  %v8066_v52 = vld [vmem:[#allocation2 + $0x120] sm:$0xff]  }
  0x36   :  { %7194 = vmatpush3.bf16.msra.mxu1 %v8031_v15  ;;  %7173 = vmatprep.subr.bf16.mxu0 %v8032_v16  ;;  %v8059_v45 = vld [vmem:[#allocation2 + $0x1b0] sm:$0xff]   ;;  %v8063_v49 = vld [vmem:[#allocation2 + $0x1a8] sm:$0xff]   ;;  %v8067_v53 = vld [vmem:[#allocation2 + $0x1a0] sm:$0xff]  }
  0x37   :  { %7195 = vmatprep.subr.bf16.mxu1 %v8033_v17  ;;  %5033 = vmatprep.mubr.bf16.mxu1 %v6519_v37  ;;  %v8068_v54 = vld [vmem:[#allocation2 + $0x158] sm:$0xff]   ;;  %v8072_v58 = vld [vmem:[#allocation2 + $0x150] sm:$0xff]   ;;  %v8076_v62 = vld [vmem:[#allocation2 + $0x148] sm:$0xff]  }
  0x38   :  { %v8069_v55 = vld [vmem:[#allocation2 + $0x1d8] sm:$0xff]   ;;  %v8073_v59 = vld [vmem:[#allocation2 + $0x1d0] sm:$0xff]   ;;  %v8077_v63 = vld [vmem:[#allocation2 + $0x1c8] sm:$0xff]  }
  0x39   :  { %7174 = vmatpush3.bf16.msra.mxu0 %v8034_v18  ;;  %v8070_v56 = vld [vmem:[#allocation2 + $0x118] sm:$0xff]   ;;  %v8074_v60 = vld [vmem:[#allocation2 + $0x110] sm:$0xff]   ;;  %v8078_v0 = vld [vmem:[#allocation2 + $0x108] sm:$0xff]  }
  0x3a   :  { %7196 = vmatpush3.bf16.msra.mxu1 %v8035_v19  ;;  %7175 = vmatprep.subr.bf16.mxu0 %v8036_v20  ;;  %v8071_v57 = vld [vmem:[#allocation2 + $0x198] sm:$0xff]   ;;  %v8075_v61 = vld [vmem:[#allocation2 + $0x190] sm:$0xff]   ;;  %v8079_v1 = vld [vmem:[#allocation2 + $0x188] sm:$0xff]  }
  0x3b   :  { %7197 = vmatprep.subr.bf16.mxu1 %v8037_v21  ;;  %v8080_v2 = vld [vmem:[#allocation2 + $0x140] sm:$0xff]   ;;  %v60_v6 = vld [vmem:[%s8973_s0 + $0x10] sm:$0xff]  ;;  %v61_v9 = vld [vmem:[%s8973_s0 + $0x18] sm:$0xff] }
  0x3c   :  { %v8081_v3 = vld [vmem:[#allocation2 + $0x1c0] sm:$0xff]   ;;  %v6520_v7 = vcombine.low %v60_v6, %v60_v6  ;;  %v6521_v8 = vcombine.high %v60_v6, %v60_v6  ;;  %v6522_v10 = vcombine.low %v61_v9, %v61_v9  ;;  %v6523_v11 = vcombine.high %v61_v9, %v61_v9  ;;  %v8088_v12 = vld [vmem:[#allocation2 + $0x278] sm:$0xff]   ;;  %v8092_v16 = vld [vmem:[#allocation2 + $0x270] sm:$0xff]  }
  0x3d   :  { %7176 = vmatpush3.bf16.msra.mxu0 %v8038_v22  ;;  %v8082_v4 = vld [vmem:[#allocation2 + $0x100] sm:$0xff]   ;;  %v8089_v13 = vld [vmem:[#allocation2 + $0x2f8] sm:$0xff]   ;;  %v8093_v17 = vld [vmem:[#allocation2 + $0x2f0] sm:$0xff]  }
  0x3e   :  { %7198 = vmatpush3.bf16.msra.mxu1 %v8039_v23  ;;  %7177 = vmatprep.subr.bf16.mxu0 %v8040_v24  ;;  %v8083_v5 = vld [vmem:[#allocation2 + $0x180] sm:$0xff]   ;;  %v8090_v14 = vld [vmem:[#allocation2 + $0x238] sm:$0xff]   ;;  %v8094_v18 = vld [vmem:[#allocation2 + $0x230] sm:$0xff]  }
  0x3f   :  { %7199 = vmatprep.subr.bf16.mxu1 %v8041_v25  ;;  %v8091_v15 = vld [vmem:[#allocation2 + $0x2b8] sm:$0xff]   ;;  %v8095_v19 = vld [vmem:[#allocation2 + $0x2b0] sm:$0xff]   ;;  %v8096_v20 = vld [vmem:[#allocation2 + $0x268] sm:$0xff]  }
  0x40   :  { %v8097_v21 = vld [vmem:[#allocation2 + $0x2e8] sm:$0xff]   ;;  %v8100_v24 = vld [vmem:[#allocation2 + $0x260] sm:$0xff]   ;;  %v8108_v32 = vld [vmem:[#allocation2 + $0x250] sm:$0xff]  }
  0x41   :  { %7178 = vmatpush3.bf16.msra.mxu0 %v8042_v26  ;;  %v8098_v22 = vld [vmem:[#allocation2 + $0x228] sm:$0xff]   ;;  %v8101_v25 = vld [vmem:[#allocation2 + $0x2e0] sm:$0xff]   ;;  %v8109_v33 = vld [vmem:[#allocation2 + $0x2d0] sm:$0xff]  }
  0x42   :  { %7200 = vmatpush3.bf16.msra.mxu1 %v8043_v27  ;;  %7179 = vmatprep.subr.bf16.mxu0 %v8044_v28  ;;  %v8099_v23 = vld [vmem:[#allocation2 + $0x2a8] sm:$0xff]   ;;  %v8102_v26 = vld [vmem:[#allocation2 + $0x220] sm:$0xff]   ;;  %v8104_v28 = vld [vmem:[#allocation2 + $0x258] sm:$0xff]  }
  0x43   :  { %7201 = vmatprep.subr.bf16.mxu1 %v8045_v29  ;;  %v8103_v27 = vld [vmem:[#allocation2 + $0x2a0] sm:$0xff]   ;;  %v8105_v29 = vld [vmem:[#allocation2 + $0x2d8] sm:$0xff]   ;;  %v8111_v35 = vld [vmem:[#allocation2 + $0x290] sm:$0xff]  }
  0x44   :  { %v8113_v37 = vld [vmem:[#allocation2 + $0x2c8] sm:$0xff]   ;;  %v8144_v6 = vld [vmem:[#allocation2 + $0x350] sm:$0xff]  }
  0x45   :  { %7180 = vmatpush3.bf16.msra.mxu0 %v8046_v30  ;;  %v8106_v30 = vld [vmem:[#allocation2 + $0x218] sm:$0xff]   ;;  %v8147_v9 = vld [vmem:[#allocation2 + $0x390] sm:$0xff]  }
  0x46   :  { %7202 = vmatpush3.bf16.msra.mxu1 %v8047_v31  ;;  %7209 = vmatprep.subr.bf16.mxu0 %v8052_v38  ;;  %v8107_v31 = vld [vmem:[#allocation2 + $0x298] sm:$0xff]   ;;  %v8114_v38 = vld [vmem:[#allocation2 + $0x208] sm:$0xff]  }
  0x47   :  { %7231 = vmatprep.subr.bf16.mxu1 %v8053_v39  ;;  %v8115_v39 = vld [vmem:[#allocation2 + $0x288] sm:$0xff]  }
  0x48   :  { %4994 = vmatmul.mubr.bf16.vlgmr.msra.gmra.mxu0 %v6516_v34  ;;  %v8110_v34 = vld [vmem:[#allocation2 + $0x210] sm:$0xff]  }
  0x49   :  { %5034 = vmatmul.mubr.bf16.vlgmr.msra.gmra.mxu1 %v6518_v36  ;;  %7210 = vmatpush3.bf16.msra.mxu0 %v8054_v40  ;;  %v8112_v36 = vld [vmem:[#allocation2 + $0x248] sm:$0xff]   ;;  %v8116_v40 = vld [vmem:[#allocation2 + $0x240] sm:$0xff]  }
  0x4a   :  { %7232 = vmatpush3.bf16.msra.mxu1 %v8055_v41  ;;  %7211 = vmatprep.subr.bf16.mxu0 %v8056_v42  ;;  %v8117_v41 = vld [vmem:[#allocation2 + $0x2c0] sm:$0xff]  }
  0x4b   :  { %7233 = vmatprep.subr.bf16.mxu1 %v8057_v43  ;;  %5073 = vmatprep.mubr.bf16.mxu0 %v6521_v8  ;;  %v8118_v42 = vld [vmem:[#allocation2 + $0x200] sm:$0xff]   ;;  %v8146_v8 = vld [vmem:[#allocation2 + $0x310] sm:$0xff]  }
  0x4c   :  { %5113 = vmatprep.mubr.bf16.mxu1 %v6523_v11  ;;  %v8119_v43 = vld [vmem:[#allocation2 + $0x280] sm:$0xff]   ;;  %v8149_v11 = vld [vmem:[#allocation2 + $0x3c8] sm:$0xff]  }
  0x4d   :  { %7212 = vmatpush3.bf16.msra.mxu0 %v8058_v44  ;;  %v62_v44 = vld [vmem:[%s8973_s0 + $0x20] sm:$0xff] }
  0x4e   :  { %7234 = vmatpush3.bf16.msra.mxu1 %v8059_v45  ;;  %7213 = vmatprep.subr.bf16.mxu0 %v8060_v46  ;;  %v63_v45 = vld [vmem:[%s8973_s0 + $0x28] sm:$0xff]  ;;  %v6524_v46 = vcombine.low %v62_v44, %v62_v44 }
  0x4f   :  { %7235 = vmatprep.subr.bf16.mxu1 %v8061_v47  ;;  %v6525_v47 = vcombine.high %v62_v44, %v62_v44  ;;  %v8180_v44 = vld [vmem:[#allocation2 + $0x450] sm:$0xff]  }
  0x51   :  { %7214 = vmatpush3.bf16.msra.mxu0 %v8062_v48  ;;  %v6526_v48 = vcombine.low %v63_v45, %v63_v45 }
  0x52   :  { %7236 = vmatpush3.bf16.msra.mxu1 %v8063_v49  ;;  %7215 = vmatprep.subr.bf16.mxu0 %v8064_v50  ;;  %v6527_v49 = vcombine.high %v63_v45, %v63_v45  ;;  %v8124_v50 = vld [vmem:[#allocation2 + $0x378] sm:$0xff]   ;;  %v8181_v45 = vld [vmem:[#allocation2 + $0x4d0] sm:$0xff]  }
  0x53   :  { %7237 = vmatprep.subr.bf16.mxu1 %v8065_v51  ;;  %v8125_v51 = vld [vmem:[#allocation2 + $0x3f8] sm:$0xff]  }
  0x55   :  { %7216 = vmatpush3.bf16.msra.mxu0 %v8066_v52  ;;  %v8126_v52 = vld [vmem:[#allocation2 + $0x338] sm:$0xff]  }
  0x56   :  { %7238 = vmatpush3.bf16.msra.mxu1 %v8067_v53  ;;  %7217 = vmatprep.subr.bf16.mxu0 %v8068_v54  ;;  %v8127_v53 = vld [vmem:[#allocation2 + $0x3b8] sm:$0xff]   ;;  %v8128_v54 = vld [vmem:[#allocation2 + $0x370] sm:$0xff]  }
  0x57   :  { %7239 = vmatprep.subr.bf16.mxu1 %v8069_v55  ;;  %v8129_v55 = vld [vmem:[#allocation2 + $0x3f0] sm:$0xff]  }
  0x59   :  { %7218 = vmatpush3.bf16.msra.mxu0 %v8070_v56  ;;  %v8130_v56 = vld [vmem:[#allocation2 + $0x330] sm:$0xff]  }
  0x5a   :  { %7240 = vmatpush3.bf16.msra.mxu1 %v8071_v57  ;;  %7219 = vmatprep.subr.bf16.mxu0 %v8072_v58  ;;  %v8131_v57 = vld [vmem:[#allocation2 + $0x3b0] sm:$0xff]   ;;  %v8132_v58 = vld [vmem:[#allocation2 + $0x368] sm:$0xff]  }
  0x5b   :  { %7241 = vmatprep.subr.bf16.mxu1 %v8073_v59  ;;  %v8133_v59 = vld [vmem:[#allocation2 + $0x3e8] sm:$0xff]  }
  0x5d   :  { %7220 = vmatpush3.bf16.msra.mxu0 %v8074_v60  ;;  %v8134_v60 = vld [vmem:[#allocation2 + $0x328] sm:$0xff]  }
  0x5e   :  { %7242 = vmatpush3.bf16.msra.mxu1 %v8075_v61  ;;  %7221 = vmatprep.subr.bf16.mxu0 %v8076_v62  ;;  %v8135_v61 = vld [vmem:[#allocation2 + $0x3a8] sm:$0xff]   ;;  %v8136_v62 = vld [vmem:[#allocation2 + $0x360] sm:$0xff]  }
  0x5f   :  { %7243 = vmatprep.subr.bf16.mxu1 %v8077_v63  ;;  %v8137_v63 = vld [vmem:[#allocation2 + $0x3e0] sm:$0xff]  }
  0x61   :  { %7222 = vmatpush3.bf16.msra.mxu0 %v8078_v0  ;;  %v8138_v0 = vld [vmem:[#allocation2 + $0x320] sm:$0xff]  }
  0x62   :  { %7244 = vmatpush3.bf16.msra.mxu1 %v8079_v1  ;;  %7223 = vmatprep.subr.bf16.mxu0 %v8080_v2  ;;  %v8139_v1 = vld [vmem:[#allocation2 + $0x3a0] sm:$0xff]   ;;  %v8140_v2 = vld [vmem:[#allocation2 + $0x358] sm:$0xff]  }
  0x63   :  { %7245 = vmatprep.subr.bf16.mxu1 %v8081_v3  ;;  %v8141_v3 = vld [vmem:[#allocation2 + $0x3d8] sm:$0xff]  }
  0x65   :  { %7224 = vmatpush3.bf16.msra.mxu0 %v8082_v4  ;;  %v8142_v4 = vld [vmem:[#allocation2 + $0x318] sm:$0xff]  }
  0x66   :  { %7246 = vmatpush3.bf16.msra.mxu1 %v8083_v5  ;;  %7253 = vmatprep.subr.bf16.mxu0 %v8088_v12  ;;  %v8143_v5 = vld [vmem:[#allocation2 + $0x398] sm:$0xff]   ;;  %v8150_v12 = vld [vmem:[#allocation2 + $0x308] sm:$0xff]  }
  0x67   :  { %7275 = vmatprep.subr.bf16.mxu1 %v8089_v13  ;;  %v8151_v13 = vld [vmem:[#allocation2 + $0x388] sm:$0xff]  }
  0x68   :  { %5074 = vmatmul.mubr.bf16.vlgmr.msra.gmra.mxu0 %v6520_v7  ;;  %v8145_v7 = vld [vmem:[#allocation2 + $0x3d0] sm:$0xff]  }
  0x69   :  { %5114 = vmatmul.mubr.bf16.vlgmr.msra.gmra.mxu1 %v6522_v10  ;;  %7254 = vmatpush3.bf16.msra.mxu0 %v8090_v14  ;;  %v8148_v10 = vld [vmem:[#allocation2 + $0x348] sm:$0xff]   ;;  %v8152_v14 = vld [vmem:[#allocation2 + $0x340] sm:$0xff]  }
  0x6a   :  { %7276 = vmatpush3.bf16.msra.mxu1 %v8091_v15  ;;  %7255 = vmatprep.subr.bf16.mxu0 %v8092_v16  ;;  %v8153_v15 = vld [vmem:[#allocation2 + $0x3c0] sm:$0xff]  }
  0x6b   :  { %7277 = vmatprep.subr.bf16.mxu1 %v8093_v17  ;;  %5153 = vmatprep.mubr.bf16.mxu0 %v6525_v47  ;;  %v8154_v16 = vld [vmem:[#allocation2 + $0x300] sm:$0xff]   ;;  %v8183_v47 = vld [vmem:[#allocation2 + $0x490] sm:$0xff]  }
  0x6c   :  { %5193 = vmatprep.mubr.bf16.mxu1 %v6527_v49  ;;  %v8155_v17 = vld [vmem:[#allocation2 + $0x380] sm:$0xff]   ;;  %v8185_v49 = vld [vmem:[#allocation2 + $0x4c8] sm:$0xff]  }
  0x6d   :  { %7256 = vmatpush3.bf16.msra.mxu0 %v8094_v18  ;;  %v64_v18 = vld [vmem:[%s8973_s0 + $0x30] sm:$0xff] }
  0x6e   :  { %7278 = vmatpush3.bf16.msra.mxu1 %v8095_v19  ;;  %7257 = vmatprep.subr.bf16.mxu0 %v8096_v20  ;;  %v65_v19 = vld [vmem:[%s8973_s0 + $0x38] sm:$0xff]  ;;  %v6528_v20 = vcombine.low %v64_v18, %v64_v18 }
  0x6f   :  { %7279 = vmatprep.subr.bf16.mxu1 %v8097_v21  ;;  %v6529_v21 = vcombine.high %v64_v18, %v64_v18  ;;  %v8216_v18 = vld [vmem:[#allocation2 + $0x550] sm:$0xff]  }
  0x71   :  { %7258 = vmatpush3.bf16.msra.mxu0 %v8098_v22  ;;  %v6530_v22 = vcombine.low %v65_v19, %v65_v19 }
  0x72   :  { %7280 = vmatpush3.bf16.msra.mxu1 %v8099_v23  ;;  %7259 = vmatprep.subr.bf16.mxu0 %v8100_v24  ;;  %v8160_v23 = vld [vmem:[#allocation2 + $0x478] sm:$0xff]   ;;  %v6531_v24 = vcombine.high %v65_v19, %v65_v19  ;;  %v8217_v19 = vld [vmem:[#allocation2 + $0x5d0] sm:$0xff]  }
  0x73   :  { %7281 = vmatprep.subr.bf16.mxu1 %v8101_v25  ;;  %v8161_v25 = vld [vmem:[#allocation2 + $0x4f8] sm:$0xff]  }
  0x75   :  { %7260 = vmatpush3.bf16.msra.mxu0 %v8102_v26  ;;  %v8162_v26 = vld [vmem:[#allocation2 + $0x438] sm:$0xff]  }
  0x76   :  { %7282 = vmatpush3.bf16.msra.mxu1 %v8103_v27  ;;  %7261 = vmatprep.subr.bf16.mxu0 %v8104_v28  ;;  %v8163_v27 = vld [vmem:[#allocation2 + $0x4b8] sm:$0xff]   ;;  %v8164_v28 = vld [vmem:[#allocation2 + $0x470] sm:$0xff]  }
  0x77   :  { %7283 = vmatprep.subr.bf16.mxu1 %v8105_v29  ;;  %v8165_v29 = vld [vmem:[#allocation2 + $0x4f0] sm:$0xff]  }
  0x79   :  { %7262 = vmatpush3.bf16.msra.mxu0 %v8106_v30  ;;  %v8166_v30 = vld [vmem:[#allocation2 + $0x430] sm:$0xff]  }
  0x7a   :  { %7284 = vmatpush3.bf16.msra.mxu1 %v8107_v31  ;;  %7263 = vmatprep.subr.bf16.mxu0 %v8108_v32  ;;  %v8167_v31 = vld [vmem:[#allocation2 + $0x4b0] sm:$0xff]   ;;  %v8168_v32 = vld [vmem:[#allocation2 + $0x468] sm:$0xff]  }
  0x7b   :  { %7285 = vmatprep.subr.bf16.mxu1 %v8109_v33  ;;  %v8169_v33 = vld [vmem:[#allocation2 + $0x4e8] sm:$0xff]  }
  0x7d   :  { %7264 = vmatpush3.bf16.msra.mxu0 %v8110_v34  ;;  %v8170_v34 = vld [vmem:[#allocation2 + $0x428] sm:$0xff]  }
  0x7e   :  { %7286 = vmatpush3.bf16.msra.mxu1 %v8111_v35  ;;  %7265 = vmatprep.subr.bf16.mxu0 %v8112_v36  ;;  %v8171_v35 = vld [vmem:[#allocation2 + $0x4a8] sm:$0xff]   ;;  %v8172_v36 = vld [vmem:[#allocation2 + $0x460] sm:$0xff]  }
  0x7f   :  { %7287 = vmatprep.subr.bf16.mxu1 %v8113_v37  ;;  %v8173_v37 = vld [vmem:[#allocation2 + $0x4e0] sm:$0xff]  }
  0x81   :  { %7266 = vmatpush3.bf16.msra.mxu0 %v8114_v38  ;;  %v8174_v38 = vld [vmem:[#allocation2 + $0x420] sm:$0xff]  }
  0x82   :  { %7288 = vmatpush3.bf16.msra.mxu1 %v8115_v39  ;;  %7267 = vmatprep.subr.bf16.mxu0 %v8116_v40  ;;  %v8175_v39 = vld [vmem:[#allocation2 + $0x4a0] sm:$0xff]   ;;  %v8176_v40 = vld [vmem:[#allocation2 + $0x458] sm:$0xff]  }
  0x83   :  { %7289 = vmatprep.subr.bf16.mxu1 %v8117_v41  ;;  %v8177_v41 = vld [vmem:[#allocation2 + $0x4d8] sm:$0xff]  }
  0x85   :  { %7268 = vmatpush3.bf16.msra.mxu0 %v8118_v42  ;;  %v8178_v42 = vld [vmem:[#allocation2 + $0x418] sm:$0xff]  }
  0x86   :  { %7290 = vmatpush3.bf16.msra.mxu1 %v8119_v43  ;;  %7297 = vmatprep.subr.bf16.mxu0 %v8124_v50  ;;  %v8179_v43 = vld [vmem:[#allocation2 + $0x498] sm:$0xff]   ;;  %v8186_v50 = vld [vmem:[#allocation2 + $0x408] sm:$0xff]  }
  0x87   :  { %7319 = vmatprep.subr.bf16.mxu1 %v8125_v51  ;;  %v8187_v51 = vld [vmem:[#allocation2 + $0x488] sm:$0xff]  }
  0x88   :  { %5154 = vmatmul.mubr.bf16.vlgmr.msra.gmra.mxu0 %v6524_v46  ;;  %v8182_v46 = vld [vmem:[#allocation2 + $0x410] sm:$0xff]  }
  0x89   :  { %5194 = vmatmul.mubr.bf16.vlgmr.msra.gmra.mxu1 %v6526_v48  ;;  %7298 = vmatpush3.bf16.msra.mxu0 %v8126_v52  ;;  %v8184_v48 = vld [vmem:[#allocation2 + $0x448] sm:$0xff]   ;;  %v8188_v52 = vld [vmem:[#allocation2 + $0x440] sm:$0xff]  }
  0x8a   :  { %7320 = vmatpush3.bf16.msra.mxu1 %v8127_v53  ;;  %7299 = vmatprep.subr.bf16.mxu0 %v8128_v54  ;;  %v8189_v53 = vld [vmem:[#allocation2 + $0x4c0] sm:$0xff]  }
  0x8b   :  { %7321 = vmatprep.subr.bf16.mxu1 %v8129_v55  ;;  %5233 = vmatprep.mubr.bf16.mxu0 %v6529_v21  ;;  %v8190_v54 = vld [vmem:[#allocation2 + $0x400] sm:$0xff]   ;;  %v8219_v21 = vld [vmem:[#allocation2 + $0x590] sm:$0xff]  }
  0x8c   :  { %5273 = vmatprep.mubr.bf16.mxu1 %v6531_v24  ;;  %v8191_v55 = vld [vmem:[#allocation2 + $0x480] sm:$0xff]   ;;  %v8222_v24 = vld [vmem:[#allocation2 + $0x508] sm:$0xff]  }
  0x8d   :  { %7300 = vmatpush3.bf16.msra.mxu0 %v8130_v56  ;;  %v66_v56 = vld [vmem:[%s8973_s0 + $0x40] sm:$0xff] }
  0x8e   :  { %7322 = vmatpush3.bf16.msra.mxu1 %v8131_v57  ;;  %7301 = vmatprep.subr.bf16.mxu0 %v8132_v58  ;;  %v6532_v57 = vcombine.low %v66_v56, %v66_v56  ;;  %v6533_v58 = vcombine.high %v66_v56, %v66_v56  ;;  %v8252_v56 = vld [vmem:[#allocation2 + $0x650] sm:$0xff]  }
  0x8f   :  { %7323 = vmatprep.subr.bf16.mxu1 %v8133_v59  ;;  %v67_v59 = vld [vmem:[%s8973_s0 + $0x48] sm:$0xff] }
  0x91   :  { %7302 = vmatpush3.bf16.msra.mxu0 %v8134_v60  ;;  %v6534_v60 = vcombine.low %v67_v59, %v67_v59 }
  0x92   :  { %7324 = vmatpush3.bf16.msra.mxu1 %v8135_v61  ;;  %7303 = vmatprep.subr.bf16.mxu0 %v8136_v62  ;;  %v6535_v61 = vcombine.high %v67_v59, %v67_v59  ;;  %v8196_v62 = vld [vmem:[#allocation2 + $0x578] sm:$0xff]   ;;  %v8255_v59 = vld [vmem:[#allocation2 + $0x690] sm:$0xff]  }
  0x93   :  { %7325 = vmatprep.subr.bf16.mxu1 %v8137_v63  ;;  %v8197_v63 = vld [vmem:[#allocation2 + $0x5f8] sm:$0xff]  }
  0x95   :  { %7304 = vmatpush3.bf16.msra.mxu0 %v8138_v0  ;;  %v8198_v0 = vld [vmem:[#allocation2 + $0x538] sm:$0xff]  }
  0x96   :  { %7326 = vmatpush3.bf16.msra.mxu1 %v8139_v1  ;;  %7305 = vmatprep.subr.bf16.mxu0 %v8140_v2  ;;  %v8199_v1 = vld [vmem:[#allocation2 + $0x5b8] sm:$0xff]   ;;  %v8200_v2 = vld [vmem:[#allocation2 + $0x570] sm:$0xff]  }
  0x97   :  { %7327 = vmatprep.subr.bf16.mxu1 %v8141_v3  ;;  %v8201_v3 = vld [vmem:[#allocation2 + $0x5f0] sm:$0xff]  }
  0x99   :  { %7306 = vmatpush3.bf16.msra.mxu0 %v8142_v4  ;;  %v8202_v4 = vld [vmem:[#allocation2 + $0x530] sm:$0xff]  }
  0x9a   :  { %7328 = vmatpush3.bf16.msra.mxu1 %v8143_v5  ;;  %7307 = vmatprep.subr.bf16.mxu0 %v8144_v6  ;;  %v8203_v5 = vld [vmem:[#allocation2 + $0x5b0] sm:$0xff]   ;;  %v8204_v6 = vld [vmem:[#allocation2 + $0x568] sm:$0xff]  }
  0x9b   :  { %7329 = vmatprep.subr.bf16.mxu1 %v8145_v7  ;;  %v8205_v7 = vld [vmem:[#allocation2 + $0x5e8] sm:$0xff]  }
  0x9d   :  { %7308 = vmatpush3.bf16.msra.mxu0 %v8146_v8  ;;  %v8206_v8 = vld [vmem:[#allocation2 + $0x528] sm:$0xff]  }
  0x9e   :  { %7330 = vmatpush3.bf16.msra.mxu1 %v8147_v9  ;;  %7309 = vmatprep.subr.bf16.mxu0 %v8148_v10  ;;  %v8207_v9 = vld [vmem:[#allocation2 + $0x5a8] sm:$0xff]   ;;  %v8208_v10 = vld [vmem:[#allocation2 + $0x560] sm:$0xff]  }
  0x9f   :  { %7331 = vmatprep.subr.bf16.mxu1 %v8149_v11  ;;  %v8209_v11 = vld [vmem:[#allocation2 + $0x5e0] sm:$0xff]  }
  0xa1   :  { %7310 = vmatpush3.bf16.msra.mxu0 %v8150_v12  ;;  %v8210_v12 = vld [vmem:[#allocation2 + $0x520] sm:$0xff]  }
  0xa2   :  { %7332 = vmatpush3.bf16.msra.mxu1 %v8151_v13  ;;  %7311 = vmatprep.subr.bf16.mxu0 %v8152_v14  ;;  %v8211_v13 = vld [vmem:[#allocation2 + $0x5a0] sm:$0xff]   ;;  %v8212_v14 = vld [vmem:[#allocation2 + $0x558] sm:$0xff]  }
  0xa3   :  { %7333 = vmatprep.subr.bf16.mxu1 %v8153_v15  ;;  %v8213_v15 = vld [vmem:[#allocation2 + $0x5d8] sm:$0xff]  }
  0xa5   :  { %7312 = vmatpush3.bf16.msra.mxu0 %v8154_v16  ;;  %v8214_v16 = vld [vmem:[#allocation2 + $0x518] sm:$0xff]  }
  0xa6   :  { %7334 = vmatpush3.bf16.msra.mxu1 %v8155_v17  ;;  %7341 = vmatprep.subr.bf16.mxu0 %v8160_v23  ;;  %v8215_v17 = vld [vmem:[#allocation2 + $0x598] sm:$0xff]   ;;  %v8221_v23 = vld [vmem:[#allocation2 + $0x5c8] sm:$0xff]  }
  0xa7   :  { %7363 = vmatprep.subr.bf16.mxu1 %v8161_v25  ;;  %v8223_v25 = vld [vmem:[#allocation2 + $0x588] sm:$0xff]  }
  0xa8   :  { %5234 = vmatmul.mubr.bf16.vlgmr.msra.gmra.mxu0 %v6528_v20  ;;  %v8218_v20 = vld [vmem:[#allocation2 + $0x510] sm:$0xff]  }
  0xa9   :  { %5274 = vmatmul.mubr.bf16.vlgmr.msra.gmra.mxu1 %v6530_v22  ;;  %7342 = vmatpush3.bf16.msra.mxu0 %v8162_v26  ;;  %v8220_v22 = vld [vmem:[#allocation2 + $0x548] sm:$0xff]   ;;  %v8224_v26 = vld [vmem:[#allocation2 + $0x540] sm:$0xff]  }
  0xaa   :  { %7364 = vmatpush3.bf16.msra.mxu1 %v8163_v27  ;;  %7343 = vmatprep.subr.bf16.mxu0 %v8164_v28  ;;  %v8225_v27 = vld [vmem:[#allocation2 + $0x5c0] sm:$0xff]  }
  0xab   :  { %7365 = vmatprep.subr.bf16.mxu1 %v8165_v29  ;;  %5313 = vmatprep.mubr.bf16.mxu0 %v6533_v58  ;;  %v8226_v28 = vld [vmem:[#allocation2 + $0x500] sm:$0xff]   ;;  %v8254_v58 = vld [vmem:[#allocation2 + $0x610] sm:$0xff]  }
  0xac   :  { %5353 = vmatprep.mubr.bf16.mxu1 %v6535_v61  ;;  %v8227_v29 = vld [vmem:[#allocation2 + $0x580] sm:$0xff]   ;;  %v8257_v61 = vld [vmem:[#allocation2 + $0x6c8] sm:$0xff]  }
  0xad   :  { %7344 = vmatpush3.bf16.msra.mxu0 %v8166_v30  ;;  %v68_v30 = vld [vmem:[%s8973_s0 + $0x50] sm:$0xff] }
  0xae   :  { %7366 = vmatpush3.bf16.msra.mxu1 %v8167_v31  ;;  %7345 = vmatprep.subr.bf16.mxu0 %v8168_v32  ;;  %v69_v31 = vld [vmem:[%s8973_s0 + $0x58] sm:$0xff]  ;;  %v6536_v32 = vcombine.low %v68_v30, %v68_v30 }
  0xaf   :  { %7367 = vmatprep.subr.bf16.mxu1 %v8169_v33  ;;  %v6537_v33 = vcombine.high %v68_v30, %v68_v30  ;;  %v8275_v30 = vld [vmem:[#allocation2 + $0x7b0] sm:$0xff]  }
  0xb1   :  { %7346 = vmatpush3.bf16.msra.mxu0 %v8170_v34  ;;  %v6538_v34 = vcombine.low %v69_v31, %v69_v31 }
  0xb2   :  { %7368 = vmatpush3.bf16.msra.mxu1 %v8171_v35  ;;  %7347 = vmatprep.subr.bf16.mxu0 %v8172_v36  ;;  %v6539_v35 = vcombine.high %v69_v31, %v69_v31  ;;  %v8232_v36 = vld [vmem:[#allocation2 + $0x678] sm:$0xff]   ;;  %v8276_v31 = vld [vmem:[#allocation2 + $0x768] sm:$0xff]  }
  0xb3   :  { %7369 = vmatprep.subr.bf16.mxu1 %v8173_v37  ;;  %v8233_v37 = vld [vmem:[#allocation2 + $0x6f8] sm:$0xff]  }
  0xb5   :  { %7348 = vmatpush3.bf16.msra.mxu0 %v8174_v38  ;;  %v8234_v38 = vld [vmem:[#allocation2 + $0x638] sm:$0xff]  }
  0xb6   :  { %7370 = vmatpush3.bf16.msra.mxu1 %v8175_v39  ;;  %7349 = vmatprep.subr.bf16.mxu0 %v8176_v40  ;;  %v8235_v39 = vld [vmem:[#allocation2 + $0x6b8] sm:$0xff]   ;;  %v8236_v40 = vld [vmem:[#allocation2 + $0x670] sm:$0xff]  }
  0xb7   :  { %7371 = vmatprep.subr.bf16.mxu1 %v8177_v41  ;;  %v8237_v41 = vld [vmem:[#allocation2 + $0x6f0] sm:$0xff]  }
  0xb9   :  { %7350 = vmatpush3.bf16.msra.mxu0 %v8178_v42  ;;  %v8238_v42 = vld [vmem:[#allocation2 + $0x630] sm:$0xff]  }
  0xba   :  { %7372 = vmatpush3.bf16.msra.mxu1 %v8179_v43  ;;  %7351 = vmatprep.subr.bf16.mxu0 %v8180_v44  ;;  %v8239_v43 = vld [vmem:[#allocation2 + $0x6b0] sm:$0xff]   ;;  %v8240_v44 = vld [vmem:[#allocation2 + $0x668] sm:$0xff]  }
  0xbb   :  { %7373 = vmatprep.subr.bf16.mxu1 %v8181_v45  ;;  %v8241_v45 = vld [vmem:[#allocation2 + $0x6e8] sm:$0xff]  }
  0xbd   :  { %7352 = vmatpush3.bf16.msra.mxu0 %v8182_v46  ;;  %v8242_v46 = vld [vmem:[#allocation2 + $0x628] sm:$0xff]  }
  0xbe   :  { %7374 = vmatpush3.bf16.msra.mxu1 %v8183_v47  ;;  %7353 = vmatprep.subr.bf16.mxu0 %v8184_v48  ;;  %v8243_v47 = vld [vmem:[#allocation2 + $0x6a8] sm:$0xff]   ;;  %v8244_v48 = vld [vmem:[#allocation2 + $0x660] sm:$0xff]  }
  0xbf   :  { %7375 = vmatprep.subr.bf16.mxu1 %v8185_v49  ;;  %v8245_v49 = vld [vmem:[#allocation2 + $0x6e0] sm:$0xff]  }
  0xc1   :  { %7354 = vmatpush3.bf16.msra.mxu0 %v8186_v50  ;;  %v8246_v50 = vld [vmem:[#allocation2 + $0x620] sm:$0xff]  }
  0xc2   :  { %7376 = vmatpush3.bf16.msra.mxu1 %v8187_v51  ;;  %7355 = vmatprep.subr.bf16.mxu0 %v8188_v52  ;;  %v8247_v51 = vld [vmem:[#allocation2 + $0x6a0] sm:$0xff]   ;;  %v8248_v52 = vld [vmem:[#allocation2 + $0x658] sm:$0xff]  }
  0xc3   :  { %7377 = vmatprep.subr.bf16.mxu1 %v8189_v53  ;;  %v8249_v53 = vld [vmem:[#allocation2 + $0x6d8] sm:$0xff]  }
  0xc5   :  { %7356 = vmatpush3.bf16.msra.mxu0 %v8190_v54  ;;  %v8250_v54 = vld [vmem:[#allocation2 + $0x618] sm:$0xff]  }
  0xc6   :  { %7378 = vmatpush3.bf16.msra.mxu1 %v8191_v55  ;;  %7385 = vmatprep.subr.bf16.mxu0 %v8196_v62  ;;  %v8251_v55 = vld [vmem:[#allocation2 + $0x698] sm:$0xff]   ;;  %v8258_v62 = vld [vmem:[#allocation2 + $0x608] sm:$0xff]  }
  0xc7   :  { %7407 = vmatprep.subr.bf16.mxu1 %v8197_v63  ;;  %v8259_v63 = vld [vmem:[#allocation2 + $0x688] sm:$0xff]  }
  0xc8   :  { %5314 = vmatmul.mubr.bf16.vlgmr.msra.gmra.mxu0 %v6532_v57  ;;  %v8253_v57 = vld [vmem:[#allocation2 + $0x6d0] sm:$0xff]  }
  0xc9   :  { %5354 = vmatmul.mubr.bf16.vlgmr.msra.gmra.mxu1 %v6534_v60  ;;  %7386 = vmatpush3.bf16.msra.mxu0 %v8198_v0  ;;  %v8256_v60 = vld [vmem:[#allocation2 + $0x648] sm:$0xff]   ;;  %v8260_v0 = vld [vmem:[#allocation2 + $0x640] sm:$0xff]  }
  0xca   :  { %7408 = vmatpush3.bf16.msra.mxu1 %v8199_v1  ;;  %7387 = vmatprep.subr.bf16.mxu0 %v8200_v2  ;;  %v8261_v1 = vld [vmem:[#allocation2 + $0x6c0] sm:$0xff]  }
  0xcb   :  { %7409 = vmatprep.subr.bf16.mxu1 %v8201_v3  ;;  %5393 = vmatprep.mubr.bf16.mxu0 %v6537_v33  ;;  %v8262_v2 = vld [vmem:[#allocation2 + $0x600] sm:$0xff]   ;;  %v8278_v33 = vld [vmem:[#allocation2 + $0x728] sm:$0xff]  }
  0xcc   :  { %5433 = vmatprep.mubr.bf16.mxu1 %v6539_v35  ;;  %v8263_v3 = vld [vmem:[#allocation2 + $0x680] sm:$0xff]  }
  0xcd   :  { %7388 = vmatpush3.bf16.msra.mxu0 %v8202_v4  ;;  %v70_v4 = vld [vmem:[%s8973_s0 + $0x60] sm:$0xff] }
  0xce   :  { %7410 = vmatpush3.bf16.msra.mxu1 %v8203_v5  ;;  %7389 = vmatprep.subr.bf16.mxu0 %v8204_v6  ;;  %v71_v5 = vld [vmem:[%s8973_s0 + $0x68] sm:$0xff]  ;;  %v8280_v35 = vld [vmem:[#allocation2 + $0x760] sm:$0xff]  }
  0xcf   :  { %7411 = vmatprep.subr.bf16.mxu1 %v8205_v7 }
  0xd1   :  { %7390 = vmatpush3.bf16.msra.mxu0 %v8206_v8  ;;  %v6540_v8 = vcombine.low %v70_v4, %v70_v4 }
  0xd2   :  { %7412 = vmatpush3.bf16.msra.mxu1 %v8207_v9  ;;  %7391 = vmatprep.subr.bf16.mxu0 %v8208_v10  ;;  %v6541_v9 = vcombine.high %v70_v4, %v70_v4  ;;  %v6542_v10 = vcombine.low %v71_v5, %v71_v5 }
  0xd3   :  { %7413 = vmatprep.subr.bf16.mxu1 %v8209_v11  ;;  %v8268_v11 = vld [vmem:[#allocation2 + $0x778] sm:$0xff]  }
  0xd5   :  { %7392 = vmatpush3.bf16.msra.mxu0 %v8210_v12  ;;  %v6543_v12 = vcombine.high %v71_v5, %v71_v5 }
  0xd6   :  { %7414 = vmatpush3.bf16.msra.mxu1 %v8211_v13  ;;  %7393 = vmatprep.subr.bf16.mxu0 %v8212_v14  ;;  %v8269_v13 = vld [vmem:[#allocation2 + $0x7f8] sm:$0xff]  }
  0xd7   :  { %7415 = vmatprep.subr.bf16.mxu1 %v8213_v15 }
  0xd9   :  { %7394 = vmatpush3.bf16.msra.mxu0 %v8214_v16  ;;  %v8270_v16 = vld [vmem:[#allocation2 + $0x738] sm:$0xff]  }
  0xda   :  { %7416 = vmatpush3.bf16.msra.mxu1 %v8215_v17  ;;  %7395 = vmatprep.subr.bf16.mxu0 %v8216_v18 }
  0xdb   :  { %7417 = vmatprep.subr.bf16.mxu1 %v8217_v19  ;;  %v8271_v19 = vld [vmem:[#allocation2 + $0x7b8] sm:$0xff]  }
  0xdd   :  { %7396 = vmatpush3.bf16.msra.mxu0 %v8218_v20  ;;  %v6515_v20 = vld [vmem:[#allocation4] ss:$0 sm:$0xff] }
  0xde   :  { %7418 = vmatpush3.bf16.msra.mxu1 %v8219_v21  ;;  %7397 = vmatprep.subr.bf16.mxu0 %v8220_v22 }
  0xdf   :  { %7419 = vmatprep.subr.bf16.mxu1 %v8221_v23 }
  0xe1   :  { %7398 = vmatpush3.bf16.msra.mxu0 %v8222_v24  ;;  %v8272_v24 = vld [vmem:[#allocation2 + $0x770] sm:$0xff]  }
  0xe2   :  { %7420 = vmatpush3.bf16.msra.mxu1 %v8223_v25  ;;  %7399 = vmatprep.subr.bf16.mxu0 %v8224_v26  ;;  %v8273_v25 = vld [vmem:[#allocation2 + $0x7f0] sm:$0xff]  }
  0xe3   :  { %7421 = vmatprep.subr.bf16.mxu1 %v8225_v27 }
  0xe5   :  { %7400 = vmatpush3.bf16.msra.mxu0 %v8226_v28 }
  0xe6   :  { %7422 = vmatpush3.bf16.msra.mxu1 %v8227_v29  ;;  %7429 = vmatprep.subr.bf16.mxu0 %v8232_v36  ;;  %v8274_v29 = vld [vmem:[#allocation2 + $0x730] sm:$0xff]   ;;  %v8281_v36 = vld [vmem:[#allocation2 + $0x7e0] sm:$0xff]  }
  0xe7   :  { %7451 = vmatprep.subr.bf16.mxu1 %v8233_v37  ;;  %v8282_v37 = vld [vmem:[#allocation2 + $0x720] sm:$0xff]  }
  0xe8   :  { %5394 = vmatmul.mubr.bf16.vlgmr.msra.gmra.mxu0 %v6536_v32  ;;  %v8277_v32 = vld [vmem:[#allocation2 + $0x7e8] sm:$0xff]  }
  0xe9   :  { %5434 = vmatmul.mubr.bf16.vlgmr.msra.gmra.mxu1 %v6538_v34  ;;  %7430 = vmatpush3.bf16.msra.mxu0 %v8234_v38  ;;  %v8279_v34 = vld [vmem:[#allocation2 + $0x7a8] sm:$0xff]   ;;  %v8283_v38 = vld [vmem:[#allocation2 + $0x7a0] sm:$0xff]  }
  0xea   :  { %7452 = vmatpush3.bf16.msra.mxu1 %v8235_v39  ;;  %7431 = vmatprep.subr.bf16.mxu0 %v8236_v40  ;;  %v8284_v39 = vld [vmem:[#allocation2 + $0x758] sm:$0xff]  }
  0xeb   :  { %7453 = vmatprep.subr.bf16.mxu1 %v8237_v41  ;;  %5473 = vmatprep.mubr.bf16.mxu0 %v6541_v9  ;;  %v8285_v40 = vld [vmem:[#allocation2 + $0x7d8] sm:$0xff]  }
  0xec   :  { %5513 = vmatprep.mubr.bf16.mxu1 %v6543_v12  ;;  %v8286_v41 = vld [vmem:[#allocation2 + $0x718] sm:$0xff]  }
  0xed   :  { %7432 = vmatpush3.bf16.msra.mxu0 %v8238_v42  ;;  %v8287_v42 = vld [vmem:[#allocation2 + $0x798] sm:$0xff]  }
  0xee   :  { %7454 = vmatpush3.bf16.msra.mxu1 %v8239_v43  ;;  %7433 = vmatprep.subr.bf16.mxu0 %v8240_v44  ;;  %v8288_v43 = vld [vmem:[#allocation2 + $0x750] sm:$0xff]  }
  0xef   :  { %7455 = vmatprep.subr.bf16.mxu1 %v8241_v45  ;;  %v8289_v44 = vld [vmem:[#allocation2 + $0x7d0] sm:$0xff]  }
  0xf0   :  { %v8290_v45 = vld [vmem:[#allocation2 + $0x710] sm:$0xff]  }
  0xf1   :  { %7434 = vmatpush3.bf16.msra.mxu0 %v8242_v46  ;;  %v8291_v46 = vld [vmem:[#allocation2 + $0x790] sm:$0xff]  }
  0xf2   :  { %7456 = vmatpush3.bf16.msra.mxu1 %v8243_v47  ;;  %7435 = vmatprep.subr.bf16.mxu0 %v8244_v48  ;;  %v8292_v47 = vld [vmem:[#allocation2 + $0x748] sm:$0xff]  }
  0xf3   :  { %7457 = vmatprep.subr.bf16.mxu1 %v8245_v49  ;;  %v8293_v48 = vld [vmem:[#allocation2 + $0x7c8] sm:$0xff]  }
  0xf4   :  { %v8294_v49 = vld [vmem:[#allocation2 + $0x708] sm:$0xff]  }
  0xf5   :  { %7436 = vmatpush3.bf16.msra.mxu0 %v8246_v50  ;;  %v8295_v50 = vld [vmem:[#allocation2 + $0x788] sm:$0xff]  }
  0xf6   :  { %7458 = vmatpush3.bf16.msra.mxu1 %v8247_v51  ;;  %7437 = vmatprep.subr.bf16.mxu0 %v8248_v52  ;;  %v8296_v51 = vld [vmem:[#allocation2 + $0x740] sm:$0xff]  }
  0xf7   :  { %7459 = vmatprep.subr.bf16.mxu1 %v8249_v53  ;;  %v8297_v52 = vld [vmem:[#allocation2 + $0x7c0] sm:$0xff]  }
  0xf8   :  { %v8298_v53 = vld [vmem:[#allocation2 + $0x700] sm:$0xff]  }
  0xf9   :  { %7438 = vmatpush3.bf16.msra.mxu0 %v8250_v54  ;;  %v8299_v54 = vld [vmem:[#allocation2 + $0x780] sm:$0xff]  }
  0xfa   :  { %7460 = vmatpush3.bf16.msra.mxu1 %v8251_v55  ;;  %7439 = vmatprep.subr.bf16.mxu0 %v8252_v56  ;;  %v72_v55 = vld [vmem:[%s8973_s0 + $0x70] sm:$0xff]  ;;  %v73_v56 = vld [vmem:[%s8973_s0 + $0x78] sm:$0xff] }
  0xfb   :  { %7461 = vmatprep.subr.bf16.mxu1 %v8253_v57 }
  0xfd   :  { %7440 = vmatpush3.bf16.msra.mxu0 %v8254_v58 }
  0xfe   :  { %7462 = vmatpush3.bf16.msra.mxu1 %v8255_v59  ;;  %7441 = vmatprep.subr.bf16.mxu0 %v8256_v60  ;;  %v6544_v59 = vcombine.low %v72_v55, %v72_v55  ;;  %v6545_v60 = vcombine.high %v72_v55, %v72_v55 }
  0xff   :  { %7463 = vmatprep.subr.bf16.mxu1 %v8257_v61  ;;  %v6546_v61 = vcombine.low %v73_v56, %v73_v56 }
 0x101   :  { %7442 = vmatpush3.bf16.msra.mxu0 %v8258_v62  ;;  %v8304_v62 = vld [vmem:[#allocation2 + $0x878] sm:$0xff]  }
 0x102   :  { %7464 = vmatpush3.bf16.msra.mxu1 %v8259_v63  ;;  %7443 = vmatprep.subr.bf16.mxu0 %v8260_v0  ;;  %v6547_v63 = vcombine.high %v73_v56, %v73_v56  ;;  %v8305_v0 = vld [vmem:[#allocation2 + $0x8f8] sm:$0xff]  }
 0x103   :  { %7465 = vmatprep.subr.bf16.mxu1 %v8261_v1 }
 0x105   :  { %7444 = vmatpush3.bf16.msra.mxu0 %v8262_v2 }
 0x106   :  { %7466 = vmatpush3.bf16.msra.mxu1 %v8263_v3  ;;  %7473 = vmatprep.subr.bf16.mxu0 %v8268_v11  ;;  %v8306_v3 = vld [vmem:[#allocation2 + $0x838] sm:$0xff]   ;;  %v8309_v11 = vld [vmem:[#allocation2 + $0x8f0] sm:$0xff]  }
 0x107   :  { %7495 = vmatprep.subr.bf16.mxu1 %v8269_v13 }
 0x108   :  { %v7181_v6 = vpop.f32.mrf.mxu0  ;;  %5474 = vmatmul.mubr.bf16.vlgmr.msra.gmra.mxu0 %v6540_v8 }
 0x109   :  { %v7203_v7 = vpop.f32.mrf.mxu1  ;;  %5514 = vmatmul.mubr.bf16.vlgmr.msra.gmra.mxu1 %v6542_v10  ;;  %7474 = vmatpush3.bf16.msra.mxu0 %v8270_v16  ;;  %v8308_v10 = vld [vmem:[#allocation2 + $0x870] sm:$0xff]  }
 0x10a   :  { %v7182_v14 = vpop.f32.mrf.mxu0  ;;  %7496 = vmatpush3.bf16.msra.mxu1 %v8271_v19  ;;  %7475 = vmatprep.subr.bf16.mxu0 %v8272_v24  ;;  %v8311_v16 = vld [vmem:[#allocation2 + $0x8b0] sm:$0xff]   ;;  %v8314_v19 = vld [vmem:[#allocation2 + $0x828] sm:$0xff]   ;;  %v8319_v24 = vld [vmem:[#allocation2 + $0x8a0] sm:$0xff]  }
 0x10b   :  { %v7204_v15 = vpop.f32.mrf.mxu1  ;;  %v7183_v17 = vadd.f32 %v7182_v14, %v7181_v6  ;;  %7497 = vmatprep.subr.bf16.mxu1 %v8273_v25  ;;  %5553 = vmatprep.mubr.bf16.mxu0 %v6545_v60  ;;  %v8307_v6 = vld [vmem:[#allocation2 + $0x8b8] sm:$0xff]   ;;  %v8344_v60 = vld [vmem:[#allocation2 + $0x970] sm:$0xff]  }
 0x10c   :  { %v7205_v18 = vadd.f32 %v7204_v15, %v7203_v7  ;;  %v7184_v21 = vpop.f32.mrf.mxu0  ;;  %5593 = vmatprep.mubr.bf16.mxu1 %v6547_v63  ;;  %v8310_v15 = vld [vmem:[#allocation2 + $0x830] sm:$0xff]   ;;  %v8320_v25 = vld [vmem:[#allocation2 + $0x858] sm:$0xff]  }
 0x10d   :  { %v7206_v22 = vpop.f32.mrf.mxu1  ;;  %v4996_v23 = vadd.f32 %v7183_v17, %v6515_v20  ;;  %7476 = vmatpush3.bf16.msra.mxu0 %v8274_v29  ;;  %v8312_v17 = vld [vmem:[#allocation2 + $0x868] sm:$0xff]   ;;  %v8316_v21 = vld [vmem:[#allocation2 + $0x860] sm:$0xff]   ;;  %v8324_v29 = vld [vmem:[#allocation2 + $0x850] sm:$0xff]  }
 0x10e   :  { %v7185_v26 = vpop.f32.mrf.mxu0  ;;  %7498 = vmatpush3.bf16.msra.mxu1 %v8275_v30  ;;  %7477 = vmatprep.subr.bf16.mxu0 %v8276_v31  ;;  %v8315_v20 = vld [vmem:[#allocation2 + $0x8a8] sm:$0xff]   ;;  %v8317_v22 = vld [vmem:[#allocation2 + $0x8e0] sm:$0xff]   ;;  %v8325_v30 = vld [vmem:[#allocation2 + $0x8d0] sm:$0xff]  }
 0x10f   :  { %v7207_v27 = vpop.f32.mrf.mxu1  ;;  %v8820_v28 = vadd.f32 %v7205_v18, %v4996_v23  ;;  %7499 = vmatprep.subr.bf16.mxu1 %v8277_v32  ;;  %v8313_v18 = vld [vmem:[#allocation2 + $0x8e8] sm:$0xff]   ;;  %v8318_v23 = vld [vmem:[#allocation2 + $0x820] sm:$0xff]   ;;  %v8321_v26 = vld [vmem:[#allocation2 + $0x8d8] sm:$0xff]  }
 0x110   :  { %v8322_v27 = vld [vmem:[#allocation2 + $0x818] sm:$0xff]   ;;  %v8326_v31 = vld [vmem:[#allocation2 + $0x810] sm:$0xff]  }
 0x111   :  { %7478 = vmatpush3.bf16.msra.mxu0 %v8278_v33  ;;  %v8327_v32 = vld [vmem:[#allocation2 + $0x890] sm:$0xff]   ;;  %v8328_v33 = vld [vmem:[#allocation2 + $0x848] sm:$0xff]  }
 0x112   :  { %7500 = vmatpush3.bf16.msra.mxu1 %v8279_v34  ;;  %7479 = vmatprep.subr.bf16.mxu0 %v8280_v35  ;;  %v8329_v34 = vld [vmem:[#allocation2 + $0x8c8] sm:$0xff]   ;;  %v8345_v63 = vld [vmem:[#allocation2 + $0x9f0] sm:$0xff]  }
 0x113   :  { %7501 = vmatprep.subr.bf16.mxu1 %v8281_v36  ;;  %v8330_v35 = vld [vmem:[#allocation2 + $0x808] sm:$0xff]  }
 0x114   :  { %v8331_v36 = vld [vmem:[#allocation2 + $0x888] sm:$0xff]  }
 0x115   :  { %7480 = vmatpush3.bf16.msra.mxu0 %v8282_v37  ;;  %v8332_v37 = vld [vmem:[#allocation2 + $0x840] sm:$0xff]  }
 0x116   :  { %7502 = vmatpush3.bf16.msra.mxu1 %v8283_v38  ;;  %7481 = vmatprep.subr.bf16.mxu0 %v8284_v39  ;;  %v8333_v38 = vld [vmem:[#allocation2 + $0x8c0] sm:$0xff]  }
 0x117   :  { %7503 = vmatprep.subr.bf16.mxu1 %v8285_v40  ;;  %v8334_v39 = vld [vmem:[#allocation2 + $0x800] sm:$0xff]  }
 0x118   :  { %v8335_v40 = vld [vmem:[#allocation2 + $0x880] sm:$0xff]  }
 0x119   :  { %7482 = vmatpush3.bf16.msra.mxu0 %v8286_v41  ;;  %v74_v41 = vld [vmem:[%s8973_s0 + $0x80] sm:$0xff] }
 0x11a   :  { %7504 = vmatpush3.bf16.msra.mxu1 %v8287_v42  ;;  %7483 = vmatprep.subr.bf16.mxu0 %v8288_v43  ;;  %v6548_v43 = vcombine.low %v74_v41, %v74_v41 }
 0x11b   :  { %7505 = vmatprep.subr.bf16.mxu1 %v8289_v44  ;;  %v6549_v44 = vcombine.high %v74_v41, %v74_v41  ;;  %v8379_v41 = vld [vmem:[#allocation2 + $0xab8] sm:$0xff]  }
 0x11d   :  { %7484 = vmatpush3.bf16.msra.mxu0 %v8290_v45  ;;  %v75_v45 = vld [vmem:[%s8973_s0 + $0x88] sm:$0xff] }
 0x11e   :  { %7506 = vmatpush3.bf16.msra.mxu1 %v8291_v46  ;;  %7485 = vmatprep.subr.bf16.mxu0 %v8292_v47  ;;  %v6550_v47 = vcombine.low %v75_v45, %v75_v45 }
 0x11f   :  { %7507 = vmatprep.subr.bf16.mxu1 %v8293_v48  ;;  %v6551_v48 = vcombine.high %v75_v45, %v75_v45 }
 0x121   :  { %7486 = vmatpush3.bf16.msra.mxu0 %v8294_v49  ;;  %v8340_v49 = vld [vmem:[#allocation2 + $0x978] sm:$0xff]  }
 0x122   :  { %7508 = vmatpush3.bf16.msra.mxu1 %v8295_v50  ;;  %7487 = vmatprep.subr.bf16.mxu0 %v8296_v51  ;;  %v8341_v51 = vld [vmem:[#allocation2 + $0x9f8] sm:$0xff]  }
 0x123   :  { %7509 = vmatprep.subr.bf16.mxu1 %v8297_v52 }
 0x125   :  { %7488 = vmatpush3.bf16.msra.mxu0 %v8298_v53 }
 0x126   :  { %7510 = vmatpush3.bf16.msra.mxu1 %v8299_v54  ;;  %7517 = vmatprep.subr.bf16.mxu0 %v8304_v62  ;;  %v8342_v54 = vld [vmem:[#allocation2 + $0x938] sm:$0xff]  }
 0x127   :  { %7539 = vmatprep.subr.bf16.mxu1 %v8305_v0 }
 0x128   :  { %v7225_v57 = vpop.f32.mrf.mxu0  ;;  %5554 = vmatmul.mubr.bf16.vlgmr.msra.gmra.mxu0 %v6544_v59 }
 0x129   :  { %v7247_v58 = vpop.f32.mrf.mxu1  ;;  %5594 = vmatmul.mubr.bf16.vlgmr.msra.gmra.mxu1 %v6546_v61  ;;  %7518 = vmatpush3.bf16.msra.mxu0 %v8306_v3  ;;  %v8348_v3 = vld [vmem:[#allocation2 + $0x968] sm:$0xff]  }
 0x12a   :  { %v7226_v1 = vpop.f32.mrf.mxu0  ;;  %7540 = vmatpush3.bf16.msra.mxu1 %v8307_v6  ;;  %7519 = vmatprep.subr.bf16.mxu0 %v8308_v10  ;;  %v8351_v6 = vld [vmem:[#allocation2 + $0x9a8] sm:$0xff]   ;;  %v8355_v10 = vld [vmem:[#allocation2 + $0x9a0] sm:$0xff]  }
 0x12b   :  { %v7248_v2 = vpop.f32.mrf.mxu1  ;;  %v7227_v4 = vadd.f32 %v7226_v1, %v7225_v57  ;;  %7541 = vmatprep.subr.bf16.mxu1 %v8309_v11  ;;  %5633 = vmatprep.mubr.bf16.mxu0 %v6549_v44  ;;  %v8343_v57 = vld [vmem:[#allocation2 + $0x9b8] sm:$0xff]   ;;  %v8346_v1 = vld [vmem:[#allocation2 + $0x930] sm:$0xff]  }
 0x12c   :  { %v7249_v5 = vadd.f32 %v7248_v2, %v7247_v58  ;;  %v7228_v7 = vpop.f32.mrf.mxu0  ;;  %5673 = vmatprep.mubr.bf16.mxu1 %v6551_v48  ;;  %v8347_v2 = vld [vmem:[#allocation2 + $0x9b0] sm:$0xff]   ;;  %v8356_v11 = vld [vmem:[#allocation2 + $0x958] sm:$0xff]  }
 0x12d   :  { %v7250_v8 = vpop.f32.mrf.mxu1  ;;  %v5076_v9 = vadd.f32 %v7227_v4, %v8820_v28  ;;  %7520 = vmatpush3.bf16.msra.mxu0 %v8310_v15  ;;  %v8323_v28 = vld [vmem:[#allocation2 + $0x898] sm:$0xff]   ;;  %v8349_v4 = vld [vmem:[#allocation2 + $0x9e8] sm:$0xff]   ;;  %v8352_v7 = vld [vmem:[#allocation2 + $0x960] sm:$0xff]  }
 0x12e   :  { %v7229_v12 = vpop.f32.mrf.mxu0  ;;  %7542 = vmatpush3.bf16.msra.mxu1 %v8311_v16  ;;  %7521 = vmatprep.subr.bf16.mxu0 %v8312_v17  ;;  %v8353_v8 = vld [vmem:[#allocation2 + $0x9e0] sm:$0xff]   ;;  %v8360_v15 = vld [vmem:[#allocation2 + $0x950] sm:$0xff]  }
 0x12f   :  { %v7251_v13 = vpop.f32.mrf.mxu1  ;;  %v8829_v14 = vadd.f32 %v7249_v5, %v5076_v9  ;;  %7543 = vmatprep.subr.bf16.mxu1 %v8313_v18  ;;  %v8350_v5 = vld [vmem:[#allocation2 + $0x928] sm:$0xff]   ;;  %v8354_v9 = vld [vmem:[#allocation2 + $0x920] sm:$0xff]   ;;  %v8357_v12 = vld [vmem:[#allocation2 + $0x9d8] sm:$0xff]  }
 0x130   :  { %v8358_v13 = vld [vmem:[#allocation2 + $0x918] sm:$0xff]   ;;  %v8361_v16 = vld [vmem:[#allocation2 + $0x9d0] sm:$0xff]  }
 0x131   :  { %7522 = vmatpush3.bf16.msra.mxu0 %v8314_v19  ;;  %v8362_v17 = vld [vmem:[#allocation2 + $0x910] sm:$0xff]   ;;  %v8364_v19 = vld [vmem:[#allocation2 + $0x948] sm:$0xff]  }
 0x132   :  { %7544 = vmatpush3.bf16.msra.mxu1 %v8315_v20  ;;  %7523 = vmatprep.subr.bf16.mxu0 %v8316_v21  ;;  %v8363_v18 = vld [vmem:[#allocation2 + $0x990] sm:$0xff]   ;;  %v8365_v20 = vld [vmem:[#allocation2 + $0x9c8] sm:$0xff]  }
 0x133   :  { %7545 = vmatprep.subr.bf16.mxu1 %v8317_v22  ;;  %v8366_v21 = vld [vmem:[#allocation2 + $0x908] sm:$0xff]  }
 0x134   :  { %v8367_v22 = vld [vmem:[#allocation2 + $0x988] sm:$0xff]  }
 0x135   :  { %7524 = vmatpush3.bf16.msra.mxu0 %v8318_v23  ;;  %v8368_v23 = vld [vmem:[#allocation2 + $0x940] sm:$0xff]  }
 0x136   :  { %7546 = vmatpush3.bf16.msra.mxu1 %v8319_v24  ;;  %7525 = vmatprep.subr.bf16.mxu0 %v8320_v25  ;;  %v8369_v24 = vld [vmem:[#allocation2 + $0x9c0] sm:$0xff]  }
 0x137   :  { %7547 = vmatprep.subr.bf16.mxu1 %v8321_v26  ;;  %v8370_v25 = vld [vmem:[#allocation2 + $0x900] sm:$0xff]  }
 0x138   :  { %v8371_v26 = vld [vmem:[#allocation2 + $0x980] sm:$0xff]  }
 0x139   :  { %7526 = vmatpush3.bf16.msra.mxu0 %v8322_v27  ;;  %v76_v27 = vld [vmem:[%s8973_s0 + $0x90] sm:$0xff] }
 0x13a   :  { %7548 = vmatpush3.bf16.msra.mxu1 %v8323_v28  ;;  %7527 = vmatprep.subr.bf16.mxu0 %v8324_v29  ;;  %v77_v28 = vld [vmem:[%s8973_s0 + $0x98] sm:$0xff] }
 0x13b   :  { %7549 = vmatprep.subr.bf16.mxu1 %v8325_v30  ;;  %v6552_v30 = vcombine.low %v76_v27, %v76_v27 }
 0x13d   :  { %7528 = vmatpush3.bf16.msra.mxu0 %v8326_v31  ;;  %v6553_v31 = vcombine.high %v76_v27, %v76_v27 }
 0x13e   :  { %7550 = vmatpush3.bf16.msra.mxu1 %v8327_v32  ;;  %7529 = vmatprep.subr.bf16.mxu0 %v8328_v33  ;;  %v6554_v32 = vcombine.low %v77_v28, %v77_v28  ;;  %v6555_v33 = vcombine.high %v77_v28, %v77_v28  ;;  %v8415_v28 = vld [vmem:[#allocation2 + $0xbb8] sm:$0xff]  }
 0x13f   :  { %7551 = vmatprep.subr.bf16.mxu1 %v8329_v34 }
 0x141   :  { %7530 = vmatpush3.bf16.msra.mxu0 %v8330_v35  ;;  %v8376_v35 = vld [vmem:[#allocation2 + $0xa78] sm:$0xff]  }
 0x142   :  { %7552 = vmatpush3.bf16.msra.mxu1 %v8331_v36  ;;  %7531 = vmatprep.subr.bf16.mxu0 %v8332_v37  ;;  %v8377_v36 = vld [vmem:[#allocation2 + $0xaf8] sm:$0xff]  }
 0x143   :  { %7553 = vmatprep.subr.bf16.mxu1 %v8333_v38  ;;  %v8378_v38 = vld [vmem:[#allocation2 + $0xa38] sm:$0xff]  }
 0x145   :  { %7532 = vmatpush3.bf16.msra.mxu0 %v8334_v39 }
 0x146   :  { %7554 = vmatpush3.bf16.msra.mxu1 %v8335_v40  ;;  %7561 = vmatprep.subr.bf16.mxu0 %v8340_v49 }
 0x147   :  { %7583 = vmatprep.subr.bf16.mxu1 %v8341_v51 }
 0x148   :  { %v7269_v42 = vpop.f32.mrf.mxu0  ;;  %5634 = vmatmul.mubr.bf16.vlgmr.msra.gmra.mxu0 %v6548_v43 }
 0x149   :  { %v7291_v46 = vpop.f32.mrf.mxu1  ;;  %5674 = vmatmul.mubr.bf16.vlgmr.msra.gmra.mxu1 %v6550_v47  ;;  %7562 = vmatpush3.bf16.msra.mxu0 %v8342_v54  ;;  %v8381_v47 = vld [vmem:[#allocation2 + $0xaf0] sm:$0xff]   ;;  %v8385_v54 = vld [vmem:[#allocation2 + $0xae8] sm:$0xff]  }
 0x14a   :  { %v7270_v50 = vpop.f32.mrf.mxu0  ;;  %7584 = vmatpush3.bf16.msra.mxu1 %v8343_v57  ;;  %7563 = vmatprep.subr.bf16.mxu0 %v8344_v60  ;;  %v8388_v57 = vld [vmem:[#allocation2 + $0xa60] sm:$0xff]  }
 0x14b   :  { %v7271_v52 = vadd.f32 %v7270_v50, %v7269_v42  ;;  %v7292_v53 = vpop.f32.mrf.mxu1  ;;  %7585 = vmatprep.subr.bf16.mxu1 %v8345_v63  ;;  %5713 = vmatprep.mubr.bf16.mxu0 %v6553_v31  ;;  %v8382_v50 = vld [vmem:[#allocation2 + $0xa30] sm:$0xff]   ;;  %v8391_v60 = vld [vmem:[#allocation2 + $0xaa0] sm:$0xff]   ;;  %v8394_v63 = vld [vmem:[#allocation2 + $0xa18] sm:$0xff]  }
 0x14c   :  { %v7293_v55 = vadd.f32 %v7292_v53, %v7291_v46  ;;  %v7272_v56 = vpop.f32.mrf.mxu0  ;;  %5753 = vmatprep.mubr.bf16.mxu1 %v6555_v33  ;;  %v8380_v46 = vld [vmem:[#allocation2 + $0xa70] sm:$0xff]   ;;  %v8384_v53 = vld [vmem:[#allocation2 + $0xa68] sm:$0xff]  }
 0x14d   :  { %v5156_v58 = vadd.f32 %v7271_v52, %v8829_v14  ;;  %v7294_v59 = vpop.f32.mrf.mxu1  ;;  %7564 = vmatpush3.bf16.msra.mxu0 %v8346_v1  ;;  %v8359_v14 = vld [vmem:[#allocation2 + $0x998] sm:$0xff]   ;;  %v8383_v52 = vld [vmem:[#allocation2 + $0xab0] sm:$0xff]   ;;  %v8387_v56 = vld [vmem:[#allocation2 + $0xaa8] sm:$0xff]  }
 0x14e   :  { %v7273_v61 = vpop.f32.mrf.mxu0  ;;  %7586 = vmatpush3.bf16.msra.mxu1 %v8347_v2  ;;  %7565 = vmatprep.subr.bf16.mxu0 %v8348_v3  ;;  %v8390_v59 = vld [vmem:[#allocation2 + $0xa20] sm:$0xff]   ;;  %v8396_v1 = vld [vmem:[#allocation2 + $0xa50] sm:$0xff]  }
 0x14f   :  { %v8838_v62 = vadd.f32 %v7293_v55, %v5156_v58  ;;  %v7295_v0 = vpop.f32.mrf.mxu1  ;;  %7587 = vmatprep.subr.bf16.mxu1 %v8349_v4  ;;  %v8386_v55 = vld [vmem:[#allocation2 + $0xa28] sm:$0xff]   ;;  %v8389_v58 = vld [vmem:[#allocation2 + $0xae0] sm:$0xff]   ;;  %v8392_v61 = vld [vmem:[#allocation2 + $0xa58] sm:$0xff]  }
 0x150   :  { %v8395_v0 = vld [vmem:[#allocation2 + $0xa98] sm:$0xff]   ;;  %v8397_v2 = vld [vmem:[#allocation2 + $0xad0] sm:$0xff]  }
 0x151   :  { %7566 = vmatpush3.bf16.msra.mxu0 %v8350_v5  ;;  %v8398_v3 = vld [vmem:[#allocation2 + $0xa10] sm:$0xff]   ;;  %v8400_v5 = vld [vmem:[#allocation2 + $0xa48] sm:$0xff]  }
 0x152   :  { %7588 = vmatpush3.bf16.msra.mxu1 %v8351_v6  ;;  %7567 = vmatprep.subr.bf16.mxu0 %v8352_v7  ;;  %v8399_v4 = vld [vmem:[#allocation2 + $0xa90] sm:$0xff]   ;;  %v8401_v6 = vld [vmem:[#allocation2 + $0xac8] sm:$0xff]  }
 0x153   :  { %7589 = vmatprep.subr.bf16.mxu1 %v8353_v8  ;;  %v8402_v7 = vld [vmem:[#allocation2 + $0xa08] sm:$0xff]   ;;  %v8417_v33 = vld [vmem:[#allocation2 + $0xbf0] sm:$0xff]  }
 0x154   :  { %v8403_v8 = vld [vmem:[#allocation2 + $0xa88] sm:$0xff]  }
 0x155   :  { %7568 = vmatpush3.bf16.msra.mxu0 %v8354_v9  ;;  %v8404_v9 = vld [vmem:[#allocation2 + $0xa40] sm:$0xff]  }
 0x156   :  { %7590 = vmatpush3.bf16.msra.mxu1 %v8355_v10  ;;  %7569 = vmatprep.subr.bf16.mxu0 %v8356_v11  ;;  %v8405_v10 = vld [vmem:[#allocation2 + $0xac0] sm:$0xff]  }
 0x157   :  { %7591 = vmatprep.subr.bf16.mxu1 %v8357_v12  ;;  %v8406_v11 = vld [vmem:[#allocation2 + $0xa00] sm:$0xff]  }
 0x158   :  { %v8407_v12 = vld [vmem:[#allocation2 + $0xa80] sm:$0xff]  }
 0x159   :  { %7570 = vmatpush3.bf16.msra.mxu0 %v8358_v13  ;;  %v78_v13 = vld [vmem:[%s8973_s0 + $0xa0] sm:$0xff] }
 0x15a   :  { %7592 = vmatpush3.bf16.msra.mxu1 %v8359_v14  ;;  %7571 = vmatprep.subr.bf16.mxu0 %v8360_v15  ;;  %v79_v14 = vld [vmem:[%s8973_s0 + $0xa8] sm:$0xff] }
 0x15b   :  { %7593 = vmatprep.subr.bf16.mxu1 %v8361_v16 }
 0x15d   :  { %7572 = vmatpush3.bf16.msra.mxu0 %v8362_v17  ;;  %v6556_v17 = vcombine.low %v78_v13, %v78_v13 }
 0x15e   :  { %7594 = vmatpush3.bf16.msra.mxu1 %v8363_v18  ;;  %7573 = vmatprep.subr.bf16.mxu0 %v8364_v19  ;;  %v6557_v18 = vcombine.high %v78_v13, %v78_v13  ;;  %v6558_v19 = vcombine.low %v79_v14, %v79_v14 }
 0x15f   :  { %7595 = vmatprep.subr.bf16.mxu1 %v8365_v20  ;;  %v8412_v20 = vld [vmem:[#allocation2 + $0xb78] sm:$0xff]  }
 0x161   :  { %7574 = vmatpush3.bf16.msra.mxu0 %v8366_v21  ;;  %v6559_v21 = vcombine.high %v79_v14, %v79_v14 }
 0x162   :  { %7596 = vmatpush3.bf16.msra.mxu1 %v8367_v22  ;;  %7575 = vmatprep.subr.bf16.mxu0 %v8368_v23  ;;  %v8413_v22 = vld [vmem:[#allocation2 + $0xbf8] sm:$0xff]  }
 0x163   :  { %7597 = vmatprep.subr.bf16.mxu1 %v8369_v24 }
 0x165   :  { %7576 = vmatpush3.bf16.msra.mxu0 %v8370_v25  ;;  %v8414_v25 = vld [vmem:[#allocation2 + $0xb38] sm:$0xff]  }
 0x166   :  { %7598 = vmatpush3.bf16.msra.mxu1 %v8371_v26  ;;  %7605 = vmatprep.subr.bf16.mxu0 %v8376_v35 }
 0x167   :  { %7627 = vmatprep.subr.bf16.mxu1 %v8377_v36 }
 0x168   :  { %v7313_v29 = vpop.f32.mrf.mxu0  ;;  %5714 = vmatmul.mubr.bf16.vlgmr.msra.gmra.mxu0 %v6552_v30 }
 0x169   :  { %v7335_v34 = vpop.f32.mrf.mxu1  ;;  %5754 = vmatmul.mubr.bf16.vlgmr.msra.gmra.mxu1 %v6554_v32  ;;  %7606 = vmatpush3.bf16.msra.mxu0 %v8378_v38  ;;  %v8416_v32 = vld [vmem:[#allocation2 + $0xb70] sm:$0xff]  }
 0x16a   :  { %v7314_v37 = vpop.f32.mrf.mxu0  ;;  %7628 = vmatpush3.bf16.msra.mxu1 %v8379_v41  ;;  %7607 = vmatprep.subr.bf16.mxu0 %v8380_v46  ;;  %v8419_v38 = vld [vmem:[#allocation2 + $0xbb0] sm:$0xff]   ;;  %v8422_v41 = vld [vmem:[#allocation2 + $0xb28] sm:$0xff]   ;;  %v8427_v46 = vld [vmem:[#allocation2 + $0xba0] sm:$0xff]  }
 0x16b   :  { %v7315_v39 = vadd.f32 %v7314_v37, %v7313_v29  ;;  %v7336_v40 = vpop.f32.mrf.mxu1  ;;  %7629 = vmatprep.subr.bf16.mxu1 %v8381_v47  ;;  %5793 = vmatprep.mubr.bf16.mxu0 %v6557_v18  ;;  %v8418_v37 = vld [vmem:[#allocation2 + $0xb30] sm:$0xff]   ;;  %v8428_v47 = vld [vmem:[#allocation2 + $0xb58] sm:$0xff]  }
 0x16c   :  { %v7337_v42 = vadd.f32 %v7336_v40, %v7335_v34  ;;  %v7316_v43 = vpop.f32.mrf.mxu0  ;;  %5833 = vmatprep.mubr.bf16.mxu1 %v6559_v21  ;;  %v8421_v40 = vld [vmem:[#allocation2 + $0xbe8] sm:$0xff]   ;;  %v8452_v18 = vld [vmem:[#allocation2 + $0xc70] sm:$0xff]  }
 0x16d   :  { %v5236_v44 = vadd.f32 %v7315_v39, %v8838_v62  ;;  %v7338_v45 = vpop.f32.mrf.mxu1  ;;  %7608 = vmatpush3.bf16.msra.mxu0 %v8382_v50  ;;  %v8393_v62 = vld [vmem:[#allocation2 + $0xad8] sm:$0xff]   ;;  %v8420_v39 = vld [vmem:[#allocation2 + $0xb68] sm:$0xff]   ;;  %v8424_v43 = vld [vmem:[#allocation2 + $0xb60] sm:$0xff]  }
 0x16e   :  { %v7317_v48 = vpop.f32.mrf.mxu0  ;;  %7630 = vmatpush3.bf16.msra.mxu1 %v8383_v52  ;;  %7609 = vmatprep.subr.bf16.mxu0 %v8384_v53  ;;  %v8426_v45 = vld [vmem:[#allocation2 + $0xb20] sm:$0xff]   ;;  %v8431_v50 = vld [vmem:[#allocation2 + $0xb98] sm:$0xff]   ;;  %v8433_v52 = vld [vmem:[#allocation2 + $0xbd0] sm:$0xff]  }
 0x16f   :  { %v8847_v49 = vadd.f32 %v7337_v42, %v5236_v44  ;;  %v7339_v51 = vpop.f32.mrf.mxu1  ;;  %7631 = vmatprep.subr.bf16.mxu1 %v8385_v54  ;;  %v8423_v42 = vld [vmem:[#allocation2 + $0xba8] sm:$0xff]   ;;  %v8425_v44 = vld [vmem:[#allocation2 + $0xbe0] sm:$0xff]   ;;  %v8429_v48 = vld [vmem:[#allocation2 + $0xbd8] sm:$0xff]  }
 0x170   :  { %v8432_v51 = vld [vmem:[#allocation2 + $0xb50] sm:$0xff]  }
 0x171   :  { %7610 = vmatpush3.bf16.msra.mxu0 %v8386_v55  ;;  %v8434_v53 = vld [vmem:[#allocation2 + $0xb10] sm:$0xff]   ;;  %v8436_v55 = vld [vmem:[#allocation2 + $0xb48] sm:$0xff]  }
 0x172   :  { %7632 = vmatpush3.bf16.msra.mxu1 %v8387_v56  ;;  %7611 = vmatprep.subr.bf16.mxu0 %v8388_v57  ;;  %v8435_v54 = vld [vmem:[#allocation2 + $0xb90] sm:$0xff]   ;;  %v8437_v56 = vld [vmem:[#allocation2 + $0xbc8] sm:$0xff]  }
 0x173   :  { %7633 = vmatprep.subr.bf16.mxu1 %v8389_v58  ;;  %v8438_v57 = vld [vmem:[#allocation2 + $0xb08] sm:$0xff]   ;;  %v8453_v21 = vld [vmem:[#allocation2 + $0xcf0] sm:$0xff]  }
 0x174   :  { %v8439_v58 = vld [vmem:[#allocation2 + $0xb88] sm:$0xff]  }
 0x175   :  { %7612 = vmatpush3.bf16.msra.mxu0 %v8390_v59  ;;  %v8440_v59 = vld [vmem:[#allocation2 + $0xb40] sm:$0xff]  }
 0x176   :  { %7634 = vmatpush3.bf16.msra.mxu1 %v8391_v60  ;;  %7613 = vmatprep.subr.bf16.mxu0 %v8392_v61  ;;  %v8441_v60 = vld [vmem:[#allocation2 + $0xbc0] sm:$0xff]  }
 0x177   :  { %7635 = vmatprep.subr.bf16.mxu1 %v8393_v62  ;;  %v8442_v61 = vld [vmem:[#allocation2 + $0xb00] sm:$0xff]  }
 0x178   :  { %v8443_v62 = vld [vmem:[#allocation2 + $0xb80] sm:$0xff]  }
 0x179   :  { %7614 = vmatpush3.bf16.msra.mxu0 %v8394_v63  ;;  %v80_v63 = vld [vmem:[%s8973_s0 + $0xb0] sm:$0xff] }
 0x17a   :  { %7636 = vmatpush3.bf16.msra.mxu1 %v8395_v0  ;;  %7615 = vmatprep.subr.bf16.mxu0 %v8396_v1  ;;  %v6560_v1 = vcombine.low %v80_v63, %v80_v63 }
 0x17b   :  { %7637 = vmatprep.subr.bf16.mxu1 %v8397_v2  ;;  %v6561_v2 = vcombine.high %v80_v63, %v80_v63  ;;  %v8487_v63 = vld [vmem:[#allocation2 + $0xdb8] sm:$0xff]  }
 0x17d   :  { %7616 = vmatpush3.bf16.msra.mxu0 %v8398_v3  ;;  %v81_v3 = vld [vmem:[%s8973_s0 + $0xb8] sm:$0xff] }
 0x17e   :  { %7638 = vmatpush3.bf16.msra.mxu1 %v8399_v4  ;;  %7617 = vmatprep.subr.bf16.mxu0 %v8400_v5  ;;  %v6562_v5 = vcombine.low %v81_v3, %v81_v3 }
 0x17f   :  { %7639 = vmatprep.subr.bf16.mxu1 %v8401_v6  ;;  %v6563_v6 = vcombine.high %v81_v3, %v81_v3 }
 0x181   :  { %7618 = vmatpush3.bf16.msra.mxu0 %v8402_v7  ;;  %v8448_v7 = vld [vmem:[#allocation2 + $0xc78] sm:$0xff]  }
 0x182   :  { %7640 = vmatpush3.bf16.msra.mxu1 %v8403_v8  ;;  %7619 = vmatprep.subr.bf16.mxu0 %v8404_v9  ;;  %v8449_v9 = vld [vmem:[#allocation2 + $0xcf8] sm:$0xff]  }
 0x183   :  { %7641 = vmatprep.subr.bf16.mxu1 %v8405_v10 }
 0x185   :  { %7620 = vmatpush3.bf16.msra.mxu0 %v8406_v11 }
 0x186   :  { %7642 = vmatpush3.bf16.msra.mxu1 %v8407_v12  ;;  %7649 = vmatprep.subr.bf16.mxu0 %v8412_v20  ;;  %v8450_v12 = vld [vmem:[#allocation2 + $0xc38] sm:$0xff]  }
 0x187   :  { %7671 = vmatprep.subr.bf16.mxu1 %v8413_v22 }
 0x188   :  { %v7357_v15 = vpop.f32.mrf.mxu0  ;;  %5794 = vmatmul.mubr.bf16.vlgmr.msra.gmra.mxu0 %v6556_v17 }
 0x189   :  { %v7379_v16 = vpop.f32.mrf.mxu1  ;;  %5834 = vmatmul.mubr.bf16.vlgmr.msra.gmra.mxu1 %v6558_v19  ;;  %7650 = vmatpush3.bf16.msra.mxu0 %v8414_v25  ;;  %v8456_v25 = vld [vmem:[#allocation2 + $0xc68] sm:$0xff]  }
 0x18a   :  { %v7358_v23 = vpop.f32.mrf.mxu0  ;;  %7672 = vmatpush3.bf16.msra.mxu1 %v8415_v28  ;;  %7651 = vmatprep.subr.bf16.mxu0 %v8416_v32  ;;  %v8459_v28 = vld [vmem:[#allocation2 + $0xca8] sm:$0xff]   ;;  %v8463_v32 = vld [vmem:[#allocation2 + $0xca0] sm:$0xff]  }
 0x18b   :  { %v7380_v24 = vpop.f32.mrf.mxu1  ;;  %v7359_v26 = vadd.f32 %v7358_v23, %v7357_v15  ;;  %7673 = vmatprep.subr.bf16.mxu1 %v8417_v33  ;;  %5873 = vmatprep.mubr.bf16.mxu0 %v6561_v2  ;;  %v8451_v15 = vld [vmem:[#allocation2 + $0xcb8] sm:$0xff]   ;;  %v8454_v23 = vld [vmem:[#allocation2 + $0xc30] sm:$0xff]  }
 0x18c   :  { %v7381_v27 = vadd.f32 %v7380_v24, %v7379_v16  ;;  %v7360_v29 = vpop.f32.mrf.mxu0  ;;  %5913 = vmatprep.mubr.bf16.mxu1 %v6563_v6  ;;  %v8455_v24 = vld [vmem:[#allocation2 + $0xcb0] sm:$0xff]   ;;  %v8464_v33 = vld [vmem:[#allocation2 + $0xc58] sm:$0xff]  }
 0x18d   :  { %v7382_v30 = vpop.f32.mrf.mxu1  ;;  %v5316_v31 = vadd.f32 %v7359_v26, %v8847_v49  ;;  %7652 = vmatpush3.bf16.msra.mxu0 %v8418_v37  ;;  %v8430_v49 = vld [vmem:[#allocation2 + $0xb18] sm:$0xff]   ;;  %v8457_v26 = vld [vmem:[#allocation2 + $0xce8] sm:$0xff]   ;;  %v8460_v29 = vld [vmem:[#allocation2 + $0xc60] sm:$0xff]  }
 0x18e   :  { %v7361_v34 = vpop.f32.mrf.mxu0  ;;  %7674 = vmatpush3.bf16.msra.mxu1 %v8419_v38  ;;  %7653 = vmatprep.subr.bf16.mxu0 %v8420_v39  ;;  %v8461_v30 = vld [vmem:[#allocation2 + $0xce0] sm:$0xff]   ;;  %v8468_v37 = vld [vmem:[#allocation2 + $0xc50] sm:$0xff]  }
 0x18f   :  { %v7383_v35 = vpop.f32.mrf.mxu1  ;;  %v8856_v36 = vadd.f32 %v7381_v27, %v5316_v31  ;;  %7675 = vmatprep.subr.bf16.mxu1 %v8421_v40  ;;  %v8458_v27 = vld [vmem:[#allocation2 + $0xc28] sm:$0xff]   ;;  %v8462_v31 = vld [vmem:[#allocation2 + $0xc20] sm:$0xff]   ;;  %v8465_v34 = vld [vmem:[#allocation2 + $0xcd8] sm:$0xff]  }
 0x190   :  { %v8466_v35 = vld [vmem:[#allocation2 + $0xc18] sm:$0xff]   ;;  %v8469_v38 = vld [vmem:[#allocation2 + $0xcd0] sm:$0xff]  }
 0x191   :  { %7654 = vmatpush3.bf16.msra.mxu0 %v8422_v41  ;;  %v8470_v39 = vld [vmem:[#allocation2 + $0xc10] sm:$0xff]   ;;  %v8472_v41 = vld [vmem:[#allocation2 + $0xc48] sm:$0xff]  }
 0x192   :  { %7676 = vmatpush3.bf16.msra.mxu1 %v8423_v42  ;;  %7655 = vmatprep.subr.bf16.mxu0 %v8424_v43  ;;  %v8471_v40 = vld [vmem:[#allocation2 + $0xc90] sm:$0xff]   ;;  %v8473_v42 = vld [vmem:[#allocation2 + $0xcc8] sm:$0xff]  }
 0x193   :  { %7677 = vmatprep.subr.bf16.mxu1 %v8425_v44  ;;  %v8474_v43 = vld [vmem:[#allocation2 + $0xc08] sm:$0xff]  }
 0x194   :  { %v8475_v44 = vld [vmem:[#allocation2 + $0xc88] sm:$0xff]  }
 0x195   :  { %7656 = vmatpush3.bf16.msra.mxu0 %v8426_v45  ;;  %v8476_v45 = vld [vmem:[#allocation2 + $0xc40] sm:$0xff]  }
 0x196   :  { %7678 = vmatpush3.bf16.msra.mxu1 %v8427_v46  ;;  %7657 = vmatprep.subr.bf16.mxu0 %v8428_v47  ;;  %v8477_v46 = vld [vmem:[#allocation2 + $0xcc0] sm:$0xff]  }
 0x197   :  { %7679 = vmatprep.subr.bf16.mxu1 %v8429_v48  ;;  %v8478_v47 = vld [vmem:[#allocation2 + $0xc00] sm:$0xff]  }
 0x198   :  { %v8479_v48 = vld [vmem:[#allocation2 + $0xc80] sm:$0xff]  }
 0x199   :  { %7658 = vmatpush3.bf16.msra.mxu0 %v8430_v49  ;;  %v82_v49 = vld [vmem:[%s8973_s0 + $0xc0] sm:$0xff] }
 0x19a   :  { %7680 = vmatpush3.bf16.msra.mxu1 %v8431_v50  ;;  %7659 = vmatprep.subr.bf16.mxu0 %v8432_v51  ;;  %v83_v50 = vld [vmem:[%s8973_s0 + $0xc8] sm:$0xff] }
 0x19b   :  { %7681 = vmatprep.subr.bf16.mxu1 %v8433_v52  ;;  %v6564_v52 = vcombine.low %v82_v49, %v82_v49 }
 0x19d   :  { %7660 = vmatpush3.bf16.msra.mxu0 %v8434_v53  ;;  %v6565_v53 = vcombine.high %v82_v49, %v82_v49  ;;  %v8523_v49 = vld [vmem:[#allocation2 + $0xeb8] sm:$0xff]  }
 0x19e   :  { %7682 = vmatpush3.bf16.msra.mxu1 %v8435_v54  ;;  %7661 = vmatprep.subr.bf16.mxu0 %v8436_v55  ;;  %v6566_v54 = vcombine.low %v83_v50, %v83_v50  ;;  %v6567_v55 = vcombine.high %v83_v50, %v83_v50 }
 0x19f   :  { %7683 = vmatprep.subr.bf16.mxu1 %v8437_v56 }
 0x1a1   :  { %7662 = vmatpush3.bf16.msra.mxu0 %v8438_v57  ;;  %v8484_v57 = vld [vmem:[#allocation2 + $0xd78] sm:$0xff]  }
 0x1a2   :  { %7684 = vmatpush3.bf16.msra.mxu1 %v8439_v58  ;;  %7663 = vmatprep.subr.bf16.mxu0 %v8440_v59  ;;  %v8485_v58 = vld [vmem:[#allocation2 + $0xdf8] sm:$0xff]  }
 0x1a3   :  { %7685 = vmatprep.subr.bf16.mxu1 %v8441_v60  ;;  %v8486_v60 = vld [vmem:[#allocation2 + $0xd38] sm:$0xff]  }
 0x1a5   :  { %7664 = vmatpush3.bf16.msra.mxu0 %v8442_v61 }
 0x1a6   :  { %7686 = vmatpush3.bf16.msra.mxu1 %v8443_v62  ;;  %7693 = vmatprep.subr.bf16.mxu0 %v8448_v7 }
 0x1a7   :  { %7715 = vmatprep.subr.bf16.mxu1 %v8449_v9 }
 0x1a8   :  { %v7401_v0 = vpop.f32.mrf.mxu0  ;;  %5874 = vmatmul.mubr.bf16.vlgmr.msra.gmra.mxu0 %v6560_v1 }
 0x1a9   :  { %v7423_v4 = vpop.f32.mrf.mxu1  ;;  %5914 = vmatmul.mubr.bf16.vlgmr.msra.gmra.mxu1 %v6562_v5  ;;  %7694 = vmatpush3.bf16.msra.mxu0 %v8450_v12  ;;  %v8489_v5 = vld [vmem:[#allocation2 + $0xdf0] sm:$0xff]   ;;  %v8493_v12 = vld [vmem:[#allocation2 + $0xde8] sm:$0xff]  }
 0x1aa   :  { %v7402_v8 = vpop.f32.mrf.mxu0  ;;  %7716 = vmatpush3.bf16.msra.mxu1 %v8451_v15  ;;  %7695 = vmatprep.subr.bf16.mxu0 %v8452_v18  ;;  %v8496_v15 = vld [vmem:[#allocation2 + $0xd60] sm:$0xff]  }
 0x1ab   :  { %v7403_v10 = vadd.f32 %v7402_v8, %v7401_v0  ;;  %v7424_v11 = vpop.f32.mrf.mxu1  ;;  %7717 = vmatprep.subr.bf16.mxu1 %v8453_v21  ;;  %5953 = vmatprep.mubr.bf16.mxu0 %v6565_v53  ;;  %v8490_v8 = vld [vmem:[#allocation2 + $0xd30] sm:$0xff]   ;;  %v8499_v18 = vld [vmem:[#allocation2 + $0xda0] sm:$0xff]   ;;  %v8502_v21 = vld [vmem:[#allocation2 + $0xd18] sm:$0xff]  }
 0x1ac   :  { %v7425_v13 = vadd.f32 %v7424_v11, %v7423_v4  ;;  %v7404_v14 = vpop.f32.mrf.mxu0  ;;  %5993 = vmatprep.mubr.bf16.mxu1 %v6567_v55  ;;  %v8488_v4 = vld [vmem:[#allocation2 + $0xd70] sm:$0xff]   ;;  %v8492_v11 = vld [vmem:[#allocation2 + $0xd68] sm:$0xff]  }
 0x1ad   :  { %v5396_v16 = vadd.f32 %v7403_v10, %v8856_v36  ;;  %v7426_v17 = vpop.f32.mrf.mxu1  ;;  %7696 = vmatpush3.bf16.msra.mxu0 %v8454_v23  ;;  %v8467_v36 = vld [vmem:[#allocation2 + $0xc98] sm:$0xff]   ;;  %v8491_v10 = vld [vmem:[#allocation2 + $0xdb0] sm:$0xff]   ;;  %v8495_v14 = vld [vmem:[#allocation2 + $0xda8] sm:$0xff]  }
 0x1ae   :  { %v7405_v19 = vpop.f32.mrf.mxu0  ;;  %7718 = vmatpush3.bf16.msra.mxu1 %v8455_v24  ;;  %7697 = vmatprep.subr.bf16.mxu0 %v8456_v25  ;;  %v8498_v17 = vld [vmem:[#allocation2 + $0xd20] sm:$0xff]   ;;  %v8504_v23 = vld [vmem:[#allocation2 + $0xd50] sm:$0xff]  }
 0x1af   :  { %v8865_v20 = vadd.f32 %v7425_v13, %v5396_v16  ;;  %v7427_v22 = vpop.f32.mrf.mxu1  ;;  %7719 = vmatprep.subr.bf16.mxu1 %v8457_v26  ;;  %v8494_v13 = vld [vmem:[#allocation2 + $0xd28] sm:$0xff]   ;;  %v8497_v16 = vld [vmem:[#allocation2 + $0xde0] sm:$0xff]   ;;  %v8500_v19 = vld [vmem:[#allocation2 + $0xd58] sm:$0xff]  }
 0x1b0   :  { %v8503_v22 = vld [vmem:[#allocation2 + $0xd98] sm:$0xff]   ;;  %v8505_v24 = vld [vmem:[#allocation2 + $0xdd0] sm:$0xff]  }
 0x1b1   :  { %7698 = vmatpush3.bf16.msra.mxu0 %v8458_v27  ;;  %v8506_v25 = vld [vmem:[#allocation2 + $0xd10] sm:$0xff]   ;;  %v8508_v27 = vld [vmem:[#allocation2 + $0xd48] sm:$0xff]  }
 0x1b2   :  { %7720 = vmatpush3.bf16.msra.mxu1 %v8459_v28  ;;  %7699 = vmatprep.subr.bf16.mxu0 %v8460_v29  ;;  %v8507_v26 = vld [vmem:[#allocation2 + $0xd90] sm:$0xff]   ;;  %v8509_v28 = vld [vmem:[#allocation2 + $0xdc8] sm:$0xff]  }
 0x1b3   :  { %7721 = vmatprep.subr.bf16.mxu1 %v8461_v30  ;;  %v8510_v29 = vld [vmem:[#allocation2 + $0xd08] sm:$0xff]   ;;  %v8525_v55 = vld [vmem:[#allocation2 + $0xef0] sm:$0xff]  }
 0x1b4   :  { %v8511_v30 = vld [vmem:[#allocation2 + $0xd88] sm:$0xff]  }
 0x1b5   :  { %7700 = vmatpush3.bf16.msra.mxu0 %v8462_v31  ;;  %v8512_v31 = vld [vmem:[#allocation2 + $0xd40] sm:$0xff]  }
 0x1b6   :  { %7722 = vmatpush3.bf16.msra.mxu1 %v8463_v32  ;;  %7701 = vmatprep.subr.bf16.mxu0 %v8464_v33  ;;  %v8513_v32 = vld [vmem:[#allocation2 + $0xdc0] sm:$0xff]  }
 0x1b7   :  { %7723 = vmatprep.subr.bf16.mxu1 %v8465_v34  ;;  %v8514_v33 = vld [vmem:[#allocation2 + $0xd00] sm:$0xff]  }
 0x1b8   :  { %v8515_v34 = vld [vmem:[#allocation2 + $0xd80] sm:$0xff]  }
 0x1b9   :  { %7702 = vmatpush3.bf16.msra.mxu0 %v8466_v35  ;;  %v84_v35 = vld [vmem:[%s8973_s0 + $0xd0] sm:$0xff] }
 0x1ba   :  { %7724 = vmatpush3.bf16.msra.mxu1 %v8467_v36  ;;  %7703 = vmatprep.subr.bf16.mxu0 %v8468_v37  ;;  %v85_v36 = vld [vmem:[%s8973_s0 + $0xd8] sm:$0xff] }
 0x1bb   :  { %7725 = vmatprep.subr.bf16.mxu1 %v8469_v38  ;;  %v6568_v38 = vcombine.low %v84_v35, %v84_v35 }
 0x1bd   :  { %7704 = vmatpush3.bf16.msra.mxu0 %v8470_v39  ;;  %v6569_v39 = vcombine.high %v84_v35, %v84_v35 }
 0x1be   :  { %7726 = vmatpush3.bf16.msra.mxu1 %v8471_v40  ;;  %7705 = vmatprep.subr.bf16.mxu0 %v8472_v41  ;;  %v6570_v40 = vcombine.low %v85_v36, %v85_v36 }
 0x1bf   :  { %7727 = vmatprep.subr.bf16.mxu1 %v8473_v42  ;;  %v8520_v42 = vld [vmem:[#allocation2 + $0xe78] sm:$0xff]  }
 0x1c1   :  { %7706 = vmatpush3.bf16.msra.mxu0 %v8474_v43  ;;  %v6571_v43 = vcombine.high %v85_v36, %v85_v36  ;;  %v8559_v36 = vld [vmem:[#allocation2 + $0xfb8] sm:$0xff]  }
 0x1c2   :  { %7728 = vmatpush3.bf16.msra.mxu1 %v8475_v44  ;;  %7707 = vmatprep.subr.bf16.mxu0 %v8476_v45  ;;  %v8521_v44 = vld [vmem:[#allocation2 + $0xef8] sm:$0xff]  }
 0x1c3   :  { %7729 = vmatprep.subr.bf16.mxu1 %v8477_v46  ;;  %v8522_v46 = vld [vmem:[#allocation2 + $0xe38] sm:$0xff]  }
 0x1c5   :  { %7708 = vmatpush3.bf16.msra.mxu0 %v8478_v47 }
 0x1c6   :  { %7730 = vmatpush3.bf16.msra.mxu1 %v8479_v48  ;;  %7737 = vmatprep.subr.bf16.mxu0 %v8484_v57 }
 0x1c7   :  { %7759 = vmatprep.subr.bf16.mxu1 %v8485_v58  ;;  %v8526_v58 = vld [vmem:[#allocation2 + $0xe30] sm:$0xff]  }
 0x1c8   :  { %v7445_v51 = vpop.f32.mrf.mxu0  ;;  %5954 = vmatmul.mubr.bf16.vlgmr.msra.gmra.mxu0 %v6564_v52 }
 0x1c9   :  { %v7467_v56 = vpop.f32.mrf.mxu1  ;;  %5994 = vmatmul.mubr.bf16.vlgmr.msra.gmra.mxu1 %v6566_v54  ;;  %7738 = vmatpush3.bf16.msra.mxu0 %v8486_v60  ;;  %v8524_v54 = vld [vmem:[#allocation2 + $0xe70] sm:$0xff]  }
 0x1ca   :  { %v7446_v59 = vpop.f32.mrf.mxu0  ;;  %7760 = vmatpush3.bf16.msra.mxu1 %v8487_v63  ;;  %7739 = vmatprep.subr.bf16.mxu0 %v8488_v4  ;;  %v8527_v60 = vld [vmem:[#allocation2 + $0xeb0] sm:$0xff]   ;;  %v8530_v63 = vld [vmem:[#allocation2 + $0xe28] sm:$0xff]   ;;  %v8535_v4 = vld [vmem:[#allocation2 + $0xea0] sm:$0xff]  }
 0x1cb   :  { %v7447_v61 = vadd.f32 %v7446_v59, %v7445_v51  ;;  %v7468_v62 = vpop.f32.mrf.mxu1  ;;  %7761 = vmatprep.subr.bf16.mxu1 %v8489_v5  ;;  %6033 = vmatprep.mubr.bf16.mxu0 %v6569_v39  ;;  %v8536_v5 = vld [vmem:[#allocation2 + $0xe58] sm:$0xff]  }
 0x1cc   :  { %v7469_v0 = vadd.f32 %v7468_v62, %v7467_v56  ;;  %v7448_v1 = vpop.f32.mrf.mxu0  ;;  %6073 = vmatprep.mubr.bf16.mxu1 %v6571_v43  ;;  %v8529_v62 = vld [vmem:[#allocation2 + $0xee8] sm:$0xff]  }
 0x1cd   :  { %v5476_v2 = vadd.f32 %v7447_v61, %v8865_v20  ;;  %v7470_v3 = vpop.f32.mrf.mxu1  ;;  %7740 = vmatpush3.bf16.msra.mxu0 %v8490_v8  ;;  %v8501_v20 = vld [vmem:[#allocation2 + $0xdd8] sm:$0xff]   ;;  %v8528_v61 = vld [vmem:[#allocation2 + $0xe68] sm:$0xff]   ;;  %v8532_v1 = vld [vmem:[#allocation2 + $0xe60] sm:$0xff]  }
 0x1ce   :  { %v7449_v6 = vpop.f32.mrf.mxu0  ;;  %7762 = vmatpush3.bf16.msra.mxu1 %v8491_v10  ;;  %7741 = vmatprep.subr.bf16.mxu0 %v8492_v11  ;;  %v8534_v3 = vld [vmem:[#allocation2 + $0xe20] sm:$0xff]   ;;  %v8539_v8 = vld [vmem:[#allocation2 + $0xe98] sm:$0xff]   ;;  %v8541_v10 = vld [vmem:[#allocation2 + $0xed0] sm:$0xff]  }
 0x1cf   :  { %v8874_v7 = vadd.f32 %v7469_v0, %v5476_v2  ;;  %v7471_v9 = vpop.f32.mrf.mxu1  ;;  %7763 = vmatprep.subr.bf16.mxu1 %v8493_v12  ;;  %v8531_v0 = vld [vmem:[#allocation2 + $0xea8] sm:$0xff]   ;;  %v8533_v2 = vld [vmem:[#allocation2 + $0xee0] sm:$0xff]   ;;  %v8537_v6 = vld [vmem:[#allocation2 + $0xed8] sm:$0xff]  }
 0x1d0   :  { %v8540_v9 = vld [vmem:[#allocation2 + $0xe50] sm:$0xff]  }
 0x1d1   :  { %7742 = vmatpush3.bf16.msra.mxu0 %v8494_v13  ;;  %v8542_v11 = vld [vmem:[#allocation2 + $0xe10] sm:$0xff]   ;;  %v8544_v13 = vld [vmem:[#allocation2 + $0xe48] sm:$0xff]  }
 0x1d2   :  { %7764 = vmatpush3.bf16.msra.mxu1 %v8495_v14  ;;  %7743 = vmatprep.subr.bf16.mxu0 %v8496_v15  ;;  %v8543_v12 = vld [vmem:[#allocation2 + $0xe90] sm:$0xff]   ;;  %v8545_v14 = vld [vmem:[#allocation2 + $0xec8] sm:$0xff]  }
 0x1d3   :  { %7765 = vmatprep.subr.bf16.mxu1 %v8497_v16  ;;  %v8546_v15 = vld [vmem:[#allocation2 + $0xe08] sm:$0xff]  }
 0x1d4   :  { %v8547_v16 = vld [vmem:[#allocation2 + $0xe88] sm:$0xff]  }
 0x1d5   :  { %7744 = vmatpush3.bf16.msra.mxu0 %v8498_v17  ;;  %v8548_v17 = vld [vmem:[#allocation2 + $0xe40] sm:$0xff]  }
 0x1d6   :  { %7766 = vmatpush3.bf16.msra.mxu1 %v8499_v18  ;;  %7745 = vmatprep.subr.bf16.mxu0 %v8500_v19  ;;  %v8549_v18 = vld [vmem:[#allocation2 + $0xec0] sm:$0xff]  }
 0x1d7   :  { %7767 = vmatprep.subr.bf16.mxu1 %v8501_v20  ;;  %v8550_v19 = vld [vmem:[#allocation2 + $0xe00] sm:$0xff]  }
 0x1d8   :  { %v8551_v20 = vld [vmem:[#allocation2 + $0xe80] sm:$0xff]  }
 0x1d9   :  { %7746 = vmatpush3.bf16.msra.mxu0 %v8502_v21  ;;  %v86_v21 = vld [vmem:[%s8973_s0 + $0xe0] sm:$0xff] }
 0x1da   :  { %7768 = vmatpush3.bf16.msra.mxu1 %v8503_v22  ;;  %7747 = vmatprep.subr.bf16.mxu0 %v8504_v23  ;;  %v6572_v22 = vcombine.low %v86_v21, %v86_v21  ;;  %v6573_v23 = vcombine.high %v86_v21, %v86_v21  ;;  %v8595_v21 = vld [vmem:[#allocation2 + $0x10b8] sm:$0xff]  }
 0x1db   :  { %7769 = vmatprep.subr.bf16.mxu1 %v8505_v24  ;;  %v87_v24 = vld [vmem:[%s8973_s0 + $0xe8] sm:$0xff] }
 0x1dd   :  { %7748 = vmatpush3.bf16.msra.mxu0 %v8506_v25 }
 0x1de   :  { %7770 = vmatpush3.bf16.msra.mxu1 %v8507_v26  ;;  %7749 = vmatprep.subr.bf16.mxu0 %v8508_v27  ;;  %v6574_v27 = vcombine.low %v87_v24, %v87_v24 }
 0x1df   :  { %7771 = vmatprep.subr.bf16.mxu1 %v8509_v28  ;;  %v6575_v28 = vcombine.high %v87_v24, %v87_v24 }
 0x1e1   :  { %7750 = vmatpush3.bf16.msra.mxu0 %v8510_v29  ;;  %v8556_v29 = vld [vmem:[#allocation2 + $0xf78] sm:$0xff]  }
 0x1e2   :  { %7772 = vmatpush3.bf16.msra.mxu1 %v8511_v30  ;;  %7751 = vmatprep.subr.bf16.mxu0 %v8512_v31  ;;  %v8557_v30 = vld [vmem:[#allocation2 + $0xff8] sm:$0xff]  }
 0x1e3   :  { %7773 = vmatprep.subr.bf16.mxu1 %v8513_v32 }
 0x1e5   :  { %7752 = vmatpush3.bf16.msra.mxu0 %v8514_v33  ;;  %v8558_v33 = vld [vmem:[#allocation2 + $0xf38] sm:$0xff]  }
 0x1e6   :  { %7774 = vmatpush3.bf16.msra.mxu1 %v8515_v34  ;;  %7781 = vmatprep.subr.bf16.mxu0 %v8520_v42 }
 0x1e7   :  { %7803 = vmatprep.subr.bf16.mxu1 %v8521_v44 }
 0x1e8   :  { %v7489_v37 = vpop.f32.mrf.mxu0  ;;  %6034 = vmatmul.mubr.bf16.vlgmr.msra.gmra.mxu0 %v6568_v38 }
 0x1e9   :  { %v7511_v41 = vpop.f32.mrf.mxu1  ;;  %6074 = vmatmul.mubr.bf16.vlgmr.msra.gmra.mxu1 %v6570_v40  ;;  %7782 = vmatpush3.bf16.msra.mxu0 %v8522_v46  ;;  %v8560_v40 = vld [vmem:[#allocation2 + $0xf70] sm:$0xff]  }
 0x1ea   :  { %v7490_v45 = vpop.f32.mrf.mxu0  ;;  %7804 = vmatpush3.bf16.msra.mxu1 %v8523_v49  ;;  %7783 = vmatprep.subr.bf16.mxu0 %v8524_v54  ;;  %v8563_v46 = vld [vmem:[#allocation2 + $0xfb0] sm:$0xff]   ;;  %v8566_v49 = vld [vmem:[#allocation2 + $0xf28] sm:$0xff]   ;;  %v8571_v54 = vld [vmem:[#allocation2 + $0xfa0] sm:$0xff]  }
 0x1eb   :  { %v7491_v47 = vadd.f32 %v7490_v45, %v7489_v37  ;;  %v7512_v48 = vpop.f32.mrf.mxu1  ;;  %7805 = vmatprep.subr.bf16.mxu1 %v8525_v55  ;;  %6113 = vmatprep.mubr.bf16.mxu0 %v6573_v23  ;;  %v8562_v45 = vld [vmem:[#allocation2 + $0xf30] sm:$0xff]   ;;  %v8572_v55 = vld [vmem:[#allocation2 + $0xf58] sm:$0xff]  }
 0x1ec   :  { %v7513_v50 = vadd.f32 %v7512_v48, %v7511_v41  ;;  %v7492_v51 = vpop.f32.mrf.mxu0  ;;  %6153 = vmatprep.mubr.bf16.mxu1 %v6575_v28  ;;  %v8561_v41 = vld [vmem:[#allocation2 + $0xff0] sm:$0xff]   ;;  %v8565_v48 = vld [vmem:[#allocation2 + $0xfe8] sm:$0xff]  }
 0x1ed   :  { %v5556_v52 = vadd.f32 %v7491_v47, %v8874_v7  ;;  %v7514_v53 = vpop.f32.mrf.mxu1  ;;  %7784 = vmatpush3.bf16.msra.mxu0 %v8526_v58  ;;  %v8538_v7 = vld [vmem:[#allocation2 + $0xe18] sm:$0xff]   ;;  %v8564_v47 = vld [vmem:[#allocation2 + $0xf68] sm:$0xff]   ;;  %v8568_v51 = vld [vmem:[#allocation2 + $0xf60] sm:$0xff]  }
 0x1ee   :  { %v7493_v56 = vpop.f32.mrf.mxu0  ;;  %7806 = vmatpush3.bf16.msra.mxu1 %v8527_v60  ;;  %7785 = vmatprep.subr.bf16.mxu0 %v8528_v61  ;;  %v8570_v53 = vld [vmem:[#allocation2 + $0xf20] sm:$0xff]   ;;  %v8575_v58 = vld [vmem:[#allocation2 + $0xf98] sm:$0xff]   ;;  %v8577_v60 = vld [vmem:[#allocation2 + $0xfd0] sm:$0xff]  }
 0x1ef   :  { %v8883_v57 = vadd.f32 %v7513_v50, %v5556_v52  ;;  %v7515_v59 = vpop.f32.mrf.mxu1  ;;  %7807 = vmatprep.subr.bf16.mxu1 %v8529_v62  ;;  %v8567_v50 = vld [vmem:[#allocation2 + $0xfa8] sm:$0xff]   ;;  %v8569_v52 = vld [vmem:[#allocation2 + $0xfe0] sm:$0xff]   ;;  %v8573_v56 = vld [vmem:[#allocation2 + $0xfd8] sm:$0xff]  }
 0x1f0   :  { %v8576_v59 = vld [vmem:[#allocation2 + $0xf50] sm:$0xff]  }
 0x1f1   :  { %7786 = vmatpush3.bf16.msra.mxu0 %v8530_v63  ;;  %v8578_v61 = vld [vmem:[#allocation2 + $0xf10] sm:$0xff]   ;;  %v8580_v63 = vld [vmem:[#allocation2 + $0xf48] sm:$0xff]  }
 0x1f2   :  { %7808 = vmatpush3.bf16.msra.mxu1 %v8531_v0  ;;  %7787 = vmatprep.subr.bf16.mxu0 %v8532_v1  ;;  %v8579_v62 = vld [vmem:[#allocation2 + $0xf90] sm:$0xff]   ;;  %v8581_v0 = vld [vmem:[#allocation2 + $0xfc8] sm:$0xff]  }
 0x1f3   :  { %7809 = vmatprep.subr.bf16.mxu1 %v8533_v2  ;;  %v8582_v1 = vld [vmem:[#allocation2 + $0xf08] sm:$0xff]  }
 0x1f4   :  { %v8583_v2 = vld [vmem:[#allocation2 + $0xf88] sm:$0xff]  }
 0x1f5   :  { %7788 = vmatpush3.bf16.msra.mxu0 %v8534_v3  ;;  %v8584_v3 = vld [vmem:[#allocation2 + $0xf40] sm:$0xff]  }
 0x1f6   :  { %7810 = vmatpush3.bf16.msra.mxu1 %v8535_v4  ;;  %7789 = vmatprep.subr.bf16.mxu0 %v8536_v5  ;;  %v8585_v4 = vld [vmem:[#allocation2 + $0xfc0] sm:$0xff]  }
 0x1f7   :  { %7811 = vmatprep.subr.bf16.mxu1 %v8537_v6  ;;  %v8586_v5 = vld [vmem:[#allocation2 + $0xf00] sm:$0xff]  }
 0x1f8   :  { %v8587_v6 = vld [vmem:[#allocation2 + $0xf80] sm:$0xff]  }
 0x1f9   :  { %7790 = vmatpush3.bf16.msra.mxu0 %v8538_v7  ;;  %v88_v7 = vld [vmem:[%s8973_s0 + $0xf0] sm:$0xff] }
 0x1fa   :  { %7812 = vmatpush3.bf16.msra.mxu1 %v8539_v8  ;;  %7791 = vmatprep.subr.bf16.mxu0 %v8540_v9  ;;  %v89_v8 = vld [vmem:[%s8973_s0 + $0xf8] sm:$0xff] }
 0x1fb   :  { %7813 = vmatprep.subr.bf16.mxu1 %v8541_v10  ;;  %v6576_v10 = vcombine.low %v88_v7, %v88_v7 }
 0x1fd   :  { %7792 = vmatpush3.bf16.msra.mxu0 %v8542_v11  ;;  %v6577_v11 = vcombine.high %v88_v7, %v88_v7  ;;  %v8631_v7 = vld [vmem:[#allocation2 + $0x11b8] sm:$0xff]  }
 0x1fe   :  { %7814 = vmatpush3.bf16.msra.mxu1 %v8543_v12  ;;  %7793 = vmatprep.subr.bf16.mxu0 %v8544_v13  ;;  %v6578_v12 = vcombine.low %v89_v8, %v89_v8  ;;  %v6579_v13 = vcombine.high %v89_v8, %v89_v8 }
 0x1ff   :  { %7815 = vmatprep.subr.bf16.mxu1 %v8545_v14 }
 0x201   :  { %7794 = vmatpush3.bf16.msra.mxu0 %v8546_v15  ;;  %v8592_v15 = vld [vmem:[#allocation2 + $0x1078] sm:$0xff]  }
 0x202   :  { %7816 = vmatpush3.bf16.msra.mxu1 %v8547_v16  ;;  %7795 = vmatprep.subr.bf16.mxu0 %v8548_v17  ;;  %v8593_v16 = vld [vmem:[#allocation2 + $0x10f8] sm:$0xff]  }
 0x203   :  { %7817 = vmatprep.subr.bf16.mxu1 %v8549_v18  ;;  %v8594_v18 = vld [vmem:[#allocation2 + $0x1038] sm:$0xff]  }
 0x205   :  { %7796 = vmatpush3.bf16.msra.mxu0 %v8550_v19 }
 0x206   :  { %7818 = vmatpush3.bf16.msra.mxu1 %v8551_v20  ;;  %7825 = vmatprep.subr.bf16.mxu0 %v8556_v29 }
 0x207   :  { %7847 = vmatprep.subr.bf16.mxu1 %v8557_v30  ;;  %v8598_v30 = vld [vmem:[#allocation2 + $0x1030] sm:$0xff]  }
 0x208   :  { %v7533_v25 = vpop.f32.mrf.mxu0  ;;  %6114 = vmatmul.mubr.bf16.vlgmr.msra.gmra.mxu0 %v6572_v22 }
 0x209   :  { %v7555_v26 = vpop.f32.mrf.mxu1  ;;  %6154 = vmatmul.mubr.bf16.vlgmr.msra.gmra.mxu1 %v6574_v27  ;;  %7826 = vmatpush3.bf16.msra.mxu0 %v8558_v33  ;;  %v8597_v27 = vld [vmem:[#allocation2 + $0x10f0] sm:$0xff]   ;;  %v8600_v33 = vld [vmem:[#allocation2 + $0x1068] sm:$0xff]  }
 0x20a   :  { %v7534_v31 = vpop.f32.mrf.mxu0  ;;  %7848 = vmatpush3.bf16.msra.mxu1 %v8559_v36  ;;  %7827 = vmatprep.subr.bf16.mxu0 %v8560_v40  ;;  %v8603_v36 = vld [vmem:[#allocation2 + $0x10a8] sm:$0xff]   ;;  %v8607_v40 = vld [vmem:[#allocation2 + $0x10a0] sm:$0xff]  }
 0x20b   :  { %v7556_v32 = vpop.f32.mrf.mxu1  ;;  %v7535_v34 = vadd.f32 %v7534_v31, %v7533_v25  ;;  %7849 = vmatprep.subr.bf16.mxu1 %v8561_v41  ;;  %6193 = vmatprep.mubr.bf16.mxu0 %v6577_v11  ;;  %v8608_v41 = vld [vmem:[#allocation2 + $0x1058] sm:$0xff]  }
 0x20c   :  { %v7557_v35 = vadd.f32 %v7556_v32, %v7555_v26  ;;  %v7536_v37 = vpop.f32.mrf.mxu0  ;;  %6233 = vmatprep.mubr.bf16.mxu1 %v6579_v13  ;;  %v8596_v26 = vld [vmem:[#allocation2 + $0x1070] sm:$0xff]  }
 0x20d   :  { %v7558_v38 = vpop.f32.mrf.mxu1  ;;  %v5636_v39 = vadd.f32 %v7535_v34, %v8883_v57  ;;  %7828 = vmatpush3.bf16.msra.mxu0 %v8562_v45  ;;  %v8574_v57 = vld [vmem:[#allocation2 + $0xf18] sm:$0xff]   ;;  %v8599_v32 = vld [vmem:[#allocation2 + $0x10b0] sm:$0xff]   ;;  %v8601_v34 = vld [vmem:[#allocation2 + $0x10e8] sm:$0xff]  }
 0x20e   :  { %v7537_v42 = vpop.f32.mrf.mxu0  ;;  %7850 = vmatpush3.bf16.msra.mxu1 %v8563_v46  ;;  %7829 = vmatprep.subr.bf16.mxu0 %v8564_v47  ;;  %v8604_v37 = vld [vmem:[#allocation2 + $0x1060] sm:$0xff]   ;;  %v8612_v45 = vld [vmem:[#allocation2 + $0x1050] sm:$0xff]  }
 0x20f   :  { %v7559_v43 = vpop.f32.mrf.mxu1  ;;  %v8892_v44 = vadd.f32 %v7557_v35, %v5636_v39  ;;  %7851 = vmatprep.subr.bf16.mxu1 %v8565_v48  ;;  %v8602_v35 = vld [vmem:[#allocation2 + $0x1028] sm:$0xff]   ;;  %v8605_v38 = vld [vmem:[#allocation2 + $0x10e0] sm:$0xff]   ;;  %v8609_v42 = vld [vmem:[#allocation2 + $0x10d8] sm:$0xff]  }
 0x210   :  { %v8606_v39 = vld [vmem:[#allocation2 + $0x1020] sm:$0xff]   ;;  %v8610_v43 = vld [vmem:[#allocation2 + $0x1018] sm:$0xff]   ;;  %v8613_v46 = vld [vmem:[#allocation2 + $0x10d0] sm:$0xff]  }
 0x211   :  { %7830 = vmatpush3.bf16.msra.mxu0 %v8566_v49  ;;  %v8614_v47 = vld [vmem:[#allocation2 + $0x1010] sm:$0xff]   ;;  %v8616_v49 = vld [vmem:[#allocation2 + $0x1048] sm:$0xff]  }
 0x212   :  { %7852 = vmatpush3.bf16.msra.mxu1 %v8567_v50  ;;  %7831 = vmatprep.subr.bf16.mxu0 %v8568_v51  ;;  %v8615_v48 = vld [vmem:[#allocation2 + $0x1090] sm:$0xff]   ;;  %v8617_v50 = vld [vmem:[#allocation2 + $0x10c8] sm:$0xff]  }
 0x213   :  { %7853 = vmatprep.subr.bf16.mxu1 %v8569_v52  ;;  %v8618_v51 = vld [vmem:[#allocation2 + $0x1008] sm:$0xff]   ;;  %v8633_v13 = vld [vmem:[#allocation2 + $0x11f0] sm:$0xff]  }
 0x214   :  { %v8619_v52 = vld [vmem:[#allocation2 + $0x1088] sm:$0xff]  }
 0x215   :  { %7832 = vmatpush3.bf16.msra.mxu0 %v8570_v53  ;;  %v8620_v53 = vld [vmem:[#allocation2 + $0x1040] sm:$0xff]  }
 0x216   :  { %7854 = vmatpush3.bf16.msra.mxu1 %v8571_v54  ;;  %7833 = vmatprep.subr.bf16.mxu0 %v8572_v55  ;;  %v8621_v54 = vld [vmem:[#allocation2 + $0x10c0] sm:$0xff]  }
 0x217   :  { %7855 = vmatprep.subr.bf16.mxu1 %v8573_v56  ;;  %v8622_v55 = vld [vmem:[#allocation2 + $0x1000] sm:$0xff]  }
 0x218   :  { %v8623_v56 = vld [vmem:[#allocation2 + $0x1080] sm:$0xff]  }
 0x219   :  { %7834 = vmatpush3.bf16.msra.mxu0 %v8574_v57  ;;  %v90_v57 = vld [vmem:[%s8973_s0 + $0x100] sm:$0xff] }
 0x21a   :  { %7856 = vmatpush3.bf16.msra.mxu1 %v8575_v58  ;;  %7835 = vmatprep.subr.bf16.mxu0 %v8576_v59  ;;  %v91_v58 = vld [vmem:[%s8973_s0 + $0x108] sm:$0xff] }
 0x21b   :  { %7857 = vmatprep.subr.bf16.mxu1 %v8577_v60  ;;  %v6580_v60 = vcombine.low %v90_v57, %v90_v57 }
 0x21d   :  { %7836 = vmatpush3.bf16.msra.mxu0 %v8578_v61  ;;  %v6581_v61 = vcombine.high %v90_v57, %v90_v57 }
 0x21e   :  { %7858 = vmatpush3.bf16.msra.mxu1 %v8579_v62  ;;  %7837 = vmatprep.subr.bf16.mxu0 %v8580_v63  ;;  %v6582_v62 = vcombine.low %v91_v58, %v91_v58 }
 0x21f   :  { %7859 = vmatprep.subr.bf16.mxu1 %v8581_v0  ;;  %v8628_v0 = vld [vmem:[#allocation2 + $0x1178] sm:$0xff]  }
 0x221   :  { %7838 = vmatpush3.bf16.msra.mxu0 %v8582_v1  ;;  %v6583_v1 = vcombine.high %v91_v58, %v91_v58 }
 0x222   :  { %7860 = vmatpush3.bf16.msra.mxu1 %v8583_v2  ;;  %7839 = vmatprep.subr.bf16.mxu0 %v8584_v3  ;;  %v8629_v2 = vld [vmem:[#allocation2 + $0x11f8] sm:$0xff]  }
 0x223   :  { %7861 = vmatprep.subr.bf16.mxu1 %v8585_v4  ;;  %v8630_v4 = vld [vmem:[#allocation2 + $0x1138] sm:$0xff]  }
 0x225   :  { %7840 = vmatpush3.bf16.msra.mxu0 %v8586_v5 }
 0x226   :  { %7862 = vmatpush3.bf16.msra.mxu1 %v8587_v6  ;;  %7869 = vmatprep.subr.bf16.mxu0 %v8592_v15 }
 0x227   :  { %7891 = vmatprep.subr.bf16.mxu1 %v8593_v16  ;;  %v8634_v16 = vld [vmem:[#allocation2 + $0x1130] sm:$0xff]  }
 0x228   :  { %v7577_v9 = vpop.f32.mrf.mxu0  ;;  %6194 = vmatmul.mubr.bf16.vlgmr.msra.gmra.mxu0 %v6576_v10 }
 0x229   :  { %v7599_v14 = vpop.f32.mrf.mxu1  ;;  %6234 = vmatmul.mubr.bf16.vlgmr.msra.gmra.mxu1 %v6578_v12  ;;  %7870 = vmatpush3.bf16.msra.mxu0 %v8594_v18  ;;  %v8632_v12 = vld [vmem:[#allocation2 + $0x1170] sm:$0xff]  }
 0x22a   :  { %v7578_v17 = vpop.f32.mrf.mxu0  ;;  %7892 = vmatpush3.bf16.msra.mxu1 %v8595_v21  ;;  %7871 = vmatprep.subr.bf16.mxu0 %v8596_v26  ;;  %v8635_v18 = vld [vmem:[#allocation2 + $0x11b0] sm:$0xff]   ;;  %v8638_v21 = vld [vmem:[#allocation2 + $0x1128] sm:$0xff]   ;;  %v8643_v26 = vld [vmem:[#allocation2 + $0x11a0] sm:$0xff]  }
 0x22b   :  { %v7579_v19 = vadd.f32 %v7578_v17, %v7577_v9  ;;  %v7600_v20 = vpop.f32.mrf.mxu1  ;;  %7893 = vmatprep.subr.bf16.mxu1 %v8597_v27  ;;  %6273 = vmatprep.mubr.bf16.mxu0 %v6581_v61  ;;  %v8644_v27 = vld [vmem:[#allocation2 + $0x1158] sm:$0xff]  }
 0x22c   :  { %v7601_v22 = vadd.f32 %v7600_v20, %v7599_v14  ;;  %v7580_v23 = vpop.f32.mrf.mxu0  ;;  %6313 = vmatprep.mubr.bf16.mxu1 %v6583_v1  ;;  %v8637_v20 = vld [vmem:[#allocation2 + $0x11e8] sm:$0xff]  }
 0x22d   :  { %v5716_v24 = vadd.f32 %v7579_v19, %v8892_v44  ;;  %v7602_v25 = vpop.f32.mrf.mxu1  ;;  %7872 = vmatpush3.bf16.msra.mxu0 %v8598_v30  ;;  %v8611_v44 = vld [vmem:[#allocation2 + $0x1098] sm:$0xff]   ;;  %v8636_v19 = vld [vmem:[#allocation2 + $0x1168] sm:$0xff]   ;;  %v8640_v23 = vld [vmem:[#allocation2 + $0x1160] sm:$0xff]  }
 0x22e   :  { %v7581_v28 = vpop.f32.mrf.mxu0  ;;  %7894 = vmatpush3.bf16.msra.mxu1 %v8599_v32  ;;  %7873 = vmatprep.subr.bf16.mxu0 %v8600_v33  ;;  %v8642_v25 = vld [vmem:[#allocation2 + $0x1120] sm:$0xff]   ;;  %v8647_v30 = vld [vmem:[#allocation2 + $0x1198] sm:$0xff]   ;;  %v8649_v32 = vld [vmem:[#allocation2 + $0x11d0] sm:$0xff]  }
 0x22f   :  { %v8901_v29 = vadd.f32 %v7601_v22, %v5716_v24  ;;  %v7603_v31 = vpop.f32.mrf.mxu1  ;;  %7895 = vmatprep.subr.bf16.mxu1 %v8601_v34  ;;  %v8639_v22 = vld [vmem:[#allocation2 + $0x11a8] sm:$0xff]   ;;  %v8641_v24 = vld [vmem:[#allocation2 + $0x11e0] sm:$0xff]   ;;  %v8645_v28 = vld [vmem:[#allocation2 + $0x11d8] sm:$0xff]  }
 0x230   :  { %v8648_v31 = vld [vmem:[#allocation2 + $0x1150] sm:$0xff]  }
 0x231   :  { %7874 = vmatpush3.bf16.msra.mxu0 %v8602_v35  ;;  %v8650_v33 = vld [vmem:[#allocation2 + $0x1110] sm:$0xff]   ;;  %v8652_v35 = vld [vmem:[#allocation2 + $0x1148] sm:$0xff]  }
 0x232   :  { %7896 = vmatpush3.bf16.msra.mxu1 %v8603_v36  ;;  %7875 = vmatprep.subr.bf16.mxu0 %v8604_v37  ;;  %v8651_v34 = vld [vmem:[#allocation2 + $0x1190] sm:$0xff]   ;;  %v8653_v36 = vld [vmem:[#allocation2 + $0x11c8] sm:$0xff]  }
 0x233   :  { %7897 = vmatprep.subr.bf16.mxu1 %v8605_v38  ;;  %v8654_v37 = vld [vmem:[#allocation2 + $0x1108] sm:$0xff]  }
 0x234   :  { %v8655_v38 = vld [vmem:[#allocation2 + $0x1188] sm:$0xff]  }
 0x235   :  { %7876 = vmatpush3.bf16.msra.mxu0 %v8606_v39  ;;  %v8656_v39 = vld [vmem:[#allocation2 + $0x1140] sm:$0xff]  }
 0x236   :  { %7898 = vmatpush3.bf16.msra.mxu1 %v8607_v40  ;;  %7877 = vmatprep.subr.bf16.mxu0 %v8608_v41  ;;  %v8657_v40 = vld [vmem:[#allocation2 + $0x11c0] sm:$0xff]  }
 0x237   :  { %7899 = vmatprep.subr.bf16.mxu1 %v8609_v42  ;;  %v8658_v41 = vld [vmem:[#allocation2 + $0x1100] sm:$0xff]  }
 0x238   :  { %v8659_v42 = vld [vmem:[#allocation2 + $0x1180] sm:$0xff]  }
 0x239   :  { %7878 = vmatpush3.bf16.msra.mxu0 %v8610_v43  ;;  %v92_v43 = vld [vmem:[%s8973_s0 + $0x110] sm:$0xff] }
 0x23a   :  { %7900 = vmatpush3.bf16.msra.mxu1 %v8611_v44  ;;  %7879 = vmatprep.subr.bf16.mxu0 %v8612_v45  ;;  %v6584_v44 = vcombine.low %v92_v43, %v92_v43  ;;  %v6585_v45 = vcombine.high %v92_v43, %v92_v43 }
 0x23b   :  { %7901 = vmatprep.subr.bf16.mxu1 %v8613_v46  ;;  %v93_v46 = vld [vmem:[%s8973_s0 + $0x118] sm:$0xff] }
 0x23d   :  { %7880 = vmatpush3.bf16.msra.mxu0 %v8614_v47 }
 0x23e   :  { %7902 = vmatpush3.bf16.msra.mxu1 %v8615_v48  ;;  %7881 = vmatprep.subr.bf16.mxu0 %v8616_v49  ;;  %v6586_v49 = vcombine.low %v93_v46, %v93_v46 }
 0x23f   :  { %7903 = vmatprep.subr.bf16.mxu1 %v8617_v50  ;;  %v6587_v50 = vcombine.high %v93_v46, %v93_v46 }
 0x241   :  { %7882 = vmatpush3.bf16.msra.mxu0 %v8618_v51 }
 0x242   :  { %7904 = vmatpush3.bf16.msra.mxu1 %v8619_v52  ;;  %7883 = vmatprep.subr.bf16.mxu0 %v8620_v53 }
 0x243   :  { %7905 = vmatprep.subr.bf16.mxu1 %v8621_v54 }
 0x245   :  { %7884 = vmatpush3.bf16.msra.mxu0 %v8622_v55 }
 0x246   :  { %7906 = vmatpush3.bf16.msra.mxu1 %v8623_v56  ;;  %7913 = vmatprep.subr.bf16.mxu0 %v8628_v0 }
 0x247   :  { %7935 = vmatprep.subr.bf16.mxu1 %v8629_v2 }
 0x248   :  { %v7621_v59 = vpop.f32.mrf.mxu0  ;;  %6274 = vmatmul.mubr.bf16.vlgmr.msra.gmra.mxu0 %v6580_v60 }
 0x249   :  { %v7643_v63 = vpop.f32.mrf.mxu1  ;;  %6314 = vmatmul.mubr.bf16.vlgmr.msra.gmra.mxu1 %v6582_v62  ;;  %7914 = vmatpush3.bf16.msra.mxu0 %v8630_v4 }
 0x24a   :  { %v7622_v3 = vpop.f32.mrf.mxu0  ;;  %7936 = vmatpush3.bf16.msra.mxu1 %v8631_v7  ;;  %7915 = vmatprep.subr.bf16.mxu0 %v8632_v12  ;;  %v6415_v12 = vld [vmem:[%s8976_s3 + $0x68] sm:$0xff] }
 0x24b   :  { %v7623_v5 = vadd.f32 %v7622_v3, %v7621_v59  ;;  %v7644_v6 = vpop.f32.mrf.mxu1  ;;  %7937 = vmatprep.subr.bf16.mxu1 %v8633_v13  ;;  %6353 = vmatprep.mubr.bf16.mxu0 %v6585_v45  ;;  %v6414_v13 = vld [vmem:[%s8976_s3 + $0x60] sm:$0xff] }
 0x24c   :  { %v7645_v8 = vadd.f32 %v7644_v6, %v7643_v63  ;;  %v7624_v9 = vpop.f32.mrf.mxu0  ;;  %6393 = vmatprep.mubr.bf16.mxu1 %v6587_v50 }
 0x24d   :  { %v5796_v10 = vadd.f32 %v7623_v5, %v8901_v29  ;;  %v7646_v11 = vpop.f32.mrf.mxu1  ;;  %7916 = vmatpush3.bf16.msra.mxu0 %v8634_v16  ;;  %v8646_v29 = vld [vmem:[#allocation2 + $0x1118] sm:$0xff]   ;;  %v6411_v16 = vld [vmem:[%s8976_s3 + $0x48] sm:$0xff] }
 0x24e   :  { %v7625_v14 = vpop.f32.mrf.mxu0  ;;  %7938 = vmatpush3.bf16.msra.mxu1 %v8635_v18  ;;  %7917 = vmatprep.subr.bf16.mxu0 %v8636_v19  ;;  %v6417_v9 = vld [vmem:[%s8976_s3 + $0x78] sm:$0xff]  ;;  %v6416_v11 = vld [vmem:[%s8976_s3 + $0x70] sm:$0xff] }
 0x24f   :  { %v8910_v15 = vadd.f32 %v7645_v8, %v5796_v10  ;;  %v7647_v17 = vpop.f32.mrf.mxu1  ;;  %7939 = vmatprep.subr.bf16.mxu1 %v8637_v20  ;;  %v8737_v10 = vmov 0.0   ;;  %v6413_v14 = vld [vmem:[%s8976_s3 + $0x58] sm:$0xff]  ;;  %v6408_v19 = vld [vmem:[%s8976_s3 + $0x30] sm:$0xff] }
 0x250   :  { %v6410_v17 = vld [vmem:[%s8976_s3 + $0x40] sm:$0xff]  ;;  %v6409_v18 = vld [vmem:[%s8976_s3 + $0x38] sm:$0xff] }
 0x251   :  { %7918 = vmatpush3.bf16.msra.mxu0 %v8638_v21 }
 0x252   :  { %7940 = vmatpush3.bf16.msra.mxu1 %v8639_v22  ;;  %7919 = vmatprep.subr.bf16.mxu0 %v8640_v23  ;;  %v6407_v23 = vld [vmem:[%s8976_s3 + $0x28] sm:$0xff] }
 0x253   :  { %7941 = vmatprep.subr.bf16.mxu1 %v8641_v24 }
 0x255   :  { %7920 = vmatpush3.bf16.msra.mxu0 %v8642_v25 }
 0x256   :  { %7942 = vmatpush3.bf16.msra.mxu1 %v8643_v26  ;;  %7921 = vmatprep.subr.bf16.mxu0 %v8644_v27 }
 0x257   :  { %7943 = vmatprep.subr.bf16.mxu1 %v8645_v28  ;;  %v6406_v28 = vld [vmem:[%s8976_s3 + $0x20] sm:$0xff] }
 0x259   :  { %7922 = vmatpush3.bf16.msra.mxu0 %v8646_v29 }
 0x25a   :  { %7944 = vmatpush3.bf16.msra.mxu1 %v8647_v30  ;;  %7923 = vmatprep.subr.bf16.mxu0 %v8648_v31 }
 0x25b   :  { %7945 = vmatprep.subr.bf16.mxu1 %v8649_v32  ;;  %v6405_v32 = vld [vmem:[%s8976_s3 + $0x18] sm:$0xff] }
 0x25d   :  { %7924 = vmatpush3.bf16.msra.mxu0 %v8650_v33 }
 0x25e   :  { %7946 = vmatpush3.bf16.msra.mxu1 %v8651_v34  ;;  %7925 = vmatprep.subr.bf16.mxu0 %v8652_v35  ;;  %v6404_v35 = vld [vmem:[%s8976_s3 + $0x10] sm:$0xff] }
 0x25f   :  { %7947 = vmatprep.subr.bf16.mxu1 %v8653_v36  ;;  %v6403_v36 = vld [vmem:[%s8976_s3 + $0x8] sm:$0xff] }
 0x261   :  { %7926 = vmatpush3.bf16.msra.mxu0 %v8654_v37  ;;  %v6402_v37 = vld [vmem:[%s8976_s3] sm:$0xff] }
 0x262   :  { %7948 = vmatpush3.bf16.msra.mxu1 %v8655_v38  ;;  %7927 = vmatprep.subr.bf16.mxu0 %v8656_v39 }
 0x263   :  { %7949 = vmatprep.subr.bf16.mxu1 %v8657_v40 }
 0x265   :  { %7928 = vmatpush3.bf16.msra.mxu0 %v8658_v41 }
 0x266   :  { %7950 = vmatpush3.bf16.msra.mxu1 %v8659_v42  ;;  %7974 = vmatprep.subr.mxu0 %v8737_v10 }
 0x268   :  { %v7665_v47 = vpop.f32.mrf.mxu0  ;;  %6354 = vmatmul.mubr.bf16.vlgmr.msra.gmra.mxu0 %v6584_v44 }
 0x269   :  { %v7687_v48 = vpop.f32.mrf.mxu1  ;;  %6394 = vmatmul.mubr.bf16.vlgmr.msra.gmra.mxu1 %v6586_v49  ;;  %7975 = vmatpush3.msra.mxu0 %v6417_v9 }
 0x26a   :  { %v7666_v51 = vpop.f32.mrf.mxu0  ;;  %7976 = vmatprep.subr.mxu0 %v8737_v10  ;;  %8006 = vmatprep.mubr.msk.f32.mxu0 %vm8738_vm0, %v8737_v10 }
 0x26b   :  { %v7688_v52 = vpop.f32.mrf.mxu1  ;;  %v7667_v53 = vadd.f32 %v7666_v51, %v7665_v47  ;;  %7977 = vmatpush3.msra.mxu0 %v6416_v11 }
 0x26c   :  { %v7689_v54 = vadd.f32 %v7688_v52, %v7687_v48  ;;  %v7668_v55 = vpop.f32.mrf.mxu0  ;;  %7978 = vmatprep.subr.mxu0 %v8737_v10 }
 0x26d   :  { %v7690_v56 = vpop.f32.mrf.mxu1  ;;  %v5876_v57 = vadd.f32 %v7667_v53, %v8910_v15  ;;  %7979 = vmatpush3.msra.mxu0 %v6415_v12  ;;  %v6412_v15 = vld [vmem:[%s8976_s3 + $0x50] sm:$0xff] }
 0x26e   :  { %v7669_v58 = vpop.f32.mrf.mxu0  ;;  %7980 = vmatprep.subr.mxu0 %v8737_v10 }
 0x26f   :  { %v7691_v59 = vpop.f32.mrf.mxu1  ;;  %v5916_v60 = vadd.f32 %v7689_v54, %v5876_v57  ;;  %7981 = vmatpush3.msra.mxu0 %v6414_v13 }
 0x270   :  { %7982 = vmatprep.subr.mxu0 %v8737_v10 }
 0x271   :  { %7983 = vmatpush3.msra.mxu0 %v6413_v14 }
 0x272   :  { %7984 = vmatprep.subr.mxu0 %v8737_v10 }
 0x273   :  { %7985 = vmatpush3.msra.mxu0 %v6412_v15 }
 0x274   :  { %7986 = vmatprep.subr.mxu0 %v8737_v10 }
 0x275   :  { %7987 = vmatpush3.msra.mxu0 %v6411_v16 }
 0x276   :  { %7988 = vmatprep.subr.mxu0 %v8737_v10 }
 0x277   :  { %7989 = vmatpush3.msra.mxu0 %v6410_v17 }
 0x278   :  { %7990 = vmatprep.subr.mxu0 %v8737_v10 }
 0x279   :  { %7991 = vmatpush3.msra.mxu0 %v6409_v18 }
 0x27a   :  { %7992 = vmatprep.subr.mxu0 %v8737_v10 }
 0x27b   :  { %7993 = vmatpush3.msra.mxu0 %v6408_v19 }
 0x27c   :  { %7994 = vmatprep.subr.mxu0 %v8737_v10 }
 0x27d   :  { %7995 = vmatpush3.msra.mxu0 %v6407_v23  ;;  %v7164_v23 = vld [vmem:[#allocation6] ss:$0 sm:$0xff] }
 0x27e   :  { %7996 = vmatprep.subr.mxu0 %v8737_v10 }
 0x27f   :  { %7997 = vmatpush3.msra.mxu0 %v6406_v28 }
 0x280   :  { %7998 = vmatprep.subr.mxu0 %v8737_v10 }
 0x281   :  { %7999 = vmatpush3.msra.mxu0 %v6405_v32 }
 0x282   :  { %8000 = vmatprep.subr.mxu0 %v8737_v10 }
 0x283   :  { %8001 = vmatpush3.msra.mxu0 %v6404_v35 }
 0x284   :  { %8002 = vmatprep.subr.mxu0 %v8737_v10 }
 0x285   :  { %8003 = vmatpush3.msra.mxu0 %v6403_v36 }
 0x286   :  { %8004 = vmatprep.subr.mxu0 %v8737_v10 }
 0x287   :  { %8005 = vmatpush3.msra.mxu0 %v6402_v37 }
 0x288   :  { %v7709_v61 = vpop.f32.mrf.mxu0 }
 0x289   :  { %v7731_v62 = vpop.f32.mrf.mxu1 }
 0x28a   :  { %v7710_v63 = vpop.f32.mrf.mxu0 }
 0x28b   :  { %v7711_v0 = vadd.f32 %v7710_v63, %v7709_v61  ;;  %v7732_v1 = vpop.f32.mrf.mxu1 }
 0x28c   :  { %v7733_v2 = vadd.f32 %v7732_v1, %v7731_v62  ;;  %v7712_v3 = vpop.f32.mrf.mxu0 }
 0x28d   :  { %v5956_v4 = vadd.f32 %v7711_v0, %v5916_v60  ;;  %v7734_v5 = vpop.f32.mrf.mxu1 }
 0x28e   :  { %v7713_v6 = vpop.f32.mrf.mxu0 }
 0x28f   :  { %v5996_v7 = vadd.f32 %v7733_v2, %v5956_v4  ;;  %v7735_v8 = vpop.f32.mrf.mxu1 }
 0x2a8   :  { %v7753_v20 = vpop.f32.mrf.mxu0 }
 0x2a9   :  { %v7775_v21 = vpop.f32.mrf.mxu1 }
 0x2aa   :  { %v7754_v22 = vpop.f32.mrf.mxu0 }
 0x2ab   :  { %v7755_v24 = vadd.f32 %v7754_v22, %v7753_v20  ;;  %v7776_v25 = vpop.f32.mrf.mxu1 }
 0x2ac   :  { %v7777_v26 = vadd.f32 %v7776_v25, %v7775_v21  ;;  %v7756_v27 = vpop.f32.mrf.mxu0 }
 0x2ad   :  { %v6036_v29 = vadd.f32 %v7755_v24, %v5996_v7  ;;  %v7778_v30 = vpop.f32.mrf.mxu1 }
 0x2ae   :  { %v7757_v31 = vpop.f32.mrf.mxu0 }
 0x2af   :  { %v6076_v33 = vadd.f32 %v7777_v26, %v6036_v29  ;;  %v7779_v34 = vpop.f32.mrf.mxu1 }
 0x2c8   :  { %v7797_v38 = vpop.f32.mrf.mxu0 }
 0x2c9   :  { %v7819_v39 = vpop.f32.mrf.mxu1 }
 0x2ca   :  { %v7798_v40 = vpop.f32.mrf.mxu0 }
 0x2cb   :  { %v7820_v41 = vpop.f32.mrf.mxu1  ;;  %v7799_v42 = vadd.f32 %v7798_v40, %v7797_v38 }
 0x2cc   :  { %v7821_v43 = vadd.f32 %v7820_v41, %v7819_v39  ;;  %v7800_v44 = vpop.f32.mrf.mxu0 }
 0x2cd   :  { %v7822_v45 = vpop.f32.mrf.mxu1  ;;  %v6116_v46 = vadd.f32 %v7799_v42, %v6076_v33 }
 0x2ce   :  { %v7801_v47 = vpop.f32.mrf.mxu0 }
 0x2cf   :  { %v7823_v48 = vpop.f32.mrf.mxu1  ;;  %v6156_v49 = vadd.f32 %v7821_v43, %v6116_v46 }
 0x2e8   :  { %v7841_v50 = vpop.f32.mrf.mxu0 }
 0x2e9   :  { %v7863_v51 = vpop.f32.mrf.mxu1 }
 0x2ea   :  { %v7842_v52 = vpop.f32.mrf.mxu0 }
 0x2eb   :  { %v7864_v53 = vpop.f32.mrf.mxu1  ;;  %v7843_v2 = vadd.f32 %v7842_v52, %v7841_v50 }
 0x2ec   :  { %v7844_v54 = vpop.f32.mrf.mxu0  ;;  %v7865_v4 = vadd.f32 %v7864_v53, %v7863_v51 }
 0x2ed   :  { %v7866_v55 = vpop.f32.mrf.mxu1  ;;  %v6196_v3 = vadd.f32 %v7843_v2, %v6156_v49 }
 0x2ee   :  { %v7845_v56 = vpop.f32.mrf.mxu0 }
 0x2ef   :  { %v7867_v57 = vpop.f32.mrf.mxu1  ;;  %v6236_v6 = vadd.f32 %v7865_v4, %v6196_v3 }
 0x308   :  { %v7885_v58 = vpop.f32.mrf.mxu0 }
 0x309   :  { %v7907_v59 = vpop.f32.mrf.mxu1 }
 0x30a   :  { %v7886_v60 = vpop.f32.mrf.mxu0 }
 0x30b   :  { %v7908_v61 = vpop.f32.mrf.mxu1  ;;  %v7887_v5 = vadd.f32 %v7886_v60, %v7885_v58 }
 0x30c   :  { %v7888_v62 = vpop.f32.mrf.mxu0  ;;  %v7909_v8 = vadd.f32 %v7908_v61, %v7907_v59 }
 0x30d   :  { %v7910_v63 = vpop.f32.mrf.mxu1  ;;  %v6276_v7 = vadd.f32 %v7887_v5, %v6236_v6 }
 0x30e   :  { %v7889_v0 = vpop.f32.mrf.mxu0 }
 0x30f   :  { %v7911_v1 = vpop.f32.mrf.mxu1  ;;  %v6316_v13 = vadd.f32 %v7909_v8, %v6276_v7 }
 0x328   :  { %v7929_v9 = vpop.f32.mrf.mxu0 }
 0x329   :  { %v7951_v10 = vpop.f32.mrf.mxu1 }
 0x32a   :  { %v7930_v11 = vpop.f32.mrf.mxu0 }
 0x32b   :  { %v7952_v12 = vpop.f32.mrf.mxu1  ;;  %v7931_v14 = vadd.f32 %v7930_v11, %v7929_v9 }
 0x32c   :  { %v7932_v15 = vpop.f32.mrf.mxu0  ;;  %v7953_v18 = vadd.f32 %v7952_v12, %v7951_v10 }
 0x32d   :  { %v7954_v16 = vpop.f32.mrf.mxu1  ;;  %v6356_v17 = vadd.f32 %v7931_v14, %v6316_v13 }
 0x32e   :  { %v7933_v19 = vpop.f32.mrf.mxu0 }
 0x32f   :  { %v7955_v20 = vpop.f32.mrf.mxu1  ;;  %v6396_v21 = vadd.f32 %v7953_v18, %v6356_v17 }
 0x331   :  { %v6401_v22 = vmax.f32 %v6396_v21, 0.0 }
 0x333   :  { %8007 = vmatmul.mubr.f32.vlgmr.msra.gmra.mxu0 %v6401_v22 }
 0x3f3   :  { %v6491_v24 = vpop.f32.mrf.mxu0 }
 0x3f4   :  { %v6492_v25 = vadd.f32 %v7164_v23, %v6491_v24 }
 0x3f5   :  { %v8008_v26 = vpop.f32.mrf.mxu0 }
 0x3f6   :  { %v6496_v27 = vsel %vm6495_vm1, %v6492_v25, -inf }
 0x3f7   :  { %6497 = vmax.xlane.f32.xlu0 %v6496_v27 }
 0x480   :  { %v6498_v28 = vpop.xlane.xlu0 %6497 }
 0x481   :  { %v6499_v29 = vsub.f32 %v6492_v25, %v6498_v28 }
 0x483   :  { %v6500_v30 = vmul.f32 1.442695, %v6499_v29 }
 0x485   :  { %8664 = vpow2.f32 %v6500_v30 }
 0x492   :  { %v8665_v31 = vpop.eup %8664 }
 0x493   :  { %v6502_v32 = vsel %vm6495_vm1, %v8665_v31, 0.0 }
 0x494   :  { %6503 = vadd.xlane.f32.xlu0 %v6502_v32 }
 0x51d   :  { %v6504_v33 = vpop.xlane.xlu0 %6503 }
 0x51e   :  { %8666 = vlog2.f32 %v6504_v33 }
 0x52b   :  { %v8667_v34 = vpop.eup %8666 }
 0x52c   :  { %v6506_v35 = vmul.f32 0.6931472, %v8667_v34 }
 0x52e   :  { %v6507_v36 = vsub.f32 %v6499_v29, %v6506_v35 }
 0x530   :  { %6508 = vst.msk [vmem:[%s8978_s5] sm:$0xff] %vm6495_vm1, %v6507_v36 }
 0x531   :  { %6513 = vsyncpa [#allocation3], 1 }
 0x532   :  { %6514 = vsyncpa [#allocation5], 1 }

</bundles_post_ra>
